<compile_context>
chip_gen: v5e
topology: v5e:2x2
jax: 0.10.0
libtpu: 0.0.40
codegen_flags: <defaults>
</compile_context>

<pallas_src>
import jax
import jax.numpy as jnp
from jax.experimental import pallas as pl
from jax.experimental.pallas import tpu as pltpu

C, S, W = 7, 256, 50          # channels, nshift, window
DIN = S * C                   # 1792 (= 14 * 128 lanes, dense)
H = 320                       # LSTM / reduction hidden size
H4 = 4 * H                    # 1280 fused-gate width (= 10 * 128 lanes)
H1 = 160
DOUT = 21 * 3                 # 63
EPS = 1e-5


def _const_spec(shape):
    """Full-array block whose index never changes -> fetched once, VMEM-resident."""
    nd = len(shape)
    return pl.BlockSpec(shape, lambda b, nd=nd: (0,) * nd)


def _sigmoid(v):
    # exp goes to the EUP slot; exact reciprocal keeps f32 semantics.
    return pl.reciprocal(1.0 + jnp.exp(-v))


# --------------------------- fused forward kernel ---------------------------
def fused_kernel(y_ref, w_red_ref, b_red_ref, w_ih_ref, w_hh_ref, b_lstm_ref,
                 w1_ref, b1_ref, w2_ref, b2_ref, o_ref, gates_ref):
    # ---- LayerNorm over the full (C,S,W) sample, on the lane-dense view ----
    y = y_ref[0]                                     # (W, DIN) f32
    n = float(W * DIN)                               # 89600 elements
    mean = jnp.sum(y) / n
    yc = y - mean
    var = jnp.sum(yc * yc) / n
    xn = yc * jax.lax.rsqrt(var + EPS)               # (W, DIN)

    # ---- reduction layer: Linear(1792 -> 320) + ReLU ----
    z = jnp.maximum(
        jnp.dot(xn, w_red_ref[...], preferred_element_type=jnp.float32)
        + b_red_ref[...], 0.0)                       # (W, H)

    # ---- hoisted input-to-hidden projection for ALL timesteps + fused bias ----
    gates_ref[...] = (
        jnp.dot(z, w_ih_ref[...], preferred_element_type=jnp.float32)
        + b_lstm_ref[...])                           # (W, 4H)

    # ---- serial recurrence: one wide matmul + elementwise per step ----
    def step(t, carry):
        h, c = carry                                 # (1, H) each
        g = gates_ref[pl.ds(t, 1), :] + jnp.dot(
            h, w_hh_ref[...], preferred_element_type=jnp.float32)   # (1, 4H)
        i_g = _sigmoid(g[:, 0 * H:1 * H])            # PyTorch gate order i,f,g,o
        f_g = _sigmoid(g[:, 1 * H:2 * H])
        g_g = jnp.tanh(g[:, 2 * H:3 * H])
        o_g = _sigmoid(g[:, 3 * H:4 * H])
        c_new = f_g * c + i_g * g_g
        h_new = o_g * jnp.tanh(c_new)
        return h_new, c_new

    h0 = jnp.zeros((1, H), jnp.float32)
    c0 = jnp.zeros((1, H), jnp.float32)
    h_last, _ = jax.lax.fori_loop(0, W, step, (h0, c0))

    # ---- head MLP: Linear(320 -> 160) + ReLU -> Linear(160 -> 63) ----
    z1 = jnp.maximum(
        jnp.dot(h_last, w1_ref[...], preferred_element_type=jnp.float32)
        + b1_ref[...], 0.0)                          # (1, H1)
    o_ref[0] = (jnp.dot(z1, w2_ref[...], preferred_element_type=jnp.float32)
                + b2_ref[...])                       # (1, DOUT)


def fused_forward(y, p):
    """y: (B, W, DIN) transposed/flattened input. Returns (B, 1, DOUT)."""
    B = y.shape[0]
    weight_args = (p["w_red"], p["b_red"], p["w_ih"], p["w_hh"], p["b_lstm"],
                   p["w1"], p["b1"], p["w2"], p["b2"])
    weight_specs = [_const_spec(a.shape) for a in weight_args]
    return pl.pallas_call(
        fused_kernel,
        out_shape=jax.ShapeDtypeStruct((B, 1, DOUT), jnp.float32),
        grid=(B,),
        in_specs=[pl.BlockSpec((1, W, DIN), lambda b: (b, 0, 0))] + weight_specs,
        out_specs=pl.BlockSpec((1, 1, DOUT), lambda b: (b, 0, 0)),
        scratch_shapes=[pltpu.VMEM((W, H4), jnp.float32)],
        compiler_params=pltpu.CompilerParams(
            dimension_semantics=("parallel",),
            vmem_limit_bytes=32 * 1024 * 1024,
        ),
    )(y, *weight_args)


# ------------------------- parameters & forward -----------------------------
def init_params(key):
    ks = jax.random.split(key, 10)
    scale = 0.05
    p = {}
    # Linear(1792, 320): stored (in, out); input feature index = s*7 + c
    p["w_red"] = jax.random.normal(ks[0], (DIN, H), jnp.float32) * scale
    p["b_red"] = jax.random.normal(ks[1], (1, H), jnp.float32) * scale
    # Fused LSTM weights: columns ordered by PyTorch gate order (i, f, g, o),
    # i.e. w_ih = weight_ih_l0.T, w_hh = weight_hh_l0.T reshaped to (H, 4H).
    p["w_ih"] = jax.random.normal(ks[2], (H, H4), jnp.float32) * scale
    p["w_hh"] = jax.random.normal(ks[3], (H, H4), jnp.float32) * scale
    # Combined bias b_ih + b_hh, folded into the precomputed input projection.
    p["b_lstm"] = (jax.random.normal(ks[4], (1, H4), jnp.float32) * scale
                   + jax.random.normal(ks[5], (1, H4), jnp.float32) * scale)
    p["w1"] = jax.random.normal(ks[6], (H, H1), jnp.float32) * scale
    p["b1"] = jax.random.normal(ks[7], (1, H1), jnp.float32) * scale
    p["w2"] = jax.random.normal(ks[8], (H1, DOUT), jnp.float32) * scale
    p["b2"] = jax.random.normal(ks[9], (1, DOUT), jnp.float32) * scale
    return p


@jax.jit
def forward(x, p):
    B = x.shape[0]
    # PyTorch: x.transpose(3,1).reshape(B, W, -1) -> feature index = s*7 + c.
    # Done once in XLA on the tiny input so the kernel sees a lane-dense
    # (W, 1792) block per sample.
    y = jnp.transpose(x, (0, 3, 2, 1)).reshape(B, W, DIN)
    out = fused_forward(y, p)                        # (B, 1, DOUT)
    return out.reshape(B, DOUT)


if __name__ == "__main__":
    key = jax.random.PRNGKey(0)
    kx, kp = jax.random.split(key)
    B = 2
    x = jax.random.normal(kx, (B, C, S, W), jnp.float32)
    params = init_params(kp)
    out = jax.block_until_ready(forward(x, params))
    assert out.shape == (B, DOUT), out.shape
    assert bool(jnp.all(jnp.isfinite(out)))
    print("KERNEL_OK")
</pallas_src>

<mosaic_0001>
module attributes {stable_mosaic.version = 11 : i64} {
  func.func @fused_kernel(%arg0: i32, %arg1: memref<1x50x1792xf32, #tpu.memory_space<vmem>>, %arg2: memref<1792x320xf32, #tpu.memory_space<vmem>>, %arg3: memref<1x320xf32, #tpu.memory_space<vmem>>, %arg4: memref<320x1280xf32, #tpu.memory_space<vmem>>, %arg5: memref<320x1280xf32, #tpu.memory_space<vmem>>, %arg6: memref<1x1280xf32, #tpu.memory_space<vmem>>, %arg7: memref<320x160xf32, #tpu.memory_space<vmem>>, %arg8: memref<1x160xf32, #tpu.memory_space<vmem>>, %arg9: memref<160x63xf32, #tpu.memory_space<vmem>>, %arg10: memref<1x63xf32, #tpu.memory_space<vmem>>, %arg11: memref<1x1x63xf32, #tpu.memory_space<vmem>>, %arg12: memref<50x1280xf32, #tpu.memory_space<vmem>>) attributes {dimension_semantics = [#tpu.dimension_semantics<parallel>], iteration_bounds = array<i64: 2>, scalar_prefetch = 0 : i64, scratch_operands = 1 : i64, tpu.core_type = #tpu.core_type<tc>, window_params = [{transform_indices = @transform_0, window_bounds = array<i64: 1, 50, 1792>}, {pipeline_mode = #tpu.pipeline_mode<synchronous>, transform_indices = @transform_1, window_bounds = array<i64: 1792, 320>}, {pipeline_mode = #tpu.pipeline_mode<synchronous>, transform_indices = @transform_2, window_bounds = array<i64: 1, 320>}, {pipeline_mode = #tpu.pipeline_mode<synchronous>, transform_indices = @transform_3, window_bounds = array<i64: 320, 1280>}, {pipeline_mode = #tpu.pipeline_mode<synchronous>, transform_indices = @transform_4, window_bounds = array<i64: 320, 1280>}, {pipeline_mode = #tpu.pipeline_mode<synchronous>, transform_indices = @transform_5, window_bounds = array<i64: 1, 1280>}, {pipeline_mode = #tpu.pipeline_mode<synchronous>, transform_indices = @transform_6, window_bounds = array<i64: 320, 160>}, {pipeline_mode = #tpu.pipeline_mode<synchronous>, transform_indices = @transform_7, window_bounds = array<i64: 1, 160>}, {pipeline_mode = #tpu.pipeline_mode<synchronous>, transform_indices = @transform_8, window_bounds = array<i64: 160, 63>}, {pipeline_mode = #tpu.pipeline_mode<synchronous>, transform_indices = @transform_9, window_bounds = array<i64: 1, 63>}, {transform_indices = @transform_10, window_bounds = array<i64: 1, 1, 63>}]} {
    %c0 = arith.constant 0 : index
    %c0_0 = arith.constant 0 : index
    %c0_1 = arith.constant 0 : index
    %0 = vector.load %arg1[%c0, %c0_0, %c0_1] : memref<1x50x1792xf32, #tpu.memory_space<vmem>>, vector<1x50x1792xf32>
    %1 = vector.shape_cast %0 : vector<1x50x1792xf32> to vector<50x1792xf32>
    %2 = vector.shape_cast %1 : vector<50x1792xf32> to vector<1x50x1792xf32>
    %cst = arith.constant dense<0.000000e+00> : vector<1xf32>
    %3 = vector.multi_reduction <add>, %2, %cst [1, 2] : vector<1x50x1792xf32> to vector<1xf32>
    %4 = vector.shape_cast %3 : vector<1xf32> to vector<1x1x1xf32>
    %5 = vector.extract %4[0, 0, 0] : f32 from vector<1x1x1xf32>
    %cst_2 = arith.constant 8.960000e+04 : f32
    %6 = arith.divf %5, %cst_2 : f32
    %7 = vector.broadcast %6 : f32 to vector<50x1792xf32>
    %8 = arith.subf %1, %7 : vector<50x1792xf32>
    %9 = arith.mulf %8, %8 : vector<50x1792xf32>
    %10 = vector.shape_cast %9 : vector<50x1792xf32> to vector<1x50x1792xf32>
    %cst_3 = arith.constant dense<0.000000e+00> : vector<1xf32>
    %11 = vector.multi_reduction <add>, %10, %cst_3 [1, 2] : vector<1x50x1792xf32> to vector<1xf32>
    %12 = vector.shape_cast %11 : vector<1xf32> to vector<1x1x1xf32>
    %13 = vector.extract %12[0, 0, 0] : f32 from vector<1x1x1xf32>
    %cst_4 = arith.constant 8.960000e+04 : f32
    %14 = arith.divf %13, %cst_4 : f32
    %cst_5 = arith.constant 9.99999974E-6 : f32
    %15 = arith.addf %14, %cst_5 : f32
    %16 = math.rsqrt %15 : f32
    %17 = vector.broadcast %16 : f32 to vector<50x1792xf32>
    %18 = arith.mulf %8, %17 : vector<50x1792xf32>
    %c0_6 = arith.constant 0 : index
    %c0_7 = arith.constant 0 : index
    %19 = vector.load %arg2[%c0_6, %c0_7] : memref<1792x320xf32, #tpu.memory_space<vmem>>, vector<1792x320xf32>
    %cst_8 = arith.constant dense<0.000000e+00> : vector<50x320xf32>
    %20 = tpu.matmul %18, %19, %cst_8 {dimension_numbers = #tpu.dot_dimension_numbers<[1], [0], [0], [1], [0, 0, 1, 1], [], []>} : vector<50x1792xf32>, vector<1792x320xf32>, vector<50x320xf32> -> vector<50x320xf32>
    %c0_9 = arith.constant 0 : index
    %c0_10 = arith.constant 0 : index
    %21 = vector.load %arg3[%c0_9, %c0_10] : memref<1x320xf32, #tpu.memory_space<vmem>>, vector<1x320xf32>
    %22 = vector.broadcast %21 : vector<1x320xf32> to vector<50x320xf32>
    %23 = arith.addf %20, %22 : vector<50x320xf32>
    %cst_11 = arith.constant 0.000000e+00 : f32
    %24 = vector.broadcast %cst_11 : f32 to vector<50x320xf32>
    %25 = arith.maximumf %23, %24 : vector<50x320xf32>
    %c0_12 = arith.constant 0 : index
    %c0_13 = arith.constant 0 : index
    %26 = vector.load %arg4[%c0_12, %c0_13] : memref<320x1280xf32, #tpu.memory_space<vmem>>, vector<320x1280xf32>
    %cst_14 = arith.constant dense<0.000000e+00> : vector<50x1280xf32>
    %27 = tpu.matmul %25, %26, %cst_14 {dimension_numbers = #tpu.dot_dimension_numbers<[1], [0], [0], [1], [0, 0, 1, 1], [], []>} : vector<50x320xf32>, vector<320x1280xf32>, vector<50x1280xf32> -> vector<50x1280xf32>
    %c0_15 = arith.constant 0 : index
    %c0_16 = arith.constant 0 : index
    %28 = vector.load %arg6[%c0_15, %c0_16] : memref<1x1280xf32, #tpu.memory_space<vmem>>, vector<1x1280xf32>
    %29 = vector.broadcast %28 : vector<1x1280xf32> to vector<50x1280xf32>
    %30 = arith.addf %27, %29 : vector<50x1280xf32>
    %c0_17 = arith.constant 0 : index
    %c0_18 = arith.constant 0 : index
    %31 = vector.load %arg12[%c0_17, %c0_18] : memref<50x1280xf32, #tpu.memory_space<vmem>>, vector<50x1280xf32>
    tpu.vector_store %arg12[%c0_17, %c0_18], %30 {strides = array<i32>} : memref<50x1280xf32, #tpu.memory_space<vmem>>, vector<50x1280xf32>,
    %cst_19 = arith.constant 0.000000e+00 : f32
    %32 = vector.broadcast %cst_19 : f32 to vector<1x320xf32>
    %cst_20 = arith.constant 0.000000e+00 : f32
    %33 = vector.broadcast %cst_20 : f32 to vector<1x320xf32>
    %c0_i32 = arith.constant 0 : i32
    %c50_i32 = arith.constant 50 : i32
    %34 = arith.addi %c0_i32, %c50_i32 : i32
    %c1_i32 = arith.constant 1 : i32
    %35:2 = scf.for %arg13 = %c0_i32 to %34 step %c1_i32 iter_args(%arg14 = %32, %arg15 = %33) -> (vector<1x320xf32>, vector<1x320xf32>)  : i32 {
      %49 = arith.index_cast %arg13 : i32 to index
      %c0_36 = arith.constant 0 : index
      %50 = vector.load %arg12[%49, %c0_36] : memref<50x1280xf32, #tpu.memory_space<vmem>>, vector<1x1280xf32>
      %c0_37 = arith.constant 0 : index
      %c0_38 = arith.constant 0 : index
      %51 = vector.load %arg5[%c0_37, %c0_38] : memref<320x1280xf32, #tpu.memory_space<vmem>>, vector<320x1280xf32>
      %cst_39 = arith.constant dense<0.000000e+00> : vector<1x1280xf32>
      %52 = tpu.matmul %arg14, %51, %cst_39 {dimension_numbers = #tpu.dot_dimension_numbers<[1], [0], [0], [1], [0, 0, 1, 1], [], []>} : vector<1x320xf32>, vector<320x1280xf32>, vector<1x1280xf32> -> vector<1x1280xf32>
      %53 = arith.addf %50, %52 : vector<1x1280xf32>
      %54 = vector.extract_strided_slice %53 {offsets = [0, 0], sizes = [1, 320], strides = [1, 1]} : vector<1x1280xf32> to vector<1x320xf32>
      %cst_40 = arith.constant 0.000000e+00 : f32
      %55 = vector.broadcast %cst_40 : f32 to vector<1x320xf32>
      %56 = arith.subf %55, %54 : vector<1x320xf32>
      %57 = math.exp %56 : vector<1x320xf32>
      %cst_41 = arith.constant 1.000000e+00 : f32
      %58 = vector.broadcast %cst_41 : f32 to vector<1x320xf32>
      %59 = arith.addf %58, %57 : vector<1x320xf32>
      %60 = tpu.reciprocal %59 : vector<1x320xf32> -> vector<1x320xf32>
      %61 = vector.extract_strided_slice %53 {offsets = [0, 320], sizes = [1, 320], strides = [1, 1]} : vector<1x1280xf32> to vector<1x320xf32>
      %cst_42 = arith.constant 0.000000e+00 : f32
      %62 = vector.broadcast %cst_42 : f32 to vector<1x320xf32>
      %63 = arith.subf %62, %61 : vector<1x320xf32>
      %64 = math.exp %63 : vector<1x320xf32>
      %cst_43 = arith.constant 1.000000e+00 : f32
      %65 = vector.broadcast %cst_43 : f32 to vector<1x320xf32>
      %66 = arith.addf %65, %64 : vector<1x320xf32>
      %67 = tpu.reciprocal %66 : vector<1x320xf32> -> vector<1x320xf32>
      %68 = vector.extract_strided_slice %53 {offsets = [0, 640], sizes = [1, 320], strides = [1, 1]} : vector<1x1280xf32> to vector<1x320xf32>
      %69 = math.tanh %68 : vector<1x320xf32>
      %70 = vector.extract_strided_slice %53 {offsets = [0, 960], sizes = [1, 320], strides = [1, 1]} : vector<1x1280xf32> to vector<1x320xf32>
      %cst_44 = arith.constant 0.000000e+00 : f32
      %71 = vector.broadcast %cst_44 : f32 to vector<1x320xf32>
      %72 = arith.subf %71, %70 : vector<1x320xf32>
      %73 = math.exp %72 : vector<1x320xf32>
      %cst_45 = arith.constant 1.000000e+00 : f32
      %74 = vector.broadcast %cst_45 : f32 to vector<1x320xf32>
      %75 = arith.addf %74, %73 : vector<1x320xf32>
      %76 = tpu.reciprocal %75 : vector<1x320xf32> -> vector<1x320xf32>
      %77 = arith.mulf %67, %arg15 : vector<1x320xf32>
      %78 = arith.mulf %60, %69 : vector<1x320xf32>
      %79 = arith.addf %77, %78 : vector<1x320xf32>
      %80 = math.tanh %79 : vector<1x320xf32>
      %81 = arith.mulf %76, %80 : vector<1x320xf32>
      scf.yield %81, %79 : vector<1x320xf32>, vector<1x320xf32>
    }
    %c50_i32_21 = arith.constant 50 : i32
    %c0_22 = arith.constant 0 : index
    %c0_23 = arith.constant 0 : index
    %36 = vector.load %arg7[%c0_22, %c0_23] : memref<320x160xf32, #tpu.memory_space<vmem>>, vector<320x160xf32>
    %cst_24 = arith.constant dense<0.000000e+00> : vector<1x160xf32>
    %37 = tpu.matmul %35#0, %36, %cst_24 {dimension_numbers = #tpu.dot_dimension_numbers<[1], [0], [0], [1], [0, 0, 1, 1], [], []>} : vector<1x320xf32>, vector<320x160xf32>, vector<1x160xf32> -> vector<1x160xf32>
    %c0_25 = arith.constant 0 : index
    %c0_26 = arith.constant 0 : index
    %38 = vector.load %arg8[%c0_25, %c0_26] : memref<1x160xf32, #tpu.memory_space<vmem>>, vector<1x160xf32>
    %39 = arith.addf %37, %38 : vector<1x160xf32>
    %cst_27 = arith.constant 0.000000e+00 : f32
    %40 = vector.broadcast %cst_27 : f32 to vector<1x160xf32>
    %41 = arith.maximumf %39, %40 : vector<1x160xf32>
    %c0_28 = arith.constant 0 : index
    %c0_29 = arith.constant 0 : index
    %42 = vector.load %arg9[%c0_28, %c0_29] : memref<160x63xf32, #tpu.memory_space<vmem>>, vector<160x63xf32>
    %cst_30 = arith.constant dense<0.000000e+00> : vector<1x63xf32>
    %43 = tpu.matmul %41, %42, %cst_30 {dimension_numbers = #tpu.dot_dimension_numbers<[1], [0], [0], [1], [0, 0, 1, 1], [], []>} : vector<1x160xf32>, vector<160x63xf32>, vector<1x63xf32> -> vector<1x63xf32>
    %c0_31 = arith.constant 0 : index
    %c0_32 = arith.constant 0 : index
    %44 = vector.load %arg10[%c0_31, %c0_32] : memref<1x63xf32, #tpu.memory_space<vmem>>, vector<1x63xf32>
    %45 = arith.addf %43, %44 : vector<1x63xf32>
    %c0_33 = arith.constant 0 : index
    %c0_34 = arith.constant 0 : index
    %c0_35 = arith.constant 0 : index
    %46 = vector.load %arg11[%c0_33, %c0_34, %c0_35] : memref<1x1x63xf32, #tpu.memory_space<vmem>>, vector<1x1x63xf32>
    %47 = vector.shape_cast %46 : vector<1x1x63xf32> to vector<1x63xf32>
    %48 = vector.shape_cast %45 : vector<1x63xf32> to vector<1x1x63xf32>
    tpu.vector_store %arg11[%c0_33, %c0_34, %c0_35], %48 {strides = array<i32>} : memref<1x1x63xf32, #tpu.memory_space<vmem>>, vector<1x1x63xf32>,
    return
  }
  func.func @transform_0(%arg0: i32) -> (i32, i32, i32) {
    %c0_i32 = arith.constant 0 : i32
    %c0_i32_0 = arith.constant 0 : i32
    %c0_i32_1 = arith.constant 0 : i32
    return %arg0, %c0_i32, %c0_i32_0 : i32, i32, i32
  }
  func.func @transform_1(%arg0: i32) -> (i32, i32) {
    %c0_i32 = arith.constant 0 : i32
    %c0_i32_0 = arith.constant 0 : i32
    %c0_i32_1 = arith.constant 0 : i32
    return %c0_i32, %c0_i32_0 : i32, i32
  }
  func.func @transform_2(%arg0: i32) -> (i32, i32) {
    %c0_i32 = arith.constant 0 : i32
    %c0_i32_0 = arith.constant 0 : i32
    %c0_i32_1 = arith.constant 0 : i32
    return %c0_i32, %c0_i32_0 : i32, i32
  }
  func.func @transform_3(%arg0: i32) -> (i32, i32) {
    %c0_i32 = arith.constant 0 : i32
    %c0_i32_0 = arith.constant 0 : i32
    %c0_i32_1 = arith.constant 0 : i32
    return %c0_i32, %c0_i32_0 : i32, i32
  }
  func.func @transform_4(%arg0: i32) -> (i32, i32) {
    %c0_i32 = arith.constant 0 : i32
    %c0_i32_0 = arith.constant 0 : i32
    %c0_i32_1 = arith.constant 0 : i32
    return %c0_i32, %c0_i32_0 : i32, i32
  }
  func.func @transform_5(%arg0: i32) -> (i32, i32) {
    %c0_i32 = arith.constant 0 : i32
    %c0_i32_0 = arith.constant 0 : i32
    %c0_i32_1 = arith.constant 0 : i32
    return %c0_i32, %c0_i32_0 : i32, i32
  }
  func.func @transform_6(%arg0: i32) -> (i32, i32) {
    %c0_i32 = arith.constant 0 : i32
    %c0_i32_0 = arith.constant 0 : i32
    %c0_i32_1 = arith.constant 0 : i32
    return %c0_i32, %c0_i32_0 : i32, i32
  }
  func.func @transform_7(%arg0: i32) -> (i32, i32) {
    %c0_i32 = arith.constant 0 : i32
    %c0_i32_0 = arith.constant 0 : i32
    %c0_i32_1 = arith.constant 0 : i32
    return %c0_i32, %c0_i32_0 : i32, i32
  }
  func.func @transform_8(%arg0: i32) -> (i32, i32) {
    %c0_i32 = arith.constant 0 : i32
    %c0_i32_0 = arith.constant 0 : i32
    %c0_i32_1 = arith.constant 0 : i32
    return %c0_i32, %c0_i32_0 : i32, i32
  }
  func.func @transform_9(%arg0: i32) -> (i32, i32) {
    %c0_i32 = arith.constant 0 : i32
    %c0_i32_0 = arith.constant 0 : i32
    %c0_i32_1 = arith.constant 0 : i32
    return %c0_i32, %c0_i32_0 : i32, i32
  }
  func.func @transform_10(%arg0: i32) -> (i32, i32, i32) {
    %c0_i32 = arith.constant 0 : i32
    %c0_i32_0 = arith.constant 0 : i32
    %c0_i32_1 = arith.constant 0 : i32
    return %arg0, %c0_i32, %c0_i32_0 : i32, i32, i32
  }
}

</mosaic_0001>

<bundles_post_ra>
// kernel: forward.1
= control target key start
LH: loop header
LB: loop body
LE: loop exit
PB: predicated region body
PF: predicated region fallthrough
CT: control target
= control target key end

     0   :  { %s14563_s0 = inlined_call_operand.vmem [shape: f32[2,50,1792], index: 0, kind: input, shape index: {}]   ;;  %s14564_s1 = inlined_call_operand.vmem [shape: f32[1792,320], index: 1, kind: input, shape index: {}]   ;;  %s14565_s2 = inlined_call_operand.vmem [shape: f32[1,320], index: 2, kind: input, shape index: {}]   ;;  %s14566_s3 = inlined_call_operand.vmem [shape: f32[320,1280], index: 3, kind: input, shape index: {}]   ;;  %s14567_s4 = inlined_call_operand.vmem [shape: f32[320,1280], index: 4, kind: input, shape index: {}]   ;;  %s14568_s5 = inlined_call_operand.vmem [shape: f32[1,1280], index: 5, kind: input, shape index: {}]   ;;  %s14569_s6 = inlined_call_operand.vmem [shape: f32[320,160], index: 6, kind: input, shape index: {}]   ;;  %s14570_s7 = inlined_call_operand.vmem [shape: f32[1,160], index: 7, kind: input, shape index: {}]   ;;  %s14571_s8 = inlined_call_operand.vmem [shape: f32[160,63], index: 8, kind: input, shape index: {}]   ;;  %s14572_s9 = inlined_call_operand.vmem [shape: f32[1,63], index: 9, kind: input, shape index: {}]   ;;  %s14573_s10 = inlined_call_operand.hbm [shape: f32[2,1,63], index: 10, kind: output, shape index: {}]  }
   0x1   :  { %14801 = sst [smem:[#allocation80_spill]] %s14563_s0 }
   0x2   :  { %15 = vsyncpa [#allocation4], 0 }
   0x3   :  { %17 = vsyncpa [#allocation4 + $0x1], 0  ;;  %s6826_s13 = smov 0   ;;  %s6828_s14 = smov 0  }
   0x4   :  { %s6830_s15 = smov 0   ;;  %s6832_s16 = smov 0  }
   0x5 LB: > { %s6847_s17 = sadd.s32 4294967295, %s6755_s16   ;;  %s6491_s18 = sadd.s32 4294967294, %s6755_s16   ;;  %s6755_s16 = sphi %s6832_s16, %s15213_s16   ;;  %s6751_s15 = sphi %s6830_s15, %s15212_s15   ;;  %s6747_s14 = sphi %s6828_s14, %s15211_s14   ;;  %s6743_s13 = sphi %s6826_s13, %s15210_s13  }
   0x6   : > { %s6851_s19 = sadd.s32 1, %s6755_s16   ;;  %s245_s20 = sadd.s32 1, %s6751_s15 }
   0x7   : > { %s242_s21 = ssub.s32 %s6755_s16, %s6851_s19  ;;  %p255_p0 = scmp.ne.s32.totalorder %s6751_s15, %s6747_s14 }
   0x8   : > { %p243_p1 = scmp.eq.s32.totalorder %s242_s21, 0  ;;  %p256_p2 = scmp.eq.s32.totalorder %s6847_s17, 1 }
   0x9   : > { %p261_p3 = scmp.ne.s32.totalorder %s6747_s14, %s6743_s13  ;;  %p262_p4 = scmp.eq.s32.totalorder %s6491_s18, 1 }
   0xa   : > { %s6862_s22 = scalar_select %p243_p1, %s6751_s15, %s245_s20  }
   0xb   : > { %p6864_p5 = por %p256_p2, %p255_p0  ;;  %p6868_p6 = por %p262_p4, %p261_p3 }
   0xc   : > { %p6494_p7 = scmp.ge.s32.totalorder %s6755_s16, 1  ;;  %p315_p8 = scmp.lt.s32.totalorder %s6755_s16, 3 }
   0xe   : > { %p316_p9 = pnand %p6494_p7, %p315_p8 }
  0x10   : > { %319 = sbr.rel (%p316_p9) target bundleno = 2872 (0xb38), region = 60 }
  0x15   : > { %p352_p10 = scmp.lt.s32.totalorder %s6847_s17, 1  ;;  %s14804_s0 = sld [smem:[#allocation80_spill]]  ;;  %vm538_vm0 = vcmask 1041408   ;;  %vm3744_vm5 = vcmask 523264  }
  0x16   : > { %s12924_s21 = smov 0  }
  0x17   : > { %s353_s25 = scalar_select %p352_p10, %s6847_s17, 1 }
  0x19   : > { %s6584_s26 = smul.u32 784, %s353_s25 }
  0x1b   : > { %s6879_s29 = scalar_lea.vmem %s14804_s0, %s6584_s26  ;;  %s15206_s0 = sand.u32 1, %s6747_s14  }
  0x1c   : > { %v6882_v0 = vld [vmem:[%s6879_s29] sm:$0xff]  ;;  %v6885_v1 = vld [vmem:[%s6879_s29 + $0x8] sm:$0xff]  ;;  %v6888_v2 = vld [vmem:[%s6879_s29 + $0x10] sm:$0xff] }
  0x1d   : > { %v455_v3 = vadd.f32 %v6885_v1, %v6882_v0  ;;  %v6893_v4 = vld [vmem:[%s6879_s29 + $0x18] sm:$0xff]  ;;  %v6897_v6 = vld [vmem:[%s6879_s29 + $0x20] sm:$0xff]  ;;  %v6901_v8 = vld [vmem:[%s6879_s29 + $0x28] sm:$0xff] }
  0x1e   : > { %v6905_v10 = vld [vmem:[%s6879_s29 + $0x30] sm:$0xff]  ;;  %v6909_v12 = vld [vmem:[%s6879_s29 + $0x38] sm:$0xff]  ;;  %v6913_v14 = vld [vmem:[%s6879_s29 + $0x40] sm:$0xff] }
  0x1f   : > { %v456_v5 = vadd.f32 %v455_v3, %v6888_v2  ;;  %v6917_v16 = vld [vmem:[%s6879_s29 + $0x48] sm:$0xff]  ;;  %v6921_v18 = vld [vmem:[%s6879_s29 + $0x50] sm:$0xff]  ;;  %v6925_v20 = vld [vmem:[%s6879_s29 + $0x58] sm:$0xff] }
  0x20   : > { %v6929_v22 = vld [vmem:[%s6879_s29 + $0x60] sm:$0xff]  ;;  %v6933_v24 = vld [vmem:[%s6879_s29 + $0x68] sm:$0xff]  ;;  %v6937_v26 = vld [vmem:[%s6879_s29 + $0x70] sm:$0xff] }
  0x21   : > { %v457_v7 = vadd.f32 %v456_v5, %v6893_v4  ;;  %v6941_v28 = vld [vmem:[%s6879_s29 + $0x78] sm:$0xff]  ;;  %v6945_v30 = vld [vmem:[%s6879_s29 + $0x80] sm:$0xff]  ;;  %v6949_v32 = vld [vmem:[%s6879_s29 + $0x88] sm:$0xff] }
  0x22   : > { %v6953_v34 = vld [vmem:[%s6879_s29 + $0x90] sm:$0xff]  ;;  %v6957_v36 = vld [vmem:[%s6879_s29 + $0x98] sm:$0xff]  ;;  %v6961_v38 = vld [vmem:[%s6879_s29 + $0xa0] sm:$0xff] }
  0x23   : > { %v458_v9 = vadd.f32 %v457_v7, %v6897_v6  ;;  %v6965_v40 = vld [vmem:[%s6879_s29 + $0xa8] sm:$0xff]  ;;  %v6969_v42 = vld [vmem:[%s6879_s29 + $0xb0] sm:$0xff]  ;;  %v6973_v44 = vld [vmem:[%s6879_s29 + $0xb8] sm:$0xff] }
  0x24   : > { %v6977_v46 = vld [vmem:[%s6879_s29 + $0xc0] sm:$0xff]  ;;  %v6981_v48 = vld [vmem:[%s6879_s29 + $0xc8] sm:$0xff]  ;;  %v6985_v50 = vld [vmem:[%s6879_s29 + $0xd0] sm:$0xff] }
  0x25   : > { %v459_v11 = vadd.f32 %v458_v9, %v6901_v8  ;;  %v6989_v52 = vld [vmem:[%s6879_s29 + $0xd8] sm:$0xff]  ;;  %v6993_v54 = vld [vmem:[%s6879_s29 + $0xe0] sm:$0xff]  ;;  %v6997_v56 = vld [vmem:[%s6879_s29 + $0xe8] sm:$0xff] }
  0x26   : > { %v7001_v58 = vld [vmem:[%s6879_s29 + $0xf0] sm:$0xff]  ;;  %v7005_v60 = vld [vmem:[%s6879_s29 + $0xf8] sm:$0xff]  ;;  %v7009_v62 = vld [vmem:[%s6879_s29 + $0x100] sm:$0xff] }
  0x27   : > { %v460_v13 = vadd.f32 %v459_v11, %v6905_v10  ;;  %v7013_v3 = vld [vmem:[%s6879_s29 + $0x108] sm:$0xff]  ;;  %v7017_v7 = vld [vmem:[%s6879_s29 + $0x110] sm:$0xff]  ;;  %v7021_v11 = vld [vmem:[%s6879_s29 + $0x118] sm:$0xff] }
  0x29   : > { %v461_v15 = vadd.f32 %v460_v13, %v6909_v12 }
  0x2b   : > { %v462_v17 = vadd.f32 %v461_v15, %v6913_v14  ;;  %v7025_v15 = vld [vmem:[%s6879_s29 + $0x120] sm:$0xff] }
  0x2d   : > { %v463_v19 = vadd.f32 %v462_v17, %v6917_v16 }
  0x2f   : > { %v464_v21 = vadd.f32 %v463_v19, %v6921_v18  ;;  %v7029_v19 = vld [vmem:[%s6879_s29 + $0x128] sm:$0xff] }
  0x31   : > { %v465_v23 = vadd.f32 %v464_v21, %v6925_v20 }
  0x33   : > { %v466_v25 = vadd.f32 %v465_v23, %v6929_v22  ;;  %v7033_v23 = vld [vmem:[%s6879_s29 + $0x130] sm:$0xff] }
  0x35   : > { %v467_v27 = vadd.f32 %v466_v25, %v6933_v24 }
  0x37   : > { %v468_v29 = vadd.f32 %v467_v27, %v6937_v26  ;;  %v7037_v27 = vld [vmem:[%s6879_s29 + $0x138] sm:$0xff] }
  0x39   : > { %v469_v31 = vadd.f32 %v468_v29, %v6941_v28 }
  0x3b   : > { %v470_v33 = vadd.f32 %v469_v31, %v6945_v30  ;;  %v7041_v31 = vld [vmem:[%s6879_s29 + $0x140] sm:$0xff] }
  0x3d   : > { %v471_v35 = vadd.f32 %v470_v33, %v6949_v32 }
  0x3f   : > { %v472_v37 = vadd.f32 %v471_v35, %v6953_v34  ;;  %v7045_v35 = vld [vmem:[%s6879_s29 + $0x148] sm:$0xff] }
  0x41   : > { %v473_v39 = vadd.f32 %v472_v37, %v6957_v36 }
  0x43   : > { %v474_v41 = vadd.f32 %v473_v39, %v6961_v38  ;;  %v7049_v39 = vld [vmem:[%s6879_s29 + $0x150] sm:$0xff] }
  0x45   : > { %v475_v43 = vadd.f32 %v474_v41, %v6965_v40 }
  0x47   : > { %v476_v45 = vadd.f32 %v475_v43, %v6969_v42  ;;  %v7053_v43 = vld [vmem:[%s6879_s29 + $0x158] sm:$0xff] }
  0x49   : > { %v477_v47 = vadd.f32 %v476_v45, %v6973_v44 }
  0x4b   : > { %v478_v49 = vadd.f32 %v477_v47, %v6977_v46  ;;  %v7057_v47 = vld [vmem:[%s6879_s29 + $0x160] sm:$0xff] }
  0x4c   : > { %14805 = vst [vmem:[#allocation6_spill] sm:$0xff] %v7057_v47 }
  0x4d   : > { %v479_v51 = vadd.f32 %v478_v49, %v6981_v48 }
  0x4f   : > { %v480_v53 = vadd.f32 %v479_v51, %v6985_v50  ;;  %v7061_v51 = vld [vmem:[%s6879_s29 + $0x168] sm:$0xff] }
  0x50   : > { %14806 = vst [vmem:[#allocation7_spill] sm:$0xff] %v7061_v51 }
  0x51   : > { %v481_v55 = vadd.f32 %v480_v53, %v6989_v52 }
  0x53   : > { %v482_v57 = vadd.f32 %v481_v55, %v6993_v54  ;;  %v7065_v55 = vld [vmem:[%s6879_s29 + $0x170] sm:$0xff] }
  0x54   : > { %14807 = vst [vmem:[#allocation8_spill] sm:$0xff] %v7065_v55 }
  0x55   : > { %v483_v59 = vadd.f32 %v482_v57, %v6997_v56 }
  0x57   : > { %v484_v61 = vadd.f32 %v483_v59, %v7001_v58  ;;  %v7069_v59 = vld [vmem:[%s6879_s29 + $0x178] sm:$0xff] }
  0x58   : > { %14808 = vst [vmem:[#allocation9_spill] sm:$0xff] %v7069_v59 }
  0x59   : > { %v485_v63 = vadd.f32 %v484_v61, %v7005_v60 }
  0x5b   : > { %v486_v5 = vadd.f32 %v485_v63, %v7009_v62  ;;  %v7073_v63 = vld [vmem:[%s6879_s29 + $0x180] sm:$0xff] }
  0x5c   : > { %14809 = vst [vmem:[#allocation10_spill] sm:$0xff] %v7073_v63 }
  0x5d   : > { %v487_v9 = vadd.f32 %v486_v5, %v7013_v3 }
  0x5f   : > { %v488_v13 = vadd.f32 %v487_v9, %v7017_v7  ;;  %v7077_v9 = vld [vmem:[%s6879_s29 + $0x188] sm:$0xff] }
  0x60   : > { %14810 = vst [vmem:[#allocation11_spill] sm:$0xff] %v7077_v9 }
  0x61   : > { %v489_v17 = vadd.f32 %v488_v13, %v7021_v11 }
  0x63   : > { %v490_v21 = vadd.f32 %v489_v17, %v7025_v15  ;;  %v7081_v17 = vld [vmem:[%s6879_s29 + $0x190] sm:$0xff] }
  0x64   : > { %14811 = vst [vmem:[#allocation12_spill] sm:$0xff] %v7081_v17 }
  0x65   : > { %v491_v25 = vadd.f32 %v490_v21, %v7029_v19 }
  0x67   : > { %v492_v29 = vadd.f32 %v491_v25, %v7033_v23  ;;  %v7085_v25 = vld [vmem:[%s6879_s29 + $0x198] sm:$0xff] }
  0x68   : > { %14812 = vst [vmem:[#allocation13_spill] sm:$0xff] %v7085_v25 }
  0x69   : > { %v493_v33 = vadd.f32 %v492_v29, %v7037_v27 }
  0x6b   : > { %v494_v37 = vadd.f32 %v493_v33, %v7041_v31  ;;  %v7089_v33 = vld [vmem:[%s6879_s29 + $0x1a0] sm:$0xff] }
  0x6c   : > { %14813 = vst [vmem:[#allocation14_spill] sm:$0xff] %v7089_v33 }
  0x6d   : > { %v495_v41 = vadd.f32 %v494_v37, %v7045_v35 }
  0x6f   : > { %v496_v45 = vadd.f32 %v495_v41, %v7049_v39  ;;  %v7093_v41 = vld [vmem:[%s6879_s29 + $0x1a8] sm:$0xff] }
  0x70   : > { %14814 = vst [vmem:[#allocation15_spill] sm:$0xff] %v7093_v41 }
  0x71   : > { %v497_v49 = vadd.f32 %v496_v45, %v7053_v43 }
  0x73   : > { %v498_v53 = vadd.f32 %v497_v49, %v7057_v47  ;;  %v7097_v49 = vld [vmem:[%s6879_s29 + $0x1b0] sm:$0xff] }
  0x74   : > { %14815 = vst [vmem:[#allocation16_spill] sm:$0xff] %v7097_v49 }
  0x75   : > { %v499_v57 = vadd.f32 %v498_v53, %v7061_v51 }
  0x77   : > { %v500_v61 = vadd.f32 %v499_v57, %v7065_v55  ;;  %v7101_v57 = vld [vmem:[%s6879_s29 + $0x1b8] sm:$0xff] }
  0x78   : > { %14816 = vst [vmem:[#allocation17_spill] sm:$0xff] %v7101_v57 }
  0x79   : > { %v501_v5 = vadd.f32 %v500_v61, %v7069_v59 }
  0x7b   : > { %v502_v13 = vadd.f32 %v501_v5, %v7073_v63  ;;  %v7105_v5 = vld [vmem:[%s6879_s29 + $0x1c0] sm:$0xff] }
  0x7c   : > { %14817 = vst [vmem:[#allocation18_spill] sm:$0xff] %v7105_v5 }
  0x7d   : > { %v503_v21 = vadd.f32 %v502_v13, %v7077_v9 }
  0x7f   : > { %v504_v29 = vadd.f32 %v503_v21, %v7081_v17  ;;  %v7109_v21 = vld [vmem:[%s6879_s29 + $0x1c8] sm:$0xff] }
  0x80   : > { %14818 = vst [vmem:[#allocation19_spill] sm:$0xff] %v7109_v21  ;;  %v7241_v17 = vld [vmem:[%s6879_s29 + $0x2c8] sm:$0x3] }
  0x81   : > { %v505_v37 = vadd.f32 %v504_v29, %v7085_v25  ;;  %14850 = vst [vmem:[#allocation51_spill] sm:$0xff] %v7241_v17 }
  0x83   : > { %v506_v45 = vadd.f32 %v505_v37, %v7089_v33  ;;  %v7113_v37 = vld [vmem:[%s6879_s29 + $0x1d0] sm:$0xff] }
  0x84   : > { %14819 = vst [vmem:[#allocation20_spill] sm:$0xff] %v7113_v37 }
  0x85   : > { %v507_v53 = vadd.f32 %v506_v45, %v7093_v41  ;;  %v7117_v41 = vld [vmem:[%s6879_s29 + $0x1d8] sm:$0xff] }
  0x86   : > { %14820 = vst [vmem:[#allocation21_spill] sm:$0xff] %v7117_v41 }
  0x87   : > { %v508_v61 = vadd.f32 %v507_v53, %v7097_v49  ;;  %v7121_v49 = vld [vmem:[%s6879_s29 + $0x1e0] sm:$0xff] }
  0x88   : > { %14821 = vst [vmem:[#allocation22_spill] sm:$0xff] %v7121_v49 }
  0x89   : > { %v509_v13 = vadd.f32 %v508_v61, %v7101_v57  ;;  %v7125_v57 = vld [vmem:[%s6879_s29 + $0x1e8] sm:$0xff] }
  0x8a   : > { %14822 = vst [vmem:[#allocation23_spill] sm:$0xff] %v7125_v57 }
  0x8b   : > { %v510_v29 = vadd.f32 %v509_v13, %v7105_v5  ;;  %v7129_v5 = vld [vmem:[%s6879_s29 + $0x1f0] sm:$0xff] }
  0x8c   : > { %14823 = vst [vmem:[#allocation24_spill] sm:$0xff] %v7129_v5 }
  0x8d   : > { %v511_v45 = vadd.f32 %v510_v29, %v7109_v21  ;;  %v7133_v21 = vld [vmem:[%s6879_s29 + $0x1f8] sm:$0xff] }
  0x8e   : > { %14824 = vst [vmem:[#allocation25_spill] sm:$0xff] %v7133_v21 }
  0x8f   : > { %v512_v53 = vadd.f32 %v511_v45, %v7113_v37  ;;  %v7137_v37 = vld [vmem:[%s6879_s29 + $0x200] sm:$0xff] }
  0x90   : > { %14825 = vst [vmem:[#allocation26_spill] sm:$0xff] %v7137_v37 }
  0x91   : > { %v513_v61 = vadd.f32 %v512_v53, %v7117_v41  ;;  %v7141_v41 = vld [vmem:[%s6879_s29 + $0x208] sm:$0xff] }
  0x92   : > { %14826 = vst [vmem:[#allocation27_spill] sm:$0xff] %v7141_v41 }
  0x93   : > { %v514_v13 = vadd.f32 %v513_v61, %v7121_v49  ;;  %v7145_v49 = vld [vmem:[%s6879_s29 + $0x210] sm:$0xff] }
  0x94   : > { %14827 = vst [vmem:[#allocation28_spill] sm:$0xff] %v7145_v49 }
  0x95   : > { %v515_v29 = vadd.f32 %v514_v13, %v7125_v57  ;;  %v7149_v57 = vld [vmem:[%s6879_s29 + $0x218] sm:$0xff] }
  0x96   : > { %14828 = vst [vmem:[#allocation29_spill] sm:$0xff] %v7149_v57 }
  0x97   : > { %v516_v45 = vadd.f32 %v515_v29, %v7129_v5  ;;  %v7153_v5 = vld [vmem:[%s6879_s29 + $0x220] sm:$0xff] }
  0x98   : > { %14829 = vst [vmem:[#allocation30_spill] sm:$0xff] %v7153_v5 }
  0x99   : > { %v517_v53 = vadd.f32 %v516_v45, %v7133_v21  ;;  %v7157_v21 = vld [vmem:[%s6879_s29 + $0x228] sm:$0xff] }
  0x9a   : > { %14830 = vst [vmem:[#allocation31_spill] sm:$0xff] %v7157_v21 }
  0x9b   : > { %v518_v61 = vadd.f32 %v517_v53, %v7137_v37  ;;  %v7161_v37 = vld [vmem:[%s6879_s29 + $0x230] sm:$0xff] }
  0x9c   : > { %14831 = vst [vmem:[#allocation32_spill] sm:$0xff] %v7161_v37 }
  0x9d   : > { %v519_v13 = vadd.f32 %v518_v61, %v7141_v41  ;;  %v7165_v41 = vld [vmem:[%s6879_s29 + $0x238] sm:$0xff] }
  0x9e   : > { %14832 = vst [vmem:[#allocation33_spill] sm:$0xff] %v7165_v41 }
  0x9f   : > { %v520_v29 = vadd.f32 %v519_v13, %v7145_v49  ;;  %v7169_v49 = vld [vmem:[%s6879_s29 + $0x240] sm:$0xff] }
  0xa0   : > { %14833 = vst [vmem:[#allocation34_spill] sm:$0xff] %v7169_v49 }
  0xa1   : > { %v521_v45 = vadd.f32 %v520_v29, %v7149_v57  ;;  %v7173_v57 = vld [vmem:[%s6879_s29 + $0x248] sm:$0xff] }
  0xa2   : > { %14834 = vst [vmem:[#allocation35_spill] sm:$0xff] %v7173_v57 }
  0xa3   : > { %v522_v53 = vadd.f32 %v521_v45, %v7153_v5  ;;  %v7177_v5 = vld [vmem:[%s6879_s29 + $0x250] sm:$0xff] }
  0xa4   : > { %14835 = vst [vmem:[#allocation36_spill] sm:$0xff] %v7177_v5 }
  0xa5   : > { %v523_v61 = vadd.f32 %v522_v53, %v7157_v21  ;;  %v7181_v21 = vld [vmem:[%s6879_s29 + $0x258] sm:$0xff] }
  0xa6   : > { %14836 = vst [vmem:[#allocation37_spill] sm:$0xff] %v7181_v21 }
  0xa7   : > { %v524_v13 = vadd.f32 %v523_v61, %v7161_v37  ;;  %v7185_v37 = vld [vmem:[%s6879_s29 + $0x260] sm:$0xff] }
  0xa8   : > { %14837 = vst [vmem:[#allocation38_spill] sm:$0xff] %v7185_v37 }
  0xa9   : > { %v525_v29 = vadd.f32 %v524_v13, %v7165_v41  ;;  %v7189_v41 = vld [vmem:[%s6879_s29 + $0x268] sm:$0xff] }
  0xaa   : > { %14838 = vst [vmem:[#allocation39_spill] sm:$0xff] %v7189_v41 }
  0xab   : > { %v526_v45 = vadd.f32 %v525_v29, %v7169_v49  ;;  %v7193_v49 = vld [vmem:[%s6879_s29 + $0x270] sm:$0xff] }
  0xac   : > { %14839 = vst [vmem:[#allocation40_spill] sm:$0xff] %v7193_v49 }
  0xad   : > { %v527_v53 = vadd.f32 %v526_v45, %v7173_v57  ;;  %v7197_v57 = vld [vmem:[%s6879_s29 + $0x278] sm:$0xff] }
  0xae   : > { %14840 = vst [vmem:[#allocation41_spill] sm:$0xff] %v7197_v57 }
  0xaf   : > { %v528_v61 = vadd.f32 %v527_v53, %v7177_v5  ;;  %v7201_v53 = vld [vmem:[%s6879_s29 + $0x280] sm:$0xff] }
  0xb0   : > { %14841 = vst [vmem:[#allocation42_spill] sm:$0xff] %v7201_v53 }
  0xb1   : > { %v529_v13 = vadd.f32 %v528_v61, %v7181_v21  ;;  %v7205_v61 = vld [vmem:[%s6879_s29 + $0x288] sm:$0xff] }
  0xb2   : > { %14842 = vst [vmem:[#allocation43_spill] sm:$0xff] %v7205_v61 }
  0xb3   : > { %v530_v29 = vadd.f32 %v529_v13, %v7185_v37  ;;  %v7209_v13 = vld [vmem:[%s6879_s29 + $0x290] sm:$0xff]  ;;  %v7212_v37 = vld [vmem:[%s6879_s29 + $0x2a0] sm:$0x3] }
  0xb4   : > { %14843 = vst [vmem:[#allocation44_spill] sm:$0xff] %v7209_v13 }
  0xb5   : > { %v531_v45 = vadd.f32 %v530_v29, %v7189_v41  ;;  %14844 = vst [vmem:[#allocation45_spill] sm:$0xff] %v7212_v37  ;;  %v7216_v41 = vld [vmem:[%s6879_s29 + $0x298] sm:$0xff] }
  0xb6   : > { %14845 = vst [vmem:[#allocation46_spill] sm:$0xff] %v7216_v41 }
  0xb7   : > { %v532_v33 = vadd.f32 %v531_v45, %v7193_v49  ;;  %v7219_v45 = vld [vmem:[%s6879_s29 + $0x2a8] sm:$0x3] }
  0xb8   : > { %14846 = vst [vmem:[#allocation47_spill] sm:$0xff] %v7219_v45  ;;  %v541_v49 = vsel %vm538_vm0, %v7219_v45, 0.0 }
  0xb9   : > { %v533_v5 = vadd.f32 %v532_v33, %v7197_v57  ;;  %v539_v57 = vsel %vm538_vm0, %v7212_v37, 0.0 }
  0xbb   : > { %v534_v21 = vadd.f32 %v533_v5, %v7201_v53  ;;  %v7225_v5 = vld [vmem:[%s6879_s29 + $0x2b0] sm:$0x3] }
  0xbc   : > { %14847 = vst [vmem:[#allocation48_spill] sm:$0xff] %v7225_v5  ;;  %v543_v25 = vsel %vm538_vm0, %v7225_v5, 0.0  ;;  %v7251_v5 = vld [vmem:[%s6879_s29 + $0x2d8] sm:$0x3] }
  0xbd   : > { %v535_v29 = vadd.f32 %v534_v21, %v7205_v61  ;;  %v7231_v21 = vld [vmem:[%s6879_s29 + $0x2b8] sm:$0x3]  ;;  %14852 = vst [vmem:[#allocation53_spill] sm:$0xff] %v7251_v5 }
  0xbe   : > { %14848 = vst [vmem:[#allocation49_spill] sm:$0xff] %v7231_v21  ;;  %v545_v37 = vsel %vm538_vm0, %v7231_v21, 0.0  ;;  %v7256_v21 = vld [vmem:[%s6879_s29 + $0x2e0] sm:$0x3] }
  0xbf   : > { %v536_v33 = vadd.f32 %v535_v29, %v7209_v13  ;;  %v7236_v29 = vld [vmem:[%s6879_s29 + $0x2c0] sm:$0x3]  ;;  %14853 = vst [vmem:[#allocation54_spill] sm:$0xff] %v7256_v21 }
  0xc0   : > { %14849 = vst [vmem:[#allocation50_spill] sm:$0xff] %v7236_v29  ;;  %v547_v45 = vsel %vm538_vm0, %v7236_v29, 0.0  ;;  %v7261_v29 = vld [vmem:[%s6879_s29 + $0x2e8] sm:$0x3] }
  0xc1   : > { %v537_v53 = vadd.f32 %v536_v33, %v7216_v41  ;;  %v7246_v41 = vld [vmem:[%s6879_s29 + $0x2d0] sm:$0x3]  ;;  %14854 = vst [vmem:[#allocation55_spill] sm:$0xff] %v7261_v29 }
  0xc2   : > { %14851 = vst [vmem:[#allocation52_spill] sm:$0xff] %v7246_v41 }
  0xc3   : > { %v540_v61 = vadd.f32 %v539_v57, %v537_v53  ;;  %v549_v53 = vsel %vm538_vm0, %v7241_v17, 0.0  ;;  %v7266_v17 = vld [vmem:[%s6879_s29 + $0x2f0] sm:$0x3] }
  0xc4   : > { %14855 = vst [vmem:[#allocation56_spill] sm:$0xff] %v7266_v17 }
  0xc5   : > { %v542_v13 = vadd.f32 %v541_v49, %v540_v61  ;;  %v551_v61 = vsel %vm538_vm0, %v7246_v41, 0.0  ;;  %v7271_v41 = vld [vmem:[%s6879_s29 + $0x2f8] sm:$0x3] }
  0xc6   : > { %14856 = vst [vmem:[#allocation57_spill] sm:$0xff] %v7271_v41 }
  0xc7   : > { %v544_v33 = vadd.f32 %v543_v25, %v542_v13  ;;  %v553_v13 = vsel %vm538_vm0, %v7251_v5, 0.0 }
  0xc9   : > { %v546_v57 = vadd.f32 %v545_v37, %v544_v33  ;;  %v555_v33 = vsel %vm538_vm0, %v7256_v21, 0.0 }
  0xcb   : > { %v548_v49 = vadd.f32 %v547_v45, %v546_v57  ;;  %v557_v57 = vsel %vm538_vm0, %v7261_v29, 0.0 }
  0xcd   : > { %v550_v25 = vadd.f32 %v549_v53, %v548_v49  ;;  %v559_v53 = vsel %vm538_vm0, %v7266_v17, 0.0  ;;  %v7276_v49 = vld [vmem:[%s6879_s29 + $0x300] sm:$0x3]  ;;  %v6769_v17 = vmov 89600.0  }
  0xce   : > { %14857 = vst [vmem:[#allocation58_spill] sm:$0xff] %v7276_v49  ;;  %6658 = vrcp.f32 %v6769_v17 }
  0xcf   : > { %v552_v37 = vadd.f32 %v551_v61, %v550_v25  ;;  %v561_v61 = vsel %vm538_vm0, %v7271_v41, 0.0  ;;  %v7281_v25 = vld [vmem:[%s6879_s29 + $0x308] sm:$0x3] }
  0xd1   : > { %v554_v45 = vadd.f32 %v553_v13, %v552_v37  ;;  %v563_v13 = vsel %vm538_vm0, %v7276_v49, 0.0 }
  0xd3   : > { %v556_v9 = vadd.f32 %v555_v33, %v554_v45  ;;  %v565_v33 = vsel %vm538_vm0, %v7281_v25, 0.0 }
  0xd5   : > { %v558_v5 = vadd.f32 %v557_v57, %v556_v9  ;;  %v6659_v9 = vpop.eup %6658 }
  0xd6   : > { %v577_v57 = vmul.f32 89600.0, %v6659_v9  ;;  %vm581_vm1 = vweird.f32 %v6659_v9 }
  0xd7   : > { %v560_v21 = vadd.f32 %v559_v53, %v558_v5 }
  0xd8   : > { %v578_v63 = vsub.f32 1.0, %v577_v57 }
  0xd9   : > { %v562_v37 = vadd.f32 %v561_v61, %v560_v21 }
  0xda   : > { %v579_v5 = vmul.f32 %v6659_v9, %v578_v63 }
  0xdb   : > { %v564_v45 = vadd.f32 %v563_v13, %v562_v37 }
  0xdc   : > { %v580_v47 = vadd.f32 %v6659_v9, %v579_v5 }
  0xdd   : > { %v566_v29 = vadd.f32 %v565_v33, %v564_v45 }
  0xde   : > { %v582_v49 = vsel %vm581_vm1, %v6659_v9, %v580_v47 }
  0xdf   : > { %567 = vadd.xlane.f32.xlu0 %v566_v29 }
 0x152   : > { %v568_v41 = vpop.xlane.xlu0 %567 }
 0x153   : > { %v569_v59 = vrot.slane %v568_v41, 4 }
 0x155   : > { %v570_v55 = vadd.f32 %v569_v59, %v568_v41 }
 0x157   : > { %v571_v53 = vrot.slane %v570_v55, 2 }
 0x159   : > { %v572_v51 = vadd.f32 %v571_v53, %v570_v55 }
 0x15b   : > { %v573_v21 = vrot.slane %v572_v51, 1 }
 0x15d   : > { %v574_v61 = vadd.f32 %v573_v21, %v572_v51 }
 0x15f   : > { %6585 = vpush %v574_v61 }
 0x160   : > { %6587 = vpush %v582_v49 }
 0x190   : > { %s6586_s11 = spop %6585 }
 0x191   : > { %s7288_s12 = spop %6587 }
 0x192   : > { %s584_s18 = smul.f32 %s7288_s12, %s6586_s11 }
 0x194   : > { %v7291_v17 = vstv %s584_s18  ;;  %s12918_s18 = scalar_lea.vmem [#allocation3], %s15206_s0 }
 0x195   : > { %v7295_v59 = vsub.f32 %v6882_v0, %v7291_v17  ;;  %v7299_v55 = vsub.f32 %v6885_v1, %v7291_v17  ;;  %v7303_v47 = vsub.f32 %v6888_v2, %v7291_v17  ;;  %v7311_v41 = vsub.f32 %v6893_v4, %v7291_v17 }
 0x196   : > { %v7315_v0 = vsub.f32 %v6897_v6, %v7291_v17  ;;  %v7321_v2 = vsub.f32 %v6901_v8, %v7291_v17  ;;  %v7327_v4 = vsub.f32 %v6905_v10, %v7291_v17  ;;  %v7333_v33 = vsub.f32 %v6909_v12, %v7291_v17 }
 0x197   : > { %v684_v51 = vmul.f32 %v7295_v59, %v7295_v59  ;;  %v685_v63 = vmul.f32 %v7299_v55, %v7299_v55  ;;  %v686_v1 = vmul.f32 %v7303_v47, %v7303_v47  ;;  %v687_v49 = vmul.f32 %v7311_v41, %v7311_v41 }
 0x198   : > { %v688_v6 = vmul.f32 %v7315_v0, %v7315_v0  ;;  %v689_v8 = vmul.f32 %v7321_v2, %v7321_v2  ;;  %v7339_v9 = vsub.f32 %v6913_v14, %v7291_v17  ;;  %v690_v10 = vmul.f32 %v7327_v4, %v7327_v4 }
 0x199   : > { %v782_v29 = vadd.f32 %v685_v63, %v684_v51  ;;  %v7345_v5 = vsub.f32 %v6917_v16, %v7291_v17  ;;  %v691_v12 = vmul.f32 %v7333_v33, %v7333_v33  ;;  %v7351_v21 = vsub.f32 %v6921_v18, %v7291_v17 }
 0x19a   : > { %14858 = vst [vmem:[#allocation59_spill] sm:$0xff] %v7339_v9  ;;  %v692_v14 = vmul.f32 %v7339_v9, %v7339_v9  ;;  %v7357_v51 = vsub.f32 %v6925_v20, %v7291_v17 }
 0x19b   : > { %v783_v13 = vadd.f32 %v782_v29, %v686_v1  ;;  %14859 = vst [vmem:[#allocation60_spill] sm:$0xff] %v7345_v5  ;;  %v693_v16 = vmul.f32 %v7345_v5, %v7345_v5  ;;  %v7363_v1 = vsub.f32 %v6929_v22, %v7291_v17  ;;  %v694_v18 = vmul.f32 %v7351_v21, %v7351_v21 }
 0x19c   : > { %14860 = vst [vmem:[#allocation61_spill] sm:$0xff] %v7351_v21  ;;  %v695_v20 = vmul.f32 %v7357_v51, %v7357_v51 }
 0x19d   : > { %v784_v37 = vadd.f32 %v783_v13, %v687_v49  ;;  %14861 = vst [vmem:[#allocation62_spill] sm:$0xff] %v7357_v51  ;;  %v7369_v49 = vsub.f32 %v6933_v24, %v7291_v17  ;;  %v696_v22 = vmul.f32 %v7363_v1, %v7363_v1 }
 0x19e   : > { %14862 = vst [vmem:[#allocation63_spill] sm:$0xff] %v7363_v1 }
 0x19f   : > { %v785_v45 = vadd.f32 %v784_v37, %v688_v6  ;;  %14863 = vst [vmem:[#allocation64_spill] sm:$0xff] %v7369_v49  ;;  %v7375_v6 = vsub.f32 %v6937_v26, %v7291_v17  ;;  %v697_v24 = vmul.f32 %v7369_v49, %v7369_v49 }
 0x1a1   : > { %v786_v57 = vadd.f32 %v785_v45, %v689_v8  ;;  %v7381_v8 = vsub.f32 %v6941_v28, %v7291_v17  ;;  %v698_v26 = vmul.f32 %v7375_v6, %v7375_v6 }
 0x1a3   : > { %v787_v53 = vadd.f32 %v786_v57, %v690_v10  ;;  %v7387_v10 = vsub.f32 %v6945_v30, %v7291_v17  ;;  %v699_v28 = vmul.f32 %v7381_v8, %v7381_v8 }
 0x1a5   : > { %v788_v61 = vadd.f32 %v787_v53, %v691_v12  ;;  %v7393_v12 = vsub.f32 %v6949_v32, %v7291_v17  ;;  %v700_v30 = vmul.f32 %v7387_v10, %v7387_v10 }
 0x1a7   : > { %v789_v63 = vadd.f32 %v788_v61, %v692_v14  ;;  %v7399_v14 = vsub.f32 %v6953_v34, %v7291_v17  ;;  %v701_v32 = vmul.f32 %v7393_v12, %v7393_v12 }
 0x1a9   : > { %v790_v29 = vadd.f32 %v789_v63, %v693_v16  ;;  %v7405_v16 = vsub.f32 %v6957_v36, %v7291_v17  ;;  %v702_v34 = vmul.f32 %v7399_v14, %v7399_v14 }
 0x1ab   : > { %v791_v13 = vadd.f32 %v790_v29, %v694_v18  ;;  %v7411_v18 = vsub.f32 %v6961_v38, %v7291_v17  ;;  %v703_v36 = vmul.f32 %v7405_v16, %v7405_v16 }
 0x1ad   : > { %v792_v37 = vadd.f32 %v791_v13, %v695_v20  ;;  %v7417_v20 = vsub.f32 %v6965_v40, %v7291_v17  ;;  %v704_v38 = vmul.f32 %v7411_v18, %v7411_v18 }
 0x1af   : > { %v793_v45 = vadd.f32 %v792_v37, %v696_v22  ;;  %v7423_v22 = vsub.f32 %v6969_v42, %v7291_v17  ;;  %v705_v40 = vmul.f32 %v7417_v20, %v7417_v20 }
 0x1b1   : > { %v794_v57 = vadd.f32 %v793_v45, %v697_v24  ;;  %14864 = vst [vmem:[#allocation65_spill] sm:$0xff] %v7423_v22  ;;  %v7429_v24 = vsub.f32 %v6973_v44, %v7291_v17  ;;  %v706_v42 = vmul.f32 %v7423_v22, %v7423_v22 }
 0x1b3   : > { %v795_v53 = vadd.f32 %v794_v57, %v698_v26  ;;  %14865 = vst [vmem:[#allocation66_spill] sm:$0xff] %v7429_v24  ;;  %v7435_v26 = vsub.f32 %v6977_v46, %v7291_v17  ;;  %v707_v44 = vmul.f32 %v7429_v24, %v7429_v24 }
 0x1b5   : > { %v796_v61 = vadd.f32 %v795_v53, %v699_v28  ;;  %14866 = vst [vmem:[#allocation67_spill] sm:$0xff] %v7435_v26  ;;  %v7441_v28 = vsub.f32 %v6981_v48, %v7291_v17  ;;  %v708_v46 = vmul.f32 %v7435_v26, %v7435_v26 }
 0x1b7   : > { %v797_v63 = vadd.f32 %v796_v61, %v700_v30  ;;  %14867 = vst [vmem:[#allocation68_spill] sm:$0xff] %v7441_v28  ;;  %v7447_v30 = vsub.f32 %v6985_v50, %v7291_v17  ;;  %v709_v48 = vmul.f32 %v7441_v28, %v7441_v28 }
 0x1b9   : > { %v798_v29 = vadd.f32 %v797_v63, %v701_v32  ;;  %14868 = vst [vmem:[#allocation69_spill] sm:$0xff] %v7447_v30  ;;  %v7453_v32 = vsub.f32 %v6989_v52, %v7291_v17  ;;  %v710_v50 = vmul.f32 %v7447_v30, %v7447_v30 }
 0x1bb   : > { %v799_v13 = vadd.f32 %v798_v29, %v702_v34  ;;  %14869 = vst [vmem:[#allocation70_spill] sm:$0xff] %v7453_v32  ;;  %v7459_v34 = vsub.f32 %v6993_v54, %v7291_v17  ;;  %v711_v52 = vmul.f32 %v7453_v32, %v7453_v32 }
 0x1bd   : > { %v800_v37 = vadd.f32 %v799_v13, %v703_v36  ;;  %v7465_v36 = vsub.f32 %v6997_v56, %v7291_v17  ;;  %v712_v54 = vmul.f32 %v7459_v34, %v7459_v34 }
 0x1bf   : > { %v801_v45 = vadd.f32 %v800_v37, %v704_v38  ;;  %v7471_v38 = vsub.f32 %v7001_v58, %v7291_v17  ;;  %v713_v56 = vmul.f32 %v7465_v36, %v7465_v36 }
 0x1c1   : > { %v802_v57 = vadd.f32 %v801_v45, %v705_v40  ;;  %v7477_v40 = vsub.f32 %v7005_v60, %v7291_v17  ;;  %v714_v58 = vmul.f32 %v7471_v38, %v7471_v38 }
 0x1c3   : > { %v803_v53 = vadd.f32 %v802_v57, %v706_v42  ;;  %v7483_v42 = vsub.f32 %v7009_v62, %v7291_v17  ;;  %v715_v60 = vmul.f32 %v7477_v40, %v7477_v40 }
 0x1c5   : > { %v804_v61 = vadd.f32 %v803_v53, %v707_v44  ;;  %v7489_v44 = vsub.f32 %v7013_v3, %v7291_v17  ;;  %v716_v62 = vmul.f32 %v7483_v42, %v7483_v42 }
 0x1c7   : > { %v805_v63 = vadd.f32 %v804_v61, %v708_v46  ;;  %v7495_v46 = vsub.f32 %v7017_v7, %v7291_v17  ;;  %v717_v3 = vmul.f32 %v7489_v44, %v7489_v44 }
 0x1c9   : > { %v806_v29 = vadd.f32 %v805_v63, %v709_v48  ;;  %v7501_v48 = vsub.f32 %v7021_v11, %v7291_v17  ;;  %v718_v7 = vmul.f32 %v7495_v46, %v7495_v46 }
 0x1cb   : > { %v807_v13 = vadd.f32 %v806_v29, %v710_v50  ;;  %v7507_v50 = vsub.f32 %v7025_v15, %v7291_v17  ;;  %v719_v11 = vmul.f32 %v7501_v48, %v7501_v48 }
 0x1cd   : > { %v808_v37 = vadd.f32 %v807_v13, %v711_v52  ;;  %14870 = vst [vmem:[#allocation71_spill] sm:$0xff] %v7507_v50  ;;  %v7513_v52 = vsub.f32 %v7029_v19, %v7291_v17  ;;  %v720_v15 = vmul.f32 %v7507_v50, %v7507_v50 }
 0x1cf   : > { %v809_v45 = vadd.f32 %v808_v37, %v712_v54  ;;  %14871 = vst [vmem:[#allocation72_spill] sm:$0xff] %v7513_v52  ;;  %v7519_v54 = vsub.f32 %v7033_v23, %v7291_v17  ;;  %v721_v19 = vmul.f32 %v7513_v52, %v7513_v52 }
 0x1d1   : > { %v810_v57 = vadd.f32 %v809_v45, %v713_v56  ;;  %14872 = vst [vmem:[#allocation73_spill] sm:$0xff] %v7519_v54  ;;  %v7525_v56 = vsub.f32 %v7037_v27, %v7291_v17  ;;  %v722_v23 = vmul.f32 %v7519_v54, %v7519_v54 }
 0x1d3   : > { %v811_v53 = vadd.f32 %v810_v57, %v714_v58  ;;  %14873 = vst [vmem:[#allocation74_spill] sm:$0xff] %v7525_v56  ;;  %v7531_v58 = vsub.f32 %v7041_v31, %v7291_v17  ;;  %v723_v27 = vmul.f32 %v7525_v56, %v7525_v56 }
 0x1d5   : > { %v812_v61 = vadd.f32 %v811_v53, %v715_v60  ;;  %14874 = vst [vmem:[#allocation75_spill] sm:$0xff] %v7531_v58  ;;  %v7537_v60 = vsub.f32 %v7045_v35, %v7291_v17  ;;  %v724_v31 = vmul.f32 %v7531_v58, %v7531_v58 }
 0x1d7   : > { %v813_v63 = vadd.f32 %v812_v61, %v716_v62  ;;  %14875 = vst [vmem:[#allocation76_spill] sm:$0xff] %v7537_v60  ;;  %v7543_v62 = vsub.f32 %v7049_v39, %v7291_v17  ;;  %v725_v35 = vmul.f32 %v7537_v60, %v7537_v60 }
 0x1d9   : > { %v814_v29 = vadd.f32 %v813_v63, %v717_v3  ;;  %v7549_v3 = vsub.f32 %v7053_v43, %v7291_v17  ;;  %v726_v39 = vmul.f32 %v7543_v62, %v7543_v62 }
 0x1db   : > { %v815_v13 = vadd.f32 %v814_v29, %v718_v7  ;;  %v14876_v7 = vld [vmem:[#allocation6_spill] sm:$0xff]  ;;  %v727_v43 = vmul.f32 %v7549_v3, %v7549_v3 }
 0x1dc   : > { %v7555_v29 = vsub.f32 %v14876_v7, %v7291_v17 }
 0x1dd   : > { %v816_v37 = vadd.f32 %v815_v13, %v719_v11  ;;  %v14877_v13 = vld [vmem:[#allocation7_spill] sm:$0xff] }
 0x1df   : > { %v817_v45 = vadd.f32 %v816_v37, %v720_v15  ;;  %v7561_v15 = vsub.f32 %v14877_v13, %v7291_v17 }
 0x1e1   : > { %v818_v57 = vadd.f32 %v817_v45, %v721_v19  ;;  %v14878_v19 = vld [vmem:[#allocation8_spill] sm:$0xff] }
 0x1e2   : > { %v7567_v45 = vsub.f32 %v14878_v19, %v7291_v17  ;;  %v14882_v19 = vld [vmem:[#allocation12_spill] sm:$0xff] }
 0x1e3   : > { %v819_v53 = vadd.f32 %v818_v57, %v722_v23  ;;  %v728_v23 = vmul.f32 %v7555_v29, %v7555_v29 }
 0x1e4   : > { %v730_v7 = vmul.f32 %v7567_v45, %v7567_v45 }
 0x1e5   : > { %v820_v61 = vadd.f32 %v819_v53, %v723_v27  ;;  %v14879_v27 = vld [vmem:[#allocation9_spill] sm:$0xff] }
 0x1e6   : > { %v7573_v53 = vsub.f32 %v14879_v27, %v7291_v17  ;;  %v7591_v27 = vsub.f32 %v14882_v19, %v7291_v17  ;;  %v14888_v19 = vld [vmem:[#allocation15_spill] sm:$0xff] }
 0x1e7   : > { %v821_v63 = vadd.f32 %v820_v61, %v724_v31  ;;  %v729_v31 = vmul.f32 %v7561_v15, %v7561_v15  ;;  %v7609_v32 = vsub.f32 %v14888_v19, %v7291_v17  ;;  %v14894_v19 = vld [vmem:[#allocation18_spill] sm:$0xff] }
 0x1e8   : > { %14883 = vst [vmem:[#allocation6_spill] sm:$0xff] %v7591_v27  ;;  %v7627_v1 = vsub.f32 %v14894_v19, %v7291_v17  ;;  %v14897_v19 = vld [vmem:[#allocation21_spill] sm:$0xff] }
 0x1e9   : > { %v822_v11 = vadd.f32 %v821_v63, %v725_v35  ;;  %v14880_v35 = vld [vmem:[#allocation10_spill] sm:$0xff]  ;;  %14889 = vst [vmem:[#allocation9_spill] sm:$0xff] %v7609_v32 }
 0x1ea   : > { %v7579_v63 = vsub.f32 %v14880_v35, %v7291_v17  ;;  %v14884_v35 = vld [vmem:[#allocation13_spill] sm:$0xff] }
 0x1eb   : > { %v823_v37 = vadd.f32 %v822_v11, %v726_v39  ;;  %v14881_v11 = vld [vmem:[#allocation11_spill] sm:$0xff]  ;;  %v7597_v60 = vsub.f32 %v14884_v35, %v7291_v17  ;;  %v14890_v35 = vld [vmem:[#allocation16_spill] sm:$0xff] }
 0x1ec   : > { %v7585_v13 = vsub.f32 %v14881_v11, %v7291_v17  ;;  %v14886_v11 = vld [vmem:[#allocation14_spill] sm:$0xff]  ;;  %v7615_v30 = vsub.f32 %v14890_v35, %v7291_v17  ;;  %v14895_v35 = vld [vmem:[#allocation19_spill] sm:$0xff] }
 0x1ed   : > { %v824_v57 = vadd.f32 %v823_v37, %v727_v43  ;;  %v731_v43 = vmul.f32 %v7573_v53, %v7573_v53  ;;  %14885 = vst [vmem:[#allocation7_spill] sm:$0xff] %v7597_v60  ;;  %v7603_v58 = vsub.f32 %v14886_v11, %v7291_v17  ;;  %v14892_v11 = vld [vmem:[#allocation17_spill] sm:$0xff] }
 0x1ee   : > { %14891 = vst [vmem:[#allocation10_spill] sm:$0xff] %v7615_v30  ;;  %v7621_v49 = vsub.f32 %v14892_v11, %v7291_v17  ;;  %v14896_v11 = vld [vmem:[#allocation20_spill] sm:$0xff] }
 0x1ef   : > { %v825_v61 = vadd.f32 %v824_v57, %v728_v23  ;;  %v732_v23 = vmul.f32 %v7579_v63, %v7579_v63  ;;  %14887 = vst [vmem:[#allocation8_spill] sm:$0xff] %v7603_v58 }
 0x1f0   : > { %14893 = vst [vmem:[#allocation11_spill] sm:$0xff] %v7621_v49 }
 0x1f1   : > { %v826_v39 = vadd.f32 %v825_v61, %v729_v31  ;;  %v733_v31 = vmul.f32 %v7585_v13, %v7585_v13 }
 0x1f3   : > { %v827_v37 = vadd.f32 %v826_v39, %v730_v7  ;;  %v734_v7 = vmul.f32 %v7591_v27, %v7591_v27 }
 0x1f5   : > { %v828_v57 = vadd.f32 %v827_v37, %v731_v43  ;;  %v735_v43 = vmul.f32 %v7597_v60, %v7597_v60 }
 0x1f7   : > { %v829_v61 = vadd.f32 %v828_v57, %v732_v23  ;;  %v736_v23 = vmul.f32 %v7603_v58, %v7603_v58  ;;  %v7633_v58 = vsub.f32 %v14895_v35, %v7291_v17  ;;  %v14898_v35 = vld [vmem:[#allocation22_spill] sm:$0xff] }
 0x1f9   : > { %v830_v39 = vadd.f32 %v829_v61, %v733_v31  ;;  %v737_v31 = vmul.f32 %v7609_v32, %v7609_v32  ;;  %v7639_v32 = vsub.f32 %v14896_v11, %v7291_v17  ;;  %v14899_v11 = vld [vmem:[#allocation23_spill] sm:$0xff] }
 0x1fa   : > { %v7657_v60 = vsub.f32 %v14899_v11, %v7291_v17  ;;  %v14905_v11 = vld [vmem:[#allocation26_spill] sm:$0xff] }
 0x1fb   : > { %v831_v37 = vadd.f32 %v830_v39, %v734_v7  ;;  %v738_v7 = vmul.f32 %v7615_v30, %v7615_v30  ;;  %v7645_v30 = vsub.f32 %v14897_v19, %v7291_v17  ;;  %v14901_v19 = vld [vmem:[#allocation24_spill] sm:$0xff]  ;;  %v7675_v54 = vsub.f32 %v14905_v11, %v7291_v17  ;;  %v14911_v11 = vld [vmem:[#allocation29_spill] sm:$0xff] }
 0x1fc   : > { %14900 = vst [vmem:[#allocation12_spill] sm:$0xff] %v7657_v60  ;;  %v7663_v27 = vsub.f32 %v14901_v19, %v7291_v17  ;;  %v14907_v19 = vld [vmem:[#allocation27_spill] sm:$0xff]  ;;  %v7693_v28 = vsub.f32 %v14911_v11, %v7291_v17  ;;  %v14917_v11 = vld [vmem:[#allocation32_spill] sm:$0xff] }
 0x1fd   : > { %v832_v57 = vadd.f32 %v831_v37, %v735_v43  ;;  %v739_v43 = vmul.f32 %v7621_v49, %v7621_v49  ;;  %v7651_v49 = vsub.f32 %v14898_v35, %v7291_v17  ;;  %v14903_v35 = vld [vmem:[#allocation25_spill] sm:$0xff]  ;;  %14906 = vst [vmem:[#allocation15_spill] sm:$0xff] %v7675_v54  ;;  %v7681_v52 = vsub.f32 %v14907_v19, %v7291_v17  ;;  %v14913_v19 = vld [vmem:[#allocation30_spill] sm:$0xff] }
 0x1fe   : > { %14902 = vst [vmem:[#allocation13_spill] sm:$0xff] %v7663_v27  ;;  %v7669_v56 = vsub.f32 %v14903_v35, %v7291_v17  ;;  %v14909_v35 = vld [vmem:[#allocation28_spill] sm:$0xff]  ;;  %v7699_v26 = vsub.f32 %v14913_v19, %v7291_v17  ;;  %v14918_v19 = vld [vmem:[#allocation33_spill] sm:$0xff] }
 0x1ff   : > { %v833_v61 = vadd.f32 %v832_v57, %v736_v23  ;;  %v740_v23 = vmul.f32 %v7627_v1, %v7627_v1  ;;  %14908 = vst [vmem:[#allocation16_spill] sm:$0xff] %v7681_v52  ;;  %v7687_v50 = vsub.f32 %v14909_v35, %v7291_v17  ;;  %v14915_v35 = vld [vmem:[#allocation31_spill] sm:$0xff] }
 0x200   : > { %14904 = vst [vmem:[#allocation14_spill] sm:$0xff] %v7669_v56 }
 0x201   : > { %v834_v39 = vadd.f32 %v833_v61, %v737_v31  ;;  %v741_v31 = vmul.f32 %v7633_v58, %v7633_v58  ;;  %14910 = vst [vmem:[#allocation17_spill] sm:$0xff] %v7687_v50 }
 0x202   : > { %14912 = vst [vmem:[#allocation18_spill] sm:$0xff] %v7693_v28 }
 0x203   : > { %v835_v37 = vadd.f32 %v834_v39, %v738_v7  ;;  %v742_v7 = vmul.f32 %v7639_v32, %v7639_v32  ;;  %14914 = vst [vmem:[#allocation19_spill] sm:$0xff] %v7699_v26 }
 0x205   : > { %v836_v57 = vadd.f32 %v835_v37, %v739_v43  ;;  %v743_v43 = vmul.f32 %v7645_v30, %v7645_v30 }
 0x207   : > { %v837_v61 = vadd.f32 %v836_v57, %v740_v23  ;;  %v744_v23 = vmul.f32 %v7651_v49, %v7651_v49 }
 0x209   : > { %v838_v39 = vadd.f32 %v837_v61, %v741_v31  ;;  %v745_v31 = vmul.f32 %v7657_v60, %v7657_v60 }
 0x20b   : > { %v839_v37 = vadd.f32 %v838_v39, %v742_v7  ;;  %v746_v7 = vmul.f32 %v7663_v27, %v7663_v27 }
 0x20d   : > { %v840_v57 = vadd.f32 %v839_v37, %v743_v43  ;;  %v747_v43 = vmul.f32 %v7669_v56, %v7669_v56 }
 0x20f   : > { %v841_v61 = vadd.f32 %v840_v57, %v744_v23  ;;  %v748_v23 = vmul.f32 %v7675_v54, %v7675_v54  ;;  %v7705_v54 = vsub.f32 %v14915_v35, %v7291_v17  ;;  %v14919_v35 = vld [vmem:[#allocation34_spill] sm:$0xff] }
 0x211   : > { %v842_v39 = vadd.f32 %v841_v61, %v745_v31  ;;  %v749_v31 = vmul.f32 %v7681_v52, %v7681_v52  ;;  %14916 = vst [vmem:[#allocation20_spill] sm:$0xff] %v7705_v54  ;;  %v7711_v52 = vsub.f32 %v14917_v11, %v7291_v17  ;;  %v14920_v11 = vld [vmem:[#allocation35_spill] sm:$0xff] }
 0x213   : > { %v843_v37 = vadd.f32 %v842_v39, %v746_v7  ;;  %v750_v7 = vmul.f32 %v7687_v50, %v7687_v50  ;;  %v7717_v50 = vsub.f32 %v14918_v19, %v7291_v17  ;;  %v14921_v19 = vld [vmem:[#allocation36_spill] sm:$0xff] }
 0x215   : > { %v844_v57 = vadd.f32 %v843_v37, %v747_v43  ;;  %v751_v43 = vmul.f32 %v7693_v28, %v7693_v28  ;;  %v7723_v28 = vsub.f32 %v14919_v35, %v7291_v17  ;;  %v14923_v35 = vld [vmem:[#allocation37_spill] sm:$0xff] }
 0x216   : > { %v7741_v24 = vsub.f32 %v14923_v35, %v7291_v17  ;;  %v14929_v35 = vld [vmem:[#allocation40_spill] sm:$0xff] }
 0x217   : > { %v845_v61 = vadd.f32 %v844_v57, %v748_v23  ;;  %v752_v23 = vmul.f32 %v7699_v26, %v7699_v26  ;;  %v7729_v26 = vsub.f32 %v14920_v11, %v7291_v17  ;;  %v14925_v11 = vld [vmem:[#allocation38_spill] sm:$0xff]  ;;  %v7759_v21 = vsub.f32 %v14929_v35, %v7291_v17  ;;  %v14935_v35 = vld [vmem:[#allocation43_spill] sm:$0xff] }
 0x218   : > { %14924 = vst [vmem:[#allocation22_spill] sm:$0xff] %v7741_v24  ;;  %v7747_v22 = vsub.f32 %v14925_v11, %v7291_v17  ;;  %v14931_v11 = vld [vmem:[#allocation41_spill] sm:$0xff] }
 0x219   : > { %v846_v39 = vadd.f32 %v845_v61, %v749_v31  ;;  %v753_v31 = vmul.f32 %v7705_v54, %v7705_v54  ;;  %v7735_v54 = vsub.f32 %v14921_v19, %v7291_v17  ;;  %v14927_v19 = vld [vmem:[#allocation39_spill] sm:$0xff]  ;;  %14930 = vst [vmem:[#allocation25_spill] sm:$0xff] %v7759_v21  ;;  %v7765_v5 = vsub.f32 %v14931_v11, %v7291_v17  ;;  %v14937_v11 = vld [vmem:[#allocation44_spill] sm:$0xff] }
 0x21a   : > { %14926 = vst [vmem:[#allocation23_spill] sm:$0xff] %v7747_v22  ;;  %v7753_v51 = vsub.f32 %v14927_v19, %v7291_v17  ;;  %v14933_v19 = vld [vmem:[#allocation42_spill] sm:$0xff] }
 0x21b   : > { %v847_v37 = vadd.f32 %v846_v39, %v750_v7  ;;  %v754_v7 = vmul.f32 %v7711_v52, %v7711_v52  ;;  %14922 = vst [vmem:[#allocation21_spill] sm:$0xff] %v7735_v54  ;;  %v7771_v9 = vsub.f32 %v14933_v19, %v7291_v17  ;;  %v14939_v19 = vld [vmem:[#allocation45_spill] sm:$0xff] }
 0x21c   : > { %14928 = vst [vmem:[#allocation24_spill] sm:$0xff] %v7753_v51 }
 0x21d   : > { %v848_v57 = vadd.f32 %v847_v37, %v751_v43  ;;  %v755_v43 = vmul.f32 %v7717_v50, %v7717_v50  ;;  %14932 = vst [vmem:[#allocation26_spill] sm:$0xff] %v7765_v5 }
 0x21e   : > { %14934 = vst [vmem:[#allocation27_spill] sm:$0xff] %v7771_v9 }
 0x21f   : > { %v849_v61 = vadd.f32 %v848_v57, %v752_v23  ;;  %v756_v23 = vmul.f32 %v7723_v28, %v7723_v28 }
 0x221   : > { %v850_v39 = vadd.f32 %v849_v61, %v753_v31  ;;  %v757_v31 = vmul.f32 %v7729_v26, %v7729_v26 }
 0x223   : > { %v851_v37 = vadd.f32 %v850_v39, %v754_v7  ;;  %v758_v7 = vmul.f32 %v7735_v54, %v7735_v54 }
 0x225   : > { %v852_v57 = vadd.f32 %v851_v37, %v755_v43  ;;  %v759_v43 = vmul.f32 %v7741_v24, %v7741_v24 }
 0x227   : > { %v853_v61 = vadd.f32 %v852_v57, %v756_v23  ;;  %v760_v23 = vmul.f32 %v7747_v22, %v7747_v22  ;;  %v7777_v22 = vsub.f32 %v14935_v35, %v7291_v17 }
 0x229   : > { %v854_v39 = vadd.f32 %v853_v61, %v757_v31  ;;  %v761_v31 = vmul.f32 %v7753_v51, %v7753_v51  ;;  %14936 = vst [vmem:[#allocation28_spill] sm:$0xff] %v7777_v22  ;;  %v7783_v51 = vsub.f32 %v14937_v11, %v7291_v17  ;;  %v765_v35 = vmul.f32 %v7777_v22, %v7777_v22 }
 0x22b   : > { %v855_v37 = vadd.f32 %v854_v39, %v758_v7  ;;  %v762_v7 = vmul.f32 %v7759_v21, %v7759_v21  ;;  %14938 = vst [vmem:[#allocation29_spill] sm:$0xff] %v7783_v51  ;;  %v7789_v21 = vsub.f32 %v14939_v19, %v7291_v17 }
 0x22d   : > { %v856_v57 = vadd.f32 %v855_v37, %v759_v43  ;;  %v763_v43 = vmul.f32 %v7765_v5, %v7765_v5 }
 0x22f   : > { %v857_v61 = vadd.f32 %v856_v57, %v760_v23  ;;  %v764_v23 = vmul.f32 %v7771_v9, %v7771_v9  ;;  %v766_v9 = vmul.f32 %v7783_v51, %v7783_v51 }
 0x231   : > { %v858_v39 = vadd.f32 %v857_v61, %v761_v31  ;;  %v14940_v31 = vld [vmem:[#allocation46_spill] sm:$0xff] }
 0x232   : > { %v7793_v61 = vsub.f32 %v14940_v31, %v7291_v17  ;;  %v768_v31 = vmul.f32 %v7789_v21, %v7789_v21 }
 0x233   : > { %v859_v37 = vadd.f32 %v858_v39, %v762_v7  ;;  %v14942_v39 = vld [vmem:[#allocation47_spill] sm:$0xff] }
 0x234   : > { %14941 = vst [vmem:[#allocation30_spill] sm:$0xff] %v7793_v61  ;;  %v7799_v11 = vsub.f32 %v14942_v39, %v7291_v17  ;;  %v767_v5 = vmul.f32 %v7793_v61, %v7793_v61  ;;  %v865_v24 = vsel %vm538_vm0, %v768_v31, 0.0 }
 0x235   : > { %v860_v57 = vadd.f32 %v859_v37, %v763_v43  ;;  %v14943_v37 = vld [vmem:[#allocation48_spill] sm:$0xff] }
 0x236   : > { %v7805_v19 = vsub.f32 %v14943_v37, %v7291_v17  ;;  %v769_v39 = vmul.f32 %v7799_v11, %v7799_v11 }
 0x237   : > { %v861_v7 = vadd.f32 %v860_v57, %v764_v23  ;;  %v14944_v23 = vld [vmem:[#allocation49_spill] sm:$0xff] }
 0x238   : > { %v7813_v57 = vsub.f32 %v14944_v23, %v7291_v17  ;;  %v770_v37 = vmul.f32 %v7805_v19, %v7805_v19  ;;  %v867_v61 = vsel %vm538_vm0, %v769_v39, 0.0 }
 0x239   : > { %v862_v43 = vadd.f32 %v861_v7, %v765_v35  ;;  %v14945_v35 = vld [vmem:[#allocation50_spill] sm:$0xff] }
 0x23a   : > { %v7819_v7 = vsub.f32 %v14945_v35, %v7291_v17  ;;  %v771_v23 = vmul.f32 %v7813_v57, %v7813_v57  ;;  %v869_v31 = vsel %vm538_vm0, %v770_v37, 0.0 }
 0x23b   : > { %v863_v22 = vadd.f32 %v862_v43, %v766_v9  ;;  %v14947_v9 = vld [vmem:[#allocation51_spill] sm:$0xff] }
 0x23c   : > { %14946 = vst [vmem:[#allocation31_spill] sm:$0xff] %v7819_v7  ;;  %v7826_v43 = vsub.f32 %v14947_v9, %v7291_v17  ;;  %v772_v56 = vmul.f32 %v7819_v7, %v7819_v7  ;;  %v871_v39 = vsel %vm538_vm0, %v771_v23, 0.0 }
 0x23d   : > { %v864_v51 = vadd.f32 %v863_v22, %v767_v5  ;;  %v14949_v22 = vld [vmem:[#allocation52_spill] sm:$0xff] }
 0x23e   : > { %14948 = vst [vmem:[#allocation32_spill] sm:$0xff] %v7826_v43  ;;  %v7833_v35 = vsub.f32 %v14949_v22, %v7291_v17  ;;  %v773_v27 = vmul.f32 %v7826_v43, %v7826_v43  ;;  %v873_v37 = vsel %vm538_vm0, %v772_v56, 0.0 }
 0x23f   : > { %v866_v54 = vadd.f32 %v865_v24, %v864_v51  ;;  %v14951_v24 = vld [vmem:[#allocation53_spill] sm:$0xff] }
 0x240   : > { %14950 = vst [vmem:[#allocation33_spill] sm:$0xff] %v7833_v35  ;;  %v7840_v9 = vsub.f32 %v14951_v24, %v7291_v17  ;;  %v774_v7 = vmul.f32 %v7833_v35, %v7833_v35  ;;  %v875_v23 = vsel %vm538_vm0, %v773_v27, 0.0 }
 0x241   : > { %v868_v5 = vadd.f32 %v867_v61, %v866_v54  ;;  %v14953_v61 = vld [vmem:[#allocation54_spill] sm:$0xff] }
 0x242   : > { %14952 = vst [vmem:[#allocation34_spill] sm:$0xff] %v7840_v9  ;;  %v7847_v22 = vsub.f32 %v14953_v61, %v7291_v17  ;;  %v775_v43 = vmul.f32 %v7840_v9, %v7840_v9  ;;  %v877_v56 = vsel %vm538_vm0, %v774_v7, 0.0 }
 0x243   : > { %v870_v51 = vadd.f32 %v869_v31, %v868_v5  ;;  %v14955_v31 = vld [vmem:[#allocation55_spill] sm:$0xff] }
 0x244   : > { %14954 = vst [vmem:[#allocation35_spill] sm:$0xff] %v7847_v22  ;;  %v7854_v24 = vsub.f32 %v14955_v31, %v7291_v17  ;;  %v776_v35 = vmul.f32 %v7847_v22, %v7847_v22  ;;  %v879_v27 = vsel %vm538_vm0, %v775_v43, 0.0 }
 0x245   : > { %v872_v54 = vadd.f32 %v871_v39, %v870_v51  ;;  %v14957_v39 = vld [vmem:[#allocation56_spill] sm:$0xff] }
 0x246   : > { %14956 = vst [vmem:[#allocation36_spill] sm:$0xff] %v7854_v24  ;;  %v7861_v61 = vsub.f32 %v14957_v39, %v7291_v17  ;;  %v777_v9 = vmul.f32 %v7854_v24, %v7854_v24  ;;  %v881_v7 = vsel %vm538_vm0, %v776_v35, 0.0 }
 0x247   : > { %v874_v5 = vadd.f32 %v873_v37, %v872_v54  ;;  %v14959_v37 = vld [vmem:[#allocation57_spill] sm:$0xff] }
 0x248   : > { %14958 = vst [vmem:[#allocation37_spill] sm:$0xff] %v7861_v61  ;;  %v7868_v31 = vsub.f32 %v14959_v37, %v7291_v17  ;;  %v778_v22 = vmul.f32 %v7861_v61, %v7861_v61  ;;  %v883_v43 = vsel %vm538_vm0, %v777_v9, 0.0 }
 0x249   : > { %v876_v51 = vadd.f32 %v875_v23, %v874_v5  ;;  %v14961_v23 = vld [vmem:[#allocation58_spill] sm:$0xff] }
 0x24a   : > { %14960 = vst [vmem:[#allocation38_spill] sm:$0xff] %v7868_v31  ;;  %v7875_v39 = vsub.f32 %v14961_v23, %v7291_v17  ;;  %v779_v37 = vmul.f32 %v7868_v31, %v7868_v31  ;;  %v885_v23 = vsel %vm538_vm0, %v778_v22, 0.0 }
 0x24b   : > { %v878_v54 = vadd.f32 %v877_v56, %v876_v51  ;;  %v7882_v56 = vsub.f32 %v7281_v25, %v7291_v17 }
 0x24c   : > { %14962 = vst [vmem:[#allocation39_spill] sm:$0xff] %v7875_v39 }
 0x24d   : > { %v880_v5 = vadd.f32 %v879_v27, %v878_v54  ;;  %v780_v27 = vmul.f32 %v7875_v39, %v7875_v39  ;;  %v781_v35 = vmul.f32 %v7882_v56, %v7882_v56 }
 0x24f   : > { %v882_v51 = vadd.f32 %v881_v7, %v880_v5  ;;  %v887_v5 = vsel %vm538_vm0, %v779_v37, 0.0  ;;  %v889_v25 = vsel %vm538_vm0, %v780_v27, 0.0  ;;  %v891_v31 = vsel %vm538_vm0, %v781_v35, 0.0  ;;  %v1068_v37 = vld [vmem:[%s14564_s1 + $0x168] sm:$0xff]  ;;  %v1161_v27 = vld [vmem:[%s14564_s1 + $0x450] sm:$0xff]  ;;  %v1062_v35 = vld [vmem:[%s14564_s1 + $0x138] sm:$0xff] }
 0x250   : > { %1703 = vmatpush.msra.mxu0 %v1068_v37  ;;  %v1152_v37 = vld [vmem:[%s14564_s1 + $0x408] sm:$0xff] }
 0x251   : > { %v884_v54 = vadd.f32 %v883_v43, %v882_v51 }
 0x253   : > { %v886_v24 = vadd.f32 %v885_v23, %v884_v54  ;;  %v1209_v23 = vld [vmem:[%s14564_s1 + $0x5d0] sm:$0xff] }
 0x255   : > { %v888_v7 = vadd.f32 %v887_v5, %v886_v24  ;;  %v1116_v24 = vld [vmem:[%s14564_s1 + $0x2e8] sm:$0xff]  ;;  %v1110_v5 = vld [vmem:[%s14564_s1 + $0x2b8] sm:$0xff] }
 0x256   : > { %1741 = vmatpush.msra.mxu1 %v1116_v24  ;;  %v1200_v24 = vld [vmem:[%s14564_s1 + $0x588] sm:$0xff] }
 0x257   : > { %v890_v17 = vadd.f32 %v889_v25, %v888_v7  ;;  %v1158_v7 = vld [vmem:[%s14564_s1 + $0x438] sm:$0xff] }
 0x258   : > { %v1206_v25 = vld [vmem:[%s14564_s1 + $0x5b8] sm:$0xff] }
 0x259   : > { %v892_v61 = vadd.f32 %v891_v31, %v890_v17  ;;  %v1212_v31 = vld [vmem:[%s14564_s1 + $0x5e8] sm:$0xff]  ;;  %v1059_v17 = vld [vmem:[%s14564_s1 + $0x120] sm:$0xff] }
 0x25a   : > { %1817 = vmatpush.msra.mxu3 %v1212_v31  ;;  %v1101_v31 = vld [vmem:[%s14564_s1 + $0x270] sm:$0xff] }
 0x25b   : > { %893 = vadd.xlane.f32.xlu0 %v892_v61  ;;  %v1164_v61 = vld [vmem:[%s14564_s1 + $0x468] sm:$0xff] }
 0x25c   : > { %1779 = vmatpush.msra.mxu2 %v1164_v61  ;;  %1818 = vmatpush.msra.mxu3 %v1209_v23  ;;  %v1053_v61 = vld [vmem:[%s14564_s1 + $0xf0] sm:$0xff]  ;;  %v1098_v23 = vld [vmem:[%s14564_s1 + $0x258] sm:$0xff] }
 0x25e   : > { %1780 = vmatpush.msra.mxu2 %v1161_v27  ;;  %1819 = vmatpush.msra.mxu3 %v1206_v25  ;;  %v1050_v27 = vld [vmem:[%s14564_s1 + $0xd8] sm:$0xff]  ;;  %v1095_v25 = vld [vmem:[%s14564_s1 + $0x240] sm:$0xff] }
 0x260   : > { %1781 = vmatpush.msra.mxu2 %v1158_v7  ;;  %v1047_v7 = vld [vmem:[%s14564_s1 + $0xc0] sm:$0xff] }
 0x2ce   : > { %v894_v9 = vpop.xlane.xlu0 %893 }
 0x2cf   : > { %v895_v51 = vrot.slane %v894_v9, 4 }
 0x2d1   : > { %v896_v43 = vadd.f32 %v895_v51, %v894_v9  ;;  %v1107_v9 = vld [vmem:[%s14564_s1 + $0x2a0] sm:$0xff] }
 0x2d2   : > { %v1155_v51 = vld [vmem:[%s14564_s1 + $0x420] sm:$0xff] }
 0x2d3   : > { %v897_v39 = vrot.slane %v896_v43, 2  ;;  %1782 = vmatpush.msra.mxu2 %v1155_v51  ;;  %v1191_v51 = vld [vmem:[%s14564_s1 + $0x540] sm:$0xff] }
 0x2d5   : > { %v898_v60 = vadd.f32 %v897_v39, %v896_v43  ;;  %v1113_v39 = vld [vmem:[%s14564_s1 + $0x2d0] sm:$0xff]  ;;  %v1203_v43 = vld [vmem:[%s14564_s1 + $0x5a0] sm:$0xff]  ;;  %1783 = vmatpush.msra.mxu2 %v1152_v37  ;;  %v1188_v37 = vld [vmem:[%s14564_s1 + $0x528] sm:$0xff] }
 0x2d6   : > { %1742 = vmatpush.msra.mxu1 %v1113_v39  ;;  %1820 = vmatpush.msra.mxu3 %v1203_v43  ;;  %v1197_v39 = vld [vmem:[%s14564_s1 + $0x570] sm:$0xff]  ;;  %v1044_v43 = vld [vmem:[%s14564_s1 + $0xa8] sm:$0xff] }
 0x2d7   : > { %v899_v22 = vrot.slane %v898_v60, 1 }
 0x2d8   : > { %1743 = vmatpush.msra.mxu1 %v1110_v5  ;;  %1821 = vmatpush.msra.mxu3 %v1200_v24  ;;  %v1194_v5 = vld [vmem:[%s14564_s1 + $0x558] sm:$0xff]  ;;  %v1041_v24 = vld [vmem:[%s14564_s1 + $0x90] sm:$0xff] }
 0x2d9   : > { %v900_v54 = vadd.f32 %v899_v22, %v898_v60  ;;  %v1065_v60 = vld [vmem:[%s14564_s1 + $0x150] sm:$0xff]  ;;  %v1056_v22 = vld [vmem:[%s14564_s1 + $0x108] sm:$0xff] }
 0x2da   : > { %1704 = vmatpush.msra.mxu0 %v1065_v60  ;;  %1744 = vmatpush.msra.mxu1 %v1107_v9  ;;  %v1149_v60 = vld [vmem:[%s14564_s1 + $0x3f0] sm:$0xff]  ;;  %v1143_v9 = vld [vmem:[%s14564_s1 + $0x3c0] sm:$0xff] }
 0x2db   : > { %6589 = vpush %v900_v54  ;;  %v1104_v54 = vld [vmem:[%s14564_s1 + $0x288] sm:$0xff]  ;;  %1784 = vmatpush.msra.mxu2 %v1149_v60  ;;  %1822 = vmatpush.msra.mxu3 %v1197_v39  ;;  %v1185_v60 = vld [vmem:[%s14564_s1 + $0x510] sm:$0xff]  ;;  %v1038_v39 = vld [vmem:[%s14564_s1 + $0x78] sm:$0xff] }
 0x2dc   : > { %1705 = vmatpush.msra.mxu0 %v1062_v35  ;;  %1745 = vmatpush.msra.mxu1 %v1104_v54  ;;  %v1146_v35 = vld [vmem:[%s14564_s1 + $0x3d8] sm:$0xff]  ;;  %v1140_v54 = vld [vmem:[%s14564_s1 + $0x3a8] sm:$0xff] }
 0x2dd   : > { %1785 = vmatpush.msra.mxu2 %v1146_v35  ;;  %1823 = vmatpush.msra.mxu3 %v1194_v5  ;;  %v1182_v35 = vld [vmem:[%s14564_s1 + $0x4f8] sm:$0xff] }
 0x2de   : > { %1706 = vmatpush.msra.mxu0 %v1059_v17  ;;  %1746 = vmatpush.msra.mxu1 %v1101_v31  ;;  %v1137_v31 = vld [vmem:[%s14564_s1 + $0x390] sm:$0xff] }
 0x2df   : > { %1786 = vmatpush.msra.mxu2 %v1143_v9  ;;  %1824 = vmatpush.msra.mxu3 %v1191_v51  ;;  %v1131_v51 = vld [vmem:[%s14564_s1 + $0x360] sm:$0xff] }
 0x2e0   : > { %1707 = vmatpush.msra.mxu0 %v1056_v22  ;;  %1747 = vmatpush.msra.mxu1 %v1098_v23  ;;  %v1092_v22 = vld [vmem:[%s14564_s1 + $0x228] sm:$0xff]  ;;  %v1134_v23 = vld [vmem:[%s14564_s1 + $0x378] sm:$0xff] }
 0x2e1   : > { %1787 = vmatpush.msra.mxu2 %v1140_v54  ;;  %1825 = vmatpush.msra.mxu3 %v1188_v37  ;;  %v1080_v54 = vld [vmem:[%s14564_s1 + $0x1c8] sm:$0xff] }
 0x2e2   : > { %1708 = vmatpush.msra.mxu0 %v1053_v61  ;;  %1748 = vmatpush.msra.mxu1 %v1095_v25  ;;  %v1089_v61 = vld [vmem:[%s14564_s1 + $0x210] sm:$0xff]  ;;  %v1083_v25 = vld [vmem:[%s14564_s1 + $0x1e0] sm:$0xff] }
 0x2e3   : > { %1788 = vmatpush.msra.mxu2 %v1137_v31  ;;  %1826 = vmatpush.msra.mxu3 %v1185_v60  ;;  %v1029_v31 = vld [vmem:[%s14564_s1 + $0x30] sm:$0xff] }
 0x2e4   : > { %1709 = vmatpush.msra.mxu0 %v1050_v27  ;;  %1749 = vmatpush.msra.mxu1 %v1092_v22  ;;  %v1086_v27 = vld [vmem:[%s14564_s1 + $0x1f8] sm:$0xff]  ;;  %v1032_v22 = vld [vmem:[%s14564_s1 + $0x48] sm:$0xff]  ;;  %v1077_v60 = vld [vmem:[%s14564_s1 + $0x1b0] sm:$0xff] }
 0x2e5   : > { %1789 = vmatpush.msra.mxu2 %v1134_v23  ;;  %1827 = vmatpush.msra.mxu3 %v1182_v35  ;;  %v1173_v23 = vld [vmem:[%s14564_s1 + $0x4b0] sm:$0xff] }
 0x2e6   : > { %1710 = vmatpush.msra.mxu0 %v1047_v7  ;;  %1750 = vmatpush.msra.mxu1 %v1089_v61  ;;  %v1035_v7 = vld [vmem:[%s14564_s1 + $0x60] sm:$0xff]  ;;  %v1176_v61 = vld [vmem:[%s14564_s1 + $0x4c8] sm:$0xff] }
 0x2e7   : > { %1790 = vmatpush.msra.mxu2 %v1131_v51  ;;  %v1074_v51 = vld [vmem:[%s14564_s1 + $0x198] sm:$0xff] }
 0x2e8   : > { %1711 = vmatpush.msra.mxu0 %v1044_v43  ;;  %1751 = vmatpush.msra.mxu1 %v1086_v27  ;;  %v1179_v43 = vld [vmem:[%s14564_s1 + $0x4e0] sm:$0xff]  ;;  %v1125_v27 = vld [vmem:[%s14564_s1 + $0x330] sm:$0xff] }
 0x2e9   : > { %1828 = vmatpush.msra.mxu3 %v1179_v43  ;;  %v1122_v43 = vld [vmem:[%s14564_s1 + $0x318] sm:$0xff] }
 0x2ea   : > { %1712 = vmatpush.msra.mxu0 %v1041_v24  ;;  %1752 = vmatpush.msra.mxu1 %v1083_v25  ;;  %v1128_v24 = vld [vmem:[%s14564_s1 + $0x348] sm:$0xff] }
 0x2eb   : > { %1791 = vmatpush.msra.mxu2 %v1128_v24  ;;  %1829 = vmatpush.msra.mxu3 %v1176_v61  ;;  %v1260_v24 = vld [vmem:[%s14564_s1 + $0x768] sm:$0xff] }
 0x2ec   : > { %1713 = vmatpush.msra.mxu0 %v1038_v39  ;;  %1753 = vmatpush.msra.mxu1 %v1080_v54  ;;  %v1119_v54 = vld [vmem:[%s14564_s1 + $0x300] sm:$0xff]  ;;  %v1308_v61 = vld [vmem:[%s14564_s1 + $0x8e8] sm:$0xff] }
 0x2ed   : > { %1792 = vmatpush.msra.mxu2 %v1125_v27  ;;  %1830 = vmatpush.msra.mxu3 %v1173_v23  ;;  %v1302_v27 = vld [vmem:[%s14564_s1 + $0x8b8] sm:$0xff]  ;;  %v1251_v23 = vld [vmem:[%s14564_s1 + $0x720] sm:$0xff] }
 0x2ee   : > { %1714 = vmatpush.msra.mxu0 %v1035_v7  ;;  %1754 = vmatpush.msra.mxu1 %v1077_v60  ;;  %v1305_v60 = vld [vmem:[%s14564_s1 + $0x8d0] sm:$0xff] }
 0x2ef   : > { %1793 = vmatpush.msra.mxu2 %v1122_v43  ;;  %v1242_v43 = vld [vmem:[%s14564_s1 + $0x6d8] sm:$0xff] }
 0x2f0   : > { %1715 = vmatpush.msra.mxu0 %v1032_v22  ;;  %1755 = vmatpush.msra.mxu1 %v1074_v51  ;;  %v1071_v22 = vld [vmem:[%s14564_s1 + $0x180] sm:$0xff]  ;;  %v1293_v51 = vld [vmem:[%s14564_s1 + $0x870] sm:$0xff] }
 0x2f1   : > { %1794 = vmatpush.msra.mxu2 %v1119_v54  ;;  %v1404_v54 = vld [vmem:[%s14564_s1 + $0xbe8] sm:$0xff] }
 0x2f2   : > { %1716 = vmatpush.msra.mxu0 %v1029_v31  ;;  %1756 = vmatpush.msra.mxu1 %v1071_v22  ;;  %v1257_v31 = vld [vmem:[%s14564_s1 + $0x750] sm:$0xff]  ;;  %v1356_v22 = vld [vmem:[%s14564_s1 + $0xa68] sm:$0xff] }
 0x2f3   : > { %1931 = vmatpush.msrb.mxu2 %v1356_v22  ;;  %v1389_v22 = vld [vmem:[%s14564_s1 + $0xb70] sm:$0xff] }
 0x2f4   : > { %1893 = vmatpush.msrb.mxu1 %v1308_v61  ;;  %v1401_v61 = vld [vmem:[%s14564_s1 + $0xbd0] sm:$0xff] }
 0x2f6   : > { %1894 = vmatpush.msrb.mxu1 %v1305_v60  ;;  %v1350_v60 = vld [vmem:[%s14564_s1 + $0xa38] sm:$0xff] }
 0x2f8   : > { %1895 = vmatpush.msrb.mxu1 %v1302_v27  ;;  %v1284_v27 = vld [vmem:[%s14564_s1 + $0x828] sm:$0xff] }
 0x30c   : > { %s6590_s20 = spop %6589 }
 0x30d   : > { %s910_s28 = smul.f32 %s6590_s20, %s7288_s12 }
 0x30f   : > { %s911_s12 = sadd.f32 1e-05, %s910_s28 }
 0x311   : > { %v7986_v17 = vstv %s911_s12 }
 0x312   : > { %6660 = vrsqrt.f32 %v7986_v17  ;;  %vm919_vm3 = vweird.f32 %v7986_v17 }
 0x318   : > { %v6661_v5 = vpop.eup %6660 }
 0x319   : > { %v914_v9 = vmul.f32 %v6661_v5, %v7986_v17  ;;  %vm920_vm2 = vweird.f32 %v6661_v5  ;;  %v1170_v17 = vld [vmem:[%s14564_s1 + $0x498] sm:$0xff] }
 0x31a   : > { %vm921_vm4 = vmor %vm919_vm3, %vm920_vm2  ;;  %1831 = vmatpush.msra.mxu3 %v1170_v17  ;;  %v1290_v17 = vld [vmem:[%s14564_s1 + $0x858] sm:$0xff] }
 0x31b   : > { %v915_v37 = vmul.f32 %v6661_v5, %v914_v9  ;;  %v1026_v9 = vld [vmem:[%s14564_s1 + $0x18] sm:$0xff] }
 0x31c   : > { %1717 = vmatpush.msra.mxu0 %v1026_v9  ;;  %v1245_v9 = vld [vmem:[%s14564_s1 + $0x6f0] sm:$0xff] }
 0x31d   : > { %v916_v39 = vmul.f32 0.5, %v915_v37  ;;  %v1167_v37 = vld [vmem:[%s14564_s1 + $0x480] sm:$0xff] }
 0x31e   : > { %1832 = vmatpush.msra.mxu3 %v1167_v37  ;;  %v1287_v37 = vld [vmem:[%s14564_s1 + $0x840] sm:$0xff] }
 0x31f   : > { %v917_v35 = vsub.f32 1.5, %v916_v39  ;;  %v1254_v39 = vld [vmem:[%s14564_s1 + $0x738] sm:$0xff] }
 0x320   : > { %1969 = vmatpush.msrb.mxu3 %v1404_v54  ;;  %v1278_v54 = vld [vmem:[%s14564_s1 + $0x7f8] sm:$0xff] }
 0x321   : > { %v918_v7 = vmul.f32 %v6661_v5, %v917_v35  ;;  %v1299_v35 = vld [vmem:[%s14564_s1 + $0x8a0] sm:$0xff] }
 0x322   : > { %1896 = vmatpush.msrb.mxu1 %v1299_v35  ;;  %1970 = vmatpush.msrb.mxu3 %v1401_v61 }
 0x323   : > { %v922_v25 = vsel %vm921_vm4, %v6661_v5, %v918_v7  ;;  %v1023_v5 = vld [vmem:[%s14564_s1] sm:$0xff]  ;;  %v1248_v7 = vld [vmem:[%s14564_s1 + $0x708] sm:$0xff] }
 0x324   : > { %6591 = vpush %v922_v25  ;;  %1718 = vmatpush.msra.mxu0 %v1023_v5  ;;  %v1296_v25 = vld [vmem:[%s14564_s1 + $0x888] sm:$0xff]  ;;  %v1239_v5 = vld [vmem:[%s14564_s1 + $0x6c0] sm:$0xff] }
 0x325   : > { %1897 = vmatpush.msrb.mxu1 %v1296_v25 }
 0x326   : > { %1855 = vmatpush.msrb.mxu0 %v1260_v24  ;;  %v1353_v24 = vld [vmem:[%s14564_s1 + $0xa50] sm:$0xff] }
 0x327   : > { %1898 = vmatpush.msrb.mxu1 %v1293_v51  ;;  %1932 = vmatpush.msrb.mxu2 %v1353_v24  ;;  %v1347_v51 = vld [vmem:[%s14564_s1 + $0xa20] sm:$0xff] }
 0x328   : > { %1856 = vmatpush.msrb.mxu0 %v1257_v31  ;;  %v1236_v31 = vld [vmem:[%s14564_s1 + $0x6a8] sm:$0xff] }
 0x329   : > { %1899 = vmatpush.msrb.mxu1 %v1290_v17  ;;  %1933 = vmatpush.msrb.mxu2 %v1350_v60  ;;  %v1230_v17 = vld [vmem:[%s14564_s1 + $0x678] sm:$0xff] }
 0x32a   : > { %1857 = vmatpush.msrb.mxu0 %v1254_v39  ;;  %v1398_v39 = vld [vmem:[%s14564_s1 + $0xbb8] sm:$0xff] }
 0x32b   : > { %1900 = vmatpush.msrb.mxu1 %v1287_v37  ;;  %1971 = vmatpush.msrb.mxu3 %v1398_v39  ;;  %v1227_v37 = vld [vmem:[%s14564_s1 + $0x660] sm:$0xff]  ;;  %v1338_v39 = vld [vmem:[%s14564_s1 + $0x9d8] sm:$0xff] }
 0x32c   : > { %1858 = vmatpush.msrb.mxu0 %v1251_v23  ;;  %1934 = vmatpush.msrb.mxu2 %v1347_v51  ;;  %v1332_v51 = vld [vmem:[%s14564_s1 + $0x9a8] sm:$0xff] }
 0x32d   : > { %1901 = vmatpush.msrb.mxu1 %v1284_v27  ;;  %v1224_v27 = vld [vmem:[%s14564_s1 + $0x648] sm:$0xff] }
 0x32e   : > { %1859 = vmatpush.msrb.mxu0 %v1248_v7 }
 0x330   : > { %1860 = vmatpush.msrb.mxu0 %v1245_v9 }
 0x332   : > { %1861 = vmatpush.msrb.mxu0 %v1242_v43  ;;  %v1281_v43 = vld [vmem:[%s14564_s1 + $0x810] sm:$0xff] }
 0x333   : > { %1902 = vmatpush.msrb.mxu1 %v1281_v43 }
 0x334   : > { %1862 = vmatpush.msrb.mxu0 %v1239_v5  ;;  %v1341_v5 = vld [vmem:[%s14564_s1 + $0x9f0] sm:$0xff] }
 0x335   : > { %1903 = vmatpush.msrb.mxu1 %v1278_v54  ;;  %v1218_v54 = vld [vmem:[%s14564_s1 + $0x618] sm:$0xff] }
 0x336   : > { %1863 = vmatpush.msrb.mxu0 %v1236_v31 }
 0x355   : > { %s6592_s27 = spop %6591 }
 0x356   : > { %v8165_v23 = vstv %s6592_s27 }
 0x357   : > { %v8169_v35 = vmul.f32 %v8165_v23, %v7295_v59  ;;  %v8173_v7 = vmul.f32 %v8165_v23, %v7299_v55  ;;  %v8177_v25 = vmul.f32 %v8165_v23, %v7303_v47  ;;  %v8181_v9 = vmul.f32 %v8165_v23, %v7311_v41  ;;  %v1395_v59 = vld [vmem:[%s14564_s1 + $0xba0] sm:$0xff]  ;;  %v1233_v55 = vld [vmem:[%s14564_s1 + $0x690] sm:$0xff]  ;;  %v1344_v47 = vld [vmem:[%s14564_s1 + $0xa08] sm:$0xff] }
 0x358   : > { %v1392_v41 = vld [vmem:[%s14564_s1 + $0xb88] sm:$0xff]  ;;  %1972 = vmatpush.msrb.mxu3 %v1395_v59  ;;  %1864 = vmatpush.msrb.mxu0 %v1233_v55  ;;  %v8222_v24 = vmul.f32 %v8165_v23, %v7375_v6  ;;  %v8226_v61 = vmul.f32 %v8165_v23, %v7381_v8  ;;  %v8230_v31 = vmul.f32 %v8165_v23, %v7387_v10  ;;  %v1386_v6 = vld [vmem:[%s14564_s1 + $0xb58] sm:$0xff]  ;;  %v1335_v8 = vld [vmem:[%s14564_s1 + $0x9c0] sm:$0xff] }
 0x359   : > { %14963 = vst [vmem:[#allocation40_spill] sm:$0xff] %v8169_v35  ;;  %1719 = vmatmul.f32.vlgmr.msra.gmra.mxu0 %v8169_v35  ;;  %1757 = vmatmul.f32.vlgmr.msra.gmra.mxu1 %v8173_v7  ;;  %v8234_v60 = vmul.f32 %v8165_v23, %v7393_v12  ;;  %v1383_v10 = vld [vmem:[%s14564_s1 + $0xb40] sm:$0xff]  ;;  %v1380_v59 = vld [vmem:[%s14564_s1 + $0xb28] sm:$0xff]  ;;  %v8276_v43 = vmul.f32 %v8165_v23, %v7465_v36  ;;  %v1326_v36 = vld [vmem:[%s14564_s1 + $0x978] sm:$0xff] }
 0x35a   : > { %14964 = vst [vmem:[#allocation41_spill] sm:$0xff] %v8173_v7  ;;  %1795 = vmatmul.f32.vlgmr.msra.gmra.mxu2 %v8177_v25  ;;  %1833 = vmatmul.f32.vlgmr.msra.gmra.mxu3 %v8181_v9  ;;  %v1275_v12 = vld [vmem:[%s14564_s1 + $0x7e0] sm:$0xff]  ;;  %v1272_v55 = vld [vmem:[%s14564_s1 + $0x7c8] sm:$0xff] }
 0x35b   : > { %1935 = vmatpush.msrb.mxu2 %v1344_v47  ;;  %1973 = vmatpush.msrb.mxu3 %v1392_v41  ;;  %14965 = vst [vmem:[#allocation42_spill] sm:$0xff] %v8222_v24  ;;  %v1221_v47 = vld [vmem:[%s14564_s1 + $0x630] sm:$0xff]  ;;  %v8272_v41 = vmul.f32 %v8165_v23, %v7459_v34 }
 0x35c   : > { %1865 = vmatpush.msrb.mxu0 %v1230_v17  ;;  %14966 = vst [vmem:[#allocation43_spill] sm:$0xff] %v8226_v61  ;;  %1904 = vmatpush.msrb.mxu1 %v1275_v12  ;;  %v8280_v17 = vmul.f32 %v8165_v23, %v7471_v38  ;;  %v1377_v34 = vld [vmem:[%s14564_s1 + $0xb10] sm:$0xff]  ;;  %v1374_v38 = vld [vmem:[%s14564_s1 + $0xaf8] sm:$0xff]  ;;  %v8325_v12 = vmul.f32 %v8165_v23, %v7543_v62  ;;  %v1368_v62 = vld [vmem:[%s14564_s1 + $0xac8] sm:$0xff] }
 0x35d   : > { %1936 = vmatpush.msrb.mxu2 %v1341_v5  ;;  %1974 = vmatpush.msrb.mxu3 %v1389_v22  ;;  %14967 = vst [vmem:[#allocation44_spill] sm:$0xff] %v8272_v41  ;;  %v8284_v5 = vmul.f32 %v8165_v23, %v7477_v40  ;;  %v1329_v22 = vld [vmem:[%s14564_s1 + $0x990] sm:$0xff] }
 0x35e   : > { %1866 = vmatpush.msrb.mxu0 %v1227_v37  ;;  %1905 = vmatpush.msrb.mxu1 %v1272_v55  ;;  %14968 = vst [vmem:[#allocation45_spill] sm:$0xff] %v8276_v43  ;;  %v1269_v40 = vld [vmem:[%s14564_s1 + $0x7b0] sm:$0xff]  ;;  %v1266_v37 = vld [vmem:[%s14564_s1 + $0x798] sm:$0xff]  ;;  %v1320_v55 = vld [vmem:[%s14564_s1 + $0x948] sm:$0xff] }
 0x35f   : > { %1937 = vmatpush.msrb.mxu2 %v1338_v39  ;;  %1975 = vmatpush.msrb.mxu3 %v1386_v6  ;;  %v1323_v39 = vld [vmem:[%s14564_s1 + $0x960] sm:$0xff]  ;;  %14969 = vst [vmem:[#allocation46_spill] sm:$0xff] %v8325_v12 }
 0x360   : > { %1867 = vmatpush.msrb.mxu0 %v1224_v27  ;;  %v1371_v6 = vld [vmem:[%s14564_s1 + $0xae0] sm:$0xff]  ;;  %1906 = vmatpush.msrb.mxu1 %v1269_v40  ;;  %v8329_v27 = vmul.f32 %v8165_v23, %v7549_v3  ;;  %v1317_v3 = vld [vmem:[%s14564_s1 + $0x930] sm:$0xff]  ;;  %v1446_v40 = vld [vmem:[%s14564_s1 + $0xd38] sm:$0xff] }
 0x361   : > { %1722 = vmatmul.f32.gmra.mxu0 %v8222_v24  ;;  %1760 = vmatmul.f32.gmra.mxu1 %v8226_v61 }
 0x362   : > { %1798 = vmatmul.f32.gmra.mxu2 %v8230_v31  ;;  %1836 = vmatmul.f32.gmra.mxu3 %v8234_v60  ;;  %14970 = vst [vmem:[#allocation47_spill] sm:$0xff] %v8329_v27 }
 0x363   : > { %1938 = vmatpush.msrb.mxu2 %v1335_v8  ;;  %1976 = vmatpush.msrb.mxu3 %v1383_v10  ;;  %v1215_v8 = vld [vmem:[%s14564_s1 + $0x600] sm:$0xff] }
 0x364   : > { %1868 = vmatpush.msrb.mxu0 %v1221_v47  ;;  %v1263_v10 = vld [vmem:[%s14564_s1 + $0x780] sm:$0xff]  ;;  %1907 = vmatpush.msrb.mxu1 %v1266_v37  ;;  %v1500_v47 = vld [vmem:[%s14564_s1 + $0xee8] sm:$0xff]  ;;  %v8382_v37 = vmul.f32 %v8165_v23, %v7633_v58 }
 0x365   : > { %1939 = vmatpush.msrb.mxu2 %v1332_v51  ;;  %1977 = vmatpush.msrb.mxu3 %v1380_v59  ;;  %v8333_v51 = vmul.f32 %v8165_v23, %v7555_v29  ;;  %v8337_v59 = vmul.f32 %v8165_v23, %v7561_v15  ;;  %v1365_v29 = vld [vmem:[%s14564_s1 + $0xab0] sm:$0xff]  ;;  %v1452_v15 = vld [vmem:[%s14564_s1 + $0xd68] sm:$0xff]  ;;  %v1491_v58 = vld [vmem:[%s14564_s1 + $0xea0] sm:$0xff] }
 0x366   : > { %1869 = vmatpush.msrb.mxu0 %v1218_v54  ;;  %1908 = vmatpush.msrb.mxu1 %v1263_v10  ;;  %v8378_v54 = vmul.f32 %v8165_v23, %v7627_v1  ;;  %14972 = vst [vmem:[#allocation49_spill] sm:$0xff] %v8382_v37  ;;  %v1359_v1 = vld [vmem:[%s14564_s1 + $0xa80] sm:$0xff]  ;;  %v1440_v10 = vld [vmem:[%s14564_s1 + $0xd08] sm:$0xff] }
 0x367   : > { %1940 = vmatpush.msrb.mxu2 %v1329_v22  ;;  %1978 = vmatpush.msrb.mxu3 %v1377_v34  ;;  %v1449_v22 = vld [vmem:[%s14564_s1 + $0xd50] sm:$0xff] }
 0x368   : > { %1870 = vmatpush.msrb.mxu0 %v1215_v8  ;;  %v1497_v34 = vld [vmem:[%s14564_s1 + $0xed0] sm:$0xff]  ;;  %2045 = vmatpush.msra.mxu1 %v1500_v47  ;;  %14971 = vst [vmem:[#allocation48_spill] sm:$0xff] %v8378_v54  ;;  %v1311_v8 = vld [vmem:[%s14564_s1 + $0x900] sm:$0xff]  ;;  %v8451_v47 = vmul.f32 %v8165_v23, %v7789_v21 }
 0x369   : > { %1725 = vmatmul.f32.gmra.mxu0 %v8272_v41  ;;  %1763 = vmatmul.f32.gmra.mxu1 %v8276_v43  ;;  %v1431_v21 = vld [vmem:[%s14564_s1 + $0xcc0] sm:$0xff] }
 0x36a   : > { %1801 = vmatmul.f32.gmra.mxu2 %v8280_v17  ;;  %1839 = vmatmul.f32.gmra.mxu3 %v8284_v5 }
 0x36b   : > { %1941 = vmatpush.msrb.mxu2 %v1326_v36  ;;  %1979 = vmatpush.msrb.mxu3 %v1374_v38  ;;  %v1314_v36 = vld [vmem:[%s14564_s1 + $0x918] sm:$0xff] }
 0x36c   : > { %v1362_v38 = vld [vmem:[%s14564_s1 + $0xa98] sm:$0xff]  ;;  %2007 = vmatpush.msra.mxu0 %v1452_v15  ;;  %2046 = vmatpush.msra.mxu1 %v1497_v34  ;;  %v8459_v34 = vmul.f32 %v8165_v23, %v7805_v19  ;;  %v1596_v19 = vld [vmem:[%s14564_s1 + $0x11e8] sm:$0xff] }
 0x36d   : > { %1942 = vmatpush.msrb.mxu2 %v1323_v39  ;;  %1980 = vmatpush.msrb.mxu3 %v1371_v6  ;;  %v8386_v39 = vmul.f32 %v8165_v23, %v7639_v32  ;;  %v8390_v6 = vmul.f32 %v8165_v23, %v7645_v30  ;;  %v1494_v30 = vld [vmem:[%s14564_s1 + $0xeb8] sm:$0xff]  ;;  %v1443_v32 = vld [vmem:[%s14564_s1 + $0xd20] sm:$0xff] }
 0x36e   : > { %2008 = vmatpush.msra.mxu0 %v1449_v22  ;;  %2047 = vmatpush.msra.mxu1 %v1494_v30  ;;  %v1482_v15 = vld [vmem:[%s14564_s1 + $0xe58] sm:$0xff]  ;;  %v8455_v22 = vmul.f32 %v8165_v23, %v7799_v11  ;;  %v1548_v11 = vld [vmem:[%s14564_s1 + $0x1068] sm:$0xff] }
 0x36f   : > { %1943 = vmatpush.msrb.mxu2 %v1320_v55  ;;  %1981 = vmatpush.msrb.mxu3 %v1368_v62  ;;  %v8416_v55 = vmul.f32 %v8165_v23, %v7711_v52  ;;  %v8420_v62 = vmul.f32 %v8165_v23, %v7717_v50  ;;  %v1488_v50 = vld [vmem:[%s14564_s1 + $0xe88] sm:$0xff]  ;;  %v1434_v52 = vld [vmem:[%s14564_s1 + $0xcd8] sm:$0xff] }
 0x370   : > { %2009 = vmatpush.msra.mxu0 %v1446_v40  ;;  %2048 = vmatpush.msra.mxu1 %v1491_v58  ;;  %v1593_v40 = vld [vmem:[%s14564_s1 + $0x11d0] sm:$0xff]  ;;  %v1590_v30 = vld [vmem:[%s14564_s1 + $0x11b8] sm:$0xff]  ;;  %v8501_v58 = vmul.f32 %v8165_v23, %v7315_v0  ;;  %v1587_v0 = vld [vmem:[%s14564_s1 + $0x11a0] sm:$0xff] }
 0x371   : > { %1728 = vmatmul.f32.gmra.mxu0 %v8325_v12  ;;  %1766 = vmatmul.f32.gmra.mxu1 %v8329_v27 }
 0x372   : > { %1804 = vmatmul.f32.gmra.mxu2 %v8333_v51  ;;  %1842 = vmatmul.f32.gmra.mxu3 %v8337_v59 }
 0x373   : > { %1944 = vmatpush.msrb.mxu2 %v1317_v3  ;;  %1982 = vmatpush.msrb.mxu3 %v1365_v29  ;;  %v8424_v3 = vmul.f32 %v8165_v23, %v7723_v28  ;;  %v8428_v29 = vmul.f32 %v8165_v23, %v7729_v26  ;;  %v1437_v28 = vld [vmem:[%s14564_s1 + $0xcf0] sm:$0xff] }
 0x374   : > { %2010 = vmatpush.msra.mxu0 %v1443_v32  ;;  %v1485_v26 = vld [vmem:[%s14564_s1 + $0xe70] sm:$0xff]  ;;  %2049 = vmatpush.msra.mxu1 %v1488_v50  ;;  %v1476_v32 = vld [vmem:[%s14564_s1 + $0xe28] sm:$0xff]  ;;  %v8509_v50 = vmul.f32 %v8165_v23, %v7327_v4 }
 0x375   : > { %1945 = vmatpush.msrb.mxu2 %v1314_v36  ;;  %1983 = vmatpush.msrb.mxu3 %v1362_v38  ;;  %v8463_v36 = vmul.f32 %v8165_v23, %v7813_v57  ;;  %v1479_v57 = vld [vmem:[%s14564_s1 + $0xe40] sm:$0xff]  ;;  %v1545_v38 = vld [vmem:[%s14564_s1 + $0x1050] sm:$0xff]  ;;  %v1536_v4 = vld [vmem:[%s14564_s1 + $0x1008] sm:$0xff] }
 0x376   : > { %2011 = vmatpush.msra.mxu0 %v1440_v10  ;;  %2050 = vmatpush.msra.mxu1 %v1485_v26  ;;  %v8505_v10 = vmul.f32 %v8165_v23, %v7321_v2  ;;  %14974 = vst [vmem:[#allocation51_spill] sm:$0xff] %v8509_v50  ;;  %v1539_v26 = vld [vmem:[%s14564_s1 + $0x1020] sm:$0xff]  ;;  %v1425_v2 = vld [vmem:[%s14564_s1 + $0xc90] sm:$0xff] }
 0x377   : > { %1946 = vmatpush.msrb.mxu2 %v1311_v8  ;;  %1984 = vmatpush.msrb.mxu3 %v1359_v1  ;;  %14973 = vst [vmem:[#allocation50_spill] sm:$0xff] %v8463_v36  ;;  %v1428_v8 = vld [vmem:[%s14564_s1 + $0xca8] sm:$0xff]  ;;  %v1542_v1 = vld [vmem:[%s14564_s1 + $0x1038] sm:$0xff] }
 0x378   : > { %2012 = vmatpush.msra.mxu0 %v1437_v28  ;;  %2051 = vmatpush.msra.mxu1 %v1482_v15  ;;  %v8513_v28 = vmul.f32 %v8165_v23, %v7333_v33  ;;  %v1584_v33 = vld [vmem:[%s14564_s1 + $0x1188] sm:$0xff]  ;;  %v1422_v15 = vld [vmem:[%s14564_s1 + $0xc78] sm:$0xff] }
 0x379   : > { %1731 = vmatmul.f32.gmra.mxu0 %v8378_v54  ;;  %1769 = vmatmul.f32.gmra.mxu1 %v8382_v37 }
 0x37a   : > { %1807 = vmatmul.f32.gmra.mxu2 %v8386_v39  ;;  %1845 = vmatmul.f32.gmra.mxu3 %v8390_v6  ;;  %14975 = vst [vmem:[#allocation52_spill] sm:$0xff] %v8513_v28 }
 0x37b   : > { %2013 = vmatpush.msra.mxu0 %v1434_v52  ;;  %2083 = vmatpush.msra.mxu2 %v1548_v11  ;;  %v1473_v52 = vld [vmem:[%s14564_s1 + $0xe10] sm:$0xff] }
 0x37c   : > { %2121 = vmatpush.msra.mxu3 %v1596_v19  ;;  %2052 = vmatpush.msra.mxu1 %v1479_v57  ;;  %v1581_v11 = vld [vmem:[%s14564_s1 + $0x1170] sm:$0xff]  ;;  %v1470_v19 = vld [vmem:[%s14564_s1 + $0xdf8] sm:$0xff]  ;;  %v1419_v57 = vld [vmem:[%s14564_s1 + $0xc60] sm:$0xff] }
 0x37d   : > { %2014 = vmatpush.msra.mxu0 %v1431_v21  ;;  %2084 = vmatpush.msra.mxu2 %v1545_v38  ;;  %v1533_v21 = vld [vmem:[%s14564_s1 + $0xff0] sm:$0xff]  ;;  %v8554_v38 = vmul.f32 %v8165_v23, %v7399_v14  ;;  %v1578_v14 = vld [vmem:[%s14564_s1 + $0x1158] sm:$0xff] }
 0x37e   : > { %2122 = vmatpush.msra.mxu3 %v1593_v40  ;;  %2053 = vmatpush.msra.mxu1 %v1476_v32  ;;  %v8558_v40 = vmul.f32 %v8165_v23, %v7405_v16  ;;  %v1527_v16 = vld [vmem:[%s14564_s1 + $0xfc0] sm:$0xff]  ;;  %v1416_v32 = vld [vmem:[%s14564_s1 + $0xc48] sm:$0xff] }
 0x37f   : > { %2015 = vmatpush.msra.mxu0 %v1428_v8  ;;  %2085 = vmatpush.msra.mxu2 %v1542_v1  ;;  %v8562_v8 = vmul.f32 %v8165_v23, %v7411_v18  ;;  %v8566_v1 = vmul.f32 %v8165_v23, %v7417_v20  ;;  %v1575_v18 = vld [vmem:[%s14564_s1 + $0x1140] sm:$0xff] }
 0x380   : > { %2123 = vmatpush.msra.mxu3 %v1590_v30  ;;  %2054 = vmatpush.msra.mxu1 %v1473_v52  ;;  %v1530_v30 = vld [vmem:[%s14564_s1 + $0xfd8] sm:$0xff]  ;;  %v1467_v20 = vld [vmem:[%s14564_s1 + $0xde0] sm:$0xff]  ;;  %v8608_v52 = vmul.f32 %v8165_v23, %v7489_v44 }
 0x381   : > { %1734 = vmatmul.f32.gmra.mxu0 %v8416_v55  ;;  %1772 = vmatmul.f32.gmra.mxu1 %v8420_v62  ;;  %14976 = vst [vmem:[#allocation53_spill] sm:$0xff] %v8562_v8  ;;  %v1518_v44 = vld [vmem:[%s14564_s1 + $0xf78] sm:$0xff] }
 0x382   : > { %1810 = vmatmul.f32.gmra.mxu2 %v8424_v3  ;;  %1848 = vmatmul.f32.gmra.mxu3 %v8428_v29  ;;  %14977 = vst [vmem:[#allocation54_spill] sm:$0xff] %v8566_v1 }
 0x383   : > { %2086 = vmatpush.msra.mxu2 %v1539_v26  ;;  %2124 = vmatpush.msra.mxu3 %v1587_v0  ;;  %v1524_v26 = vld [vmem:[%s14564_s1 + $0xfa8] sm:$0xff] }
 0x384   : > { %2016 = vmatpush.msra.mxu0 %v1425_v2  ;;  %2055 = vmatpush.msra.mxu1 %v1470_v19  ;;  %v1572_v0 = vld [vmem:[%s14564_s1 + $0x1128] sm:$0xff]  ;;  %v1410_v19 = vld [vmem:[%s14564_s1 + $0xc18] sm:$0xff] }
 0x385   : > { %2087 = vmatpush.msra.mxu2 %v1536_v4  ;;  %2125 = vmatpush.msra.mxu3 %v1584_v33  ;;  %v1464_v2 = vld [vmem:[%s14564_s1 + $0xdc8] sm:$0xff]  ;;  %v1413_v4 = vld [vmem:[%s14564_s1 + $0xc30] sm:$0xff]  ;;  %v8604_v33 = vmul.f32 %v8165_v23, %v7483_v42 }
 0x386   : > { %2017 = vmatpush.msra.mxu0 %v1422_v15  ;;  %2056 = vmatpush.msra.mxu1 %v1467_v20  ;;  %v8612_v15 = vmul.f32 %v8165_v23, %v7495_v46  ;;  %v1569_v42 = vld [vmem:[%s14564_s1 + $0x1110] sm:$0xff]  ;;  %v1566_v46 = vld [vmem:[%s14564_s1 + $0x10f8] sm:$0xff]  ;;  %v8657_v20 = vmul.f32 %v8165_v23, %v7567_v45  ;;  %v1560_v45 = vld [vmem:[%s14564_s1 + $0x10c8] sm:$0xff] }
 0x387   : > { %2088 = vmatpush.msra.mxu2 %v1533_v21  ;;  %2126 = vmatpush.msra.mxu3 %v1581_v11  ;;  %v8616_v21 = vmul.f32 %v8165_v23, %v7501_v48  ;;  %v1521_v11 = vld [vmem:[%s14564_s1 + $0xf90] sm:$0xff] }
 0x388   : > { %2018 = vmatpush.msra.mxu0 %v1419_v57  ;;  %2057 = vmatpush.msra.mxu1 %v1464_v2  ;;  %14978 = vst [vmem:[#allocation55_spill] sm:$0xff] %v8612_v15  ;;  %v1461_v48 = vld [vmem:[%s14564_s1 + $0xdb0] sm:$0xff]  ;;  %v1458_v57 = vld [vmem:[%s14564_s1 + $0xd98] sm:$0xff]  ;;  %v1512_v2 = vld [vmem:[%s14564_s1 + $0xf48] sm:$0xff] }
 0x389   : > { %1737 = vmatmul.f32.gmra.mxu0 %v8451_v47  ;;  %1775 = vmatmul.f32.gmra.mxu1 %v8455_v22  ;;  %14979 = vst [vmem:[#allocation56_spill] sm:$0xff] %v8616_v21 }
 0x38a   : > { %1813 = vmatmul.f32.gmra.mxu2 %v8459_v34  ;;  %1851 = vmatmul.f32.gmra.mxu3 %v8463_v36  ;;  %14980 = vst [vmem:[#allocation57_spill] sm:$0xff] %v8657_v20 }
 0x38b   : > { %2089 = vmatpush.msra.mxu2 %v1530_v30  ;;  %2127 = vmatpush.msra.mxu3 %v1578_v14  ;;  %v1515_v30 = vld [vmem:[%s14564_s1 + $0xf60] sm:$0xff] }
 0x38c   : > { %2019 = vmatpush.msra.mxu0 %v1416_v32  ;;  %v1563_v14 = vld [vmem:[%s14564_s1 + $0x10e0] sm:$0xff]  ;;  %2058 = vmatpush.msra.mxu1 %v1461_v48  ;;  %v8661_v32 = vmul.f32 %v8165_v23, %v7573_v53  ;;  %v1509_v53 = vld [vmem:[%s14564_s1 + $0xf30] sm:$0xff]  ;;  %v1638_v48 = vld [vmem:[%s14564_s1 + $0x1338] sm:$0xff] }
 0x38d   : > { %2090 = vmatpush.msra.mxu2 %v1527_v16  ;;  %2128 = vmatpush.msra.mxu3 %v1575_v18  ;;  %v1407_v16 = vld [vmem:[%s14564_s1 + $0xc00] sm:$0xff] }
 0x38e   : > { %2020 = vmatpush.msra.mxu0 %v1413_v4  ;;  %v1455_v18 = vld [vmem:[%s14564_s1 + $0xd80] sm:$0xff]  ;;  %2059 = vmatpush.msra.mxu1 %v1458_v57  ;;  %14981 = vst [vmem:[#allocation58_spill] sm:$0xff] %v8661_v32  ;;  %v1692_v4 = vld [vmem:[%s14564_s1 + $0x14e8] sm:$0xff] }
 0x38f   : > { %2091 = vmatpush.msra.mxu2 %v1524_v26  ;;  %2129 = vmatpush.msra.mxu3 %v1572_v0  ;;  %v8665_v26 = vmul.f32 %v8165_v23, %v7579_v63  ;;  %v8669_v0 = vmul.f32 %v8165_v23, %v7585_v13  ;;  %v1557_v63 = vld [vmem:[%s14564_s1 + $0x10b0] sm:$0xff]  ;;  %v1644_v13 = vld [vmem:[%s14564_s1 + $0x1368] sm:$0xff] }
 0x390   : > { %2021 = vmatpush.msra.mxu0 %v1410_v19  ;;  %2060 = vmatpush.msra.mxu1 %v1455_v18  ;;  %v8710_v19 = vmul.f32 %v8165_v23, %v7651_v49  ;;  %v14985_v57 = vld [vmem:[#allocation12_spill] sm:$0xff]  ;;  %v14989_v18 = vld [vmem:[#allocation14_spill] sm:$0xff] }
 0x391   : > { %1871 = vmatmul.f32.vlgmr.msrb.gmra.mxu0 %v8501_v58  ;;  %1909 = vmatmul.f32.vlgmr.msrb.gmra.mxu1 %v8505_v10  ;;  %14982 = vst [vmem:[#allocation77_spill] sm:$0xff] %v8665_v26  ;;  %v1551_v49 = vld [vmem:[%s14564_s1 + $0x1080] sm:$0xff] }
 0x392   : > { %1947 = vmatmul.f32.vlgmr.msrb.gmra.mxu2 %v8509_v50  ;;  %1985 = vmatmul.f32.vlgmr.msrb.gmra.mxu3 %v8513_v28  ;;  %14983 = vst [vmem:[#allocation78_spill] sm:$0xff] %v8669_v0  ;;  %v15041_v50 = vld [vmem:[#allocation16_spill] sm:$0xff] }
 0x393   : > { %2092 = vmatpush.msra.mxu2 %v1521_v11  ;;  %2130 = vmatpush.msra.mxu3 %v1569_v42  ;;  %v1641_v11 = vld [vmem:[%s14564_s1 + $0x1350] sm:$0xff]  ;;  %14984 = vst [vmem:[#allocation79_spill] sm:$0xff] %v8710_v19 }
 0x394   : > { %2022 = vmatpush.msra.mxu0 %v1407_v16  ;;  %v1689_v42 = vld [vmem:[%s14564_s1 + $0x14d0] sm:$0xff]  ;;  %2197 = vmatpush.msrb.mxu1 %v1692_v4 }
 0x395   : > { %2093 = vmatpush.msra.mxu2 %v1518_v44  ;;  %2131 = vmatpush.msra.mxu3 %v1566_v46  ;;  %v1506_v44 = vld [vmem:[%s14564_s1 + $0xf18] sm:$0xff] }
 0x396   : > { %v1554_v46 = vld [vmem:[%s14564_s1 + $0x1098] sm:$0xff]  ;;  %2159 = vmatpush.msrb.mxu0 %v1644_v13  ;;  %2198 = vmatpush.msrb.mxu1 %v1689_v42  ;;  %v14991_v13 = vld [vmem:[#allocation21_spill] sm:$0xff] }
 0x397   : > { %2094 = vmatpush.msra.mxu2 %v1515_v30  ;;  %2132 = vmatpush.msra.mxu3 %v1563_v14  ;;  %v8714_v30 = vmul.f32 %v8165_v23, %v14985_v57  ;;  %v14987_v14 = vld [vmem:[#allocation13_spill] sm:$0xff]  ;;  %v8742_v4 = vmul.f32 %v8165_v23, %v14991_v13  ;;  %v15001_v13 = vld [vmem:[#allocation32_spill] sm:$0xff] }
 0x398   : > { %2160 = vmatpush.msrb.mxu0 %v1641_v11  ;;  %v8718_v16 = vmul.f32 %v8165_v23, %v14987_v14  ;;  %v14993_v11 = vld [vmem:[#allocation22_spill] sm:$0xff]  ;;  %v1683_v14 = vld [vmem:[%s14564_s1 + $0x14a0] sm:$0xff] }
 0x399   : > { %1874 = vmatmul.f32.gmra.mxu0 %v8554_v38  ;;  %1912 = vmatmul.f32.gmra.mxu1 %v8558_v40  ;;  %14986 = vst [vmem:[#allocation12_spill] sm:$0xff] %v8714_v30  ;;  %v8746_v42 = vmul.f32 %v8165_v23, %v14993_v11  ;;  %v8778_v11 = vmul.f32 %v8165_v23, %v15001_v13  ;;  %v15007_v13 = vld [vmem:[#allocation59_spill] sm:$0xff] }
 0x39a   : > { %1950 = vmatmul.f32.gmra.mxu2 %v8562_v8  ;;  %1988 = vmatmul.f32.gmra.mxu3 %v8566_v1  ;;  %14988 = vst [vmem:[#allocation13_spill] sm:$0xff] %v8718_v16  ;;  %v15029_v8 = vld [vmem:[#allocation74_spill] sm:$0xff] }
 0x39b   : > { %2095 = vmatpush.msra.mxu2 %v1512_v2  ;;  %2133 = vmatpush.msra.mxu3 %v1560_v45  ;;  %v8722_v2 = vmul.f32 %v8165_v23, %v14989_v18  ;;  %v1503_v45 = vld [vmem:[%s14564_s1 + $0xf00] sm:$0xff]  ;;  %14992 = vst [vmem:[#allocation21_spill] sm:$0xff] %v8742_v4  ;;  %v1632_v18 = vld [vmem:[%s14564_s1 + $0x1308] sm:$0xff] }
 0x39c   : > { %2161 = vmatpush.msrb.mxu0 %v1638_v48  ;;  %14994 = vst [vmem:[#allocation22_spill] sm:$0xff] %v8746_v42  ;;  %v14997_v48 = vld [vmem:[#allocation24_spill] sm:$0xff] }
 0x39d   : > { %2096 = vmatpush.msra.mxu2 %v1509_v53  ;;  %2134 = vmatpush.msra.mxu3 %v1557_v63  ;;  %14990 = vst [vmem:[#allocation14_spill] sm:$0xff] %v8722_v2  ;;  %v1686_v53 = vld [vmem:[%s14564_s1 + $0x14b8] sm:$0xff]  ;;  %v1635_v63 = vld [vmem:[%s14564_s1 + $0x1320] sm:$0xff]  ;;  %v8754_v57 = vmul.f32 %v8165_v23, %v14997_v48 }
 0x39e   : > { %2199 = vmatpush.msrb.mxu1 %v1686_v53  ;;  %2162 = vmatpush.msrb.mxu0 %v1635_v63  ;;  %v14999_v53 = vld [vmem:[#allocation31_spill] sm:$0xff]  ;;  %15002 = vst [vmem:[#allocation32_spill] sm:$0xff] %v8778_v11 }
 0x39f   : > { %2097 = vmatpush.msra.mxu2 %v1506_v44  ;;  %2135 = vmatpush.msra.mxu3 %v1554_v46  ;;  %v14995_v44 = vld [vmem:[#allocation23_spill] sm:$0xff]  ;;  %14998 = vst [vmem:[#allocation24_spill] sm:$0xff] %v8754_v57  ;;  %v8774_v63 = vmul.f32 %v8165_v23, %v14999_v53  ;;  %v1117_v53 = vld [vmem:[%s14564_s1 + $0x2f0] sm:$0xff] }
 0x3a0   : > { %v8750_v46 = vmul.f32 %v8165_v23, %v14995_v44  ;;  %2200 = vmatpush.msrb.mxu1 %v1683_v14  ;;  %2163 = vmatpush.msrb.mxu0 %v1632_v18  ;;  %v15003_v44 = vld [vmem:[#allocation33_spill] sm:$0xff]  ;;  %v1626_v18 = vld [vmem:[%s14564_s1 + $0x12d8] sm:$0xff] }
 0x3a1   : > { %1877 = vmatmul.f32.gmra.mxu0 %v8604_v33  ;;  %1915 = vmatmul.f32.gmra.mxu1 %v8608_v52  ;;  %15000 = vst [vmem:[#allocation31_spill] sm:$0xff] %v8774_v63  ;;  %v8782_v48 = vmul.f32 %v8165_v23, %v15003_v44  ;;  %v1677_v14 = vld [vmem:[%s14564_s1 + $0x1470] sm:$0xff]  ;;  %v8812_v44 = vmul.f32 %v8165_v23, %v15007_v13  ;;  %v1060_v13 = vld [vmem:[%s14564_s1 + $0x128] sm:$0xff] }
 0x3a2   : > { %1953 = vmatmul.f32.gmra.mxu2 %v8612_v15  ;;  %1991 = vmatmul.f32.gmra.mxu3 %v8616_v21  ;;  %14996 = vst [vmem:[#allocation23_spill] sm:$0xff] %v8750_v46 }
 0x3a3   : > { %2098 = vmatpush.msra.mxu2 %v1503_v45  ;;  %2136 = vmatpush.msra.mxu3 %v1551_v49  ;;  %v1680_v45 = vld [vmem:[%s14564_s1 + $0x1488] sm:$0xff]  ;;  %v1629_v49 = vld [vmem:[%s14564_s1 + $0x12f0] sm:$0xff]  ;;  %15004 = vst [vmem:[#allocation33_spill] sm:$0xff] %v8782_v48 }
 0x3a4   : > { %2201 = vmatpush.msrb.mxu1 %v1680_v45  ;;  %2164 = vmatpush.msrb.mxu0 %v1629_v49  ;;  %v1674_v45 = vld [vmem:[%s14564_s1 + $0x1458] sm:$0xff]  ;;  %v1069_v49 = vld [vmem:[%s14564_s1 + $0x170] sm:$0xff]  ;;  %15008 = vst [vmem:[#allocation59_spill] sm:$0xff] %v8812_v44 }
 0x3a5   : > { %2235 = vmatpush.msrb.mxu2 %v1069_v49  ;;  %2273 = vmatpush.msrb.mxu3 %v1117_v53  ;;  %v1111_v49 = vld [vmem:[%s14564_s1 + $0x2c0] sm:$0xff]  ;;  %v1617_v53 = vld [vmem:[%s14564_s1 + $0x1290] sm:$0xff] }
 0x3a6   : > { %2202 = vmatpush.msrb.mxu1 %v1677_v14  ;;  %2165 = vmatpush.msrb.mxu0 %v1626_v18  ;;  %v1671_v18 = vld [vmem:[%s14564_s1 + $0x1440] sm:$0xff] }
 0x3a8   : > { %2203 = vmatpush.msrb.mxu1 %v1674_v45  ;;  %v1066_v45 = vld [vmem:[%s14564_s1 + $0x158] sm:$0xff] }
 0x3a9   : > { %1880 = vmatmul.f32.gmra.mxu0 %v8657_v20  ;;  %1918 = vmatmul.f32.gmra.mxu1 %v8661_v32 }
 0x3aa   : > { %1956 = vmatmul.f32.gmra.mxu2 %v8665_v26  ;;  %1994 = vmatmul.f32.gmra.mxu3 %v8669_v0  ;;  %v15013_v0 = vld [vmem:[#allocation62_spill] sm:$0xff]  ;;  %v15019_v26 = vld [vmem:[#allocation67_spill] sm:$0xff] }
 0x3ab   : > { %v8824_v14 = vmul.f32 %v8165_v23, %v15013_v0  ;;  %v1620_v0 = vld [vmem:[%s14564_s1 + $0x12a8] sm:$0xff]  ;;  %2204 = vmatpush.msrb.mxu1 %v1671_v18  ;;  %2236 = vmatpush.msrb.mxu2 %v1066_v45 }
 0x3ac   : > { %v1108_v18 = vld [vmem:[%s14564_s1 + $0x2a8] sm:$0xff] }
 0x3ad   : > { %15014 = vst [vmem:[#allocation62_spill] sm:$0xff] %v8824_v14  ;;  %v15015_v45 = vld [vmem:[#allocation65_spill] sm:$0xff] }
 0x3b1   : > { %1883 = vmatmul.f32.gmra.mxu0 %v8710_v19  ;;  %1921 = vmatmul.f32.gmra.mxu1 %v8714_v30 }
 0x3b2   : > { %1959 = vmatmul.f32.gmra.mxu2 %v8718_v16  ;;  %1997 = vmatmul.f32.gmra.mxu3 %v8722_v2  ;;  %v15011_v2 = vld [vmem:[#allocation61_spill] sm:$0xff] }
 0x3b3   : > { %v8820_v16 = vmul.f32 %v8165_v23, %v15011_v2  ;;  %v1114_v2 = vld [vmem:[%s14564_s1 + $0x2d8] sm:$0xff] }
 0x3b4   : > { %2274 = vmatpush.msrb.mxu3 %v1114_v2  ;;  %v8865_v2 = vmul.f32 %v8165_v23, %v15015_v45  ;;  %v1102_v45 = vld [vmem:[%s14564_s1 + $0x278] sm:$0xff] }
 0x3b5   : > { %15012 = vst [vmem:[#allocation61_spill] sm:$0xff] %v8820_v16 }
 0x3b6   : > { %2275 = vmatpush.msrb.mxu3 %v1111_v49  ;;  %15016 = vst [vmem:[#allocation65_spill] sm:$0xff] %v8865_v2  ;;  %v1057_v49 = vld [vmem:[%s14564_s1 + $0x110] sm:$0xff] }
 0x3b8   : > { %2276 = vmatpush.msrb.mxu3 %v1108_v18  ;;  %v1054_v18 = vld [vmem:[%s14564_s1 + $0xf8] sm:$0xff] }
 0x3b9   : > { %1886 = vmatmul.f32.gmra.mxu0 %v8742_v4  ;;  %1924 = vmatmul.f32.gmra.mxu1 %v8746_v42 }
 0x3ba   : > { %1962 = vmatmul.f32.gmra.mxu2 %v8750_v46  ;;  %2000 = vmatmul.f32.gmra.mxu3 %v8754_v57  ;;  %v15005_v57 = vld [vmem:[#allocation34_spill] sm:$0xff] }
 0x3bb   : > { %v8786_v46 = vmul.f32 %v8165_v23, %v15005_v57  ;;  %v1623_v57 = vld [vmem:[%s14564_s1 + $0x12c0] sm:$0xff] }
 0x3bc   : > { %2166 = vmatpush.msrb.mxu0 %v1623_v57  ;;  %v1668_v57 = vld [vmem:[%s14564_s1 + $0x1428] sm:$0xff] }
 0x3bd   : > { %15006 = vst [vmem:[#allocation34_spill] sm:$0xff] %v8786_v46  ;;  %2205 = vmatpush.msrb.mxu1 %v1668_v57  ;;  %v15021_v57 = vld [vmem:[#allocation68_spill] sm:$0xff] }
 0x3be   : > { %2167 = vmatpush.msrb.mxu0 %v1620_v0  ;;  %v15017_v0 = vld [vmem:[#allocation66_spill] sm:$0xff]  ;;  %v8877_v21 = vmul.f32 %v8165_v23, %v15021_v57  ;;  %v1659_v57 = vld [vmem:[%s14564_s1 + $0x13e0] sm:$0xff] }
 0x3c0   : > { %2168 = vmatpush.msrb.mxu0 %v1617_v53  ;;  %15022 = vst [vmem:[#allocation68_spill] sm:$0xff] %v8877_v21  ;;  %v1105_v53 = vld [vmem:[%s14564_s1 + $0x290] sm:$0xff] }
 0x3c1   : > { %1889 = vmatmul.f32.gmra.mxu0 %v8774_v63  ;;  %1927 = vmatmul.f32.gmra.mxu1 %v8778_v11  ;;  %v15065_v63 = vld [vmem:[#allocation64_spill] sm:$0xff] }
 0x3c2   : > { %1965 = vmatmul.f32.gmra.mxu2 %v8782_v48  ;;  %2003 = vmatmul.f32.gmra.mxu3 %v8786_v46  ;;  %v15009_v46 = vld [vmem:[#allocation60_spill] sm:$0xff]  ;;  %v9166_v36 = vmul.f32 %v8165_v23, %v15065_v63  ;;  %v1306_v63 = vld [vmem:[%s14564_s1 + $0x8d8] sm:$0xff] }
 0x3c3   : > { %v8816_v48 = vmul.f32 %v8165_v23, %v15009_v46  ;;  %v1063_v46 = vld [vmem:[%s14564_s1 + $0x140] sm:$0xff]  ;;  %2277 = vmatpush.msrb.mxu3 %v1105_v53  ;;  %v1608_v53 = vld [vmem:[%s14564_s1 + $0x1248] sm:$0xff] }
 0x3c4   : > { %2237 = vmatpush.msrb.mxu2 %v1063_v46  ;;  %v8873_v46 = vmul.f32 %v8165_v23, %v15019_v26  ;;  %v1695_v26 = vld [vmem:[%s14565_s2] sm:$0x7]  ;;  %15066 = vst [vmem:[#allocation64_spill] sm:$0xff] %v9166_v36 }
 0x3c5   : > { %15010 = vst [vmem:[#allocation60_spill] sm:$0xff] %v8816_v48  ;;  %2278 = vmatpush.msrb.mxu3 %v1102_v45  ;;  %v15027_v45 = vld [vmem:[#allocation73_spill] sm:$0xff] }
 0x3c6   : > { %2238 = vmatpush.msrb.mxu2 %v1060_v13  ;;  %15020 = vst [vmem:[#allocation67_spill] sm:$0xff] %v8873_v46  ;;  %v1662_v13 = vld [vmem:[%s14564_s1 + $0x13f8] sm:$0xff]  ;;  %v8932_v1 = vmul.f32 %v8165_v23, %v15027_v45 }
 0x3c8   : > { %2239 = vmatpush.msrb.mxu2 %v1057_v49  ;;  %v1099_v49 = vld [vmem:[%s14564_s1 + $0x260] sm:$0xff]  ;;  %15028 = vst [vmem:[#allocation73_spill] sm:$0xff] %v8932_v1 }
 0x3c9   : > { %2023 = vmatmul.f32.vlgmr.msra.gmra.mxu0 %v8812_v44  ;;  %2061 = vmatmul.f32.vlgmr.msra.gmra.mxu1 %v8816_v48  ;;  %v15033_v44 = vld [vmem:[#allocation7_spill] sm:$0xff] }
 0x3ca   : > { %2099 = vmatmul.f32.vlgmr.msra.gmra.mxu2 %v8820_v16  ;;  %2137 = vmatmul.f32.vlgmr.msra.gmra.mxu3 %v8824_v14  ;;  %v1665_v14 = vld [vmem:[%s14564_s1 + $0x1410] sm:$0xff]  ;;  %v8869_v16 = vmul.f32 %v8165_v23, %v15017_v0  ;;  %v1611_v0 = vld [vmem:[%s14564_s1 + $0x1260] sm:$0xff]  ;;  %v8978_v28 = vmul.f32 %v8165_v23, %v15033_v44  ;;  %v1650_v44 = vld [vmem:[%s14564_s1 + $0x1398] sm:$0xff] }
 0x3cb   : > { %2206 = vmatpush.msrb.mxu1 %v1665_v14  ;;  %v1614_v14 = vld [vmem:[%s14564_s1 + $0x1278] sm:$0xff]  ;;  %2240 = vmatpush.msrb.mxu2 %v1054_v18 }
 0x3cc   : > { %15018 = vst [vmem:[#allocation66_spill] sm:$0xff] %v8869_v16  ;;  %2169 = vmatpush.msrb.mxu0 %v1614_v14  ;;  %2279 = vmatpush.msrb.mxu3 %v1099_v49  ;;  %v1093_v49 = vld [vmem:[%s14564_s1 + $0x230] sm:$0xff] }
 0x3cd   : > { %2207 = vmatpush.msrb.mxu1 %v1662_v13  ;;  %v15025_v13 = vld [vmem:[#allocation72_spill] sm:$0xff]  ;;  %15034 = vst [vmem:[#allocation7_spill] sm:$0xff] %v8978_v28 }
 0x3ce   : > { %2170 = vmatpush.msrb.mxu0 %v1611_v0  ;;  %v8936_v0 = vmul.f32 %v8165_v23, %v15029_v8  ;;  %v1605_v8 = vld [vmem:[%s14564_s1 + $0x1230] sm:$0xff] }
 0x3cf   : > { %2208 = vmatpush.msrb.mxu1 %v1659_v57  ;;  %v1048_v57 = vld [vmem:[%s14564_s1 + $0xc8] sm:$0xff] }
 0x3d0   : > { %15030 = vst [vmem:[#allocation74_spill] sm:$0xff] %v8936_v0  ;;  %2171 = vmatpush.msrb.mxu0 %v1608_v53  ;;  %v1653_v53 = vld [vmem:[%s14564_s1 + $0x13b0] sm:$0xff] }
 0x3d1   : > { %2026 = vmatmul.f32.gmra.mxu0 %v8865_v2  ;;  %2064 = vmatmul.f32.gmra.mxu1 %v8869_v16  ;;  %v8927_v2 = vmul.f32 %v8165_v23, %v15025_v13  ;;  %v1602_v13 = vld [vmem:[%s14564_s1 + $0x1218] sm:$0xff] }
 0x3d2   : > { %2102 = vmatmul.f32.gmra.mxu2 %v8873_v46  ;;  %2140 = vmatmul.f32.gmra.mxu3 %v8877_v21  ;;  %v8910_v46 = vperm.slane %v1695_v26, 0  ;;  %v1051_v21 = vld [vmem:[%s14564_s1 + $0xe0] sm:$0xff] }
 0x3d3   : > { %v15023_v26 = vld [vmem:[#allocation71_spill] sm:$0xff]  ;;  %15026 = vst [vmem:[#allocation72_spill] sm:$0xff] %v8927_v2  ;;  %2241 = vmatpush.msrb.mxu2 %v1051_v21  ;;  %v1045_v21 = vld [vmem:[%s14564_s1 + $0xb0] sm:$0xff]  ;;  %2172 = vmatpush.msrb.mxu0 %v1605_v8 }
 0x3d4   : > { %v8923_v14 = vmul.f32 %v8165_v23, %v15023_v26  ;;  %v1096_v26 = vld [vmem:[%s14564_s1 + $0x248] sm:$0xff] }
 0x3d5   : > { %2242 = vmatpush.msrb.mxu2 %v1048_v57  ;;  %2280 = vmatpush.msrb.mxu3 %v1096_v26 }
 0x3d6   : > { %v1720_v15 = vpop.f32.mrf.mxu0  ;;  %v1758_v16 = vpop.f32.mrf.mxu1  ;;  %15024 = vst [vmem:[#allocation71_spill] sm:$0xff] %v8923_v14  ;;  %2173 = vmatpush.msrb.mxu0 %v1602_v13 }
 0x3d7   : > { %v1721_v18 = vadd.f32 %v1720_v15, %v8910_v46  ;;  %v1656_v15 = vld [vmem:[%s14564_s1 + $0x13c8] sm:$0xff]  ;;  %2243 = vmatpush.msrb.mxu2 %v1045_v21  ;;  %2281 = vmatpush.msrb.mxu3 %v1093_v49 }
 0x3d8   : > { %2209 = vmatpush.msrb.mxu1 %v1656_v15  ;;  %v15035_v21 = vld [vmem:[#allocation8_spill] sm:$0xff] }
 0x3d9   : > { %2029 = vmatmul.f32.gmra.mxu0 %v8923_v14  ;;  %2067 = vmatmul.f32.gmra.mxu1 %v8927_v2  ;;  %v1759_v45 = vadd.f32 %v1758_v16, %v1721_v18  ;;  %v15031_v16 = vld [vmem:[#allocation6_spill] sm:$0xff]  ;;  %v8985_v49 = vmul.f32 %v8165_v23, %v15035_v21 }
 0x3da   : > { %2105 = vmatmul.f32.gmra.mxu2 %v8932_v1  ;;  %2143 = vmatmul.f32.gmra.mxu3 %v8936_v0  ;;  %v1042_v0 = vld [vmem:[%s14564_s1 + $0x98] sm:$0xff]  ;;  %v8974_v18 = vmul.f32 %v8165_v23, %v15031_v16  ;;  %v1033_v21 = vld [vmem:[%s14564_s1 + $0x50] sm:$0xff] }
 0x3db   : > { %v1090_v1 = vld [vmem:[%s14564_s1 + $0x218] sm:$0xff]  ;;  %2210 = vmatpush.msrb.mxu1 %v1653_v53  ;;  %2244 = vmatpush.msrb.mxu2 %v1042_v0  ;;  %15036 = vst [vmem:[#allocation8_spill] sm:$0xff] %v8985_v49  ;;  %v15037_v53 = vld [vmem:[#allocation9_spill] sm:$0xff] }
 0x3dc   : > { %15032 = vst [vmem:[#allocation6_spill] sm:$0xff] %v8974_v18  ;;  %2282 = vmatpush.msrb.mxu3 %v1090_v1  ;;  %v8989_v13 = vmul.f32 %v8165_v23, %v15037_v53  ;;  %v1087_v1 = vld [vmem:[%s14564_s1 + $0x200] sm:$0xff]  ;;  %v1084_v0 = vld [vmem:[%s14564_s1 + $0x1e8] sm:$0xff]  ;;  %v1081_v53 = vld [vmem:[%s14564_s1 + $0x1d0] sm:$0xff] }
 0x3dd   : > { %v1796_v57 = vpop.f32.mrf.mxu2  ;;  %v1834_v26 = vpop.f32.mrf.mxu3  ;;  %2211 = vmatpush.msrb.mxu1 %v1650_v44  ;;  %v9034_v44 = vmul.f32 %v8165_v23, %v15041_v50  ;;  %v1078_v50 = vld [vmem:[%s14564_s1 + $0x1b8] sm:$0xff] }
 0x3de   : > { %v1797_v2 = vadd.f32 %v1796_v57, %v1759_v45  ;;  %v1723_v14 = vpop.f32.mrf.mxu0  ;;  %v1761_v48 = vpop.f32.mrf.mxu1  ;;  %15038 = vst [vmem:[#allocation9_spill] sm:$0xff] %v8989_v13  ;;  %v1039_v45 = vld [vmem:[%s14564_s1 + $0x80] sm:$0xff]  ;;  %2283 = vmatpush.msrb.mxu3 %v1087_v1 }
 0x3df   : > { %v1724_v8 = vadd.f32 %v1723_v14, %v8910_v46  ;;  %v1036_v14 = vld [vmem:[%s14564_s1 + $0x68] sm:$0xff]  ;;  %2245 = vmatpush.msrb.mxu2 %v1039_v45  ;;  %v1647_v57 = vld [vmem:[%s14564_s1 + $0x1380] sm:$0xff]  ;;  %15042 = vst [vmem:[#allocation16_spill] sm:$0xff] %v9034_v44 }
 0x3e0   : > { %v8980_v15 = vadd.f32 %v1834_v26, %v1797_v2  ;;  %v1599_v2 = vld [vmem:[%s14564_s1 + $0x1200] sm:$0xff]  ;;  %v1165_v26 = vld [vmem:[%s14564_s1 + $0x470] sm:$0xff]  ;;  %2284 = vmatpush.msrb.mxu3 %v1084_v0  ;;  %2212 = vmatpush.msrb.mxu1 %v1647_v57 }
 0x3e1   : > { %2032 = vmatmul.f32.gmra.mxu0 %v8974_v18  ;;  %2070 = vmatmul.f32.gmra.mxu1 %v8978_v28  ;;  %v1762_v16 = vadd.f32 %v1761_v48, %v1724_v8  ;;  %v15039_v28 = vld [vmem:[#allocation15_spill] sm:$0xff]  ;;  %v15043_v0 = vld [vmem:[#allocation17_spill] sm:$0xff]  ;;  %v15045_v57 = vld [vmem:[#allocation18_spill] sm:$0xff] }
 0x3e2   : > { %2108 = vmatmul.f32.gmra.mxu2 %v8985_v49  ;;  %2146 = vmatmul.f32.gmra.mxu3 %v8989_v13  ;;  %v1213_v13 = vld [vmem:[%s14564_s1 + $0x5f0] sm:$0xff]  ;;  %v9030_v18 = vmul.f32 %v8165_v23, %v15039_v28  ;;  %v1030_v28 = vld [vmem:[%s14564_s1 + $0x38] sm:$0xff] }
 0x3e3   : > { %2174 = vmatpush.msrb.mxu0 %v1599_v2  ;;  %2246 = vmatpush.msrb.mxu2 %v1036_v14 }
 0x3e4   : > { %15040 = vst [vmem:[#allocation15_spill] sm:$0xff] %v9030_v18  ;;  %2285 = vmatpush.msrb.mxu3 %v1081_v53  ;;  %2349 = vmatpush.msra.mxu1 %v1213_v13  ;;  %v1027_v13 = vld [vmem:[%s14564_s1 + $0x20] sm:$0xff] }
 0x3e5   : > { %v1799_v45 = vpop.f32.mrf.mxu2  ;;  %v1837_v1 = vpop.f32.mrf.mxu3  ;;  %2311 = vmatpush.msra.mxu0 %v1165_v26  ;;  %2247 = vmatpush.msrb.mxu2 %v1033_v21  ;;  %v9045_v26 = vmul.f32 %v8165_v23, %v15045_v57  ;;  %v1210_v21 = vld [vmem:[%s14564_s1 + $0x5d8] sm:$0xff]  ;;  %v1075_v53 = vld [vmem:[%s14564_s1 + $0x1a0] sm:$0xff]  ;;  %v1072_v57 = vld [vmem:[%s14564_s1 + $0x188] sm:$0xff] }
 0x3e6   : > { %v1800_v49 = vadd.f32 %v1799_v45, %v1762_v16  ;;  %v1726_v48 = vpop.f32.mrf.mxu0  ;;  %v1764_v8 = vpop.f32.mrf.mxu1  ;;  %v9041_v16 = vmul.f32 %v8165_v23, %v15043_v0  ;;  %2286 = vmatpush.msrb.mxu3 %v1078_v50  ;;  %v1159_v45 = vld [vmem:[%s14564_s1 + $0x440] sm:$0xff]  ;;  %v1024_v0 = vld [vmem:[%s14564_s1 + $0x8] sm:$0xff]  ;;  %2350 = vmatpush.msra.mxu1 %v1210_v21 }
 0x3e7   : > { %v1727_v14 = vadd.f32 %v1726_v48, %v8910_v46  ;;  %15046 = vst [vmem:[#allocation18_spill] sm:$0xff] %v9045_v26  ;;  %2248 = vmatpush.msrb.mxu2 %v1030_v28 }
 0x3e8   : > { %v9036_v2 = vadd.f32 %v1837_v1, %v1800_v49  ;;  %15044 = vst [vmem:[#allocation17_spill] sm:$0xff] %v9041_v16  ;;  %v1162_v49 = vld [vmem:[%s14564_s1 + $0x458] sm:$0xff]  ;;  %v1207_v1 = vld [vmem:[%s14564_s1 + $0x5c0] sm:$0xff]  ;;  %2287 = vmatpush.msrb.mxu3 %v1075_v53 }
 0x3e9   : > { %2035 = vmatmul.f32.gmra.mxu0 %v9030_v18  ;;  %2073 = vmatmul.f32.gmra.mxu1 %v9034_v44  ;;  %v1765_v48 = vadd.f32 %v1764_v8, %v1727_v14  ;;  %v15047_v8 = vld [vmem:[#allocation25_spill] sm:$0xff]  ;;  %v15049_v18 = vld [vmem:[#allocation26_spill] sm:$0xff] }
 0x3ea   : > { %2111 = vmatmul.f32.gmra.mxu2 %v9041_v16  ;;  %2149 = vmatmul.f32.gmra.mxu3 %v9045_v26  ;;  %v9083_v14 = vmul.f32 %v8165_v23, %v15047_v8  ;;  %v9087_v11 = vmul.f32 %v8165_v23, %v15049_v18  ;;  %v1204_v18 = vld [vmem:[%s14564_s1 + $0x5a8] sm:$0xff] }
 0x3eb   : > { %2312 = vmatpush.msra.mxu0 %v1162_v49  ;;  %2249 = vmatpush.msrb.mxu2 %v1027_v13  ;;  %v15051_v13 = vld [vmem:[#allocation27_spill] sm:$0xff] }
 0x3ec   : > { %2351 = vmatpush.msra.mxu1 %v1207_v1  ;;  %15048 = vst [vmem:[#allocation25_spill] sm:$0xff] %v9083_v14  ;;  %2288 = vmatpush.msrb.mxu3 %v1072_v57  ;;  %v9094_v53 = vmul.f32 %v8165_v23, %v15051_v13  ;;  %v1150_v57 = vld [vmem:[%s14564_s1 + $0x3f8] sm:$0xff] }
 0x3ed   : > { %v1802_v28 = vpop.f32.mrf.mxu2  ;;  %v1840_v50 = vpop.f32.mrf.mxu3  ;;  %2313 = vmatpush.msra.mxu0 %v1159_v45  ;;  %15050 = vst [vmem:[#allocation26_spill] sm:$0xff] %v9087_v11  ;;  %2250 = vmatpush.msrb.mxu2 %v1024_v0  ;;  %v15053_v45 = vld [vmem:[#allocation28_spill] sm:$0xff] }
 0x3ee   : > { %v1803_v26 = vadd.f32 %v1802_v28, %v1765_v48  ;;  %v1729_v16 = vpop.f32.mrf.mxu0  ;;  %v1767_v44 = vpop.f32.mrf.mxu1  ;;  %15052 = vst [vmem:[#allocation27_spill] sm:$0xff] %v9094_v53  ;;  %v9098_v1 = vmul.f32 %v8165_v23, %v15053_v45  ;;  %v1156_v48 = vld [vmem:[%s14564_s1 + $0x428] sm:$0xff]  ;;  %2352 = vmatpush.msra.mxu1 %v1204_v18 }
 0x3ef   : > { %v1730_v21 = vadd.f32 %v1729_v16, %v8910_v46  ;;  %v1153_v16 = vld [vmem:[%s14564_s1 + $0x410] sm:$0xff]  ;;  %2314 = vmatpush.msra.mxu0 %v1156_v48 }
 0x3f0   : > { %v9089_v49 = vadd.f32 %v1840_v50, %v1803_v26  ;;  %15054 = vst [vmem:[#allocation28_spill] sm:$0xff] %v9098_v1  ;;  %v1201_v26 = vld [vmem:[%s14564_s1 + $0x590] sm:$0xff] }
 0x3f1   : > { %2038 = vmatmul.f32.gmra.mxu0 %v9083_v14  ;;  %2076 = vmatmul.f32.gmra.mxu1 %v9087_v11  ;;  %v1768_v0 = vadd.f32 %v1767_v44, %v1730_v21  ;;  %v15057_v11 = vld [vmem:[#allocation36_spill] sm:$0xff]  ;;  %v15059_v18 = vld [vmem:[#allocation37_spill] sm:$0xff] }
 0x3f2   : > { %2114 = vmatmul.f32.gmra.mxu2 %v9094_v53  ;;  %2152 = vmatmul.f32.gmra.mxu3 %v9098_v1  ;;  %v15055_v1 = vld [vmem:[#allocation35_spill] sm:$0xff]  ;;  %v9125_v48 = vmul.f32 %v8165_v23, %v15057_v11 }
 0x3f3   : > { %2315 = vmatpush.msra.mxu0 %v1153_v16  ;;  %2353 = vmatpush.msra.mxu1 %v1201_v26  ;;  %v9121_v53 = vmul.f32 %v8165_v23, %v15055_v1  ;;  %v9132_v16 = vmul.f32 %v8165_v23, %v15059_v18  ;;  %v15061_v26 = vld [vmem:[#allocation38_spill] sm:$0xff]  ;;  %v1147_v11 = vld [vmem:[%s14564_s1 + $0x3e0] sm:$0xff] }
 0x3f4   : > { %15058 = vst [vmem:[#allocation36_spill] sm:$0xff] %v9125_v48  ;;  %v1198_v1 = vld [vmem:[%s14564_s1 + $0x578] sm:$0xff] }
 0x3f5   : > { %v1805_v28 = vpop.f32.mrf.mxu2  ;;  %v1843_v50 = vpop.f32.mrf.mxu3  ;;  %15056 = vst [vmem:[#allocation35_spill] sm:$0xff] %v9121_v53  ;;  %2316 = vmatpush.msra.mxu0 %v1150_v57  ;;  %v1195_v57 = vld [vmem:[%s14564_s1 + $0x560] sm:$0xff]  ;;  %2354 = vmatpush.msra.mxu1 %v1198_v1 }
 0x3f6   : > { %v1806_v8 = vadd.f32 %v1805_v28, %v1768_v0  ;;  %v1732_v13 = vpop.f32.mrf.mxu0  ;;  %v1770_v45 = vpop.f32.mrf.mxu1  ;;  %15060 = vst [vmem:[#allocation37_spill] sm:$0xff] %v9132_v16  ;;  %v9136_v0 = vmul.f32 %v8165_v23, %v15061_v26  ;;  %v1144_v28 = vld [vmem:[%s14564_s1 + $0x3c8] sm:$0xff] }
 0x3f7   : > { %v1733_v21 = vadd.f32 %v1732_v13, %v8910_v46  ;;  %2317 = vmatpush.msra.mxu0 %v1147_v11  ;;  %2355 = vmatpush.msra.mxu1 %v1195_v57  ;;  %v1258_v11 = vld [vmem:[%s14564_s1 + $0x758] sm:$0xff]  ;;  %v1303_v57 = vld [vmem:[%s14564_s1 + $0x8c0] sm:$0xff] }
 0x3f8   : > { %v9127_v44 = vadd.f32 %v1843_v50, %v1806_v8  ;;  %15062 = vst [vmem:[#allocation38_spill] sm:$0xff] %v9136_v0  ;;  %v1261_v50 = vld [vmem:[%s14564_s1 + $0x770] sm:$0xff] }
 0x3f9   : > { %2041 = vmatmul.f32.gmra.mxu0 %v9121_v53  ;;  %2079 = vmatmul.f32.gmra.mxu1 %v9125_v48  ;;  %v1309_v8 = vld [vmem:[%s14564_s1 + $0x8f0] sm:$0xff]  ;;  %v1771_v13 = vadd.f32 %v1770_v45, %v1733_v21  ;;  %v15063_v53 = vld [vmem:[#allocation63_spill] sm:$0xff]  ;;  %v1192_v21 = vld [vmem:[%s14564_s1 + $0x548] sm:$0xff] }
 0x3fa   : > { %2117 = vmatmul.f32.gmra.mxu2 %v9132_v16  ;;  %2155 = vmatmul.f32.gmra.mxu3 %v9136_v0  ;;  %v9162_v14 = vmul.f32 %v8165_v23, %v15063_v53  ;;  %v1141_v53 = vld [vmem:[%s14564_s1 + $0x3b0] sm:$0xff] }
 0x3fb   : > { %2387 = vmatpush.msra.mxu2 %v1261_v50  ;;  %2425 = vmatpush.msra.mxu3 %v1309_v8  ;;  %v1252_v8 = vld [vmem:[%s14564_s1 + $0x728] sm:$0xff] }
 0x3fc   : > { %2318 = vmatpush.msra.mxu0 %v1144_v28  ;;  %15064 = vst [vmem:[#allocation63_spill] sm:$0xff] %v9162_v14  ;;  %2356 = vmatpush.msra.mxu1 %v1192_v21  ;;  %v1138_v28 = vld [vmem:[%s14564_s1 + $0x398] sm:$0xff]  ;;  %v1300_v21 = vld [vmem:[%s14564_s1 + $0x8a8] sm:$0xff] }
 0x3fd   : > { %v1808_v18 = vpop.f32.mrf.mxu2  ;;  %v1846_v26 = vpop.f32.mrf.mxu3  ;;  %2388 = vmatpush.msra.mxu2 %v1258_v11  ;;  %2426 = vmatpush.msra.mxu3 %v1306_v63  ;;  %v15067_v63 = vld [vmem:[#allocation69_spill] sm:$0xff] }
 0x3fe   : > { %v1809_v0 = vadd.f32 %v1808_v18, %v1771_v13  ;;  %v1735_v16 = vpop.f32.mrf.mxu0  ;;  %v1773_v48 = vpop.f32.mrf.mxu1  ;;  %2319 = vmatpush.msra.mxu0 %v1141_v53  ;;  %v1186_v13 = vld [vmem:[%s14564_s1 + $0x518] sm:$0xff]  ;;  %v9210_v53 = vmul.f32 %v8165_v23, %v15067_v63 }
 0x3ff   : > { %v1736_v45 = vadd.f32 %v1735_v16, %v8910_v46  ;;  %v1255_v16 = vld [vmem:[%s14564_s1 + $0x740] sm:$0xff]  ;;  %2427 = vmatpush.msra.mxu3 %v1303_v57  ;;  %v1249_v57 = vld [vmem:[%s14564_s1 + $0x710] sm:$0xff] }
 0x400   : > { %v9168_v1 = vadd.f32 %v1846_v26, %v1809_v0  ;;  %v1189_v0 = vld [vmem:[%s14564_s1 + $0x530] sm:$0xff]  ;;  %2389 = vmatpush.msra.mxu2 %v1255_v16  ;;  %2320 = vmatpush.msra.mxu0 %v1138_v28  ;;  %15068 = vst [vmem:[#allocation69_spill] sm:$0xff] %v9210_v53 }
 0x401   : > { %2175 = vmatmul.f32.vlgmr.msrb.gmra.mxu0 %v9162_v14  ;;  %2213 = vmatmul.f32.vlgmr.msrb.gmra.mxu1 %v9166_v36  ;;  %v1774_v50 = vadd.f32 %v1773_v48, %v1736_v45  ;;  %v1297_v28 = vld [vmem:[%s14564_s1 + $0x890] sm:$0xff] }
 0x402   : > { %2251 = vmatmul.f32.vlgmr.msrb.gmra.mxu2 %v8169_v35  ;;  %2289 = vmatmul.f32.vlgmr.msrb.gmra.mxu3 %v8173_v7  ;;  %v15069_v7 = vld [vmem:[#allocation70_spill] sm:$0xff] }
 0x403   : > { %2357 = vmatpush.msra.mxu1 %v1189_v0  ;;  %v9214_v35 = vmul.f32 %v8165_v23, %v15069_v7  ;;  %2390 = vmatpush.msra.mxu2 %v1252_v8  ;;  %v1135_v7 = vld [vmem:[%s14564_s1 + $0x380] sm:$0xff]  ;;  %v1294_v8 = vld [vmem:[%s14564_s1 + $0x878] sm:$0xff] }
 0x404   : > { %2428 = vmatpush.msra.mxu3 %v1300_v21  ;;  %2321 = vmatpush.msra.mxu0 %v1135_v7  ;;  %v1243_v21 = vld [vmem:[%s14564_s1 + $0x6e0] sm:$0xff] }
 0x405   : > { %v1811_v18 = vpop.f32.mrf.mxu2  ;;  %v1849_v26 = vpop.f32.mrf.mxu3  ;;  %15070 = vst [vmem:[#allocation70_spill] sm:$0xff] %v9214_v35  ;;  %2358 = vmatpush.msra.mxu1 %v1186_v13  ;;  %2391 = vmatpush.msra.mxu2 %v1249_v57  ;;  %v1132_v13 = vld [vmem:[%s14564_s1 + $0x368] sm:$0xff]  ;;  %v1129_v57 = vld [vmem:[%s14564_s1 + $0x350] sm:$0xff] }
 0x406   : > { %v1812_v11 = vadd.f32 %v1811_v18, %v1774_v50  ;;  %v1738_v48 = vpop.f32.mrf.mxu0  ;;  %v1776_v45 = vpop.f32.mrf.mxu1  ;;  %v1246_v50 = vld [vmem:[%s14564_s1 + $0x6f8] sm:$0xff]  ;;  %2429 = vmatpush.msra.mxu3 %v1297_v28  ;;  %v1180_v18 = vld [vmem:[%s14564_s1 + $0x4e8] sm:$0xff]  ;;  %2322 = vmatpush.msra.mxu0 %v1132_v13 }
 0x407   : > { %v1739_v0 = vadd.f32 %v1738_v48, %v8910_v46  ;;  %v1183_v46 = vld [vmem:[%s14564_s1 + $0x500] sm:$0xff]  ;;  %2392 = vmatpush.msra.mxu2 %v1246_v50 }
 0x408   : > { %v9216_v16 = vadd.f32 %v1849_v26, %v1812_v11  ;;  %2359 = vmatpush.msra.mxu1 %v1183_v46  ;;  %v1291_v11 = vld [vmem:[%s14564_s1 + $0x860] sm:$0xff]  ;;  %2430 = vmatpush.msra.mxu3 %v1294_v8  ;;  %v1240_v8 = vld [vmem:[%s14564_s1 + $0x6c8] sm:$0xff] }
 0x409   : > { %2178 = vmatmul.f32.gmra.mxu0 %v9210_v53  ;;  %2216 = vmatmul.f32.gmra.mxu1 %v9214_v35  ;;  %v1777_v26 = vadd.f32 %v1776_v45, %v1739_v0  ;;  %v15071_v46 = vld [vmem:[#allocation75_spill] sm:$0xff] }
 0x40a   : > { %2254 = vmatmul.f32.gmra.mxu2 %v8222_v24  ;;  %2292 = vmatmul.f32.gmra.mxu3 %v8226_v61  ;;  %v9259_v61 = vmul.f32 %v8165_v23, %v15071_v46  ;;  %v15073_v24 = vld [vmem:[#allocation76_spill] sm:$0xff] }
 0x40b   : > { %2360 = vmatpush.msra.mxu1 %v1180_v18  ;;  %v9263_v35 = vmul.f32 %v8165_v23, %v15073_v24  ;;  %2393 = vmatpush.msra.mxu2 %v1243_v21  ;;  %v1177_v24 = vld [vmem:[%s14564_s1 + $0x4d0] sm:$0xff]  ;;  %v1126_v18 = vld [vmem:[%s14564_s1 + $0x338] sm:$0xff] }
 0x40c   : > { %15072 = vst [vmem:[#allocation75_spill] sm:$0xff] %v9259_v61  ;;  %2431 = vmatpush.msra.mxu3 %v1291_v11  ;;  %2323 = vmatpush.msra.mxu0 %v1129_v57  ;;  %v1285_v21 = vld [vmem:[%s14564_s1 + $0x830] sm:$0xff]  ;;  %v1174_v11 = vld [vmem:[%s14564_s1 + $0x4b8] sm:$0xff] }
 0x40d   : > { %v1814_v48 = vpop.f32.mrf.mxu2  ;;  %v1852_v63 = vpop.f32.mrf.mxu3  ;;  %15074 = vst [vmem:[#allocation76_spill] sm:$0xff] %v9263_v35  ;;  %2394 = vmatpush.msra.mxu2 %v1240_v8  ;;  %v1282_v57 = vld [vmem:[%s14564_s1 + $0x818] sm:$0xff]  ;;  %2361 = vmatpush.msra.mxu1 %v1177_v24 }
 0x40e   : > { %v1815_v28 = vadd.f32 %v1814_v48, %v1777_v26  ;;  %v1872_v45 = vpop.f32.mrf.mxu0  ;;  %v1910_v0 = vpop.f32.mrf.mxu1  ;;  %v1237_v26 = vld [vmem:[%s14564_s1 + $0x6b0] sm:$0xff]  ;;  %v1123_v48 = vld [vmem:[%s14564_s1 + $0x320] sm:$0xff]  ;;  %2324 = vmatpush.msra.mxu0 %v1126_v18 }
 0x40f   : > { %v1873_v7 = vadd.f32 %v1872_v45, %v8980_v15  ;;  %v1288_v15 = vld [vmem:[%s14564_s1 + $0x848] sm:$0xff]  ;;  %2395 = vmatpush.msra.mxu2 %v1237_v26  ;;  %2362 = vmatpush.msra.mxu1 %v1174_v11 }
 0x410   : > { %v9265_v50 = vadd.f32 %v1852_v63, %v1815_v28  ;;  %2432 = vmatpush.msra.mxu3 %v1288_v15  ;;  %v1234_v63 = vld [vmem:[%s14564_s1 + $0x698] sm:$0xff]  ;;  %2325 = vmatpush.msra.mxu0 %v1123_v48  ;;  %v1120_v26 = vld [vmem:[%s14564_s1 + $0x308] sm:$0xff] }
 0x411   : > { %v1911_v13 = vadd.f32 %v1910_v0, %v1873_v7  ;;  %2181 = vmatmul.f32.gmra.mxu0 %v9259_v61  ;;  %2219 = vmatmul.f32.gmra.mxu1 %v9263_v35  ;;  %v15075_v15 = vld [vmem:[#allocation10_spill] sm:$0xff]  ;;  %v1276_v11 = vld [vmem:[%s14564_s1 + $0x7e8] sm:$0xff] }
 0x412   : > { %2257 = vmatmul.f32.gmra.mxu2 %v8272_v41  ;;  %2295 = vmatmul.f32.gmra.mxu3 %v8276_v43  ;;  %v9304_v43 = vmul.f32 %v8165_v23, %v15075_v15  ;;  %v15077_v41 = vld [vmem:[#allocation11_spill] sm:$0xff]  ;;  %v1168_v48 = vld [vmem:[%s14564_s1 + $0x488] sm:$0xff] }
 0x413   : > { %2433 = vmatpush.msra.mxu3 %v1285_v21  ;;  %v9308_v35 = vmul.f32 %v8165_v23, %v15077_v41  ;;  %2396 = vmatpush.msra.mxu2 %v1234_v63  ;;  %v1171_v41 = vld [vmem:[%s14564_s1 + $0x4a0] sm:$0xff]  ;;  %v1228_v21 = vld [vmem:[%s14564_s1 + $0x668] sm:$0xff]  ;;  %v1357_v63 = vld [vmem:[%s14564_s1 + $0xa70] sm:$0xff] }
 0x414   : > { %15076 = vst [vmem:[#allocation10_spill] sm:$0xff] %v9304_v43  ;;  %2363 = vmatpush.msra.mxu1 %v1171_v41  ;;  %2326 = vmatpush.msra.mxu0 %v1120_v26  ;;  %v15081_v41 = vld [vmem:[#allocation20_spill] sm:$0xff] }
 0x415   : > { %v1948_v28 = vpop.f32.mrf.mxu2  ;;  %v1986_v45 = vpop.f32.mrf.mxu3  ;;  %15078 = vst [vmem:[#allocation11_spill] sm:$0xff] %v9308_v35  ;;  %2434 = vmatpush.msra.mxu3 %v1282_v57  ;;  %v1225_v57 = vld [vmem:[%s14564_s1 + $0x650] sm:$0xff]  ;;  %v9356_v26 = vmul.f32 %v8165_v23, %v15081_v41 }
 0x416   : > { %v1949_v0 = vadd.f32 %v1948_v28, %v1911_v13  ;;  %v1875_v7 = vpop.f32.mrf.mxu0  ;;  %v1913_v46 = vpop.f32.mrf.mxu1  ;;  %v1231_v13 = vld [vmem:[%s14564_s1 + $0x680] sm:$0xff]  ;;  %v1273_v28 = vld [vmem:[%s14564_s1 + $0x7d0] sm:$0xff]  ;;  %2364 = vmatpush.msra.mxu1 %v1168_v48  ;;  %2463 = vmatpush.msrb.mxu0 %v1357_v63  ;;  %v1354_v48 = vld [vmem:[%s14564_s1 + $0xa58] sm:$0xff] }
 0x417   : > { %v1876_v8 = vadd.f32 %v1875_v7, %v9036_v2  ;;  %v1279_v2 = vld [vmem:[%s14564_s1 + $0x800] sm:$0xff]  ;;  %2397 = vmatpush.msra.mxu2 %v1231_v13  ;;  %v1405_v7 = vld [vmem:[%s14564_s1 + $0xbf0] sm:$0xff]  ;;  %15082 = vst [vmem:[#allocation20_spill] sm:$0xff] %v9356_v26  ;;  %v1402_v63 = vld [vmem:[%s14564_s1 + $0xbd8] sm:$0xff] }
 0x418   : > { %v9310_v24 = vadd.f32 %v1986_v45, %v1949_v0  ;;  %2435 = vmatpush.msra.mxu3 %v1279_v2  ;;  %v15079_v2 = vld [vmem:[#allocation19_spill] sm:$0xff]  ;;  %2501 = vmatpush.msrb.mxu1 %v1405_v7  ;;  %v1216_v7 = vld [vmem:[%s14564_s1 + $0x608] sm:$0xff] }
 0x419   : > { %v1914_v18 = vadd.f32 %v1913_v46, %v1876_v8  ;;  %2184 = vmatmul.f32.gmra.mxu0 %v9304_v43  ;;  %2222 = vmatmul.f32.gmra.mxu1 %v9308_v35 }
 0x41a   : > { %2260 = vmatmul.f32.gmra.mxu2 %v8325_v12  ;;  %2298 = vmatmul.f32.gmra.mxu3 %v8329_v27  ;;  %v9352_v27 = vmul.f32 %v8165_v23, %v15079_v2 }
 0x41b   : > { %2398 = vmatpush.msra.mxu2 %v1228_v21  ;;  %2436 = vmatpush.msra.mxu3 %v1276_v11 }
 0x41c   : > { %15080 = vst [vmem:[#allocation19_spill] sm:$0xff] %v9352_v27  ;;  %2464 = vmatpush.msrb.mxu0 %v1354_v48  ;;  %2502 = vmatpush.msrb.mxu1 %v1402_v63 }
 0x41d   : > { %v1951_v45 = vpop.f32.mrf.mxu2  ;;  %v1989_v0 = vpop.f32.mrf.mxu3  ;;  %2399 = vmatpush.msra.mxu2 %v1225_v57  ;;  %2437 = vmatpush.msra.mxu3 %v1273_v28  ;;  %v1219_v57 = vld [vmem:[%s14564_s1 + $0x620] sm:$0xff] }
 0x41e   : > { %v1952_v46 = vadd.f32 %v1951_v45, %v1914_v18  ;;  %v1878_v8 = vpop.f32.mrf.mxu0  ;;  %v1916_v15 = vpop.f32.mrf.mxu1  ;;  %v1222_v18 = vld [vmem:[%s14564_s1 + $0x638] sm:$0xff]  ;;  %v1267_v28 = vld [vmem:[%s14564_s1 + $0x7a0] sm:$0xff] }
 0x41f   : > { %v1879_v13 = vadd.f32 %v1878_v8, %v9089_v49  ;;  %v1270_v49 = vld [vmem:[%s14564_s1 + $0x7b8] sm:$0xff]  ;;  %2400 = vmatpush.msra.mxu2 %v1222_v18  ;;  %v1351_v45 = vld [vmem:[%s14564_s1 + $0xa40] sm:$0xff] }
 0x420   : > { %v9358_v21 = vadd.f32 %v1989_v0, %v1952_v46  ;;  %2438 = vmatpush.msra.mxu3 %v1270_v49  ;;  %v1399_v0 = vld [vmem:[%s14564_s1 + $0xbc0] sm:$0xff]  ;;  %v1264_v46 = vld [vmem:[%s14564_s1 + $0x788] sm:$0xff]  ;;  %2465 = vmatpush.msrb.mxu0 %v1351_v45 }
 0x421   : > { %v1917_v11 = vadd.f32 %v1916_v15, %v1879_v13  ;;  %2187 = vmatmul.f32.gmra.mxu0 %v9352_v27  ;;  %2225 = vmatmul.f32.gmra.mxu1 %v9356_v26  ;;  %v15083_v49 = vld [vmem:[#allocation29_spill] sm:$0xff] }
 0x422   : > { %2263 = vmatmul.f32.gmra.mxu2 %v8378_v54  ;;  %2301 = vmatmul.f32.gmra.mxu3 %v8382_v37  ;;  %v9397_v37 = vmul.f32 %v8165_v23, %v15083_v49  ;;  %v15084_v54 = vld [vmem:[#allocation30_spill] sm:$0xff] }
 0x423   : > { %2401 = vmatpush.msra.mxu2 %v1219_v57  ;;  %2439 = vmatpush.msra.mxu3 %v1267_v28  ;;  %v9401_v12 = vmul.f32 %v8165_v23, %v15084_v54  ;;  %v1345_v54 = vld [vmem:[%s14564_s1 + $0xa10] sm:$0xff]  ;;  %v1342_v28 = vld [vmem:[%s14564_s1 + $0x9f8] sm:$0xff] }
 0x424   : > { %2503 = vmatpush.msrb.mxu1 %v1399_v0  ;;  %v1393_v57 = vld [vmem:[%s14564_s1 + $0xb90] sm:$0xff]  ;;  %v1390_v49 = vld [vmem:[%s14564_s1 + $0xb78] sm:$0xff] }
 0x425   : > { %v1954_v8 = vpop.f32.mrf.mxu2  ;;  %v1992_v15 = vpop.f32.mrf.mxu3  ;;  %2402 = vmatpush.msra.mxu2 %v1216_v7  ;;  %2440 = vmatpush.msra.mxu3 %v1264_v46 }
 0x426   : > { %v1955_v13 = vadd.f32 %v1954_v8, %v1917_v11  ;;  %v1881_v2 = vpop.f32.mrf.mxu0  ;;  %v1919_v41 = vpop.f32.mrf.mxu1  ;;  %v1348_v11 = vld [vmem:[%s14564_s1 + $0xa28] sm:$0xff] }
 0x427   : > { %v1882_v18 = vadd.f32 %v1881_v2, %v9127_v44  ;;  %v1396_v44 = vld [vmem:[%s14564_s1 + $0xba8] sm:$0xff]  ;;  %2466 = vmatpush.msrb.mxu0 %v1348_v11 }
 0x428   : > { %v9403_v48 = vadd.f32 %v1992_v15, %v1955_v13  ;;  %2504 = vmatpush.msrb.mxu1 %v1396_v44  ;;  %v15085_v13 = vld [vmem:[#allocation39_spill] sm:$0xff]  ;;  %v1501_v44 = vld [vmem:[%s14564_s1 + $0xef0] sm:$0xff] }
 0x429   : > { %v1920_v63 = vadd.f32 %v1919_v41, %v1882_v18  ;;  %2190 = vmatmul.f32.gmra.mxu0 %v9397_v37  ;;  %2228 = vmatmul.f32.gmra.mxu1 %v9401_v12  ;;  %v9427_v2 = vmul.f32 %v8165_v23, %v15085_v13  ;;  %v9431_v41 = vmul.f32 %v8165_v23, %v7882_v56  ;;  %v1387_v56 = vld [vmem:[%s14564_s1 + $0xb60] sm:$0xff]  ;;  %v1336_v23 = vld [vmem:[%s14564_s1 + $0x9c8] sm:$0xff] }
 0x42a   : > { %2266 = vmatmul.f32.gmra.mxu2 %v8416_v55  ;;  %2304 = vmatmul.f32.gmra.mxu3 %v8420_v62 }
 0x42b   : > { %2467 = vmatpush.msrb.mxu0 %v1345_v54  ;;  %2505 = vmatpush.msrb.mxu1 %v1393_v57  ;;  %15086 = vst [vmem:[#allocation29_spill] sm:$0xff] %v9427_v2 }
 0x42c   : > { %15087 = vst [vmem:[#allocation30_spill] sm:$0xff] %v9431_v41  ;;  %2577 = vmatpush.msrb.mxu3 %v1501_v44  ;;  %v1378_v44 = vld [vmem:[%s14564_s1 + $0xb18] sm:$0xff] }
 0x42d   : > { %v1957_v45 = vpop.f32.mrf.mxu2  ;;  %v1995_v0 = vpop.f32.mrf.mxu3  ;;  %2468 = vmatpush.msrb.mxu0 %v1342_v28  ;;  %2506 = vmatpush.msrb.mxu1 %v1390_v49  ;;  %v1498_v49 = vld [vmem:[%s14564_s1 + $0xed8] sm:$0xff] }
 0x42e   : > { %v1958_v7 = vadd.f32 %v1957_v45, %v1920_v63  ;;  %v1884_v46 = vpop.f32.mrf.mxu0  ;;  %v1922_v8 = vpop.f32.mrf.mxu1  ;;  %v1453_v63 = vld [vmem:[%s14564_s1 + $0xd70] sm:$0xff]  ;;  %2578 = vmatpush.msrb.mxu3 %v1498_v49 }
 0x42f   : > { %v1885_v15 = vadd.f32 %v1884_v46, %v9168_v1  ;;  %v1339_v1 = vld [vmem:[%s14564_s1 + $0x9e0] sm:$0xff]  ;;  %2539 = vmatpush.msrb.mxu2 %v1453_v63  ;;  %2507 = vmatpush.msrb.mxu1 %v1387_v56  ;;  %v1444_v63 = vld [vmem:[%s14564_s1 + $0xd28] sm:$0xff]  ;;  %v1441_v49 = vld [vmem:[%s14564_s1 + $0xd10] sm:$0xff] }
 0x430   : > { %v9433_v18 = vadd.f32 %v1995_v0, %v1958_v7  ;;  %2469 = vmatpush.msrb.mxu0 %v1339_v1  ;;  %v1381_v1 = vld [vmem:[%s14564_s1 + $0xb30] sm:$0xff]  ;;  %v1495_v56 = vld [vmem:[%s14564_s1 + $0xec0] sm:$0xff] }
 0x431   : > { %v1923_v11 = vadd.f32 %v1922_v8, %v1885_v15  ;;  %2193 = vmatmul.f32.gmra.mxu0 %v9427_v2  ;;  %2231 = vmatmul.f32.gmra.mxu1 %v9431_v41  ;;  %v1384_v8 = vld [vmem:[%s14564_s1 + $0xb48] sm:$0xff]  ;;  %v1450_v15 = vld [vmem:[%s14564_s1 + $0xd58] sm:$0xff] }
 0x432   : > { %2269 = vmatmul.f32.gmra.mxu2 %v8451_v47  ;;  %2307 = vmatmul.f32.gmra.mxu3 %v8455_v22 }
 0x433   : > { %2470 = vmatpush.msrb.mxu0 %v1336_v23  ;;  %2508 = vmatpush.msrb.mxu1 %v1384_v8  ;;  %v1330_v23 = vld [vmem:[%s14564_s1 + $0x998] sm:$0xff] }
 0x434   : > { %2540 = vmatpush.msrb.mxu2 %v1450_v15  ;;  %2579 = vmatpush.msrb.mxu3 %v1495_v56  ;;  %v1486_v56 = vld [vmem:[%s14564_s1 + $0xe78] sm:$0xff] }
 0x435   : > { %v1960_v54 = vpop.f32.mrf.mxu2  ;;  %v1998_v57 = vpop.f32.mrf.mxu3  ;;  %2509 = vmatpush.msrb.mxu1 %v1381_v1  ;;  %v1438_v1 = vld [vmem:[%s14564_s1 + $0xcf8] sm:$0xff] }
 0x436   : > { %v1961_v28 = vadd.f32 %v1960_v54, %v1923_v11  ;;  %v1887_v45 = vpop.f32.mrf.mxu0  ;;  %v1925_v0 = vpop.f32.mrf.mxu1  ;;  %v1447_v11 = vld [vmem:[%s14564_s1 + $0xd40] sm:$0xff] }
 0x437   : > { %v1888_v7 = vadd.f32 %v1887_v45, %v9216_v16  ;;  %v1333_v16 = vld [vmem:[%s14564_s1 + $0x9b0] sm:$0xff]  ;;  %2541 = vmatpush.msrb.mxu2 %v1447_v11  ;;  %2510 = vmatpush.msrb.mxu1 %v1378_v44  ;;  %v1375_v11 = vld [vmem:[%s14564_s1 + $0xb00] sm:$0xff] }
 0x438   : > { %v9458_v46 = vadd.f32 %v1998_v57, %v1961_v28  ;;  %2471 = vmatpush.msrb.mxu0 %v1333_v16  ;;  %v1492_v28 = vld [vmem:[%s14564_s1 + $0xea8] sm:$0xff]  ;;  %v1489_v16 = vld [vmem:[%s14564_s1 + $0xe90] sm:$0xff]  ;;  %v1435_v44 = vld [vmem:[%s14564_s1 + $0xce0] sm:$0xff] }
 0x439   : > { %v1926_v13 = vadd.f32 %v1925_v0, %v1888_v7  ;;  %2327 = vmatmul.f32.vlgmr.msra.gmra.mxu0 %v8177_v25  ;;  %2365 = vmatmul.f32.vlgmr.msra.gmra.mxu1 %v8181_v9 }
 0x43a   : > { %2403 = vmatmul.f32.vlgmr.msra.gmra.mxu2 %v8501_v58  ;;  %2441 = vmatmul.f32.vlgmr.msra.gmra.mxu3 %v8505_v10 }
 0x43b   : > { %2472 = vmatpush.msrb.mxu0 %v1330_v23  ;;  %2542 = vmatpush.msrb.mxu2 %v1444_v63  ;;  %v1324_v23 = vld [vmem:[%s14564_s1 + $0x968] sm:$0xff] }
 0x43c   : > { %2580 = vmatpush.msrb.mxu3 %v1492_v28  ;;  %v1372_v63 = vld [vmem:[%s14564_s1 + $0xae8] sm:$0xff]  ;;  %2511 = vmatpush.msrb.mxu1 %v1375_v11 }
 0x43d   : > { %v1963_v54 = vpop.f32.mrf.mxu2  ;;  %v2001_v57 = vpop.f32.mrf.mxu3  ;;  %2543 = vmatpush.msrb.mxu2 %v1441_v49  ;;  %v1480_v11 = vld [vmem:[%s14564_s1 + $0xe48] sm:$0xff] }
 0x43e   : > { %v1964_v45 = vadd.f32 %v1963_v54, %v1926_v13  ;;  %v1890_v0 = vpop.f32.mrf.mxu0  ;;  %v1928_v7 = vpop.f32.mrf.mxu1  ;;  %2581 = vmatpush.msrb.mxu3 %v1489_v16  ;;  %v1483_v54 = vld [vmem:[%s14564_s1 + $0xe60] sm:$0xff]  ;;  %2512 = vmatpush.msrb.mxu1 %v1372_v63  ;;  %v1366_v63 = vld [vmem:[%s14564_s1 + $0xab8] sm:$0xff] }
 0x43f   : > { %v1891_v8 = vadd.f32 %v1890_v0, %v9265_v50  ;;  %v1327_v50 = vld [vmem:[%s14564_s1 + $0x980] sm:$0xff]  ;;  %2544 = vmatpush.msrb.mxu2 %v1438_v1  ;;  %v1318_v1 = vld [vmem:[%s14564_s1 + $0x938] sm:$0xff] }
 0x440   : > { %v9498_v15 = vadd.f32 %v2001_v57, %v1964_v45  ;;  %2473 = vmatpush.msrb.mxu0 %v1327_v50  ;;  %2582 = vmatpush.msrb.mxu3 %v1486_v56  ;;  %v1321_v45 = vld [vmem:[%s14564_s1 + $0x950] sm:$0xff]  ;;  %v1432_v50 = vld [vmem:[%s14564_s1 + $0xcc8] sm:$0xff] }
 0x441   : > { %v1929_v13 = vadd.f32 %v1928_v7, %v1891_v8  ;;  %2330 = vmatmul.f32.gmra.mxu0 %v8230_v31  ;;  %2368 = vmatmul.f32.gmra.mxu1 %v8234_v60  ;;  %v1429_v56 = vld [vmem:[%s14564_s1 + $0xcb0] sm:$0xff] }
 0x442   : > { %2406 = vmatmul.f32.gmra.mxu2 %v8554_v38  ;;  %2444 = vmatmul.f32.gmra.mxu3 %v8558_v40 }
 0x443   : > { %2474 = vmatpush.msrb.mxu0 %v1324_v23  ;;  %2545 = vmatpush.msrb.mxu2 %v1435_v44  ;;  %v1477_v23 = vld [vmem:[%s14564_s1 + $0xe30] sm:$0xff]  ;;  %v1315_v44 = vld [vmem:[%s14564_s1 + $0x920] sm:$0xff] }
 0x444   : > { %2583 = vmatpush.msrb.mxu3 %v1483_v54  ;;  %v1426_v54 = vld [vmem:[%s14564_s1 + $0xc98] sm:$0xff] }
 0x445   : > { %v1966_v57 = vpop.f32.mrf.mxu2  ;;  %v2004_v28 = vpop.f32.mrf.mxu3  ;;  %2475 = vmatpush.msrb.mxu0 %v1321_v45  ;;  %2546 = vmatpush.msrb.mxu2 %v1432_v50 }
 0x446   : > { %v1967_v0 = vadd.f32 %v1966_v57, %v1929_v13  ;;  %v2024_v7 = vpop.f32.mrf.mxu0  ;;  %v2062_v8 = vpop.f32.mrf.mxu1  ;;  %2584 = vmatpush.msrb.mxu3 %v1480_v11  ;;  %v1474_v57 = vld [vmem:[%s14564_s1 + $0xe18] sm:$0xff]  ;;  %v1423_v11 = vld [vmem:[%s14564_s1 + $0xc80] sm:$0xff] }
 0x447   : > { %v2025_v49 = vadd.f32 %v2024_v7, %v9310_v24  ;;  %v1369_v24 = vld [vmem:[%s14564_s1 + $0xad0] sm:$0xff]  ;;  %2476 = vmatpush.msrb.mxu0 %v1318_v1  ;;  %2547 = vmatpush.msrb.mxu2 %v1429_v56  ;;  %v1420_v56 = vld [vmem:[%s14564_s1 + $0xc68] sm:$0xff] }
 0x448   : > { %v9538_v16 = vadd.f32 %v2004_v28, %v1967_v0  ;;  %2513 = vmatpush.msrb.mxu1 %v1369_v24  ;;  %2585 = vmatpush.msrb.mxu3 %v1477_v23  ;;  %v1471_v24 = vld [vmem:[%s14564_s1 + $0xe00] sm:$0xff]  ;;  %v1468_v23 = vld [vmem:[%s14564_s1 + $0xde8] sm:$0xff] }
 0x449   : > { %v2063_v13 = vadd.f32 %v2062_v8, %v2025_v49  ;;  %2333 = vmatmul.f32.gmra.mxu0 %v8280_v17  ;;  %2371 = vmatmul.f32.gmra.mxu1 %v8284_v5 }
 0x44a   : > { %2409 = vmatmul.f32.gmra.mxu2 %v8604_v33  ;;  %2447 = vmatmul.f32.gmra.mxu3 %v8608_v52 }
 0x44b   : > { %2514 = vmatpush.msrb.mxu1 %v1366_v63  ;;  %2477 = vmatpush.msrb.mxu0 %v1315_v44  ;;  %v1360_v63 = vld [vmem:[%s14564_s1 + $0xa88] sm:$0xff]  ;;  %v1549_v44 = vld [vmem:[%s14564_s1 + $0x1070] sm:$0xff] }
 0x44c   : > { %2548 = vmatpush.msrb.mxu2 %v1426_v54  ;;  %2586 = vmatpush.msrb.mxu3 %v1474_v57  ;;  %v1417_v54 = vld [vmem:[%s14564_s1 + $0xc50] sm:$0xff] }
 0x44d   : > { %v2100_v28 = vpop.f32.mrf.mxu2  ;;  %v2138_v45 = vpop.f32.mrf.mxu3  ;;  %v1465_v57 = vld [vmem:[%s14564_s1 + $0xdd0] sm:$0xff] }
 0x44e   : > { %v2101_v0 = vadd.f32 %v2100_v28, %v2063_v13  ;;  %v2027_v7 = vpop.f32.mrf.mxu0  ;;  %v2065_v8 = vpop.f32.mrf.mxu1  ;;  %v1312_v13 = vld [vmem:[%s14564_s1 + $0x908] sm:$0xff]  ;;  %2549 = vmatpush.msrb.mxu2 %v1423_v11  ;;  %2587 = vmatpush.msrb.mxu3 %v1471_v24 }
 0x44f   : > { %v2028_v49 = vadd.f32 %v2027_v7, %v9358_v21  ;;  %v1363_v21 = vld [vmem:[%s14564_s1 + $0xaa0] sm:$0xff]  ;;  %2478 = vmatpush.msrb.mxu0 %v1312_v13  ;;  %v1462_v13 = vld [vmem:[%s14564_s1 + $0xdb8] sm:$0xff] }
 0x450   : > { %v9575_v50 = vadd.f32 %v2138_v45, %v2101_v0  ;;  %2515 = vmatpush.msrb.mxu1 %v1363_v21  ;;  %2550 = vmatpush.msrb.mxu2 %v1420_v56  ;;  %v1597_v0 = vld [vmem:[%s14564_s1 + $0x11f0] sm:$0xff]  ;;  %v1414_v21 = vld [vmem:[%s14564_s1 + $0xc38] sm:$0xff] }
 0x451   : > { %v2066_v1 = vadd.f32 %v2065_v8, %v2028_v49  ;;  %2336 = vmatmul.f32.gmra.mxu0 %v8333_v51  ;;  %2374 = vmatmul.f32.gmra.mxu1 %v8337_v59  ;;  %v1594_v56 = vld [vmem:[%s14564_s1 + $0x11d8] sm:$0xff] }
 0x452   : > { %2412 = vmatmul.f32.gmra.mxu2 %v8657_v20  ;;  %2450 = vmatmul.f32.gmra.mxu3 %v8661_v32  ;;  %v15110_v20 = vld [vmem:[#allocation13_spill] sm:$0xff] }
 0x453   : > { %2588 = vmatpush.msrb.mxu3 %v1468_v23  ;;  %2516 = vmatpush.msrb.mxu1 %v1360_v63  ;;  %v1411_v23 = vld [vmem:[%s14564_s1 + $0xc20] sm:$0xff] }
 0x454   : > { %2615 = vmatpush.msra.mxu0 %v1549_v44  ;;  %2551 = vmatpush.msrb.mxu2 %v1417_v54  ;;  %v1459_v63 = vld [vmem:[%s14564_s1 + $0xda0] sm:$0xff] }
 0x455   : > { %v2103_v28 = vpop.f32.mrf.mxu2  ;;  %v2141_v45 = vpop.f32.mrf.mxu3  ;;  %2589 = vmatpush.msrb.mxu3 %v1465_v57  ;;  %2653 = vmatpush.msra.mxu1 %v1597_v0  ;;  %v1543_v44 = vld [vmem:[%s14564_s1 + $0x1040] sm:$0xff]  ;;  %v1408_v57 = vld [vmem:[%s14564_s1 + $0xc08] sm:$0xff] }
 0x456   : > { %v2104_v7 = vadd.f32 %v2103_v28, %v2066_v1  ;;  %v2030_v8 = vpop.f32.mrf.mxu0  ;;  %v2068_v49 = vpop.f32.mrf.mxu1  ;;  %2552 = vmatpush.msrb.mxu2 %v1414_v21  ;;  %v1591_v54 = vld [vmem:[%s14564_s1 + $0x11c0] sm:$0xff]  ;;  %v1456_v28 = vld [vmem:[%s14564_s1 + $0xd88] sm:$0xff] }
 0x457   : > { %v2031_v11 = vadd.f32 %v2030_v8, %v9403_v48  ;;  %v1546_v48 = vld [vmem:[%s14564_s1 + $0x1058] sm:$0xff]  ;;  %2590 = vmatpush.msrb.mxu3 %v1462_v13  ;;  %2654 = vmatpush.msra.mxu1 %v1594_v56  ;;  %v1540_v13 = vld [vmem:[%s14564_s1 + $0x1028] sm:$0xff]  ;;  %v1585_v56 = vld [vmem:[%s14564_s1 + $0x1190] sm:$0xff] }
 0x458   : > { %v9615_v24 = vadd.f32 %v2141_v45, %v2104_v7  ;;  %2616 = vmatpush.msra.mxu0 %v1546_v48  ;;  %2553 = vmatpush.msrb.mxu2 %v1411_v23  ;;  %v1534_v23 = vld [vmem:[%s14564_s1 + $0xff8] sm:$0xff] }
 0x459   : > { %v2069_v1 = vadd.f32 %v2068_v49, %v2031_v11  ;;  %2339 = vmatmul.f32.gmra.mxu0 %v8386_v39  ;;  %2377 = vmatmul.f32.gmra.mxu1 %v8390_v6 }
 0x45a   : > { %2415 = vmatmul.f32.gmra.mxu2 %v8710_v19  ;;  %2453 = vmatmul.f32.gmra.mxu3 %v8714_v30 }
 0x45b   : > { %2591 = vmatpush.msrb.mxu3 %v1459_v63  ;;  %2617 = vmatpush.msra.mxu0 %v1543_v44 }
 0x45c   : > { %2655 = vmatpush.msra.mxu1 %v1591_v54  ;;  %2554 = vmatpush.msrb.mxu2 %v1408_v57 }
 0x45d   : > { %v2106_v45 = vpop.f32.mrf.mxu2  ;;  %v2144_v0 = vpop.f32.mrf.mxu3  ;;  %2592 = vmatpush.msrb.mxu3 %v1456_v28  ;;  %2618 = vmatpush.msra.mxu0 %v1540_v13  ;;  %v15090_v13 = vld [vmem:[#allocation32_spill] sm:$0xff] }
 0x45e   : > { %v2107_v7 = vadd.f32 %v2106_v45, %v2069_v1  ;;  %v2033_v8 = vpop.f32.mrf.mxu0  ;;  %v2071_v49 = vpop.f32.mrf.mxu1  ;;  %v1537_v1 = vld [vmem:[%s14564_s1 + $0x1010] sm:$0xff] }
 0x45f   : > { %v2034_v11 = vadd.f32 %v2033_v8, %v9433_v18  ;;  %v1588_v18 = vld [vmem:[%s14564_s1 + $0x11a8] sm:$0xff]  ;;  %2619 = vmatpush.msra.mxu0 %v1537_v1  ;;  %v1645_v1 = vld [vmem:[%s14564_s1 + $0x1370] sm:$0xff] }
 0x460   : > { %v9652_v21 = vadd.f32 %v2144_v0, %v2107_v7  ;;  %2656 = vmatpush.msra.mxu1 %v1588_v18  ;;  %v1582_v7 = vld [vmem:[%s14564_s1 + $0x1178] sm:$0xff]  ;;  %v1528_v18 = vld [vmem:[%s14564_s1 + $0xfc8] sm:$0xff]  ;;  %2691 = vmatpush.msra.mxu2 %v1645_v1 }
 0x461   : > { %v2072_v48 = vadd.f32 %v2071_v49, %v2034_v11  ;;  %2342 = vmatmul.f32.gmra.mxu0 %v8424_v3  ;;  %2380 = vmatmul.f32.gmra.mxu1 %v8428_v29  ;;  %v15088_v49 = vld [vmem:[#allocation50_spill] sm:$0xff]  ;;  %v15089_v11 = vld [vmem:[#allocation31_spill] sm:$0xff] }
 0x462   : > { %2418 = vmatmul.f32.gmra.mxu2 %v8742_v4  ;;  %2456 = vmatmul.f32.gmra.mxu3 %v8746_v42  ;;  %v15093_v1 = vld [vmem:[#allocation59_spill] sm:$0xff] }
 0x463   : > { %2657 = vmatpush.msra.mxu1 %v1585_v56  ;;  %2620 = vmatpush.msra.mxu0 %v1534_v23  ;;  %v1693_v56 = vld [vmem:[%s14564_s1 + $0x14f0] sm:$0xff] }
 0x464   : > { %2729 = vmatpush.msra.mxu3 %v1693_v56  ;;  %v15094_v56 = vld [vmem:[#allocation60_spill] sm:$0xff] }
 0x465   : > { %v2109_v63 = vpop.f32.mrf.mxu2  ;;  %v2147_v44 = vpop.f32.mrf.mxu3  ;;  %2658 = vmatpush.msra.mxu1 %v1582_v7  ;;  %v1576_v7 = vld [vmem:[%s14564_s1 + $0x1148] sm:$0xff] }
 0x466   : > { %v2110_v54 = vadd.f32 %v2109_v63, %v2072_v48  ;;  %v2036_v57 = vpop.f32.mrf.mxu0  ;;  %v2074_v28 = vpop.f32.mrf.mxu1  ;;  %v1579_v48 = vld [vmem:[%s14564_s1 + $0x1160] sm:$0xff] }
 0x467   : > { %v2037_v45 = vadd.f32 %v2036_v57, %v9458_v46  ;;  %v1531_v46 = vld [vmem:[%s14564_s1 + $0xfe0] sm:$0xff]  ;;  %2659 = vmatpush.msra.mxu1 %v1579_v48 }
 0x468   : > { %v9674_v0 = vadd.f32 %v2147_v44, %v2110_v54  ;;  %2621 = vmatpush.msra.mxu0 %v1531_v46  ;;  %v1642_v46 = vld [vmem:[%s14564_s1 + $0x1358] sm:$0xff] }
 0x469   : > { %v2075_v8 = vadd.f32 %v2074_v28, %v2037_v45  ;;  %2345 = vmatmul.f32.gmra.mxu0 %v8459_v34  ;;  %2383 = vmatmul.f32.gmra.mxu1 %v15088_v49  ;;  %v15091_v48 = vld [vmem:[#allocation51_spill] sm:$0xff] }
 0x46a   : > { %2421 = vmatmul.f32.gmra.mxu2 %v15089_v11  ;;  %2459 = vmatmul.f32.gmra.mxu3 %v15090_v13 }
 0x46b   : > { %2622 = vmatpush.msra.mxu0 %v1528_v18  ;;  %v1690_v18 = vld [vmem:[%s14564_s1 + $0x14d8] sm:$0xff]  ;;  %2660 = vmatpush.msra.mxu1 %v1576_v7 }
 0x46c   : > { %2692 = vmatpush.msra.mxu2 %v1642_v46  ;;  %2730 = vmatpush.msra.mxu3 %v1690_v18  ;;  %v1684_v46 = vld [vmem:[%s14564_s1 + $0x14a8] sm:$0xff]  ;;  %v1570_v18 = vld [vmem:[%s14564_s1 + $0x1118] sm:$0xff] }
 0x46d   : > { %v2112_v23 = vpop.f32.mrf.mxu2  ;;  %v2150_v63 = vpop.f32.mrf.mxu3 }
 0x46e   : > { %v2113_v44 = vadd.f32 %v2112_v23, %v2075_v8  ;;  %v2039_v54 = vpop.f32.mrf.mxu0  ;;  %v2077_v57 = vpop.f32.mrf.mxu1  ;;  %v15092_v8 = vld [vmem:[#allocation52_spill] sm:$0xff] }
 0x46f   : > { %v2040_v28 = vadd.f32 %v2039_v54, %v9498_v15  ;;  %v1525_v15 = vld [vmem:[%s14564_s1 + $0xfb0] sm:$0xff]  ;;  %v1639_v23 = vld [vmem:[%s14564_s1 + $0x1340] sm:$0xff]  ;;  %v1636_v54 = vld [vmem:[%s14564_s1 + $0x1328] sm:$0xff] }
 0x470   : > { %v9699_v45 = vadd.f32 %v2150_v63, %v2113_v44  ;;  %v1687_v63 = vld [vmem:[%s14564_s1 + $0x14c0] sm:$0xff]  ;;  %v1573_v44 = vld [vmem:[%s14564_s1 + $0x1130] sm:$0xff]  ;;  %2623 = vmatpush.msra.mxu0 %v1525_v15  ;;  %2693 = vmatpush.msra.mxu2 %v1639_v23 }
 0x471   : > { %v2078_v13 = vadd.f32 %v2077_v57, %v2040_v28  ;;  %2479 = vmatmul.f32.vlgmr.msrb.gmra.mxu0 %v15091_v48  ;;  %2517 = vmatmul.f32.vlgmr.msrb.gmra.mxu1 %v15092_v8  ;;  %v1522_v57 = vld [vmem:[%s14564_s1 + $0xf98] sm:$0xff]  ;;  %v1633_v23 = vld [vmem:[%s14564_s1 + $0x1310] sm:$0xff] }
 0x472   : > { %2555 = vmatmul.f32.vlgmr.msrb.gmra.mxu2 %v15093_v1  ;;  %2593 = vmatmul.f32.vlgmr.msrb.gmra.mxu3 %v15094_v56 }
 0x473   : > { %2661 = vmatpush.msra.mxu1 %v1573_v44  ;;  %2731 = vmatpush.msra.mxu3 %v1687_v63  ;;  %v1681_v44 = vld [vmem:[%s14564_s1 + $0x1490] sm:$0xff] }
 0x474   : > { %2624 = vmatpush.msra.mxu0 %v1522_v57  ;;  %2694 = vmatpush.msra.mxu2 %v1636_v54  ;;  %v15096_v63 = vld [vmem:[#allocation54_spill] sm:$0xff] }
 0x475   : > { %v2115_v28 = vpop.f32.mrf.mxu2  ;;  %v2153_v7 = vpop.f32.mrf.mxu3  ;;  %2662 = vmatpush.msra.mxu1 %v1570_v18  ;;  %2732 = vmatpush.msra.mxu3 %v1684_v46  ;;  %v15098_v54 = vld [vmem:[#allocation66_spill] sm:$0xff]  ;;  %v1675_v46 = vld [vmem:[%s14564_s1 + $0x1460] sm:$0xff]  ;;  %v1516_v18 = vld [vmem:[%s14564_s1 + $0xf68] sm:$0xff] }
 0x476   : > { %v2116_v15 = vadd.f32 %v2115_v28, %v2078_v13  ;;  %v2042_v56 = vpop.f32.mrf.mxu0  ;;  %v2080_v1 = vpop.f32.mrf.mxu1  ;;  %v15095_v28 = vld [vmem:[#allocation53_spill] sm:$0xff]  ;;  %v1630_v57 = vld [vmem:[%s14564_s1 + $0x12f8] sm:$0xff]  ;;  %2695 = vmatpush.msra.mxu2 %v1633_v23 }
 0x477   : > { %v2043_v11 = vadd.f32 %v2042_v56, %v9538_v16  ;;  %v1519_v16 = vld [vmem:[%s14564_s1 + $0xf80] sm:$0xff]  ;;  %v15097_v56 = vld [vmem:[#allocation65_spill] sm:$0xff]  ;;  %2733 = vmatpush.msra.mxu3 %v1681_v44 }
 0x478   : > { %v9739_v42 = vadd.f32 %v2153_v7, %v2116_v15  ;;  %2625 = vmatpush.msra.mxu0 %v1519_v16  ;;  %v1627_v7 = vld [vmem:[%s14564_s1 + $0x12e0] sm:$0xff]  ;;  %2696 = vmatpush.msra.mxu2 %v1630_v57  ;;  %v1564_v44 = vld [vmem:[%s14564_s1 + $0x10e8] sm:$0xff] }
 0x479   : > { %v2081_v13 = vadd.f32 %v2080_v1, %v2043_v11  ;;  %2482 = vmatmul.f32.gmra.mxu0 %v15095_v28  ;;  %2520 = vmatmul.f32.gmra.mxu1 %v15096_v63  ;;  %v1678_v11 = vld [vmem:[%s14564_s1 + $0x1478] sm:$0xff]  ;;  %v1567_v1 = vld [vmem:[%s14564_s1 + $0x1100] sm:$0xff]  ;;  %v1624_v57 = vld [vmem:[%s14564_s1 + $0x12c8] sm:$0xff] }
 0x47a   : > { %2558 = vmatmul.f32.gmra.mxu2 %v15097_v56  ;;  %2596 = vmatmul.f32.gmra.mxu3 %v15098_v54  ;;  %v1513_v56 = vld [vmem:[%s14564_s1 + $0xf50] sm:$0xff] }
 0x47b   : > { %2663 = vmatpush.msra.mxu1 %v1567_v1  ;;  %2734 = vmatpush.msra.mxu3 %v1678_v11 }
 0x47c   : > { %2626 = vmatpush.msra.mxu0 %v1516_v18  ;;  %2697 = vmatpush.msra.mxu2 %v1627_v7  ;;  %v15100_v18 = vld [vmem:[#allocation55_spill] sm:$0xff] }
 0x47d   : > { %v2118_v15 = vpop.f32.mrf.mxu2  ;;  %v2156_v23 = vpop.f32.mrf.mxu3  ;;  %2664 = vmatpush.msra.mxu1 %v1564_v44  ;;  %2735 = vmatpush.msra.mxu3 %v1675_v46  ;;  %v15102_v7 = vld [vmem:[#allocation71_spill] sm:$0xff]  ;;  %v15103_v46 = vld [vmem:[#allocation72_spill] sm:$0xff] }
 0x47e   : > { %v2119_v16 = vadd.f32 %v2118_v15, %v2081_v13  ;;  %v2176_v1 = vpop.f32.mrf.mxu0  ;;  %v2214_v54 = vpop.f32.mrf.mxu1  ;;  %v1672_v13 = vld [vmem:[%s14564_s1 + $0x1448] sm:$0xff]  ;;  %2627 = vmatpush.msra.mxu0 %v1513_v56  ;;  %v1669_v56 = vld [vmem:[%s14564_s1 + $0x1430] sm:$0xff]  ;;  %2698 = vmatpush.msra.mxu2 %v1624_v57 }
 0x47f   : > { %v2177_v4 = vadd.f32 %v2176_v1, %v9575_v50  ;;  %v15101_v15 = vld [vmem:[#allocation56_spill] sm:$0xff]  ;;  %v1561_v50 = vld [vmem:[%s14564_s1 + $0x10d0] sm:$0xff]  ;;  %2736 = vmatpush.msra.mxu3 %v1672_v13  ;;  %v1666_v1 = vld [vmem:[%s14564_s1 + $0x1418] sm:$0xff] }
 0x480   : > { %v9779_v30 = vadd.f32 %v2156_v23, %v2119_v16  ;;  %v6662_v23 = vld [vmem:[%s14565_s2] sm:$0x7]  ;;  %v1618_v16 = vld [vmem:[%s14564_s1 + $0x1298] sm:$0xff]  ;;  %2665 = vmatpush.msra.mxu1 %v1561_v50 }
 0x481   : > { %v9787_v11 = vadd.f32 %v2214_v54, %v2177_v4  ;;  %2485 = vmatmul.f32.gmra.mxu0 %v15100_v18  ;;  %2523 = vmatmul.f32.gmra.mxu1 %v15101_v15  ;;  %v9799_v44 = vperm.slane %v6662_v23, 1  ;;  %v1621_v4 = vld [vmem:[%s14564_s1 + $0x12b0] sm:$0xff]  ;;  %v1510_v54 = vld [vmem:[%s14564_s1 + $0xf38] sm:$0xff] }
 0x482   : > { %2561 = vmatmul.f32.gmra.mxu2 %v15102_v7  ;;  %2599 = vmatmul.f32.gmra.mxu3 %v15103_v46  ;;  %v1558_v23 = vld [vmem:[%s14564_s1 + $0x10b8] sm:$0xff] }
 0x483   : > { %15099 = vst [vmem:[#allocation39_spill] sm:$0xff] %v9787_v11  ;;  %2628 = vmatpush.msra.mxu0 %v1510_v54  ;;  %2699 = vmatpush.msra.mxu2 %v1621_v4  ;;  %v1507_v11 = vld [vmem:[%s14564_s1 + $0xf20] sm:$0xff] }
 0x484   : > { %2737 = vmatpush.msra.mxu3 %v1669_v56  ;;  %2666 = vmatpush.msra.mxu1 %v1558_v23  ;;  %v1615_v4 = vld [vmem:[%s14564_s1 + $0x1280] sm:$0xff]  ;;  %v15106_v23 = vld [vmem:[#allocation78_spill] sm:$0xff] }
 0x485   : > { %v2252_v57 = vpop.f32.mrf.mxu2  ;;  %v2290_v13 = vpop.f32.mrf.mxu3  ;;  %2629 = vmatpush.msra.mxu0 %v1507_v11  ;;  %2700 = vmatpush.msra.mxu2 %v1618_v16  ;;  %v1663_v56 = vld [vmem:[%s14564_s1 + $0x1400] sm:$0xff]  ;;  %v15107_v11 = vld [vmem:[#allocation6_spill] sm:$0xff]  ;;  %v1504_v16 = vld [vmem:[%s14564_s1 + $0xf08] sm:$0xff] }
 0x486   : > { %v2253_v46 = vadd.f32 %v2252_v57, %v9799_v44  ;;  %v2179_v7 = vpop.f32.mrf.mxu0  ;;  %v2217_v19 = vpop.f32.mrf.mxu1  ;;  %2738 = vmatpush.msra.mxu3 %v1666_v1  ;;  %v15105_v57 = vld [vmem:[#allocation77_spill] sm:$0xff] }
 0x487   : > { %v2180_v50 = vadd.f32 %v2179_v7, %v9615_v24  ;;  %v1555_v24 = vld [vmem:[%s14564_s1 + $0x10a0] sm:$0xff]  ;;  %2701 = vmatpush.msra.mxu2 %v1615_v4  ;;  %v1609_v1 = vld [vmem:[%s14564_s1 + $0x1250] sm:$0xff]  ;;  %2630 = vmatpush.msra.mxu0 %v1504_v16 }
 0x488   : > { %v9824_v54 = vadd.f32 %v2290_v13, %v2253_v46  ;;  %v15108_v7 = vld [vmem:[#allocation7_spill] sm:$0xff]  ;;  %v1612_v46 = vld [vmem:[%s14564_s1 + $0x1268] sm:$0xff]  ;;  %2739 = vmatpush.msra.mxu3 %v1663_v56  ;;  %v1657_v13 = vld [vmem:[%s14564_s1 + $0x13d0] sm:$0xff]  ;;  %2667 = vmatpush.msra.mxu1 %v1555_v24 }
 0x489   : > { %v9832_v32 = vadd.f32 %v2217_v19, %v2180_v50  ;;  %2488 = vmatmul.f32.gmra.mxu0 %v15105_v57  ;;  %2526 = vmatmul.f32.gmra.mxu1 %v15106_v23  ;;  %v1660_v19 = vld [vmem:[%s14564_s1 + $0x13e8] sm:$0xff]  ;;  %v1654_v57 = vld [vmem:[%s14564_s1 + $0x13b8] sm:$0xff] }
 0x48a   : > { %2564 = vmatmul.f32.gmra.mxu2 %v15107_v11  ;;  %2602 = vmatmul.f32.gmra.mxu3 %v15108_v7  ;;  %v1552_v50 = vld [vmem:[%s14564_s1 + $0x1088] sm:$0xff]  ;;  %v1118_v7 = vld [vmem:[%s14564_s1 + $0x2f8] sm:$0xff] }
 0x48b   : > { %15104 = vst [vmem:[#allocation50_spill] sm:$0xff] %v9832_v32  ;;  %2702 = vmatpush.msra.mxu2 %v1612_v46  ;;  %2740 = vmatpush.msra.mxu3 %v1660_v19  ;;  %v1070_v32 = vld [vmem:[%s14564_s1 + $0x178] sm:$0xff] }
 0x48c   : > { %2668 = vmatpush.msra.mxu1 %v1552_v50  ;;  %2767 = vmatpush.msrb.mxu0 %v1070_v32  ;;  %v1606_v19 = vld [vmem:[%s14564_s1 + $0x1238] sm:$0xff]  ;;  %v1064_v50 = vld [vmem:[%s14564_s1 + $0x148] sm:$0xff] }
 0x48d   : > { %v2255_v4 = vpop.f32.mrf.mxu2  ;;  %v2293_v56 = vpop.f32.mrf.mxu3  ;;  %2703 = vmatpush.msra.mxu2 %v1609_v1  ;;  %2741 = vmatpush.msra.mxu3 %v1657_v13  ;;  %v15111_v32 = vld [vmem:[#allocation14_spill] sm:$0xff]  ;;  %v15113_v1 = vld [vmem:[#allocation16_spill] sm:$0xff] }
 0x48e   : > { %v2256_v11 = vadd.f32 %v2255_v4, %v9799_v44  ;;  %v2182_v24 = vpop.f32.mrf.mxu0  ;;  %v2220_v16 = vpop.f32.mrf.mxu1  ;;  %2805 = vmatpush.msrb.mxu1 %v1118_v7  ;;  %v1603_v13 = vld [vmem:[%s14564_s1 + $0x1220] sm:$0xff] }
 0x48f   : > { %v2183_v23 = vadd.f32 %v2182_v24, %v9652_v21  ;;  %v1067_v21 = vld [vmem:[%s14564_s1 + $0x160] sm:$0xff]  ;;  %2704 = vmatpush.msra.mxu2 %v1606_v19  ;;  %2742 = vmatpush.msra.mxu3 %v1654_v57  ;;  %v1600_v24 = vld [vmem:[%s14564_s1 + $0x1208] sm:$0xff] }
 0x490   : > { %v9867_v46 = vadd.f32 %v2293_v56, %v2256_v11  ;;  %v15112_v11 = vld [vmem:[#allocation15_spill] sm:$0xff]  ;;  %v1112_v56 = vld [vmem:[%s14564_s1 + $0x2c8] sm:$0xff]  ;;  %2768 = vmatpush.msrb.mxu0 %v1067_v21  ;;  %v1061_v21 = vld [vmem:[%s14564_s1 + $0x130] sm:$0xff] }
 0x491   : > { %v9875_v4 = vadd.f32 %v2220_v16, %v2183_v23  ;;  %2491 = vmatmul.f32.gmra.mxu0 %v15110_v20  ;;  %2529 = vmatmul.f32.gmra.mxu1 %v15111_v32  ;;  %v1651_v23 = vld [vmem:[%s14564_s1 + $0x13a0] sm:$0xff]  ;;  %v1648_v57 = vld [vmem:[%s14564_s1 + $0x1388] sm:$0xff] }
 0x492   : > { %2567 = vmatmul.f32.gmra.mxu2 %v15112_v11  ;;  %2605 = vmatmul.f32.gmra.mxu3 %v15113_v1  ;;  %v1115_v7 = vld [vmem:[%s14564_s1 + $0x2e0] sm:$0xff] }
 0x493   : > { %15109 = vst [vmem:[#allocation51_spill] sm:$0xff] %v9875_v4  ;;  %2806 = vmatpush.msrb.mxu1 %v1115_v7  ;;  %2705 = vmatpush.msra.mxu2 %v1603_v13  ;;  %v15115_v13 = vld [vmem:[#allocation23_spill] sm:$0xff] }
 0x494   : > { %2743 = vmatpush.msra.mxu3 %v1651_v23  ;;  %2769 = vmatpush.msrb.mxu0 %v1064_v50  ;;  %v15116_v23 = vld [vmem:[#allocation24_spill] sm:$0xff]  ;;  %v1109_v50 = vld [vmem:[%s14564_s1 + $0x2b0] sm:$0xff] }
 0x495   : > { %v2258_v16 = vpop.f32.mrf.mxu2  ;;  %v2296_v19 = vpop.f32.mrf.mxu3  ;;  %2807 = vmatpush.msrb.mxu1 %v1112_v56  ;;  %2706 = vmatpush.msra.mxu2 %v1600_v24  ;;  %v15117_v56 = vld [vmem:[#allocation25_spill] sm:$0xff] }
 0x496   : > { %v2259_v4 = vadd.f32 %v2258_v16, %v9799_v44  ;;  %v2185_v1 = vpop.f32.mrf.mxu0  ;;  %v2223_v11 = vpop.f32.mrf.mxu1  ;;  %2744 = vmatpush.msra.mxu3 %v1648_v57  ;;  %2770 = vmatpush.msrb.mxu0 %v1061_v21  ;;  %v1103_v21 = vld [vmem:[%s14564_s1 + $0x280] sm:$0xff] }
 0x497   : > { %v2186_v32 = vadd.f32 %v2185_v1, %v9674_v0  ;;  %v15118_v0 = vld [vmem:[#allocation26_spill] sm:$0xff]  ;;  %2808 = vmatpush.msrb.mxu1 %v1109_v50 }
 0x498   : > { %v9907_v20 = vadd.f32 %v2296_v19, %v2259_v4  ;;  %v1058_v4 = vld [vmem:[%s14564_s1 + $0x118] sm:$0xff] }
 0x499   : > { %v9912_v7 = vadd.f32 %v2223_v11, %v2186_v32  ;;  %2494 = vmatmul.f32.gmra.mxu0 %v15115_v13  ;;  %2532 = vmatmul.f32.gmra.mxu1 %v15116_v23  ;;  %v1106_v32 = vld [vmem:[%s14564_s1 + $0x298] sm:$0xff]  ;;  %v1055_v11 = vld [vmem:[%s14564_s1 + $0x100] sm:$0xff] }
 0x49a   : > { %2570 = vmatmul.f32.gmra.mxu2 %v15117_v56  ;;  %2608 = vmatmul.f32.gmra.mxu3 %v15118_v0  ;;  %v15120_v56 = vld [vmem:[#allocation33_spill] sm:$0xff]  ;;  %v15121_v23 = vld [vmem:[#allocation34_spill] sm:$0xff] }
 0x49b   : > { %15114 = vst [vmem:[#allocation52_spill] sm:$0xff] %v9912_v7  ;;  %2771 = vmatpush.msrb.mxu0 %v1058_v4  ;;  %2809 = vmatpush.msrb.mxu1 %v1106_v32  ;;  %v1052_v4 = vld [vmem:[%s14564_s1 + $0xe8] sm:$0xff]  ;;  %v15122_v32 = vld [vmem:[#allocation35_spill] sm:$0xff] }
 0x49d   : > { %v2261_v1 = vpop.f32.mrf.mxu2  ;;  %v2299_v24 = vpop.f32.mrf.mxu3  ;;  %2772 = vmatpush.msrb.mxu0 %v1055_v11  ;;  %v15123_v11 = vld [vmem:[#allocation36_spill] sm:$0xff]  ;;  %2810 = vmatpush.msrb.mxu1 %v1103_v21 }
 0x49e   : > { %v2262_v57 = vadd.f32 %v2261_v1, %v9799_v44  ;;  %v2188_v16 = vpop.f32.mrf.mxu0  ;;  %v2226_v19 = vpop.f32.mrf.mxu1  ;;  %v1166_v1 = vld [vmem:[%s14564_s1 + $0x478] sm:$0xff]  ;;  %v1163_v21 = vld [vmem:[%s14564_s1 + $0x460] sm:$0xff] }
 0x49f   : > { %v2189_v7 = vadd.f32 %v2188_v16, %v9699_v45  ;;  %v1100_v45 = vld [vmem:[%s14564_s1 + $0x268] sm:$0xff]  ;;  %2773 = vmatpush.msrb.mxu0 %v1052_v4  ;;  %2843 = vmatpush.msrb.mxu2 %v1166_v1 }
 0x4a0   : > { %v9932_v0 = vadd.f32 %v2299_v24, %v2262_v57  ;;  %v1214_v24 = vld [vmem:[%s14564_s1 + $0x5f8] sm:$0xff]  ;;  %2811 = vmatpush.msrb.mxu1 %v1100_v45  ;;  %v15125_v45 = vld [vmem:[#allocation61_spill] sm:$0xff] }
 0x4a1   : > { %v9937_v50 = vadd.f32 %v2226_v19, %v2189_v7  ;;  %2497 = vmatmul.f32.gmra.mxu0 %v15120_v56  ;;  %2535 = vmatmul.f32.gmra.mxu1 %v15121_v23  ;;  %v1049_v7 = vld [vmem:[%s14564_s1 + $0xd0] sm:$0xff]  ;;  %v1208_v1 = vld [vmem:[%s14564_s1 + $0x5c8] sm:$0xff] }
 0x4a2   : > { %2573 = vmatmul.f32.gmra.mxu2 %v15122_v32  ;;  %2611 = vmatmul.f32.gmra.mxu3 %v15123_v11  ;;  %v1097_v56 = vld [vmem:[%s14564_s1 + $0x250] sm:$0xff] }
 0x4a3   : > { %15119 = vst [vmem:[#allocation53_spill] sm:$0xff] %v9937_v50  ;;  %2881 = vmatpush.msrb.mxu3 %v1214_v24  ;;  %2774 = vmatpush.msrb.mxu0 %v1049_v7  ;;  %v15126_v7 = vld [vmem:[#allocation62_spill] sm:$0xff]  ;;  %v1043_v24 = vld [vmem:[%s14564_s1 + $0xa0] sm:$0xff] }
 0x4a4   : > { %2812 = vmatpush.msrb.mxu1 %v1097_v56  ;;  %2844 = vmatpush.msrb.mxu2 %v1163_v21  ;;  %v1205_v21 = vld [vmem:[%s14564_s1 + $0x5b0] sm:$0xff] }
 0x4a5   : > { %v2264_v57 = vpop.f32.mrf.mxu2  ;;  %v2302_v16 = vpop.f32.mrf.mxu3 }
 0x4a6   : > { %v2265_v19 = vadd.f32 %v2264_v57, %v9799_v44  ;;  %v2191_v50 = vpop.f32.mrf.mxu0  ;;  %v2229_v11 = vpop.f32.mrf.mxu1  ;;  %v1157_v57 = vld [vmem:[%s14564_s1 + $0x430] sm:$0xff] }
 0x4a7   : > { %v2192_v32 = vadd.f32 %v2191_v50, %v9739_v42  ;;  %v1211_v42 = vld [vmem:[%s14564_s1 + $0x5e0] sm:$0xff]  ;;  %v1046_v50 = vld [vmem:[%s14564_s1 + $0xb8] sm:$0xff] }
 0x4a8   : > { %v9960_v23 = vadd.f32 %v2302_v16, %v2265_v19  ;;  %2882 = vmatpush.msrb.mxu3 %v1211_v42  ;;  %2775 = vmatpush.msrb.mxu0 %v1046_v50  ;;  %v1091_v16 = vld [vmem:[%s14564_s1 + $0x220] sm:$0xff] }
 0x4a9   : > { %v9968_v4 = vadd.f32 %v2229_v11, %v2192_v32  ;;  %2631 = vmatmul.f32.vlgmr.msra.gmra.mxu0 %v15125_v45  ;;  %2669 = vmatmul.f32.vlgmr.msra.gmra.mxu1 %v15126_v7  ;;  %v1160_v32 = vld [vmem:[%s14564_s1 + $0x448] sm:$0xff]  ;;  %v1094_v11 = vld [vmem:[%s14564_s1 + $0x238] sm:$0xff] }
 0x4aa   : > { %2707 = vmatmul.f32.vlgmr.msra.gmra.mxu2 %v9162_v14  ;;  %2745 = vmatmul.f32.vlgmr.msra.gmra.mxu3 %v9166_v36  ;;  %v15128_v7 = vld [vmem:[#allocation67_spill] sm:$0xff] }
 0x4ab   : > { %15124 = vst [vmem:[#allocation54_spill] sm:$0xff] %v9968_v4  ;;  %2845 = vmatpush.msrb.mxu2 %v1160_v32  ;;  %2813 = vmatpush.msrb.mxu1 %v1094_v11  ;;  %v1154_v32 = vld [vmem:[%s14564_s1 + $0x418] sm:$0xff] }
 0x4ac   : > { %2883 = vmatpush.msrb.mxu3 %v1208_v1  ;;  %2776 = vmatpush.msrb.mxu0 %v1043_v24  ;;  %v1202_v11 = vld [vmem:[%s14564_s1 + $0x598] sm:$0xff]  ;;  %v15129_v1 = vld [vmem:[#allocation68_spill] sm:$0xff] }
 0x4ad   : > { %v2267_v56 = vpop.f32.mrf.mxu2  ;;  %v2305_v19 = vpop.f32.mrf.mxu3  ;;  %2846 = vmatpush.msrb.mxu2 %v1157_v57  ;;  %2814 = vmatpush.msrb.mxu1 %v1091_v16  ;;  %v15130_v24 = vld [vmem:[#allocation70_spill] sm:$0xff]  ;;  %v1199_v57 = vld [vmem:[%s14564_s1 + $0x580] sm:$0xff] }
 0x4ae   : > { %v2268_v4 = vadd.f32 %v2267_v56, %v9799_v44  ;;  %v2194_v42 = vpop.f32.mrf.mxu0  ;;  %v2232_v50 = vpop.f32.mrf.mxu1  ;;  %2884 = vmatpush.msrb.mxu3 %v1205_v21  ;;  %v1037_v16 = vld [vmem:[%s14564_s1 + $0x70] sm:$0xff]  ;;  %v1148_v21 = vld [vmem:[%s14564_s1 + $0x3e8] sm:$0xff] }
 0x4af   : > { %v2195_v36 = vadd.f32 %v2194_v42, %v9779_v30  ;;  %v1040_v30 = vld [vmem:[%s14564_s1 + $0x88] sm:$0xff]  ;;  %2847 = vmatpush.msrb.mxu2 %v1154_v32 }
 0x4b0   : > { %v10003_v14 = vadd.f32 %v2305_v19, %v2268_v4  ;;  %v1088_v4 = vld [vmem:[%s14564_s1 + $0x208] sm:$0xff]  ;;  %2885 = vmatpush.msrb.mxu3 %v1202_v11  ;;  %v1085_v19 = vld [vmem:[%s14564_s1 + $0x1f0] sm:$0xff]  ;;  %2777 = vmatpush.msrb.mxu0 %v1040_v30  ;;  %v1034_v11 = vld [vmem:[%s14564_s1 + $0x58] sm:$0xff] }
 0x4b1   : > { %v10011_v56 = vadd.f32 %v2232_v50, %v2195_v36  ;;  %2634 = vmatmul.f32.gmra.mxu0 %v15128_v7  ;;  %2672 = vmatmul.f32.gmra.mxu1 %v15129_v1  ;;  %v1151_v36 = vld [vmem:[%s14564_s1 + $0x400] sm:$0xff]  ;;  %v1196_v42 = vld [vmem:[%s14564_s1 + $0x568] sm:$0xff] }
 0x4b2   : > { %2710 = vmatmul.f32.gmra.mxu2 %v9210_v53  ;;  %2748 = vmatmul.f32.gmra.mxu3 %v15130_v24 }
 0x4b3   : > { %15127 = vst [vmem:[#allocation55_spill] sm:$0xff] %v10011_v56  ;;  %2815 = vmatpush.msrb.mxu1 %v1088_v4  ;;  %2848 = vmatpush.msrb.mxu2 %v1151_v36  ;;  %v1145_v36 = vld [vmem:[%s14564_s1 + $0x3d0] sm:$0xff] }
 0x4b4   : > { %2886 = vmatpush.msrb.mxu3 %v1199_v57  ;;  %2778 = vmatpush.msrb.mxu0 %v1037_v16  ;;  %v1193_v57 = vld [vmem:[%s14564_s1 + $0x550] sm:$0xff] }
 0x4b5   : > { %v2270_v50 = vpop.f32.mrf.mxu2  ;;  %v2308_v32 = vpop.f32.mrf.mxu3  ;;  %2816 = vmatpush.msrb.mxu1 %v1085_v19  ;;  %2849 = vmatpush.msrb.mxu2 %v1148_v21  ;;  %v15132_v16 = vld [vmem:[#allocation74_spill] sm:$0xff]  ;;  %v15133_v19 = vld [vmem:[#allocation76_spill] sm:$0xff] }
 0x4b6   : > { %v2271_v56 = vadd.f32 %v2270_v50, %v9799_v44  ;;  %v2328_v30 = vpop.f32.mrf.mxu0  ;;  %v2366_v4 = vpop.f32.mrf.mxu1  ;;  %2887 = vmatpush.msrb.mxu3 %v1196_v42  ;;  %2779 = vmatpush.msrb.mxu0 %v1034_v11  ;;  %v15131_v50 = vld [vmem:[#allocation73_spill] sm:$0xff]  ;;  %v1190_v21 = vld [vmem:[%s14564_s1 + $0x538] sm:$0xff]  ;;  %v1079_v42 = vld [vmem:[%s14564_s1 + $0x1c0] sm:$0xff] }
 0x4b7   : > { %v2329_v24 = vadd.f32 %v2328_v30, %v9824_v54  ;;  %v1082_v54 = vld [vmem:[%s14564_s1 + $0x1d8] sm:$0xff]  ;;  %2850 = vmatpush.msrb.mxu2 %v1145_v36  ;;  %v1139_v11 = vld [vmem:[%s14564_s1 + $0x3a0] sm:$0xff] }
 0x4b8   : > { %v10046_v53 = vadd.f32 %v2308_v32, %v2271_v56  ;;  %v1031_v56 = vld [vmem:[%s14564_s1 + $0x40] sm:$0xff]  ;;  %2888 = vmatpush.msrb.mxu3 %v1193_v57  ;;  %v1028_v32 = vld [vmem:[%s14564_s1 + $0x28] sm:$0xff]  ;;  %2817 = vmatpush.msrb.mxu1 %v1082_v54 }
 0x4b9   : > { %v2367_v44 = vadd.f32 %v2366_v4, %v2329_v24  ;;  %2637 = vmatmul.f32.gmra.mxu0 %v15131_v50  ;;  %2675 = vmatmul.f32.gmra.mxu1 %v15132_v16  ;;  %v1142_v24 = vld [vmem:[%s14564_s1 + $0x3b8] sm:$0xff]  ;;  %v1187_v30 = vld [vmem:[%s14564_s1 + $0x520] sm:$0xff]  ;;  %v1136_v54 = vld [vmem:[%s14564_s1 + $0x388] sm:$0xff] }
 0x4ba   : > { %2713 = vmatmul.f32.gmra.mxu2 %v9259_v61  ;;  %2751 = vmatmul.f32.gmra.mxu3 %v15133_v19 }
 0x4bb   : > { %2780 = vmatpush.msrb.mxu0 %v1031_v56  ;;  %2851 = vmatpush.msrb.mxu2 %v1142_v24  ;;  %v1184_v56 = vld [vmem:[%s14564_s1 + $0x508] sm:$0xff] }
 0x4bc   : > { %2889 = vmatpush.msrb.mxu3 %v1190_v21  ;;  %2818 = vmatpush.msrb.mxu1 %v1079_v42  ;;  %v15135_v21 = vld [vmem:[#allocation9_spill] sm:$0xff] }
 0x4bd   : > { %v2404_v4 = vpop.f32.mrf.mxu2  ;;  %v2442_v36 = vpop.f32.mrf.mxu3  ;;  %2781 = vmatpush.msrb.mxu0 %v1028_v32  ;;  %2852 = vmatpush.msrb.mxu2 %v1139_v11  ;;  %v1073_v42 = vld [vmem:[%s14564_s1 + $0x190] sm:$0xff]  ;;  %v1262_v32 = vld [vmem:[%s14564_s1 + $0x778] sm:$0xff] }
 0x4be   : > { %v2405_v57 = vadd.f32 %v2404_v4, %v2367_v44  ;;  %v2331_v19 = vpop.f32.mrf.mxu0  ;;  %v2369_v61 = vpop.f32.mrf.mxu1  ;;  %2890 = vmatpush.msrb.mxu3 %v1187_v30  ;;  %v15134_v44 = vld [vmem:[#allocation8_spill] sm:$0xff]  ;;  %v1130_v11 = vld [vmem:[%s14564_s1 + $0x358] sm:$0xff] }
 0x4bf   : > { %v2332_v16 = vadd.f32 %v2331_v19, %v9867_v46  ;;  %v1076_v46 = vld [vmem:[%s14564_s1 + $0x1a8] sm:$0xff]  ;;  %v1025_v19 = vld [vmem:[%s14564_s1 + $0x10] sm:$0xff]  ;;  %2853 = vmatpush.msrb.mxu2 %v1136_v54  ;;  %v1178_v30 = vld [vmem:[%s14564_s1 + $0x4d8] sm:$0xff] }
 0x4c0   : > { %v10083_v50 = vadd.f32 %v2442_v36, %v2405_v57  ;;  %2891 = vmatpush.msrb.mxu3 %v1184_v56  ;;  %2819 = vmatpush.msrb.mxu1 %v1076_v46  ;;  %v1310_v57 = vld [vmem:[%s14564_s1 + $0x8f8] sm:$0xff]  ;;  %v1127_v46 = vld [vmem:[%s14564_s1 + $0x340] sm:$0xff] }
 0x4c1   : > { %v2370_v24 = vadd.f32 %v2369_v61, %v2332_v16  ;;  %2640 = vmatmul.f32.gmra.mxu0 %v15134_v44  ;;  %2678 = vmatmul.f32.gmra.mxu1 %v15135_v21  ;;  %v1133_v61 = vld [vmem:[%s14564_s1 + $0x370] sm:$0xff] }
 0x4c2   : > { %2716 = vmatmul.f32.gmra.mxu2 %v9304_v43  ;;  %2754 = vmatmul.f32.gmra.mxu3 %v9308_v35  ;;  %v1181_v16 = vld [vmem:[%s14564_s1 + $0x4f0] sm:$0xff] }
 0x4c3   : > { %2782 = vmatpush.msrb.mxu0 %v1025_v19  ;;  %2854 = vmatpush.msrb.mxu2 %v1133_v61  ;;  %v1175_v19 = vld [vmem:[%s14564_s1 + $0x4c0] sm:$0xff]  ;;  %v15136_v61 = vld [vmem:[#allocation17_spill] sm:$0xff] }
 0x4c4   : > { %2892 = vmatpush.msrb.mxu3 %v1181_v16  ;;  %2820 = vmatpush.msrb.mxu1 %v1073_v42  ;;  %v15137_v16 = vld [vmem:[#allocation18_spill] sm:$0xff]  ;;  %v1307_v42 = vld [vmem:[%s14564_s1 + $0x8e0] sm:$0xff] }
 0x4c5   : > { %v2407_v4 = vpop.f32.mrf.mxu2  ;;  %v2445_v36 = vpop.f32.mrf.mxu3  ;;  %2919 = vmatpush.msra.mxu0 %v1262_v32  ;;  %2855 = vmatpush.msrb.mxu2 %v1130_v11  ;;  %v1256_v32 = vld [vmem:[%s14564_s1 + $0x748] sm:$0xff] }
 0x4c6   : > { %v2408_v54 = vadd.f32 %v2407_v4, %v2370_v24  ;;  %v2334_v56 = vpop.f32.mrf.mxu0  ;;  %v2372_v35 = vpop.f32.mrf.mxu1  ;;  %2893 = vmatpush.msrb.mxu3 %v1178_v30  ;;  %2957 = vmatpush.msra.mxu1 %v1310_v57  ;;  %v1304_v11 = vld [vmem:[%s14564_s1 + $0x8c8] sm:$0xff]  ;;  %v1121_v30 = vld [vmem:[%s14564_s1 + $0x310] sm:$0xff] }
 0x4c7   : > { %v2335_v43 = vadd.f32 %v2334_v56, %v9907_v20  ;;  %v1259_v20 = vld [vmem:[%s14564_s1 + $0x760] sm:$0xff]  ;;  %2856 = vmatpush.msrb.mxu2 %v1127_v46  ;;  %v1169_v4 = vld [vmem:[%s14564_s1 + $0x490] sm:$0xff] }
 0x4c8   : > { %v10123_v21 = vadd.f32 %v2445_v36, %v2408_v54  ;;  %2894 = vmatpush.msrb.mxu3 %v1175_v19  ;;  %2920 = vmatpush.msra.mxu0 %v1259_v20  ;;  %v1253_v20 = vld [vmem:[%s14564_s1 + $0x730] sm:$0xff] }
 0x4c9   : > { %v2373_v24 = vadd.f32 %v2372_v35, %v2335_v43  ;;  %2643 = vmatmul.f32.gmra.mxu0 %v15136_v61  ;;  %2681 = vmatmul.f32.gmra.mxu1 %v15137_v16  ;;  %v1124_v35 = vld [vmem:[%s14564_s1 + $0x328] sm:$0xff] }
 0x4ca   : > { %2719 = vmatmul.f32.gmra.mxu2 %v9352_v27  ;;  %2757 = vmatmul.f32.gmra.mxu3 %v9356_v26  ;;  %v1172_v43 = vld [vmem:[%s14564_s1 + $0x4a8] sm:$0xff]  ;;  %v15138_v27 = vld [vmem:[#allocation27_spill] sm:$0xff] }
 0x4cb   : > { %2958 = vmatpush.msra.mxu1 %v1307_v42  ;;  %2857 = vmatpush.msrb.mxu2 %v1124_v35  ;;  %v15139_v35 = vld [vmem:[#allocation28_spill] sm:$0xff] }
 0x4cc   : > { %2895 = vmatpush.msrb.mxu3 %v1172_v43  ;;  %2921 = vmatpush.msra.mxu0 %v1256_v32  ;;  %v1298_v43 = vld [vmem:[%s14564_s1 + $0x898] sm:$0xff]  ;;  %v1247_v32 = vld [vmem:[%s14564_s1 + $0x700] sm:$0xff] }
 0x4cd   : > { %v2410_v36 = vpop.f32.mrf.mxu2  ;;  %v2448_v57 = vpop.f32.mrf.mxu3  ;;  %2959 = vmatpush.msra.mxu1 %v1304_v11  ;;  %2858 = vmatpush.msrb.mxu2 %v1121_v30 }
 0x4ce   : > { %v2411_v54 = vadd.f32 %v2410_v36, %v2373_v24  ;;  %v2337_v56 = vpop.f32.mrf.mxu0  ;;  %v2375_v46 = vpop.f32.mrf.mxu1  ;;  %2896 = vmatpush.msrb.mxu3 %v1169_v4  ;;  %v1301_v24 = vld [vmem:[%s14564_s1 + $0x8b0] sm:$0xff]  ;;  %2922 = vmatpush.msra.mxu0 %v1253_v20 }
 0x4cf   : > { %v2338_v19 = vadd.f32 %v2337_v56, %v9932_v0  ;;  %v1250_v0 = vld [vmem:[%s14564_s1 + $0x718] sm:$0xff]  ;;  %2960 = vmatpush.msra.mxu1 %v1301_v24  ;;  %v15140_v20 = vld [vmem:[#allocation37_spill] sm:$0xff] }
 0x4d0   : > { %v10160_v26 = vadd.f32 %v2448_v57, %v2411_v54  ;;  %2923 = vmatpush.msra.mxu0 %v1250_v0  ;;  %v15141_v24 = vld [vmem:[#allocation38_spill] sm:$0xff] }
 0x4d1   : > { %v2376_v42 = vadd.f32 %v2375_v46, %v2338_v19  ;;  %2646 = vmatmul.f32.gmra.mxu0 %v15138_v27  ;;  %2684 = vmatmul.f32.gmra.mxu1 %v15139_v35  ;;  %v1295_v46 = vld [vmem:[%s14564_s1 + $0x880] sm:$0xff]  ;;  %v1241_v0 = vld [vmem:[%s14564_s1 + $0x6d0] sm:$0xff] }
 0x4d2   : > { %2722 = vmatmul.f32.gmra.mxu2 %v9397_v37  ;;  %2760 = vmatmul.f32.gmra.mxu3 %v9401_v12 }
 0x4d3   : > { %2961 = vmatpush.msra.mxu1 %v1298_v43  ;;  %2924 = vmatpush.msra.mxu0 %v1247_v32  ;;  %v1358_v43 = vld [vmem:[%s14564_s1 + $0xa78] sm:$0xff] }
 0x4d4   : > { %v1406_v32 = vld [vmem:[%s14564_s1 + $0xbf8] sm:$0xff]  ;;  %2995 = vmatpush.msra.mxu2 %v1358_v43  ;;  %v15142_v43 = vld [vmem:[#allocation40_spill] sm:$0xff] }
 0x4d5   : > { %v2413_v11 = vpop.f32.mrf.mxu2  ;;  %v2451_v30 = vpop.f32.mrf.mxu3  ;;  %2962 = vmatpush.msra.mxu1 %v1295_v46  ;;  %3033 = vmatpush.msra.mxu3 %v1406_v32  ;;  %v1355_v46 = vld [vmem:[%s14564_s1 + $0xa60] sm:$0xff]  ;;  %v1286_v32 = vld [vmem:[%s14564_s1 + $0x838] sm:$0xff] }
 0x4d6   : > { %v2414_v4 = vadd.f32 %v2413_v11, %v2376_v42  ;;  %v2340_v36 = vpop.f32.mrf.mxu0  ;;  %v2378_v57 = vpop.f32.mrf.mxu1  ;;  %v1244_v42 = vld [vmem:[%s14564_s1 + $0x6e8] sm:$0xff]  ;;  %2996 = vmatpush.msra.mxu2 %v1355_v46 }
 0x4d7   : > { %v2341_v54 = vadd.f32 %v2340_v36, %v9960_v23  ;;  %v1292_v23 = vld [vmem:[%s14564_s1 + $0x868] sm:$0xff]  ;;  %2925 = vmatpush.msra.mxu0 %v1244_v42 }
 0x4d8   : > { %v10182_v56 = vadd.f32 %v2451_v30, %v2414_v4  ;;  %2963 = vmatpush.msra.mxu1 %v1292_v23  ;;  %v15143_v23 = vld [vmem:[#allocation41_spill] sm:$0xff] }
 0x4d9   : > { %v2379_v19 = vadd.f32 %v2378_v57, %v2341_v54  ;;  %2649 = vmatmul.f32.gmra.mxu0 %v15140_v20  ;;  %2687 = vmatmul.f32.gmra.mxu1 %v15141_v24 }
 0x4da   : > { %2725 = vmatmul.f32.gmra.mxu2 %v9427_v2  ;;  %2763 = vmatmul.f32.gmra.mxu3 %v9431_v41  ;;  %v1289_v2 = vld [vmem:[%s14564_s1 + $0x850] sm:$0xff] }
 0x4db   : > { %2926 = vmatpush.msra.mxu0 %v1241_v0  ;;  %v1352_v0 = vld [vmem:[%s14564_s1 + $0xa48] sm:$0xff]  ;;  %2964 = vmatpush.msra.mxu1 %v1289_v2 }
 0x4dc   : > { %2997 = vmatpush.msra.mxu2 %v1352_v0  ;;  %v15144_v0 = vld [vmem:[#allocation42_spill] sm:$0xff] }
 0x4dd   : > { %v2416_v11 = vpop.f32.mrf.mxu2  ;;  %v2454_v30 = vpop.f32.mrf.mxu3  ;;  %2965 = vmatpush.msra.mxu1 %v1286_v32  ;;  %v15145_v32 = vld [vmem:[#allocation43_spill] sm:$0xff] }
 0x4de   : > { %v2417_v4 = vadd.f32 %v2416_v11, %v2379_v19  ;;  %v2343_v36 = vpop.f32.mrf.mxu0  ;;  %v2381_v57 = vpop.f32.mrf.mxu1  ;;  %v1403_v19 = vld [vmem:[%s14564_s1 + $0xbe0] sm:$0xff]  ;;  %v1400_v11 = vld [vmem:[%s14564_s1 + $0xbc8] sm:$0xff] }
 0x4df   : > { %v2344_v54 = vadd.f32 %v2343_v36, %v10003_v14  ;;  %v1238_v14 = vld [vmem:[%s14564_s1 + $0x6b8] sm:$0xff]  ;;  %3034 = vmatpush.msra.mxu3 %v1403_v19  ;;  %v1397_v36 = vld [vmem:[%s14564_s1 + $0xbb0] sm:$0xff] }
 0x4e0   : > { %v10207_v41 = vadd.f32 %v2454_v30, %v2417_v4  ;;  %2927 = vmatpush.msra.mxu0 %v1238_v14  ;;  %v1283_v30 = vld [vmem:[%s14564_s1 + $0x820] sm:$0xff]  ;;  %v1346_v19 = vld [vmem:[%s14564_s1 + $0xa18] sm:$0xff] }
 0x4e1   : > { %v2382_v42 = vadd.f32 %v2381_v57, %v2344_v54  ;;  %2783 = vmatmul.f32.vlgmr.msrb.gmra.mxu0 %v15142_v43  ;;  %2821 = vmatmul.f32.vlgmr.msrb.gmra.mxu1 %v15143_v23  ;;  %v1394_v14 = vld [vmem:[%s14564_s1 + $0xb98] sm:$0xff] }
 0x4e2   : > { %2859 = vmatmul.f32.vlgmr.msrb.gmra.mxu2 %v8177_v25  ;;  %2897 = vmatmul.f32.vlgmr.msrb.gmra.mxu3 %v8181_v9  ;;  %v1235_v25 = vld [vmem:[%s14564_s1 + $0x6a0] sm:$0xff]  ;;  %v1349_v9 = vld [vmem:[%s14564_s1 + $0xa30] sm:$0xff] }
 0x4e3   : > { %3035 = vmatpush.msra.mxu3 %v1400_v11  ;;  %2928 = vmatpush.msra.mxu0 %v1235_v25  ;;  %v1280_v11 = vld [vmem:[%s14564_s1 + $0x808] sm:$0xff]  ;;  %v1343_v25 = vld [vmem:[%s14564_s1 + $0xa00] sm:$0xff] }
 0x4e4   : > { %2998 = vmatpush.msra.mxu2 %v1349_v9  ;;  %2966 = vmatpush.msra.mxu1 %v1283_v30  ;;  %v1391_v9 = vld [vmem:[%s14564_s1 + $0xb80] sm:$0xff]  ;;  %v1229_v30 = vld [vmem:[%s14564_s1 + $0x670] sm:$0xff] }
 0x4e5   : > { %v2419_v2 = vpop.f32.mrf.mxu2  ;;  %v2457_v4 = vpop.f32.mrf.mxu3  ;;  %3036 = vmatpush.msra.mxu3 %v1397_v36 }
 0x4e6   : > { %v2420_v57 = vadd.f32 %v2419_v2, %v2382_v42  ;;  %v2346_v54 = vpop.f32.mrf.mxu0  ;;  %v2384_v46 = vpop.f32.mrf.mxu1  ;;  %2999 = vmatpush.msra.mxu2 %v1346_v19  ;;  %2967 = vmatpush.msra.mxu1 %v1280_v11  ;;  %v1388_v2 = vld [vmem:[%s14564_s1 + $0xb68] sm:$0xff] }
 0x4e7   : > { %v2347_v43 = vadd.f32 %v2346_v54, %v10046_v53  ;;  %v1232_v53 = vld [vmem:[%s14564_s1 + $0x688] sm:$0xff]  ;;  %3037 = vmatpush.msra.mxu3 %v1394_v14 }
 0x4e8   : > { %v10247_v23 = vadd.f32 %v2457_v4, %v2420_v57  ;;  %2929 = vmatpush.msra.mxu0 %v1232_v53  ;;  %3000 = vmatpush.msra.mxu2 %v1343_v25  ;;  %v1226_v57 = vld [vmem:[%s14564_s1 + $0x658] sm:$0xff]  ;;  %v15146_v53 = vld [vmem:[#allocation44_spill] sm:$0xff]  ;;  %v15147_v11 = vld [vmem:[#allocation45_spill] sm:$0xff] }
 0x4e9   : > { %v2385_v42 = vadd.f32 %v2384_v46, %v2347_v43  ;;  %2786 = vmatmul.f32.gmra.mxu0 %v15144_v0  ;;  %2824 = vmatmul.f32.gmra.mxu1 %v15145_v32  ;;  %v1337_v0 = vld [vmem:[%s14564_s1 + $0x9d0] sm:$0xff]  ;;  %v1223_v25 = vld [vmem:[%s14564_s1 + $0x640] sm:$0xff] }
 0x4ea   : > { %2862 = vmatmul.f32.gmra.mxu2 %v8230_v31  ;;  %2900 = vmatmul.f32.gmra.mxu3 %v8234_v60  ;;  %v1277_v31 = vld [vmem:[%s14564_s1 + $0x7f0] sm:$0xff]  ;;  %v1340_v60 = vld [vmem:[%s14564_s1 + $0x9e8] sm:$0xff] }
 0x4eb   : > { %3038 = vmatpush.msra.mxu3 %v1391_v9  ;;  %2930 = vmatpush.msra.mxu0 %v1229_v30  ;;  %v1385_v32 = vld [vmem:[%s14564_s1 + $0xb50] sm:$0xff]  ;;  %v1334_v9 = vld [vmem:[%s14564_s1 + $0x9b8] sm:$0xff] }
 0x4ec   : > { %2968 = vmatpush.msra.mxu1 %v1277_v31  ;;  %3001 = vmatpush.msra.mxu2 %v1340_v60  ;;  %v1382_v30 = vld [vmem:[%s14564_s1 + $0xb38] sm:$0xff]  ;;  %v1271_v31 = vld [vmem:[%s14564_s1 + $0x7c0] sm:$0xff] }
 0x4ed   : > { %v2422_v4 = vpop.f32.mrf.mxu2  ;;  %v2460_v36 = vpop.f32.mrf.mxu3  ;;  %3039 = vmatpush.msra.mxu3 %v1388_v2  ;;  %2931 = vmatpush.msra.mxu0 %v1226_v57  ;;  %v1379_v60 = vld [vmem:[%s14564_s1 + $0xb20] sm:$0xff] }
 0x4ee   : > { %v2423_v54 = vadd.f32 %v2422_v4, %v2385_v42  ;;  %v2480_v46 = vpop.f32.mrf.mxu0  ;;  %v2518_v43 = vpop.f32.mrf.mxu1  ;;  %3002 = vmatpush.msra.mxu2 %v1337_v0  ;;  %v1376_v0 = vld [vmem:[%s14564_s1 + $0xb08] sm:$0xff] }
 0x4ef   : > { %v2481_v19 = vadd.f32 %v2480_v46, %v10083_v50  ;;  %v1274_v50 = vld [vmem:[%s14564_s1 + $0x7d8] sm:$0xff]  ;;  %3040 = vmatpush.msra.mxu3 %v1385_v32  ;;  %2932 = vmatpush.msra.mxu0 %v1223_v25  ;;  %v1373_v25 = vld [vmem:[%s14564_s1 + $0xaf0] sm:$0xff] }
 0x4f0   : > { %v10287_v14 = vadd.f32 %v2460_v36, %v2423_v54  ;;  %2969 = vmatpush.msra.mxu1 %v1274_v50  ;;  %3003 = vmatpush.msra.mxu2 %v1334_v9  ;;  %v1325_v50 = vld [vmem:[%s14564_s1 + $0x970] sm:$0xff] }
 0x4f1   : > { %v2519_v42 = vadd.f32 %v2518_v43, %v2481_v19  ;;  %2789 = vmatmul.f32.gmra.mxu0 %v15146_v53  ;;  %2827 = vmatmul.f32.gmra.mxu1 %v15147_v11  ;;  %v1328_v19 = vld [vmem:[%s14564_s1 + $0x988] sm:$0xff]  ;;  %v15149_v53 = vld [vmem:[#allocation47_spill] sm:$0xff]  ;;  %v1217_v11 = vld [vmem:[%s14564_s1 + $0x610] sm:$0xff] }
 0x4f2   : > { %2865 = vmatmul.f32.gmra.mxu2 %v8280_v17  ;;  %2903 = vmatmul.f32.gmra.mxu3 %v8284_v5  ;;  %v1220_v17 = vld [vmem:[%s14564_s1 + $0x628] sm:$0xff]  ;;  %v1331_v5 = vld [vmem:[%s14564_s1 + $0x9a0] sm:$0xff]  ;;  %v1265_v9 = vld [vmem:[%s14564_s1 + $0x790] sm:$0xff] }
 0x4f3   : > { %3041 = vmatpush.msra.mxu3 %v1382_v30  ;;  %2970 = vmatpush.msra.mxu1 %v1271_v31  ;;  %v1370_v30 = vld [vmem:[%s14564_s1 + $0xad8] sm:$0xff] }
 0x4f4   : > { %2933 = vmatpush.msra.mxu0 %v1220_v17  ;;  %3004 = vmatpush.msra.mxu2 %v1331_v5  ;;  %v1502_v5 = vld [vmem:[%s14564_s1 + $0xef8] sm:$0xff] }
 0x4f5   : > { %v2556_v2 = vpop.f32.mrf.mxu2  ;;  %v2594_v4 = vpop.f32.mrf.mxu3  ;;  %3042 = vmatpush.msra.mxu3 %v1379_v60 }
 0x4f6   : > { %v2557_v36 = vadd.f32 %v2556_v2, %v2519_v42  ;;  %v2483_v57 = vpop.f32.mrf.mxu0  ;;  %v2521_v54 = vpop.f32.mrf.mxu1  ;;  %v15148_v42 = vld [vmem:[#allocation46_spill] sm:$0xff]  ;;  %3005 = vmatpush.msra.mxu2 %v1328_v19  ;;  %2934 = vmatpush.msra.mxu0 %v1217_v11  ;;  %v1448_v11 = vld [vmem:[%s14564_s1 + $0xd48] sm:$0xff] }
 0x4f7   : > { %v2484_v46 = vadd.f32 %v2483_v57, %v10123_v21  ;;  %v1268_v21 = vld [vmem:[%s14564_s1 + $0x7a8] sm:$0xff]  ;;  %3043 = vmatpush.msra.mxu3 %v1376_v0 }
 0x4f8   : > { %v10324_v43 = vadd.f32 %v2594_v4, %v2557_v36  ;;  %2971 = vmatpush.msra.mxu1 %v1268_v21  ;;  %3006 = vmatpush.msra.mxu2 %v1325_v50  ;;  %v15150_v0 = vld [vmem:[#allocation48_spill] sm:$0xff]  ;;  %v1361_v50 = vld [vmem:[%s14564_s1 + $0xa90] sm:$0xff] }
 0x4f9   : > { %v2522_v32 = vadd.f32 %v2521_v54, %v2484_v46  ;;  %2792 = vmatmul.f32.gmra.mxu0 %v15148_v42  ;;  %2830 = vmatmul.f32.gmra.mxu1 %v15149_v53  ;;  %v1319_v54 = vld [vmem:[%s14564_s1 + $0x940] sm:$0xff]  ;;  %v1316_v53 = vld [vmem:[%s14564_s1 + $0x928] sm:$0xff] }
 0x4fa   : > { %2868 = vmatmul.f32.gmra.mxu2 %v8333_v51  ;;  %2906 = vmatmul.f32.gmra.mxu3 %v8337_v59  ;;  %v1454_v51 = vld [vmem:[%s14564_s1 + $0xd78] sm:$0xff]  ;;  %v1367_v46 = vld [vmem:[%s14564_s1 + $0xac0] sm:$0xff]  ;;  %v1364_v21 = vld [vmem:[%s14564_s1 + $0xaa8] sm:$0xff] }
 0x4fb   : > { %v1322_v59 = vld [vmem:[%s14564_s1 + $0x958] sm:$0xff]  ;;  %3044 = vmatpush.msra.mxu3 %v1373_v25  ;;  %2972 = vmatpush.msra.mxu1 %v1265_v9  ;;  %v1499_v42 = vld [vmem:[%s14564_s1 + $0xee0] sm:$0xff] }
 0x4fc   : > { %3071 = vmatpush.msrb.mxu0 %v1454_v51  ;;  %3007 = vmatpush.msra.mxu2 %v1322_v59 }
 0x4fd   : > { %v2559_v31 = vpop.f32.mrf.mxu2  ;;  %v2597_v17 = vpop.f32.mrf.mxu3  ;;  %3045 = vmatpush.msra.mxu3 %v1370_v30  ;;  %3109 = vmatpush.msrb.mxu1 %v1502_v5  ;;  %v1445_v5 = vld [vmem:[%s14564_s1 + $0xd30] sm:$0xff] }
 0x4fe   : > { %v2560_v60 = vadd.f32 %v2559_v31, %v2522_v32  ;;  %v2486_v2 = vpop.f32.mrf.mxu0  ;;  %v2524_v4 = vpop.f32.mrf.mxu1  ;;  %v15151_v32 = vld [vmem:[#allocation49_spill] sm:$0xff]  ;;  %3008 = vmatpush.msra.mxu2 %v1319_v54 }
 0x4ff   : > { %v2487_v36 = vadd.f32 %v2486_v2, %v10160_v26  ;;  %v1451_v26 = vld [vmem:[%s14564_s1 + $0xd60] sm:$0xff]  ;;  %3046 = vmatpush.msra.mxu3 %v1367_v46  ;;  %3110 = vmatpush.msrb.mxu1 %v1499_v42  ;;  %v1493_v2 = vld [vmem:[%s14564_s1 + $0xeb0] sm:$0xff] }
 0x500   : > { %v10364_v57 = vadd.f32 %v2597_v17, %v2560_v60  ;;  %3072 = vmatpush.msrb.mxu0 %v1451_v26  ;;  %3009 = vmatpush.msra.mxu2 %v1316_v53  ;;  %v1484_v26 = vld [vmem:[%s14564_s1 + $0xe68] sm:$0xff] }
 0x501   : > { %v2525_v19 = vadd.f32 %v2524_v4, %v2487_v36  ;;  %2795 = vmatmul.f32.gmra.mxu0 %v15150_v0  ;;  %2833 = vmatmul.f32.gmra.mxu1 %v15151_v32  ;;  %v1490_v4 = vld [vmem:[%s14564_s1 + $0xe98] sm:$0xff]  ;;  %v1487_v32 = vld [vmem:[%s14564_s1 + $0xe80] sm:$0xff] }
 0x502   : > { %2871 = vmatmul.f32.gmra.mxu2 %v8386_v39  ;;  %2909 = vmatmul.f32.gmra.mxu3 %v8390_v6  ;;  %v1496_v39 = vld [vmem:[%s14564_s1 + $0xec8] sm:$0xff]  ;;  %v1313_v6 = vld [vmem:[%s14564_s1 + $0x910] sm:$0xff] }
 0x503   : > { %3047 = vmatpush.msra.mxu3 %v1364_v21  ;;  %3073 = vmatpush.msrb.mxu0 %v1448_v11 }
 0x504   : > { %3111 = vmatpush.msrb.mxu1 %v1496_v39  ;;  %3010 = vmatpush.msra.mxu2 %v1313_v6 }
 0x505   : > { %v2562_v25 = vpop.f32.mrf.mxu2  ;;  %v2600_v9 = vpop.f32.mrf.mxu3  ;;  %3048 = vmatpush.msra.mxu3 %v1361_v50  ;;  %3074 = vmatpush.msrb.mxu0 %v1445_v5  ;;  %v1427_v5 = vld [vmem:[%s14564_s1 + $0xca0] sm:$0xff] }
 0x506   : > { %v2563_v51 = vadd.f32 %v2562_v25, %v2525_v19  ;;  %v2489_v59 = vpop.f32.mrf.mxu0  ;;  %v2527_v30 = vpop.f32.mrf.mxu1  ;;  %3112 = vmatpush.msrb.mxu1 %v1493_v2  ;;  %v1481_v25 = vld [vmem:[%s14564_s1 + $0xe50] sm:$0xff] }
 0x507   : > { %v2490_v31 = vadd.f32 %v2489_v59, %v10182_v56  ;;  %v1442_v56 = vld [vmem:[%s14564_s1 + $0xd18] sm:$0xff] }
 0x508   : > { %v10401_v17 = vadd.f32 %v2600_v9, %v2563_v51  ;;  %3075 = vmatpush.msrb.mxu0 %v1442_v56  ;;  %3113 = vmatpush.msrb.mxu1 %v1490_v4  ;;  %v1547_v9 = vld [vmem:[%s14564_s1 + $0x1060] sm:$0xff]  ;;  %v1541_v51 = vld [vmem:[%s14564_s1 + $0x1030] sm:$0xff] }
 0x509   : > { %v2528_v60 = vadd.f32 %v2527_v30, %v2490_v31  ;;  %2798 = vmatmul.f32.gmra.mxu0 %v8416_v55  ;;  %2836 = vmatmul.f32.gmra.mxu1 %v8420_v62  ;;  %v1439_v55 = vld [vmem:[%s14564_s1 + $0xd00] sm:$0xff]  ;;  %v1589_v31 = vld [vmem:[%s14564_s1 + $0x11b0] sm:$0xff] }
 0x50a   : > { %2874 = vmatmul.f32.gmra.mxu2 %v8424_v3  ;;  %2912 = vmatmul.f32.gmra.mxu3 %v8428_v29  ;;  %v1475_v4 = vld [vmem:[%s14564_s1 + $0xe20] sm:$0xff] }
 0x50b   : > { %3076 = vmatpush.msrb.mxu0 %v1439_v55  ;;  %3114 = vmatpush.msrb.mxu1 %v1487_v32 }
 0x50d   : > { %v2565_v62 = vpop.f32.mrf.mxu2  ;;  %v2603_v36 = vpop.f32.mrf.mxu3  ;;  %3115 = vmatpush.msrb.mxu1 %v1484_v26 }
 0x50e   : > { %v2566_v3 = vadd.f32 %v2565_v62, %v2528_v60  ;;  %v2492_v29 = vpop.f32.mrf.mxu0  ;;  %v2530_v54 = vpop.f32.mrf.mxu1 }
 0x50f   : > { %v2493_v46 = vadd.f32 %v2492_v29, %v10207_v41  ;;  %v1436_v41 = vld [vmem:[%s14564_s1 + $0xce8] sm:$0xff]  ;;  %3116 = vmatpush.msrb.mxu1 %v1481_v25 }
 0x510   : > { %v10423_v19 = vadd.f32 %v2603_v36, %v2566_v3  ;;  %3077 = vmatpush.msrb.mxu0 %v1436_v41  ;;  %v1538_v36 = vld [vmem:[%s14564_s1 + $0x1018] sm:$0xff]  ;;  %v1469_v41 = vld [vmem:[%s14564_s1 + $0xdf0] sm:$0xff] }
 0x511   : > { %v2531_v0 = vadd.f32 %v2530_v54, %v2493_v46  ;;  %2801 = vmatmul.f32.gmra.mxu0 %v8451_v47  ;;  %2839 = vmatmul.f32.gmra.mxu1 %v8455_v22  ;;  %v1433_v47 = vld [vmem:[%s14564_s1 + $0xcd0] sm:$0xff]  ;;  %v1550_v22 = vld [vmem:[%s14564_s1 + $0x1078] sm:$0xff]  ;;  %v1535_v54 = vld [vmem:[%s14564_s1 + $0x1000] sm:$0xff] }
 0x512   : > { %2877 = vmatmul.f32.gmra.mxu2 %v8459_v34  ;;  %2915 = vmatmul.f32.gmra.mxu3 %v15088_v49  ;;  %v1598_v34 = vld [vmem:[%s14564_s1 + $0x11f8] sm:$0xff]  ;;  %v1583_v46 = vld [vmem:[%s14564_s1 + $0x1180] sm:$0xff] }
 0x513   : > { %3147 = vmatpush.msrb.mxu2 %v1550_v22  ;;  %3185 = vmatpush.msrb.mxu3 %v1598_v34  ;;  %v1586_v3 = vld [vmem:[%s14564_s1 + $0x1198] sm:$0xff] }
 0x514   : > { %3078 = vmatpush.msrb.mxu0 %v1433_v47  ;;  %v1418_v34 = vld [vmem:[%s14564_s1 + $0xc58] sm:$0xff] }
 0x515   : > { %v2568_v49 = vpop.f32.mrf.mxu2  ;;  %v2606_v42 = vpop.f32.mrf.mxu3  ;;  %3148 = vmatpush.msrb.mxu2 %v1547_v9 }
 0x516   : > { %v2569_v53 = vadd.f32 %v2568_v49, %v2531_v0  ;;  %v2495_v21 = vpop.f32.mrf.mxu0  ;;  %v2533_v11 = vpop.f32.mrf.mxu1 }
 0x517   : > { %v2496_v39 = vadd.f32 %v2495_v21, %v10247_v23  ;;  %v1595_v23 = vld [vmem:[%s14564_s1 + $0x11e0] sm:$0xff]  ;;  %v1577_v21 = vld [vmem:[%s14564_s1 + $0x1150] sm:$0xff] }
 0x518   : > { %v10448_v6 = vadd.f32 %v2606_v42, %v2569_v53  ;;  %3186 = vmatpush.msrb.mxu3 %v1595_v23  ;;  %v1529_v53 = vld [vmem:[%s14564_s1 + $0xfd0] sm:$0xff]  ;;  %v1412_v23 = vld [vmem:[%s14564_s1 + $0xc28] sm:$0xff] }
 0x519   : > { %v2534_v50 = vadd.f32 %v2533_v11, %v2496_v39  ;;  %2935 = vmatmul.f32.vlgmr.msra.gmra.mxu0 %v8501_v58  ;;  %2973 = vmatmul.f32.vlgmr.msra.gmra.mxu1 %v8505_v10  ;;  %v1430_v58 = vld [vmem:[%s14564_s1 + $0xcb8] sm:$0xff]  ;;  %v1544_v10 = vld [vmem:[%s14564_s1 + $0x1048] sm:$0xff] }
 0x51a   : > { %3011 = vmatmul.f32.vlgmr.msra.gmra.mxu2 %v15091_v48  ;;  %3049 = vmatmul.f32.vlgmr.msra.gmra.mxu3 %v15092_v8  ;;  %v1592_v48 = vld [vmem:[%s14564_s1 + $0x11c8] sm:$0xff]  ;;  %v1478_v8 = vld [vmem:[%s14564_s1 + $0xe38] sm:$0xff] }
 0x51b   : > { %3079 = vmatpush.msrb.mxu0 %v1430_v58  ;;  %3149 = vmatpush.msrb.mxu2 %v1544_v10  ;;  %v1574_v39 = vld [vmem:[%s14564_s1 + $0x1138] sm:$0xff] }
 0x51c   : > { %3117 = vmatpush.msrb.mxu1 %v1478_v8  ;;  %3187 = vmatpush.msrb.mxu3 %v1592_v48  ;;  %v1520_v8 = vld [vmem:[%s14564_s1 + $0xf88] sm:$0xff] }
 0x51d   : > { %v2571_v59 = vpop.f32.mrf.mxu2  ;;  %v2609_v30 = vpop.f32.mrf.mxu3  ;;  %3080 = vmatpush.msrb.mxu0 %v1427_v5  ;;  %3150 = vmatpush.msrb.mxu2 %v1541_v51  ;;  %v1568_v51 = vld [vmem:[%s14564_s1 + $0x1108] sm:$0xff] }
 0x51e   : > { %v2572_v60 = vadd.f32 %v2571_v59, %v2534_v50  ;;  %v2498_v2 = vpop.f32.mrf.mxu0  ;;  %v2536_v56 = vpop.f32.mrf.mxu1  ;;  %3118 = vmatpush.msrb.mxu1 %v1475_v4  ;;  %3188 = vmatpush.msrb.mxu3 %v1589_v31  ;;  %v1466_v50 = vld [vmem:[%s14564_s1 + $0xdd8] sm:$0xff]  ;;  %v15154_v5 = vld [vmem:[#allocation77_spill] sm:$0xff] }
 0x51f   : > { %v2499_v55 = vadd.f32 %v2498_v2, %v10287_v14  ;;  %v1424_v14 = vld [vmem:[%s14564_s1 + $0xc88] sm:$0xff]  ;;  %3151 = vmatpush.msrb.mxu2 %v1538_v36  ;;  %v15153_v31 = vld [vmem:[#allocation58_spill] sm:$0xff] }
 0x520   : > { %v10488_v62 = vadd.f32 %v2609_v30, %v2572_v60  ;;  %3189 = vmatpush.msrb.mxu3 %v1586_v3  ;;  %3081 = vmatpush.msrb.mxu0 %v1424_v14  ;;  %v15152_v30 = vld [vmem:[#allocation57_spill] sm:$0xff]  ;;  %v15155_v60 = vld [vmem:[#allocation78_spill] sm:$0xff] }
 0x521   : > { %v2537_v29 = vadd.f32 %v2536_v56, %v2499_v55  ;;  %2938 = vmatmul.f32.gmra.mxu0 %v8554_v38  ;;  %2976 = vmatmul.f32.gmra.mxu1 %v8558_v40  ;;  %v1472_v38 = vld [vmem:[%s14564_s1 + $0xe08] sm:$0xff]  ;;  %v1565_v2 = vld [vmem:[%s14564_s1 + $0x10f0] sm:$0xff]  ;;  %v1514_v55 = vld [vmem:[%s14564_s1 + $0xf58] sm:$0xff] }
 0x522   : > { %3014 = vmatmul.f32.gmra.mxu2 %v15095_v28  ;;  %3052 = vmatmul.f32.gmra.mxu3 %v15096_v63  ;;  %v1532_v40 = vld [vmem:[%s14564_s1 + $0xfe8] sm:$0xff]  ;;  %v1421_v63 = vld [vmem:[%s14564_s1 + $0xc70] sm:$0xff]  ;;  %v1562_v36 = vld [vmem:[%s14564_s1 + $0x10d8] sm:$0xff] }
 0x523   : > { %3119 = vmatpush.msrb.mxu1 %v1472_v38  ;;  %v1580_v28 = vld [vmem:[%s14564_s1 + $0x1168] sm:$0xff]  ;;  %3152 = vmatpush.msrb.mxu2 %v1535_v54  ;;  %v1409_v4 = vld [vmem:[%s14564_s1 + $0xc10] sm:$0xff]  ;;  %v1646_v54 = vld [vmem:[%s14564_s1 + $0x1378] sm:$0xff] }
 0x524   : > { %3190 = vmatpush.msrb.mxu3 %v1583_v46  ;;  %3082 = vmatpush.msrb.mxu0 %v1421_v63  ;;  %v1460_v56 = vld [vmem:[%s14564_s1 + $0xda8] sm:$0xff]  ;;  %v1457_v3 = vld [vmem:[%s14564_s1 + $0xd90] sm:$0xff]  ;;  %v1694_v46 = vld [vmem:[%s14564_s1 + $0x14f8] sm:$0xff] }
 0x525   : > { %v2574_v0 = vpop.f32.mrf.mxu2  ;;  %v2612_v32 = vpop.f32.mrf.mxu3  ;;  %3120 = vmatpush.msrb.mxu1 %v1469_v41  ;;  %3153 = vmatpush.msrb.mxu2 %v1532_v40  ;;  %v1511_v63 = vld [vmem:[%s14564_s1 + $0xf40] sm:$0xff] }
 0x526   : > { %v2575_v26 = vadd.f32 %v2574_v0, %v2537_v29  ;;  %v2632_v47 = vpop.f32.mrf.mxu0  ;;  %v2670_v22 = vpop.f32.mrf.mxu1  ;;  %3191 = vmatpush.msrb.mxu3 %v1580_v28  ;;  %3083 = vmatpush.msrb.mxu0 %v1418_v34  ;;  %v1559_v0 = vld [vmem:[%s14564_s1 + $0x10c0] sm:$0xff]  ;;  %v1556_v34 = vld [vmem:[%s14564_s1 + $0x10a8] sm:$0xff] }
 0x527   : > { %v2633_v49 = vadd.f32 %v2632_v47, %v10324_v43  ;;  %v1526_v43 = vld [vmem:[%s14564_s1 + $0xfb8] sm:$0xff]  ;;  %3154 = vmatpush.msrb.mxu2 %v1529_v53  ;;  %3121 = vmatpush.msrb.mxu1 %v1466_v50  ;;  %v15158_v47 = vld [vmem:[#allocation13_spill] sm:$0xff]  ;;  %v1691_v53 = vld [vmem:[%s14564_s1 + $0x14e0] sm:$0xff] }
 0x528   : > { %v10528_v42 = vadd.f32 %v2612_v32, %v2575_v26  ;;  %3192 = vmatpush.msrb.mxu3 %v1577_v21  ;;  %v15156_v41 = vld [vmem:[#allocation79_spill] sm:$0xff]  ;;  %v15157_v26 = vld [vmem:[#allocation12_spill] sm:$0xff]  ;;  %v1553_v50 = vld [vmem:[%s14564_s1 + $0x1090] sm:$0xff] }
 0x529   : > { %v10536_v11 = vadd.f32 %v2670_v22, %v2633_v49  ;;  %2941 = vmatmul.f32.gmra.mxu0 %v8604_v33  ;;  %2979 = vmatmul.f32.gmra.mxu1 %v8608_v52  ;;  %v1415_v33 = vld [vmem:[%s14564_s1 + $0xc40] sm:$0xff]  ;;  %v15159_v22 = vld [vmem:[#allocation14_spill] sm:$0xff]  ;;  %v1640_v21 = vld [vmem:[%s14564_s1 + $0x1348] sm:$0xff] }
 0x52a   : > { %3017 = vmatmul.f32.gmra.mxu2 %v15100_v18  ;;  %3055 = vmatmul.f32.gmra.mxu3 %v15101_v15  ;;  %v1523_v52 = vld [vmem:[%s14564_s1 + $0xfa0] sm:$0xff] }
 0x52b   : > { %v1571_v18 = vld [vmem:[%s14564_s1 + $0x1120] sm:$0xff]  ;;  %3084 = vmatpush.msrb.mxu0 %v1415_v33  ;;  %3155 = vmatpush.msrb.mxu2 %v1526_v43  ;;  %v1688_v43 = vld [vmem:[%s14564_s1 + $0x14c8] sm:$0xff] }
 0x52c   : > { %v1463_v15 = vld [vmem:[%s14564_s1 + $0xdc0] sm:$0xff]  ;;  %3193 = vmatpush.msrb.mxu3 %v1574_v39  ;;  %v1505_v39 = vld [vmem:[%s14564_s1 + $0xf10] sm:$0xff] }
 0x52d   : > { %v10563_v25 = vpop.f32.mrf.mxu2  ;;  %v10565_v9 = vpop.f32.mrf.mxu3  ;;  %3122 = vmatpush.msrb.mxu1 %v1463_v15  ;;  %3085 = vmatpush.msrb.mxu0 %v1412_v23  ;;  %v1643_v49 = vld [vmem:[%s14564_s1 + $0x1360] sm:$0xff] }
 0x52e   : > { %v2635_v58 = vpop.f32.mrf.mxu0  ;;  %v2673_v10 = vpop.f32.mrf.mxu1  ;;  %3156 = vmatpush.msrb.mxu2 %v1523_v52  ;;  %3194 = vmatpush.msrb.mxu3 %v1571_v18 }
 0x52f   : > { %v2636_v48 = vadd.f32 %v2635_v58, %v10364_v57  ;;  %v1517_v57 = vld [vmem:[%s14564_s1 + $0xf70] sm:$0xff]  ;;  %3123 = vmatpush.msrb.mxu1 %v1460_v56  ;;  %3086 = vmatpush.msrb.mxu0 %v1409_v4  ;;  %v1679_v4 = vld [vmem:[%s14564_s1 + $0x1480] sm:$0xff] }
 0x530   : > { %3157 = vmatpush.msrb.mxu2 %v1520_v8  ;;  %3195 = vmatpush.msrb.mxu3 %v1568_v51  ;;  %v15162_v8 = vld [vmem:[#allocation24_spill] sm:$0xff]  ;;  %v1637_v51 = vld [vmem:[%s14564_s1 + $0x1330] sm:$0xff] }
 0x531   : > { %v10577_v59 = vadd.f32 %v2673_v10, %v2636_v48  ;;  %2944 = vmatmul.f32.gmra.mxu0 %v15152_v30  ;;  %2982 = vmatmul.f32.gmra.mxu1 %v15153_v31  ;;  %v15160_v10 = vld [vmem:[#allocation21_spill] sm:$0xff]  ;;  %v15161_v48 = vld [vmem:[#allocation22_spill] sm:$0xff]  ;;  %v1631_v31 = vld [vmem:[%s14564_s1 + $0x1300] sm:$0xff] }
 0x532   : > { %3020 = vmatmul.f32.gmra.mxu2 %v15154_v5  ;;  %3058 = vmatmul.f32.gmra.mxu3 %v15155_v60  ;;  %v1634_v30 = vld [vmem:[%s14564_s1 + $0x1318] sm:$0xff] }
 0x533   : > { %3158 = vmatpush.msrb.mxu2 %v1517_v57  ;;  %3196 = vmatpush.msrb.mxu3 %v1565_v2 }
 0x534   : > { %3124 = vmatpush.msrb.mxu1 %v1457_v3  ;;  %3223 = vmatpush.msra.mxu0 %v1646_v54  ;;  %v15164_v3 = vld [vmem:[#allocation32_spill] sm:$0xff] }
 0x535   : > { %v10604_v29 = vpop.f32.mrf.mxu2  ;;  %v10606_v14 = vpop.f32.mrf.mxu3  ;;  %3159 = vmatpush.msrb.mxu2 %v1514_v55  ;;  %3197 = vmatpush.msrb.mxu3 %v1562_v36  ;;  %v15163_v36 = vld [vmem:[#allocation31_spill] sm:$0xff]  ;;  %v1628_v54 = vld [vmem:[%s14564_s1 + $0x12e8] sm:$0xff] }
 0x536   : > { %v2638_v38 = vpop.f32.mrf.mxu0  ;;  %v2676_v40 = vpop.f32.mrf.mxu1  ;;  %3261 = vmatpush.msra.mxu1 %v1694_v46  ;;  %3224 = vmatpush.msra.mxu0 %v1643_v49  ;;  %v1676_v46 = vld [vmem:[%s14564_s1 + $0x1468] sm:$0xff] }
 0x537   : > { %v2639_v28 = vadd.f32 %v2638_v38, %v10401_v17  ;;  %v1508_v17 = vld [vmem:[%s14564_s1 + $0xf28] sm:$0xff]  ;;  %3160 = vmatpush.msrb.mxu2 %v1511_v63  ;;  %3198 = vmatpush.msrb.mxu3 %v1559_v0  ;;  %v15166_v38 = vld [vmem:[#allocation34_spill] sm:$0xff] }
 0x538   : > { %3262 = vmatpush.msra.mxu1 %v1691_v53  ;;  %3225 = vmatpush.msra.mxu0 %v1640_v21  ;;  %v3630_v63 = vld [vmem:[%s14566_s3 + $0x9b0] sm:$0xff]  ;;  %v15167_v53 = vld [vmem:[#allocation59_spill] sm:$0xff]  ;;  %v15168_v21 = vld [vmem:[#allocation60_spill] sm:$0xff] }
 0x539   : > { %v10621_v32 = vadd.f32 %v2676_v40, %v2639_v28  ;;  %2947 = vmatmul.f32.gmra.mxu0 %v15156_v41  ;;  %2985 = vmatmul.f32.gmra.mxu1 %v15157_v26  ;;  %v1625_v40 = vld [vmem:[%s14564_s1 + $0x12d0] sm:$0xff] }
 0x53a   : > { %3023 = vmatmul.f32.gmra.mxu2 %v15158_v47  ;;  %3061 = vmatmul.f32.gmra.mxu3 %v15159_v22  ;;  %v3470_v28 = vld [vmem:[%s14566_s3 + $0x4b0] sm:$0xff] }
 0x53b   : > { %3161 = vmatpush.msrb.mxu2 %v1508_v17  ;;  %3199 = vmatpush.msrb.mxu3 %v1556_v34  ;;  %v1673_v22 = vld [vmem:[%s14564_s1 + $0x1450] sm:$0xff]  ;;  %v3460_v34 = vld [vmem:[%s14566_s3 + $0x460] sm:$0xff] }
 0x53c   : > { %3263 = vmatpush.msra.mxu1 %v1688_v43  ;;  %3226 = vmatpush.msra.mxu0 %v1637_v51  ;;  %v3620_v43 = vld [vmem:[%s14566_s3 + $0x960] sm:$0xff] }
 0x53d   : > { %v10651_v33 = vpop.f32.mrf.mxu2  ;;  %v10653_v52 = vpop.f32.mrf.mxu3  ;;  %3162 = vmatpush.msrb.mxu2 %v1505_v39  ;;  %3200 = vmatpush.msrb.mxu3 %v1553_v50  ;;  %v15169_v39 = vld [vmem:[#allocation62_spill] sm:$0xff]  ;;  %v3600_v51 = vld [vmem:[%s14566_s3 + $0x8c0] sm:$0xff] }
 0x53e   : > { %v2641_v18 = vpop.f32.mrf.mxu0  ;;  %v2679_v15 = vpop.f32.mrf.mxu1  ;;  %3227 = vmatpush.msra.mxu0 %v1634_v30  ;;  %v3450_v50 = vld [vmem:[%s14566_s3 + $0x410] sm:$0xff] }
 0x53f   : > { %v2642_v23 = vadd.f32 %v2641_v18, %v10423_v19  ;;  %v1685_v19 = vld [vmem:[%s14564_s1 + $0x14b0] sm:$0xff]  ;;  %3766 = vmatpush.msra.mxu2 %v3470_v28  ;;  %3804 = vmatpush.msra.mxu3 %v3630_v63  ;;  %v1670_v18 = vld [vmem:[%s14564_s1 + $0x1438] sm:$0xff] }
 0x540   : > { %3264 = vmatpush.msra.mxu1 %v1685_v19  ;;  %3228 = vmatpush.msra.mxu0 %v1631_v31  ;;  %v3430_v31 = vld [vmem:[%s14566_s3 + $0x370] sm:$0xff] }
 0x541   : > { %v10656_v58 = vadd.f32 %v2679_v15, %v2642_v23  ;;  %2950 = vmatmul.f32.gmra.mxu0 %v15160_v10  ;;  %2988 = vmatmul.f32.gmra.mxu1 %v15161_v48  ;;  %v3610_v15 = vld [vmem:[%s14566_s3 + $0x910] sm:$0xff]  ;;  %v3440_v23 = vld [vmem:[%s14566_s3 + $0x3c0] sm:$0xff] }
 0x542   : > { %3026 = vmatmul.f32.gmra.mxu2 %v15115_v13  ;;  %3064 = vmatmul.f32.gmra.mxu3 %v15162_v8  ;;  %v1682_v13 = vld [vmem:[%s14564_s1 + $0x1498] sm:$0xff]  ;;  %v1667_v10 = vld [vmem:[%s14564_s1 + $0x1420] sm:$0xff] }
 0x543   : > { %3265 = vmatpush.msra.mxu1 %v1682_v13  ;;  %3229 = vmatpush.msra.mxu0 %v1628_v54  ;;  %v3580_v54 = vld [vmem:[%s14566_s3 + $0x820] sm:$0xff] }
 0x544   : > { %3767 = vmatpush.msra.mxu2 %v3460_v34  ;;  %3805 = vmatpush.msra.mxu3 %v3620_v43  ;;  %v3400_v34 = vld [vmem:[%s14566_s3 + $0x280] sm:$0xff] }
 0x545   : > { %v10677_v5 = vpop.f32.mrf.mxu2  ;;  %v10679_v60 = vpop.f32.mrf.mxu3  ;;  %3266 = vmatpush.msra.mxu1 %v1679_v4  ;;  %3230 = vmatpush.msra.mxu0 %v1625_v40  ;;  %v15171_v4 = vld [vmem:[#allocation66_spill] sm:$0xff]  ;;  %v15173_v43 = vld [vmem:[#allocation72_spill] sm:$0xff] }
 0x546   : > { %v2644_v57 = vpop.f32.mrf.mxu0  ;;  %v2682_v2 = vpop.f32.mrf.mxu1  ;;  %3768 = vmatpush.msra.mxu2 %v3450_v50  ;;  %3806 = vmatpush.msra.mxu3 %v3610_v15  ;;  %v3570_v40 = vld [vmem:[%s14566_s3 + $0x7d0] sm:$0xff] }
 0x547   : > { %v2645_v56 = vadd.f32 %v2644_v57, %v10448_v6  ;;  %v15165_v6 = vld [vmem:[#allocation33_spill] sm:$0xff]  ;;  %3267 = vmatpush.msra.mxu1 %v1676_v46 }
 0x548   : > { %3769 = vmatpush.msra.mxu2 %v3440_v23  ;;  %3807 = vmatpush.msra.mxu3 %v3600_v51  ;;  %v3590_v57 = vld [vmem:[%s14566_s3 + $0x870] sm:$0xff]  ;;  %v1655_v23 = vld [vmem:[%s14564_s1 + $0x13c0] sm:$0xff] }
 0x549   : > { %v10685_v55 = vadd.f32 %v2682_v2, %v2645_v56  ;;  %2953 = vmatmul.f32.gmra.mxu0 %v15163_v36  ;;  %2991 = vmatmul.f32.gmra.mxu1 %v15164_v3  ;;  %v15170_v56 = vld [vmem:[#allocation65_spill] sm:$0xff]  ;;  %v3420_v3 = vld [vmem:[%s14566_s3 + $0x320] sm:$0xff] }
 0x54a   : > { %3029 = vmatmul.f32.gmra.mxu2 %v15165_v6  ;;  %3067 = vmatmul.f32.gmra.mxu3 %v15166_v38  ;;  %v1664_v36 = vld [vmem:[%s14564_s1 + $0x1408] sm:$0xff]  ;;  %v1613_v46 = vld [vmem:[%s14564_s1 + $0x1270] sm:$0xff] }
 0x54b   : > { %3268 = vmatpush.msra.mxu1 %v1673_v22  ;;  %3770 = vmatpush.msra.mxu2 %v3430_v31  ;;  %v3410_v38 = vld [vmem:[%s14566_s3 + $0x2d0] sm:$0xff] }
 0x54c   : > { %3808 = vmatpush.msra.mxu3 %v3590_v57  ;;  %v15174_v50 = vld [vmem:[#allocation73_spill] sm:$0xff] }
 0x54d   : > { %v10706_v0 = vpop.f32.mrf.mxu2  ;;  %v10708_v41 = vpop.f32.mrf.mxu3  ;;  %3269 = vmatpush.msra.mxu1 %v1670_v18  ;;  %3771 = vmatpush.msra.mxu2 %v3420_v3  ;;  %v15175_v18 = vld [vmem:[#allocation74_spill] sm:$0xff] }
 0x54e   : > { %v2647_v26 = vpop.f32.mrf.mxu0  ;;  %v2685_v17 = vpop.f32.mrf.mxu1  ;;  %3809 = vmatpush.msra.mxu3 %v3580_v54  ;;  %v3390_v15 = vld [vmem:[%s14566_s3 + $0x230] sm:$0xff] }
 0x54f   : > { %v2648_v47 = vadd.f32 %v2647_v26, %v10488_v62  ;;  %v1622_v62 = vld [vmem:[%s14564_s1 + $0x12b8] sm:$0xff]  ;;  %3270 = vmatpush.msra.mxu1 %v1667_v10  ;;  %3772 = vmatpush.msra.mxu2 %v3410_v38  ;;  %v1604_v10 = vld [vmem:[%s14564_s1 + $0x1228] sm:$0xff]  ;;  %v3370_v3 = vld [vmem:[%s14566_s3 + $0x190] sm:$0xff] }
 0x550   : > { %3231 = vmatpush.msra.mxu0 %v1622_v62  ;;  %v1610_v26 = vld [vmem:[%s14564_s1 + $0x1258] sm:$0xff]  ;;  %3810 = vmatpush.msra.mxu3 %v3570_v40  ;;  %v3530_v54 = vld [vmem:[%s14566_s3 + $0x690] sm:$0xff] }
 0x551   : > { %v10717_v49 = vadd.f32 %v2685_v17, %v2648_v47  ;;  %3087 = vmatmul.f32.vlgmr.msrb.gmra.mxu0 %v15167_v53  ;;  %3125 = vmatmul.f32.vlgmr.msrb.gmra.mxu1 %v15168_v21  ;;  %v3560_v53 = vld [vmem:[%s14566_s3 + $0x780] sm:$0xff]  ;;  %v1658_v62 = vld [vmem:[%s14564_s1 + $0x13d8] sm:$0xff]  ;;  %v1601_v38 = vld [vmem:[%s14564_s1 + $0x1210] sm:$0xff] }
 0x552   : > { %3163 = vmatmul.f32.vlgmr.msrb.gmra.mxu2 %v15125_v45  ;;  %3201 = vmatmul.f32.vlgmr.msrb.gmra.mxu3 %v15169_v39  ;;  %v1619_v45 = vld [vmem:[%s14564_s1 + $0x12a0] sm:$0xff]  ;;  %v15178_v40 = vld [vmem:[#allocation9_spill] sm:$0xff] }
 0x553   : > { %3232 = vmatpush.msra.mxu0 %v1619_v45  ;;  %3271 = vmatpush.msra.mxu1 %v1664_v36  ;;  %v15172_v21 = vld [vmem:[#allocation71_spill] sm:$0xff]  ;;  %v3550_v45 = vld [vmem:[%s14566_s3 + $0x730] sm:$0xff] }
 0x554   : > { %v1607_v39 = vld [vmem:[%s14564_s1 + $0x1240] sm:$0xff]  ;;  %3773 = vmatpush.msra.mxu2 %v3400_v34  ;;  %3811 = vmatpush.msra.mxu3 %v3560_v53  ;;  %v3510_v34 = vld [vmem:[%s14566_s3 + $0x5f0] sm:$0xff] }
 0x555   : > { %v10747_v48 = vpop.f32.mrf.mxu2  ;;  %v10749_v8 = vpop.f32.mrf.mxu3 }
 0x556   : > { %v2650_v19 = vpop.f32.mrf.mxu0  ;;  %v2688_v30 = vpop.f32.mrf.mxu1  ;;  %3774 = vmatpush.msra.mxu2 %v3390_v15  ;;  %3812 = vmatpush.msra.mxu3 %v3550_v45  ;;  %v3340_v15 = vld [vmem:[%s14566_s3 + $0xa0] sm:$0xff] }
 0x557   : > { %v2651_v13 = vadd.f32 %v2650_v19, %v10528_v42  ;;  %v1616_v42 = vld [vmem:[%s14564_s1 + $0x1288] sm:$0xff]  ;;  %v3380_v19 = vld [vmem:[%s14566_s3 + $0x1e0] sm:$0xff] }
 0x558   : > { %3233 = vmatpush.msra.mxu0 %v1616_v42  ;;  %3775 = vmatpush.msra.mxu2 %v3380_v19  ;;  %v3500_v45 = vld [vmem:[%s14566_s3 + $0x5a0] sm:$0xff]  ;;  %v3490_v19 = vld [vmem:[%s14566_s3 + $0x550] sm:$0xff] }
 0x559   : > { %v10761_v2 = vadd.f32 %v2688_v30, %v2651_v13  ;;  %3090 = vmatmul.f32.gmra.mxu0 %v15170_v56  ;;  %3128 = vmatmul.f32.gmra.mxu1 %v15171_v4  ;;  %v3540_v30 = vld [vmem:[%s14566_s3 + $0x6e0] sm:$0xff] }
 0x55a   : > { %3166 = vmatmul.f32.gmra.mxu2 %v15128_v7  ;;  %3204 = vmatmul.f32.gmra.mxu3 %v15129_v1  ;;  %v1661_v7 = vld [vmem:[%s14564_s1 + $0x13f0] sm:$0xff]  ;;  %v6663_v1 = vld [vmem:[%s14565_s2] sm:$0x7] }
 0x55b   : > { %v10788_v6 = vperm.slane %v6663_v1, 2  ;;  %3234 = vmatpush.msra.mxu0 %v1613_v46  ;;  %3272 = vmatpush.msra.mxu1 %v1661_v7  ;;  %v15176_v46 = vld [vmem:[#allocation6_spill] sm:$0xff]  ;;  %v15177_v7 = vld [vmem:[#allocation7_spill] sm:$0xff]  ;;  %v1652_v1 = vld [vmem:[%s14564_s1 + $0x13a8] sm:$0xff] }
 0x55c   : > { %3813 = vmatpush.msra.mxu3 %v3540_v30  ;;  %3776 = vmatpush.msra.mxu2 %v3370_v3 }
 0x55d   : > { %v10796_v28 = vpop.f32.mrf.mxu2  ;;  %v10798_v63 = vpop.f32.mrf.mxu3  ;;  %3235 = vmatpush.msra.mxu0 %v1610_v26  ;;  %3273 = vmatpush.msra.mxu1 %v1658_v62  ;;  %v3360_v26 = vld [vmem:[%s14566_s3 + $0x140] sm:$0xff] }
 0x55e   : > { %v2784_v17 = vpop.f32.mrf.mxu0  ;;  %v2822_v47 = vpop.f32.mrf.mxu1  ;;  %3814 = vmatpush.msra.mxu3 %v3530_v54  ;;  %3777 = vmatpush.msra.mxu2 %v3360_v26  ;;  %v15181_v54 = vld [vmem:[#allocation25_spill] sm:$0xff] }
 0x55f   : > { %v2785_v22 = vadd.f32 %v2784_v17, %v10788_v6  ;;  %3236 = vmatpush.msra.mxu0 %v1607_v39  ;;  %3274 = vmatpush.msra.mxu1 %v1655_v23  ;;  %v3520_v17 = vld [vmem:[%s14566_s3 + $0x640] sm:$0xff] }
 0x560   : > { %3815 = vmatpush.msra.mxu3 %v3520_v17  ;;  %v15179_v23 = vld [vmem:[#allocation15_spill] sm:$0xff] }
 0x561   : > { %3093 = vmatmul.f32.gmra.mxu0 %v15172_v21  ;;  %3131 = vmatmul.f32.gmra.mxu1 %v15173_v43  ;;  %v2823_v51 = vadd.f32 %v2822_v47, %v2785_v22  ;;  %v1649_v47 = vld [vmem:[%s14564_s1 + $0x1390] sm:$0xff] }
 0x562   : > { %3169 = vmatmul.f32.gmra.mxu2 %v15174_v50  ;;  %3207 = vmatmul.f32.gmra.mxu3 %v15175_v18 }
 0x563   : > { %3237 = vmatpush.msra.mxu0 %v1604_v10  ;;  %3275 = vmatpush.msra.mxu1 %v1652_v1  ;;  %v15180_v10 = vld [vmem:[#allocation16_spill] sm:$0xff] }
 0x564   : > { %3816 = vmatpush.msra.mxu3 %v3510_v34  ;;  %v15183_v34 = vld [vmem:[#allocation35_spill] sm:$0xff] }
 0x565   : > { %v2860_v13 = vpop.f32.mrf.mxu2  ;;  %v2898_v31 = vpop.f32.mrf.mxu3  ;;  %3238 = vmatpush.msra.mxu0 %v1601_v38  ;;  %3276 = vmatpush.msra.mxu1 %v1649_v47  ;;  %v2709_v47 = vadd.f32 %v10563_v25, %v10536_v11 }
 0x566   : > { %v2861_v57 = vadd.f32 %v2860_v13, %v2823_v51  ;;  %v2787_v56 = vpop.f32.mrf.mxu0  ;;  %v2825_v4 = vpop.f32.mrf.mxu1  ;;  %v3330_v51 = vld [vmem:[%s14566_s3 + $0x50] sm:$0xff]  ;;  %3817 = vmatpush.msra.mxu3 %v3500_v45  ;;  %v3320_v13 = vld [vmem:[%s14566_s3] sm:$0xff] }
 0x567   : > { %v2788_v36 = vadd.f32 %v2787_v56, %v10788_v6  ;;  %v2747_v11 = vadd.f32 %v10565_v9, %v2709_v47  ;;  %v3461_v9 = vld [vmem:[%s14566_s3 + $0x468] sm:$0xff]  ;;  %v3411_v47 = vld [vmem:[%s14566_s3 + $0x2d8] sm:$0xff] }
 0x568   : > { %v10838_v42 = vadd.f32 %v2898_v31, %v2861_v57  ;;  %3818 = vmatpush.msra.mxu3 %v3490_v19 }
 0x569   : > { %3096 = vmatmul.f32.gmra.mxu0 %v15176_v46  ;;  %3134 = vmatmul.f32.gmra.mxu1 %v15177_v7  ;;  %v2826_v22 = vadd.f32 %v2825_v4, %v2788_v36  ;;  %v15182_v46 = vld [vmem:[#allocation26_spill] sm:$0xff] }
 0x56a   : > { %3172 = vmatmul.f32.gmra.mxu2 %v15134_v44  ;;  %3210 = vmatmul.f32.gmra.mxu3 %v15178_v40  ;;  %v3350_v44 = vld [vmem:[%s14566_s3 + $0xf0] sm:$0xff] }
 0x56b   : > { %3778 = vmatpush.msra.mxu2 %v3350_v44 }
 0x56d   : > { %v2863_v53 = vpop.f32.mrf.mxu2  ;;  %v2901_v21 = vpop.f32.mrf.mxu3  ;;  %3779 = vmatpush.msra.mxu2 %v3340_v15  ;;  %v2712_v15 = vadd.f32 %v10604_v29, %v10577_v59  ;;  %v3451_v59 = vld [vmem:[%s14566_s3 + $0x418] sm:$0xff] }
 0x56e   : > { %v2864_v43 = vadd.f32 %v2863_v53, %v2826_v22  ;;  %v2790_v62 = vpop.f32.mrf.mxu0  ;;  %v2828_v39 = vpop.f32.mrf.mxu1  ;;  %v15184_v53 = vld [vmem:[#allocation36_spill] sm:$0xff]  ;;  %v3611_v29 = vld [vmem:[%s14566_s3 + $0x918] sm:$0xff] }
 0x56f   : > { %v2791_v18 = vadd.f32 %v2790_v62, %v10788_v6  ;;  %3780 = vmatpush.msra.mxu2 %v3330_v51  ;;  %v15187_v51 = vld [vmem:[#allocation64_spill] sm:$0xff]  ;;  %v2750_v19 = vadd.f32 %v10606_v14, %v2712_v15 }
 0x570   : > { %v10872_v50 = vadd.f32 %v2901_v21, %v2864_v43 }
 0x571   : > { %3099 = vmatmul.f32.gmra.mxu0 %v15179_v23  ;;  %3137 = vmatmul.f32.gmra.mxu1 %v15180_v10  ;;  %v2829_v30 = vadd.f32 %v2828_v39, %v2791_v18  ;;  %v15185_v39 = vld [vmem:[#allocation39_spill] sm:$0xff]  ;;  %v10925_v18 = vmax.f32 %v2747_v11, 0.0  ;;  %v3621_v23 = vld [vmem:[%s14566_s3 + $0x968] sm:$0xff] }
 0x572   : > { %3175 = vmatmul.f32.gmra.mxu2 %v15136_v61  ;;  %3213 = vmatmul.f32.gmra.mxu3 %v15137_v16  ;;  %v3480_v61 = vld [vmem:[%s14566_s3 + $0x500] sm:$0xff] }
 0x573   : > { %3781 = vmatpush.msra.mxu2 %v3320_v13  ;;  %3819 = vmatpush.msra.mxu3 %v3480_v61  ;;  %v15186_v10 = vld [vmem:[#allocation63_spill] sm:$0xff]  ;;  %v3441_v13 = vld [vmem:[%s14566_s3 + $0x3c8] sm:$0xff] }
 0x574   : > { %v3601_v61 = vld [vmem:[%s14566_s3 + $0x8c8] sm:$0xff] }
 0x575   : > { %v2866_v16 = vpop.f32.mrf.mxu2  ;;  %v2904_v31 = vpop.f32.mrf.mxu3 }
 0x576   : > { %v2867_v57 = vadd.f32 %v2866_v16, %v2829_v30  ;;  %v2793_v56 = vpop.f32.mrf.mxu0  ;;  %v2831_v4 = vpop.f32.mrf.mxu1 }
 0x577   : > { %v2794_v3 = vadd.f32 %v2793_v56, %v10788_v6 }
 0x578   : > { %v10897_v36 = vadd.f32 %v2904_v31, %v2867_v57 }
 0x579   : > { %3102 = vmatmul.f32.gmra.mxu0 %v15181_v54  ;;  %3140 = vmatmul.f32.gmra.mxu1 %v15182_v46  ;;  %v2832_v7 = vadd.f32 %v2831_v4, %v2794_v3  ;;  %v15188_v4 = vld [vmem:[#allocation50_spill] sm:$0xff]  ;;  %v10958_v3 = vmax.f32 %v2750_v19, 0.0  ;;  %v2715_v54 = vadd.f32 %v10651_v33, %v10621_v32  ;;  %v3421_v32 = vld [vmem:[%s14566_s3 + $0x328] sm:$0xff] }
 0x57a   : > { %3178 = vmatmul.f32.gmra.mxu2 %v15138_v27  ;;  %3216 = vmatmul.f32.gmra.mxu3 %v15139_v35  ;;  %v3471_v27 = vld [vmem:[%s14566_s3 + $0x4b8] sm:$0xff]  ;;  %v10956_v14 = vmax.f32 %v15188_v4, 0.0  ;;  %v3581_v33 = vld [vmem:[%s14566_s3 + $0x828] sm:$0xff] }
 0x57b   : > { %v3631_v35 = vld [vmem:[%s14566_s3 + $0x9b8] sm:$0xff]  ;;  %3880 = vmatpush.msrb.mxu1 %v3471_v27 }
 0x57c   : > { %3918 = vmatpush.msrb.mxu2 %v3631_v35 }
 0x57d   : > { %v2869_v1 = vpop.f32.mrf.mxu2  ;;  %v2907_v17 = vpop.f32.mrf.mxu3  ;;  %3881 = vmatpush.msrb.mxu1 %v3461_v9 }
 0x57e   : > { %v2870_v38 = vadd.f32 %v2869_v1, %v2832_v7  ;;  %v2796_v40 = vpop.f32.mrf.mxu0  ;;  %v2834_v26 = vpop.f32.mrf.mxu1  ;;  %3919 = vmatpush.msrb.mxu2 %v3621_v23  ;;  %v3431_v7 = vld [vmem:[%s14566_s3 + $0x378] sm:$0xff]  ;;  %v3381_v23 = vld [vmem:[%s14566_s3 + $0x1e8] sm:$0xff] }
 0x57f   : > { %v2797_v44 = vadd.f32 %v2796_v40, %v10788_v6  ;;  %3882 = vmatpush.msrb.mxu1 %v3451_v59  ;;  %v3591_v1 = vld [vmem:[%s14566_s3 + $0x878] sm:$0xff] }
 0x580   : > { %v10906_v22 = vadd.f32 %v2907_v17, %v2870_v38  ;;  %3920 = vmatpush.msrb.mxu2 %v3611_v29  ;;  %v15189_v38 = vld [vmem:[#allocation69_spill] sm:$0xff]  ;;  %v15190_v40 = vld [vmem:[#allocation70_spill] sm:$0xff] }
 0x581   : > { %3105 = vmatmul.f32.gmra.mxu0 %v15183_v34  ;;  %3143 = vmatmul.f32.gmra.mxu1 %v15184_v53  ;;  %v2835_v25 = vadd.f32 %v2834_v26, %v2797_v44  ;;  %v2753_v26 = vadd.f32 %v10653_v52, %v2715_v54  ;;  %v3571_v44 = vld [vmem:[%s14566_s3 + $0x7d8] sm:$0xff] }
 0x582   : > { %3181 = vmatmul.f32.gmra.mxu2 %v15140_v20  ;;  %3219 = vmatmul.f32.gmra.mxu3 %v15141_v24  ;;  %v10923_v24 = vmax.f32 %v15185_v39, 0.0  ;;  %v15191_v52 = vld [vmem:[#allocation51_spill] sm:$0xff]  ;;  %v3561_v39 = vld [vmem:[%s14566_s3 + $0x788] sm:$0xff] }
 0x583   : > { %3883 = vmatpush.msrb.mxu1 %v3441_v13  ;;  %3921 = vmatpush.msrb.mxu2 %v3601_v61  ;;  %v15196_v54 = vld [vmem:[#allocation11_spill] sm:$0xff] }
 0x585   : > { %v2872_v21 = vpop.f32.mrf.mxu2  ;;  %3884 = vmatpush.msrb.mxu1 %v3431_v7  ;;  %3922 = vmatpush.msrb.mxu2 %v3591_v1  ;;  %v3351_v7 = vld [vmem:[%s14566_s3 + $0xf8] sm:$0xff] }
 0x586   : > { %v10920_v43 = vadd.f32 %v2872_v21, %v2835_v25  ;;  %v2799_v62 = vpop.f32.mrf.mxu0  ;;  %v2837_v20 = vpop.f32.mrf.mxu1  ;;  %v10992_v25 = vmax.f32 %v15191_v52, 0.0  ;;  %v10994_v21 = vmax.f32 %v2753_v26, 0.0  ;;  %v3511_v1 = vld [vmem:[%s14566_s3 + $0x5f8] sm:$0xff] }
 0x587   : > { %v2800_v45 = vadd.f32 %v2799_v62, %v10788_v6  ;;  %3885 = vmatpush.msrb.mxu1 %v3421_v32  ;;  %3923 = vmatpush.msrb.mxu2 %v3581_v33  ;;  %v2718_v62 = vadd.f32 %v10677_v5, %v10656_v58  ;;  %v3391_v58 = vld [vmem:[%s14566_s3 + $0x238] sm:$0xff] }
 0x588   : > { %v3551_v5 = vld [vmem:[%s14566_s3 + $0x738] sm:$0xff] }
 0x589   : > { %3239 = vmatmul.f32.vlgmr.msra.gmra.mxu0 %v15186_v10  ;;  %3277 = vmatmul.f32.vlgmr.msra.gmra.mxu1 %v15187_v51  ;;  %v2838_v30 = vadd.f32 %v2837_v20, %v2800_v45  ;;  %v3401_v20 = vld [vmem:[%s14566_s3 + $0x288] sm:$0xff]  ;;  %v2756_v9 = vadd.f32 %v10679_v60, %v2718_v62 }
 0x58a   : > { %3782 = vmatmul.f32.vlgmr.msra.gmra.mxu2 %v10923_v24  ;;  %3820 = vmatmul.f32.vlgmr.msra.gmra.mxu3 %v10925_v18  ;;  %v15193_v45 = vld [vmem:[#allocation76_spill] sm:$0xff] }
 0x58b   : > { %3886 = vmatpush.msrb.mxu1 %v3411_v47  ;;  %3924 = vmatpush.msrb.mxu2 %v3571_v44  ;;  %v3541_v10 = vld [vmem:[%s14566_s3 + $0x6e8] sm:$0xff]  ;;  %v11031_v61 = vmax.f32 %v2756_v9, 0.0  ;;  %v2724_v44 = vadd.f32 %v10747_v48, %v10717_v49  ;;  %v3331_v49 = vld [vmem:[%s14566_s3 + $0x58] sm:$0xff] }
 0x58c   : > { %v15194_v60 = vld [vmem:[#allocation52_spill] sm:$0xff]  ;;  %v3491_v48 = vld [vmem:[%s14566_s3 + $0x558] sm:$0xff] }
 0x58d   : > { %v2875_v16 = vpop.f32.mrf.mxu2  ;;  %3887 = vmatpush.msrb.mxu1 %v3401_v20  ;;  %3925 = vmatpush.msrb.mxu2 %v3561_v39  ;;  %v11029_v13 = vmax.f32 %v15194_v60, 0.0  ;;  %v2762_v52 = vadd.f32 %v10749_v8, %v2724_v44  ;;  %v3321_v62 = vld [vmem:[%s14566_s3 + $0x8] sm:$0xff]  ;;  %v3602_v44 = vld [vmem:[%s14566_s3 + $0x8d0] sm:$0xff] }
 0x58e   : > { %v10953_v31 = vadd.f32 %v2875_v16, %v2838_v30  ;;  %v2802_v57 = vpop.f32.mrf.mxu0  ;;  %v2840_v56 = vpop.f32.mrf.mxu1  ;;  %v2721_v16 = vadd.f32 %v10706_v0, %v10685_v55  ;;  %v3361_v55 = vld [vmem:[%s14566_s3 + $0x148] sm:$0xff] }
 0x58f   : > { %v2803_v46 = vadd.f32 %v2802_v57, %v10788_v6  ;;  %v10979_v6 = vpop.f32.mrf.mxu3  ;;  %3888 = vmatpush.msrb.mxu1 %v3391_v58  ;;  %3926 = vmatpush.msrb.mxu2 %v3551_v5  ;;  %v3371_v57 = vld [vmem:[%s14566_s3 + $0x198] sm:$0xff]  ;;  %v3521_v0 = vld [vmem:[%s14566_s3 + $0x648] sm:$0xff]  ;;  %v11103_v9 = vmax.f32 %v2762_v52, 0.0 }
 0x590   : > { %v3481_v20 = vld [vmem:[%s14566_s3 + $0x508] sm:$0xff]  ;;  %v15201_v5 = vld [vmem:[#allocation54_spill] sm:$0xff] }
 0x591   : > { %3242 = vmatmul.f32.gmra.mxu0 %v15189_v38  ;;  %3280 = vmatmul.f32.gmra.mxu1 %v15190_v40  ;;  %v2841_v17 = vadd.f32 %v2840_v56, %v2803_v46  ;;  %v3531_v56 = vld [vmem:[%s14566_s3 + $0x698] sm:$0xff]  ;;  %v2759_v46 = vadd.f32 %v10708_v41, %v2721_v16  ;;  %v15197_v41 = vld [vmem:[#allocation53_spill] sm:$0xff]  ;;  %v11101_v8 = vmax.f32 %v15201_v5, 0.0  ;;  %v3552_v5 = vld [vmem:[%s14566_s3 + $0x740] sm:$0xff] }
 0x592   : > { %3785 = vmatmul.f32.gmra.mxu2 %v10956_v14  ;;  %3823 = vmatmul.f32.gmra.mxu3 %v10958_v3  ;;  %v15202_v16 = vld [vmem:[#allocation55_spill] sm:$0xff] }
 0x593   : > { %3889 = vmatpush.msrb.mxu1 %v3381_v23  ;;  %3927 = vmatpush.msrb.mxu2 %v3541_v10  ;;  %v11068_v47 = vmax.f32 %v2759_v46, 0.0  ;;  %v2727_v23 = vadd.f32 %v10796_v28, %v10761_v2 }
 0x595   : > { %v2878_v34 = vpop.f32.mrf.mxu2  ;;  %3890 = vmatpush.msrb.mxu1 %v3371_v57  ;;  %3928 = vmatpush.msrb.mxu2 %v3531_v56  ;;  %v11121_v57 = vmax.f32 %v15202_v16, 0.0  ;;  %v3671_v16 = vld [vmem:[%s14566_s3 + $0xaf8] sm:$0xff] }
 0x596   : > { %v10988_v53 = vadd.f32 %v2878_v34, %v2841_v17  ;;  %v2936_v27 = vpop.f32.mrf.mxu0  ;;  %v2974_v35 = vpop.f32.mrf.mxu1  ;;  %v11066_v17 = vmax.f32 %v15197_v41, 0.0  ;;  %v3341_v34 = vld [vmem:[%s14566_s3 + $0xa8] sm:$0xff]  ;;  %v3691_v41 = vld [vmem:[%s14566_s3 + $0xb98] sm:$0xff] }
 0x597   : > { %v2937_v11 = vadd.f32 %v2936_v27, %v10838_v42  ;;  %v15192_v42 = vld [vmem:[#allocation75_spill] sm:$0xff]  ;;  %v11023_v51 = vpop.f32.mrf.mxu3  ;;  %3891 = vmatpush.msrb.mxu1 %v3361_v55  ;;  %3929 = vmatpush.msrb.mxu2 %v3521_v0  ;;  %v3501_v27 = vld [vmem:[%s14566_s3 + $0x5a8] sm:$0xff] }
 0x598   : > { %15198 = vst [vmem:[#allocation56_spill] sm:$0xff] %v11066_v17  ;;  %v2914_v55 = vadd.f32 %v11023_v51, %v10953_v31  ;;  %v3612_v31 = vld [vmem:[%s14566_s3 + $0x920] sm:$0xff] }
 0x599   : > { %v11004_v15 = vadd.f32 %v2974_v35, %v2937_v11  ;;  %3245 = vmatmul.f32.gmra.mxu0 %v15192_v42  ;;  %3283 = vmatmul.f32.gmra.mxu1 %v15193_v45  ;;  %v15200_v11 = vld [vmem:[#allocation20_spill] sm:$0xff] }
 0x59a   : > { %3788 = vmatmul.f32.gmra.mxu2 %v10992_v25  ;;  %3826 = vmatmul.f32.gmra.mxu3 %v10994_v21  ;;  %v3700_v51 = vld [vmem:[%s14566_s3 + $0xbe0] sm:$0xff] }
 0x59b   : > { %3892 = vmatpush.msrb.mxu1 %v3351_v7  ;;  %3930 = vmatpush.msrb.mxu2 %v3511_v1 }
 0x59d   : > { %v11025_v59 = vpop.f32.mrf.mxu2  ;;  %3893 = vmatpush.msrb.mxu1 %v3341_v34  ;;  %3931 = vmatpush.msrb.mxu2 %v3501_v27 }
 0x59e   : > { %v2939_v29 = vpop.f32.mrf.mxu0  ;;  %v2977_v19 = vpop.f32.mrf.mxu1 }
 0x59f   : > { %v2940_v30 = vadd.f32 %v2939_v29, %v10872_v50  ;;  %v15195_v50 = vld [vmem:[#allocation10_spill] sm:$0xff]  ;;  %v11062_v33 = vpop.f32.mrf.mxu3  ;;  %3894 = vmatpush.msrb.mxu1 %v3331_v49  ;;  %3932 = vmatpush.msrb.mxu2 %v3491_v48 }
 0x5a0   : > { %v2917_v34 = vadd.f32 %v11062_v33, %v10988_v53  ;;  %v3572_v53 = vld [vmem:[%s14566_s3 + $0x7e0] sm:$0xff]  ;;  %v3690_v33 = vld [vmem:[%s14566_s3 + $0xb90] sm:$0xff] }
 0x5a1   : > { %v11041_v4 = vadd.f32 %v2977_v19, %v2940_v30  ;;  %3248 = vmatmul.f32.gmra.mxu0 %v15195_v50  ;;  %3286 = vmatmul.f32.gmra.mxu1 %v15196_v54  ;;  %v2911_v19 = vadd.f32 %v10979_v6, %v10920_v43  ;;  %v15204_v50 = vld [vmem:[#allocation30_spill] sm:$0xff]  ;;  %v3632_v43 = vld [vmem:[%s14566_s3 + $0x9c0] sm:$0xff] }
 0x5a2   : > { %3791 = vmatmul.f32.gmra.mxu2 %v11029_v13  ;;  %3829 = vmatmul.f32.gmra.mxu3 %v11031_v61  ;;  %v3710_v6 = vld [vmem:[%s14566_s3 + $0xc30] sm:$0xff] }
 0x5a3   : > { %3895 = vmatpush.msrb.mxu1 %v3321_v62  ;;  %3933 = vmatpush.msrb.mxu2 %v3481_v20  ;;  %v3582_v62 = vld [vmem:[%s14566_s3 + $0x830] sm:$0xff] }
 0x5a4   : > { %3850 = vmatpush.msrb.mxu0 %v3710_v6 }
 0x5a5   : > { %v11060_v38 = vpop.f32.mrf.mxu2  ;;  %4032 = vmatpush.msra.mxu1 %v3632_v43 }
 0x5a6   : > { %v2942_v40 = vpop.f32.mrf.mxu0  ;;  %v2980_v32 = vpop.f32.mrf.mxu1  ;;  %3851 = vmatpush.msrb.mxu0 %v3700_v51 }
 0x5a7   : > { %v2943_v26 = vadd.f32 %v2942_v40, %v10897_v36  ;;  %v15199_v36 = vld [vmem:[#allocation19_spill] sm:$0xff]  ;;  %v11107_v10 = vpop.f32.mrf.mxu3  ;;  %v3701_v40 = vld [vmem:[%s14566_s3 + $0xbe8] sm:$0xff] }
 0x5a8   : > { %3852 = vmatpush.msrb.mxu0 %v3690_v33 }
 0x5a9   : > { %v11078_v35 = vadd.f32 %v2980_v32, %v2943_v26  ;;  %3251 = vmatmul.f32.gmra.mxu0 %v15199_v36  ;;  %3289 = vmatmul.f32.gmra.mxu1 %v15200_v11  ;;  %v3622_v32 = vld [vmem:[%s14566_s3 + $0x970] sm:$0xff]  ;;  %v3592_v11 = vld [vmem:[%s14566_s3 + $0x880] sm:$0xff] }
 0x5aa   : > { %3794 = vmatmul.f32.gmra.mxu2 %v11066_v17  ;;  %3832 = vmatmul.f32.gmra.mxu3 %v11068_v47 }
 0x5ab   : > { %4033 = vmatpush.msra.mxu1 %v3622_v32  ;;  %v3482_v32 = vld [vmem:[%s14566_s3 + $0x510] sm:$0xff] }
 0x5ad   : > { %v11097_v39 = vpop.f32.mrf.mxu2  ;;  %4034 = vmatpush.msra.mxu1 %v3612_v31 }
 0x5ae   : > { %v2945_v42 = vpop.f32.mrf.mxu0  ;;  %v2983_v45 = vpop.f32.mrf.mxu1 }
 0x5af   : > { %v2946_v58 = vadd.f32 %v2945_v42, %v10906_v22  ;;  %v2765_v22 = vadd.f32 %v10798_v63, %v2727_v23  ;;  %v15203_v63 = vld [vmem:[#allocation29_spill] sm:$0xff]  ;;  %v11140_v54 = vpop.f32.mrf.mxu3  ;;  %4035 = vmatpush.msra.mxu1 %v3602_v44  ;;  %v3660_v44 = vld [vmem:[%s14566_s3 + $0xaa0] sm:$0xff] }
 0x5b0   : > { %v3681_v42 = vld [vmem:[%s14566_s3 + $0xb48] sm:$0xff] }
 0x5b1   : > { %v11109_v29 = vadd.f32 %v2983_v45, %v2946_v58  ;;  %3254 = vmatmul.f32.gmra.mxu0 %v9397_v37  ;;  %3292 = vmatmul.f32.gmra.mxu1 %v9401_v12  ;;  %v11123_v37 = vmax.f32 %v2765_v22, 0.0  ;;  %v3711_v12 = vld [vmem:[%s14566_s3 + $0xc38] sm:$0xff]  ;;  %v3562_v45 = vld [vmem:[%s14566_s3 + $0x790] sm:$0xff] }
 0x5b2   : > { %3797 = vmatmul.f32.gmra.mxu2 %v11101_v8  ;;  %3835 = vmatmul.f32.gmra.mxu3 %v11103_v9 }
 0x5b3   : > { %3964 = vmatpush.msrb.mxu3 %v3711_v12  ;;  %4036 = vmatpush.msra.mxu1 %v3592_v11  ;;  %v3522_v12 = vld [vmem:[%s14566_s3 + $0x650] sm:$0xff]  ;;  %v3651_v11 = vld [vmem:[%s14566_s3 + $0xa58] sm:$0xff] }
 0x5b5   : > { %v11118_v30 = vpop.f32.mrf.mxu2  ;;  %3965 = vmatpush.msrb.mxu3 %v3701_v40  ;;  %4037 = vmatpush.msra.mxu1 %v3582_v62  ;;  %v3661_v40 = vld [vmem:[%s14566_s3 + $0xaa8] sm:$0xff] }
 0x5b6   : > { %v2948_v2 = vpop.f32.mrf.mxu0  ;;  %v2986_v28 = vpop.f32.mrf.mxu1 }
 0x5b7   : > { %v2949_v60 = vadd.f32 %v2948_v2, %v2911_v19  ;;  %3966 = vmatpush.msrb.mxu3 %v3691_v41  ;;  %v11170_v27 = vpop.f32.mrf.mxu3  ;;  %4038 = vmatpush.msra.mxu1 %v3572_v53  ;;  %v3542_v2 = vld [vmem:[%s14566_s3 + $0x6f0] sm:$0xff] }
 0x5b9   : > { %v11128_v56 = vadd.f32 %v2986_v28, %v2949_v60  ;;  %3257 = vmatmul.f32.gmra.mxu0 %v15203_v63  ;;  %3295 = vmatmul.f32.gmra.mxu1 %v15204_v50  ;;  %v3532_v28 = vld [vmem:[%s14566_s3 + $0x6a0] sm:$0xff] }
 0x5ba   : > { %3800 = vmatmul.f32.gmra.mxu2 %v11121_v57  ;;  %3838 = vmatmul.f32.gmra.mxu3 %v11123_v37  ;;  %v3680_v60 = vld [vmem:[%s14566_s3 + $0xb40] sm:$0xff] }
 0x5bb   : > { %3967 = vmatpush.msrb.mxu3 %v3681_v42  ;;  %4039 = vmatpush.msra.mxu1 %v3562_v45  ;;  %v3512_v50 = vld [vmem:[%s14566_s3 + $0x600] sm:$0xff]  ;;  %v3682_v42 = vld [vmem:[%s14566_s3 + $0xb50] sm:$0xff] }
 0x5bc   : > { %3853 = vmatpush.msrb.mxu0 %v3680_v60  ;;  %v3650_v45 = vld [vmem:[%s14566_s3 + $0xa50] sm:$0xff] }
 0x5bd   : > { %v11144_v0 = vpop.f32.mrf.mxu2  ;;  %4040 = vmatpush.msra.mxu1 %v3552_v5  ;;  %3968 = vmatpush.msrb.mxu3 %v3671_v16  ;;  %v3641_v5 = vld [vmem:[%s14566_s3 + $0xa08] sm:$0xff] }
 0x5be   : > { %v2951_v46 = vpop.f32.mrf.mxu0  ;;  %v2989_v7 = vpop.f32.mrf.mxu1 }
 0x5bf   : > { %v2952_v1 = vadd.f32 %v2951_v46, %v2914_v55  ;;  %v11205_v19 = vpop.f32.mrf.mxu3  ;;  %4041 = vmatpush.msra.mxu1 %v3542_v2  ;;  %v3502_v55 = vld [vmem:[%s14566_s3 + $0x5b0] sm:$0xff]  ;;  %3969 = vmatpush.msrb.mxu3 %v3661_v40  ;;  %v3672_v2 = vld [vmem:[%s14566_s3 + $0xb00] sm:$0xff]  ;;  %v3473_v40 = vld [vmem:[%s14566_s3 + $0x4c8] sm:$0xff] }
 0x5c1   : > { %v11152_v26 = vadd.f32 %v2989_v7, %v2952_v1  ;;  %3896 = vmatmul.f32.vlgmr.msrb.gmra.mxu1 %v10923_v24  ;;  %v3492_v7 = vld [vmem:[%s14566_s3 + $0x560] sm:$0xff]  ;;  %v3670_v1 = vld [vmem:[%s14566_s3 + $0xaf0] sm:$0xff]  ;;  %3970 = vmatpush.msrb.mxu3 %v3651_v11 }
 0x5c2   : > { %3934 = vmatmul.f32.vlgmr.msrb.gmra.mxu2 %v10925_v18  ;;  %4042 = vmatpush.msra.mxu1 %v3532_v28  ;;  %v3662_v28 = vld [vmem:[%s14566_s3 + $0xab0] sm:$0xff] }
 0x5c3   : > { %3854 = vmatpush.msrb.mxu0 %v3670_v1  ;;  %3971 = vmatpush.msrb.mxu3 %v3641_v5  ;;  %v3642_v1 = vld [vmem:[%s14566_s3 + $0xa10] sm:$0xff] }
 0x5c4   : > { %4043 = vmatpush.msra.mxu1 %v3522_v12  ;;  %v3652_v12 = vld [vmem:[%s14566_s3 + $0xa60] sm:$0xff] }
 0x5c5   : > { %v11172_v36 = vpop.f32.mrf.mxu2  ;;  %3855 = vmatpush.msrb.mxu0 %v3660_v44  ;;  %4108 = vmatpush.msra.mxu3 %v3473_v40  ;;  %v3472_v44 = vld [vmem:[%s14566_s3 + $0x4c0] sm:$0xff] }
 0x5c6   : > { %v2954_v49 = vpop.f32.mrf.mxu0  ;;  %v2992_v48 = vpop.f32.mrf.mxu1  ;;  %4044 = vmatpush.msra.mxu1 %v3512_v50 }
 0x5c7   : > { %v2955_v52 = vadd.f32 %v2954_v49, %v2917_v34  ;;  %v11236_v46 = vpop.f32.mrf.mxu3  ;;  %v3712_v34 = vld [vmem:[%s14566_s3 + $0xc40] sm:$0xff]  ;;  %v3702_v49 = vld [vmem:[%s14566_s3 + $0xbf0] sm:$0xff]  ;;  %3856 = vmatpush.msrb.mxu0 %v3650_v45  ;;  %v3453_v45 = vld [vmem:[%s14566_s3 + $0x428] sm:$0xff] }
 0x5c8   : > { %4045 = vmatpush.msra.mxu1 %v3502_v55  ;;  %4078 = vmatpush.msra.mxu2 %v3712_v34  ;;  %v3013_v34 = vadd.f32 %v11025_v59, %v11004_v15  ;;  %v3462_v15 = vld [vmem:[%s14566_s3 + $0x470] sm:$0xff]  ;;  %v3443_v59 = vld [vmem:[%s14566_s3 + $0x3d8] sm:$0xff] }
 0x5c9   : > { %v11180_v20 = vadd.f32 %v2992_v48, %v2955_v52  ;;  %3899 = vmatmul.f32.gmra.mxu1 %v10956_v14  ;;  %v3692_v52 = vld [vmem:[%s14566_s3 + $0xba0] sm:$0xff] }
 0x5ca   : > { %3937 = vmatmul.f32.gmra.mxu2 %v10958_v3  ;;  %4046 = vmatpush.msra.mxu1 %v3492_v7  ;;  %v3640_v7 = vld [vmem:[%s14566_s3 + $0xa00] sm:$0xff]  ;;  %v3051_v5 = vadd.f32 %v11107_v10, %v3013_v34  ;;  %v3433_v10 = vld [vmem:[%s14566_s3 + $0x388] sm:$0xff] }
 0x5cb   : > { %4079 = vmatpush.msra.mxu2 %v3702_v49  ;;  %3857 = vmatpush.msrb.mxu0 %v3640_v7 }
 0x5cc   : > { %4047 = vmatpush.msra.mxu1 %v3482_v32  ;;  %v3463_v32 = vld [vmem:[%s14566_s3 + $0x478] sm:$0xff] }
 0x5cd   : > { %v11196_v58 = vpop.f32.mrf.mxu2  ;;  %4080 = vmatpush.msra.mxu2 %v3692_v52  ;;  %4109 = vmatpush.msra.mxu3 %v3463_v32 }
 0x5ce   : > { %v11201_v23 = vpop.f32.mrf.mxu0  ;;  %v11203_v22 = vpop.f32.mrf.mxu1  ;;  %3994 = vmatpush.msra.mxu0 %v3472_v44 }
 0x5cf   : > { %v11272_v48 = vpop.f32.mrf.mxu3  ;;  %4081 = vmatpush.msra.mxu2 %v3682_v42  ;;  %4110 = vmatpush.msra.mxu3 %v3453_v45 }
 0x5d0   : > { %3995 = vmatpush.msra.mxu0 %v3462_v15 }
 0x5d1   : > { %3902 = vmatmul.f32.gmra.mxu1 %v10992_v25  ;;  %4082 = vmatpush.msra.mxu2 %v3672_v2  ;;  %v3089_v2 = vadd.f32 %v11201_v23, %v3051_v5  ;;  %v3016_v23 = vadd.f32 %v11060_v38, %v11041_v4  ;;  %v3442_v4 = vld [vmem:[%s14566_s3 + $0x3d0] sm:$0xff]  ;;  %v3423_v38 = vld [vmem:[%s14566_s3 + $0x338] sm:$0xff] }
 0x5d2   : > { %3940 = vmatmul.f32.gmra.mxu2 %v10994_v21  ;;  %4111 = vmatpush.msra.mxu3 %v3443_v59 }
 0x5d3   : > { %4083 = vmatpush.msra.mxu2 %v3662_v28  ;;  %v3452_v28 = vld [vmem:[%s14566_s3 + $0x420] sm:$0xff]  ;;  %v3127_v40 = vadd.f32 %v11203_v22, %v3089_v2  ;;  %v3054_v32 = vadd.f32 %v11140_v54, %v3016_v23  ;;  %v3413_v54 = vld [vmem:[%s14566_s3 + $0x2e8] sm:$0xff]  ;;  %v3703_v23 = vld [vmem:[%s14566_s3 + $0xbf8] sm:$0xff] }
 0x5d4   : > { %3996 = vmatpush.msra.mxu0 %v3452_v28  ;;  %4112 = vmatpush.msra.mxu3 %v3433_v10  ;;  %v3432_v22 = vld [vmem:[%s14566_s3 + $0x380] sm:$0xff] }
 0x5d5   : > { %v11224_v63 = vpop.f32.mrf.mxu2  ;;  %4084 = vmatpush.msra.mxu2 %v3652_v12 }
 0x5d6   : > { %v11229_v43 = vpop.f32.mrf.mxu0  ;;  %v11231_v6 = vpop.f32.mrf.mxu1  ;;  %v3165_v44 = vadd.f32 %v11224_v63, %v3127_v40  ;;  %3997 = vmatpush.msra.mxu0 %v3442_v4  ;;  %4113 = vmatpush.msra.mxu3 %v3423_v38  ;;  %v3713_v63 = vld [vmem:[%s14566_s3 + $0xc48] sm:$0xff]  ;;  %v3422_v40 = vld [vmem:[%s14566_s3 + $0x330] sm:$0xff]  ;;  %v3683_v4 = vld [vmem:[%s14566_s3 + $0xb58] sm:$0xff]  ;;  %v3022_v38 = vadd.f32 %v11118_v30, %v11109_v29 }
 0x5d7   : > { %v11300_v60 = vpop.f32.mrf.mxu3  ;;  %4085 = vmatpush.msra.mxu2 %v3642_v1  ;;  %v3092_v45 = vadd.f32 %v11229_v43, %v3054_v32  ;;  %v3019_v43 = vadd.f32 %v11097_v39, %v11078_v35  ;;  %4192 = vmatpush.msrb.mxu1 %v3713_v63  ;;  %v3393_v63 = vld [vmem:[%s14566_s3 + $0x248] sm:$0xff]  ;;  %v3464_v29 = vld [vmem:[%s14566_s3 + $0x480] sm:$0xff] }
 0x5d8   : > { %3998 = vmatpush.msra.mxu0 %v3432_v22  ;;  %4114 = vmatpush.msra.mxu3 %v3413_v54 }
 0x5d9   : > { %3905 = vmatmul.f32.gmra.mxu1 %v11029_v13  ;;  %v3130_v28 = vadd.f32 %v11231_v6, %v3092_v45  ;;  %v3057_v35 = vadd.f32 %v11170_v27, %v3019_v43  ;;  %v3403_v45 = vld [vmem:[%s14566_s3 + $0x298] sm:$0xff]  ;;  %v3693_v27 = vld [vmem:[%s14566_s3 + $0xba8] sm:$0xff] }
 0x5da   : > { %3943 = vmatmul.f32.gmra.mxu2 %v11031_v61  ;;  %3999 = vmatpush.msra.mxu0 %v3422_v40  ;;  %v3663_v40 = vld [vmem:[%s14566_s3 + $0xab8] sm:$0xff] }
 0x5db   : > { %4193 = vmatpush.msrb.mxu1 %v3703_v23  ;;  %4115 = vmatpush.msra.mxu3 %v3403_v45  ;;  %v3025_v45 = vadd.f32 %v11144_v0, %v11128_v56 }
 0x5dd   : > { %v11252_v31 = vpop.f32.mrf.mxu2  ;;  %4194 = vmatpush.msrb.mxu1 %v3693_v27  ;;  %4116 = vmatpush.msra.mxu3 %v3393_v63 }
 0x5de   : > { %v11254_v51 = vpop.f32.mrf.mxu0  ;;  %v11256_v41 = vpop.f32.mrf.mxu1  ;;  %v3168_v39 = vadd.f32 %v11252_v31, %v3130_v28  ;;  %v3474_v31 = vld [vmem:[%s14566_s3 + $0x4d0] sm:$0xff] }
 0x5df   : > { %v3202_v42 = vpop.f32.mrf.mxu3  ;;  %v3095_v6 = vadd.f32 %v11254_v51, %v3057_v35  ;;  %v3412_v51 = vld [vmem:[%s14566_s3 + $0x2e0] sm:$0xff]  ;;  %4222 = vmatpush.msrb.mxu2 %v3474_v31  ;;  %4195 = vmatpush.msrb.mxu1 %v3683_v4  ;;  %v3402_v28 = vld [vmem:[%s14566_s3 + $0x290] sm:$0xff]  ;;  %v3383_v35 = vld [vmem:[%s14566_s3 + $0x1f8] sm:$0xff] }
 0x5e0   : > { %v3203_v5 = vadd.f32 %v3202_v42, %v3165_v44  ;;  %4000 = vmatpush.msra.mxu0 %v3412_v51  ;;  %4117 = vmatpush.msra.mxu3 %v3383_v35  ;;  %v3643_v4 = vld [vmem:[%s14566_s3 + $0xa18] sm:$0xff] }
 0x5e1   : > { %3908 = vmatmul.f32.gmra.mxu1 %v11066_v17  ;;  %v3133_v30 = vadd.f32 %v11256_v41, %v3095_v6  ;;  %4223 = vmatpush.msrb.mxu2 %v3464_v29  ;;  %v3444_v6 = vld [vmem:[%s14566_s3 + $0x3e0] sm:$0xff]  ;;  %v3063_v29 = vadd.f32 %v11236_v46, %v3025_v45  ;;  %v3353_v46 = vld [vmem:[%s14566_s3 + $0x108] sm:$0xff] }
 0x5e2   : > { %3946 = vmatmul.f32.gmra.mxu2 %v11068_v47  ;;  %4001 = vmatpush.msra.mxu0 %v3402_v28  ;;  %v3028_v28 = vadd.f32 %v11172_v36, %v11152_v26  ;;  %v3404_v26 = vld [vmem:[%s14566_s3 + $0x2a0] sm:$0xff] }
 0x5e4   : > { %v3066_v45 = vadd.f32 %v11272_v48, %v3028_v28  ;;  %v3332_v48 = vld [vmem:[%s14566_s3 + $0x60] sm:$0xff]  ;;  %v3354_v28 = vld [vmem:[%s14566_s3 + $0x110] sm:$0xff] }
 0x5e5   : > { %v11277_v62 = vpop.f32.mrf.mxu2 }
 0x5e6   : > { %v11279_v53 = vpop.f32.mrf.mxu0  ;;  %v11281_v33 = vpop.f32.mrf.mxu1  ;;  %v3171_v41 = vadd.f32 %v11277_v62, %v3133_v30  ;;  %v3392_v62 = vld [vmem:[%s14566_s3 + $0x240] sm:$0xff] }
 0x5e7   : > { %v3205_v34 = vpop.f32.mrf.mxu3  ;;  %4002 = vmatpush.msra.mxu0 %v3392_v62  ;;  %v3394_v62 = vld [vmem:[%s14566_s3 + $0x250] sm:$0xff] }
 0x5e8   : > { %v3206_v22 = vadd.f32 %v3205_v34, %v3168_v39 }
 0x5e9   : > { %3911 = vmatmul.f32.gmra.mxu1 %v11101_v8 }
 0x5ea   : > { %3949 = vmatmul.f32.gmra.mxu2 %v11103_v9 }
 0x5ed   : > { %v11302_v16 = vpop.f32.mrf.mxu2 }
 0x5ee   : > { %v11307_v50 = vpop.f32.mrf.mxu0  ;;  %v11309_v55 = vpop.f32.mrf.mxu1 }
 0x5ef   : > { %v3208_v32 = vpop.f32.mrf.mxu3 }
 0x5f0   : > { %v3209_v27 = vadd.f32 %v3208_v32, %v3171_v41  ;;  %v3434_v32 = vld [vmem:[%s14566_s3 + $0x390] sm:$0xff] }
 0x5f1   : > { %3914 = vmatmul.f32.gmra.mxu1 %v11121_v57 }
 0x5f2   : > { %3952 = vmatmul.f32.gmra.mxu2 %v11123_v37 }
 0x5f5   : > { %v11330_v11 = vpop.f32.mrf.mxu2 }
 0x5f6   : > { %v11332_v49 = vpop.f32.mrf.mxu0  ;;  %v11334_v52 = vpop.f32.mrf.mxu1 }
 0x5f7   : > { %v3211_v31 = vpop.f32.mrf.mxu3 }
 0x5f9   : > { %4048 = vmatmul.f32.vlgmr.msra.gmra.mxu1 %v10925_v18 }
 0x5fd   : > { %v11356_v12 = vpop.f32.mrf.mxu2 }
 0x5fe   : > { %v11358_v7 = vpop.f32.mrf.mxu0  ;;  %v11360_v1 = vpop.f32.mrf.mxu1 }
 0x601   : > { %4051 = vmatmul.f32.gmra.mxu1 %v10958_v3 }
 0x605   : > { %v11384_v2 = vpop.f32.mrf.mxu2 }
 0x606   : > { %v3240_v15 = vpop.f32.mrf.mxu0  ;;  %v3278_v59 = vpop.f32.mrf.mxu1 }
 0x607   : > { %v3241_v10 = vadd.f32 %v3240_v15, %v3203_v5  ;;  %v3673_v15 = vld [vmem:[%s14566_s3 + $0xb08] sm:$0xff] }
 0x608   : > { %4196 = vmatpush.msrb.mxu1 %v3673_v15 }
 0x609   : > { %v3279_v42 = vadd.f32 %v3278_v59, %v3241_v10  ;;  %4054 = vmatmul.f32.gmra.mxu1 %v10994_v21  ;;  %v3454_v59 = vld [vmem:[%s14566_s3 + $0x430] sm:$0xff]  ;;  %v3060_v10 = vadd.f32 %v11205_v19, %v3022_v38  ;;  %v3653_v19 = vld [vmem:[%s14566_s3 + $0xa68] sm:$0xff] }
 0x60a   : > { %4224 = vmatpush.msrb.mxu2 %v3454_v59  ;;  %4197 = vmatpush.msrb.mxu1 %v3663_v40  ;;  %v3382_v38 = vld [vmem:[%s14566_s3 + $0x1f0] sm:$0xff]  ;;  %v3372_v59 = vld [vmem:[%s14566_s3 + $0x1a0] sm:$0xff] }
 0x60b   : > { %v11397_v44 = vmax.f32 %v3279_v42, 0.0  ;;  %v3098_v39 = vadd.f32 %v11279_v53, %v3060_v10  ;;  %v3373_v53 = vld [vmem:[%s14566_s3 + $0x1a8] sm:$0xff]  ;;  %4003 = vmatpush.msra.mxu0 %v3382_v38  ;;  %v3104_v38 = vadd.f32 %v11332_v49, %v3066_v45 }
 0x60c   : > { %4198 = vmatpush.msrb.mxu1 %v3653_v19  ;;  %4225 = vmatpush.msrb.mxu2 %v3444_v6  ;;  %v3214_v19 = vpop.f32.mrf.mxu3  ;;  %v3352_v6 = vld [vmem:[%s14566_s3 + $0x100] sm:$0xff] }
 0x60d   : > { %v11416_v54 = vpop.f32.mrf.mxu2  ;;  %6496 = vmatmul.msk.f32.vlgmr.msrb.gmra.mxu0 %vm3744_vm5, %v11397_v44  ;;  %6503 = vmatmul.msk.f32.vlgmr.msrb.gmra.mxu3 %vm3744_vm5, %v11397_v44 }
 0x60e   : > { %6510 = vmatmul.msk.f32.vlgmr.msra.gmra.mxu2 %vm3744_vm5, %v11397_v44  ;;  %v3243_v43 = vpop.f32.mrf.mxu0  ;;  %v3281_v5 = vpop.f32.mrf.mxu1  ;;  %4118 = vmatpush.msra.mxu3 %v3373_v53  ;;  %v3333_v53 = vld [vmem:[%s14566_s3 + $0x68] sm:$0xff] }
 0x60f   : > { %v3244_v34 = vadd.f32 %v3243_v43, %v3206_v22  ;;  %v3136_v22 = vadd.f32 %v11281_v33, %v3098_v39  ;;  %4199 = vmatpush.msrb.mxu1 %v3643_v4  ;;  %v3424_v43 = vld [vmem:[%s14566_s3 + $0x340] sm:$0xff]  ;;  %4226 = vmatpush.msrb.mxu2 %v3434_v32  ;;  %v3101_v33 = vadd.f32 %v11307_v50, %v3063_v29  ;;  %v3362_v50 = vld [vmem:[%s14566_s3 + $0x150] sm:$0xff]  ;;  %v3323_v4 = vld [vmem:[%s14566_s3 + $0x18] sm:$0xff] }
 0x610   : > { %4004 = vmatpush.msra.mxu0 %v3372_v59 }
 0x611   : > { %v3282_v23 = vadd.f32 %v3281_v5, %v3244_v34  ;;  %4057 = vmatmul.f32.gmra.mxu1 %v11031_v61  ;;  %v3363_v5 = vld [vmem:[%s14566_s3 + $0x158] sm:$0xff]  ;;  %v3174_v30 = vadd.f32 %v11302_v16, %v3136_v22  ;;  %4227 = vmatpush.msrb.mxu2 %v3424_v43  ;;  %v3414_v16 = vld [vmem:[%s14566_s3 + $0x2f0] sm:$0xff]  ;;  %v3139_v36 = vadd.f32 %v11309_v55, %v3101_v33 }
 0x612   : > { %4119 = vmatpush.msra.mxu3 %v3363_v5  ;;  %4005 = vmatpush.msra.mxu0 %v3362_v50  ;;  %v3374_v43 = vld [vmem:[%s14566_s3 + $0x1b0] sm:$0xff]  ;;  %v3142_v5 = vadd.f32 %v11334_v52, %v3104_v38  ;;  %v3624_v52 = vld [vmem:[%s14566_s3 + $0x980] sm:$0xff]  ;;  %v3435_v38 = vld [vmem:[%s14566_s3 + $0x398] sm:$0xff] }
 0x613   : > { %v11450_v42 = vmax.f32 %v3282_v23, 0.0  ;;  %v3212_v10 = vadd.f32 %v3211_v31, %v3174_v30  ;;  %v3343_v23 = vld [vmem:[%s14566_s3 + $0xb8] sm:$0xff]  ;;  %4228 = vmatpush.msrb.mxu2 %v3414_v16  ;;  %v3177_v55 = vadd.f32 %v11330_v11, %v3139_v36  ;;  %v3342_v31 = vld [vmem:[%s14566_s3 + $0xb0] sm:$0xff]  ;;  %v3384_v11 = vld [vmem:[%s14566_s3 + $0x200] sm:$0xff] }
 0x614   : > { %4120 = vmatpush.msra.mxu3 %v3353_v46  ;;  %4006 = vmatpush.msra.mxu0 %v3352_v6  ;;  %v3364_v30 = vld [vmem:[%s14566_s3 + $0x160] sm:$0xff]  ;;  %v3180_v33 = vadd.f32 %v11356_v12, %v3142_v5  ;;  %v3475_v46 = vld [vmem:[%s14566_s3 + $0x4d8] sm:$0xff]  ;;  %v3633_v16 = vld [vmem:[%s14566_s3 + $0x9c8] sm:$0xff]  ;;  %v3217_v50 = vpop.f32.mrf.mxu3 }
 0x615   : > { %v11466_v51 = vpop.f32.mrf.mxu2  ;;  %6497 = vmatmul.msk.f32.gmra.mxu0 %vm3744_vm5, %v11450_v42  ;;  %6504 = vmatmul.msk.f32.gmra.mxu3 %vm3744_vm5, %v11450_v42  ;;  %v3215_v32 = vadd.f32 %v3214_v19, %v3177_v55  ;;  %v3623_v6 = vld [vmem:[%s14566_s3 + $0x978] sm:$0xff]  ;;  %v3584_v5 = vld [vmem:[%s14566_s3 + $0x840] sm:$0xff] }
 0x616   : > { %6511 = vmatmul.msk.f32.gmra.mxu2 %vm3744_vm5, %v11450_v42  ;;  %v3246_v56 = vpop.f32.mrf.mxu0  ;;  %v3284_v0 = vpop.f32.mrf.mxu1  ;;  %4121 = vmatpush.msra.mxu3 %v3343_v23 }
 0x617   : > { %v3247_v63 = vadd.f32 %v3246_v56, %v3209_v27  ;;  %4229 = vmatpush.msrb.mxu2 %v3404_v26  ;;  %4007 = vmatpush.msra.mxu0 %v3342_v31  ;;  %v3465_v26 = vld [vmem:[%s14566_s3 + $0x488] sm:$0xff] }
 0x618   : > { %4122 = vmatpush.msra.mxu3 %v3333_v53  ;;  %4336 = vmatpush.msra.mxu1 %v3475_v46  ;;  %v3604_v53 = vld [vmem:[%s14566_s3 + $0x8e0] sm:$0xff]  ;;  %v3613_v31 = vld [vmem:[%s14566_s3 + $0x928] sm:$0xff]  ;;  %v3395_v46 = vld [vmem:[%s14566_s3 + $0x258] sm:$0xff] }
 0x619   : > { %v3285_v34 = vadd.f32 %v3284_v0, %v3247_v63  ;;  %4060 = vmatmul.f32.gmra.mxu1 %v11068_v47  ;;  %4230 = vmatpush.msrb.mxu2 %v3394_v62  ;;  %v3031_v0 = vadd.f32 %v11196_v58, %v11180_v20  ;;  %v3322_v20 = vld [vmem:[%s14566_s3 + $0x10] sm:$0xff]  ;;  %v3455_v62 = vld [vmem:[%s14566_s3 + $0x438] sm:$0xff] }
 0x61a   : > { %4123 = vmatpush.msra.mxu3 %v3323_v4  ;;  %4008 = vmatpush.msra.mxu0 %v3332_v48  ;;  %v3634_v58 = vld [vmem:[%s14566_s3 + $0x9d0] sm:$0xff] }
 0x61b   : > { %v11494_v15 = vmax.f32 %v3285_v34, 0.0  ;;  %4231 = vmatpush.msrb.mxu2 %v3384_v11  ;;  %v3069_v34 = vadd.f32 %v11300_v60, %v3031_v0  ;;  %4337 = vmatpush.msra.mxu1 %v3465_v26  ;;  %v3594_v4 = vld [vmem:[%s14566_s3 + $0x890] sm:$0xff]  ;;  %v3324_v11 = vld [vmem:[%s14566_s3 + $0x20] sm:$0xff] }
 0x61c   : > { %4260 = vmatpush.msrb.mxu3 %v3634_v58  ;;  %4009 = vmatpush.msra.mxu0 %v3322_v20  ;;  %v3220_v48 = vpop.f32.mrf.mxu3  ;;  %v3603_v20 = vld [vmem:[%s14566_s3 + $0x8d8] sm:$0xff]  ;;  %v3554_v26 = vld [vmem:[%s14566_s3 + $0x750] sm:$0xff] }
 0x61d   : > { %v11510_v41 = vpop.f32.mrf.mxu2  ;;  %6498 = vmatmul.msk.f32.gmra.mxu0 %vm3744_vm5, %v11494_v15  ;;  %6505 = vmatmul.msk.f32.gmra.mxu3 %vm3744_vm5, %v11494_v15  ;;  %v3107_v60 = vadd.f32 %v11358_v7, %v3069_v34  ;;  %v3415_v58 = vld [vmem:[%s14566_s3 + $0x2f8] sm:$0xff] }
 0x61e   : > { %6512 = vmatmul.msk.f32.gmra.mxu2 %vm3744_vm5, %v11494_v15  ;;  %v3249_v40 = vpop.f32.mrf.mxu0  ;;  %v3287_v35 = vpop.f32.mrf.mxu1  ;;  %4261 = vmatpush.msrb.mxu3 %v3624_v52 }
 0x61f   : > { %v3250_v39 = vadd.f32 %v3249_v40, %v3212_v10  ;;  %4232 = vmatpush.msrb.mxu2 %v3374_v43  ;;  %4146 = vmatpush.msrb.mxu0 %v3633_v16  ;;  %v3218_v10 = vadd.f32 %v3217_v50, %v3180_v33  ;;  %v3344_v40 = vld [vmem:[%s14566_s3 + $0xc0] sm:$0xff]  ;;  %v3145_v36 = vadd.f32 %v11360_v1, %v3107_v60  ;;  %v3334_v1 = vld [vmem:[%s14566_s3 + $0x70] sm:$0xff]  ;;  %v3405_v33 = vld [vmem:[%s14566_s3 + $0x2a8] sm:$0xff] }
 0x620   : > { %4338 = vmatpush.msra.mxu1 %v3455_v62  ;;  %v3385_v50 = vld [vmem:[%s14566_s3 + $0x208] sm:$0xff]  ;;  %v3583_v60 = vld [vmem:[%s14566_s3 + $0x838] sm:$0xff] }
 0x621   : > { %v3288_v27 = vadd.f32 %v3287_v35, %v3250_v39  ;;  %4063 = vmatmul.f32.gmra.mxu1 %v11103_v9  ;;  %4233 = vmatpush.msrb.mxu2 %v3364_v30  ;;  %v3614_v35 = vld [vmem:[%s14566_s3 + $0x930] sm:$0xff]  ;;  %v3183_v45 = vadd.f32 %v11384_v2, %v3145_v36  ;;  %v3615_v62 = vld [vmem:[%s14566_s3 + $0x938] sm:$0xff] }
 0x622   : > { %4262 = vmatpush.msrb.mxu3 %v3614_v35  ;;  %4147 = vmatpush.msrb.mxu0 %v3623_v6  ;;  %v3365_v35 = vld [vmem:[%s14566_s3 + $0x168] sm:$0xff] }
 0x623   : > { %v11544_v56 = vmax.f32 %v3288_v27, 0.0  ;;  %4234 = vmatpush.msrb.mxu2 %v3354_v28  ;;  %v3445_v27 = vld [vmem:[%s14566_s3 + $0x3e8] sm:$0xff]  ;;  %v3221_v0 = vadd.f32 %v3220_v48, %v3183_v45  ;;  %v3564_v28 = vld [vmem:[%s14566_s3 + $0x7a0] sm:$0xff] }
 0x624   : > { %4263 = vmatpush.msrb.mxu3 %v3604_v53  ;;  %4148 = vmatpush.msrb.mxu0 %v3613_v31  ;;  %v3563_v53 = vld [vmem:[%s14566_s3 + $0x798] sm:$0xff]  ;;  %v3605_v45 = vld [vmem:[%s14566_s3 + $0x8e8] sm:$0xff] }
 0x625   : > { %v11554_v22 = vpop.f32.mrf.mxu2  ;;  %6499 = vmatmul.msk.f32.gmra.mxu0 %vm3744_vm5, %v11544_v56  ;;  %6506 = vmatmul.msk.f32.gmra.mxu3 %vm3744_vm5, %v11544_v56  ;;  %v3595_v31 = vld [vmem:[%s14566_s3 + $0x898] sm:$0xff]  ;;  %v3325_v48 = vld [vmem:[%s14566_s3 + $0x28] sm:$0xff] }
 0x626   : > { %6513 = vmatmul.msk.f32.gmra.mxu2 %vm3744_vm5, %v11544_v56  ;;  %v3252_v49 = vpop.f32.mrf.mxu0  ;;  %v3290_v63 = vpop.f32.mrf.mxu1  ;;  %4339 = vmatpush.msra.mxu1 %v3445_v27  ;;  %v3335_v27 = vld [vmem:[%s14566_s3 + $0x78] sm:$0xff] }
 0x627   : > { %v3253_v29 = vadd.f32 %v3252_v49, %v3215_v32  ;;  %4235 = vmatpush.msrb.mxu2 %v3344_v40  ;;  %4264 = vmatpush.msrb.mxu3 %v3594_v4  ;;  %v3625_v40 = vld [vmem:[%s14566_s3 + $0x988] sm:$0xff] }
 0x628   : > { %4340 = vmatpush.msra.mxu1 %v3435_v38  ;;  %4149 = vmatpush.msrb.mxu0 %v3603_v20  ;;  %v3553_v4 = vld [vmem:[%s14566_s3 + $0x748] sm:$0xff]  ;;  %v3534_v38 = vld [vmem:[%s14566_s3 + $0x6b0] sm:$0xff]  ;;  %v3524_v20 = vld [vmem:[%s14566_s3 + $0x660] sm:$0xff] }
 0x629   : > { %v3291_v59 = vadd.f32 %v3290_v63, %v3253_v29  ;;  %4066 = vmatmul.f32.gmra.mxu1 %v11123_v37  ;;  %4236 = vmatpush.msrb.mxu2 %v3334_v1  ;;  %v3425_v63 = vld [vmem:[%s14566_s3 + $0x348] sm:$0xff] }
 0x62a   : > { %4341 = vmatpush.msra.mxu1 %v3425_v63  ;;  %v3593_v29 = vld [vmem:[%s14566_s3 + $0x888] sm:$0xff]  ;;  %4265 = vmatpush.msrb.mxu3 %v3584_v5  ;;  %v3514_v5 = vld [vmem:[%s14566_s3 + $0x610] sm:$0xff] }
 0x62b   : > { %v11588_v12 = vmax.f32 %v3291_v59, 0.0  ;;  %4237 = vmatpush.msrb.mxu2 %v3324_v11  ;;  %v3574_v59 = vld [vmem:[%s14566_s3 + $0x7f0] sm:$0xff]  ;;  %4150 = vmatpush.msrb.mxu0 %v3593_v29  ;;  %v3345_v1 = vld [vmem:[%s14566_s3 + $0xc8] sm:$0xff]  ;;  %v3543_v11 = vld [vmem:[%s14566_s3 + $0x6f8] sm:$0xff] }
 0x62c   : > { %4342 = vmatpush.msra.mxu1 %v3415_v58  ;;  %4266 = vmatpush.msrb.mxu3 %v3574_v59  ;;  %v3533_v58 = vld [vmem:[%s14566_s3 + $0x6a8] sm:$0xff]  ;;  %v3555_v59 = vld [vmem:[%s14566_s3 + $0x758] sm:$0xff] }
 0x62d   : > { %6500 = vmatmul.msk.f32.gmra.mxu0 %vm3744_vm5, %v11588_v12  ;;  %6507 = vmatmul.msk.f32.gmra.mxu3 %vm3744_vm5, %v11588_v12  ;;  %v11609_v39 = vpop.f32.mrf.mxu2  ;;  %v3565_v29 = vld [vmem:[%s14566_s3 + $0x7a8] sm:$0xff] }
 0x62e   : > { %6514 = vmatmul.msk.f32.gmra.mxu2 %vm3744_vm5, %v11588_v12  ;;  %v3255_v23 = vpop.f32.mrf.mxu0  ;;  %v3293_v7 = vpop.f32.mrf.mxu1  ;;  %4343 = vmatpush.msra.mxu1 %v3405_v33  ;;  %v3504_v33 = vld [vmem:[%s14566_s3 + $0x5c0] sm:$0xff] }
 0x62f   : > { %v3256_v19 = vadd.f32 %v3255_v23, %v3218_v10  ;;  %4151 = vmatpush.msrb.mxu0 %v3583_v60  ;;  %v3375_v10 = vld [vmem:[%s14566_s3 + $0x1b8] sm:$0xff]  ;;  %4267 = vmatpush.msrb.mxu3 %v3564_v28  ;;  %v3545_v60 = vld [vmem:[%s14566_s3 + $0x708] sm:$0xff] }
 0x630   : > { %4344 = vmatpush.msra.mxu1 %v3395_v46  ;;  %v3635_v23 = vld [vmem:[%s14566_s3 + $0x9d8] sm:$0xff]  ;;  %v3513_v28 = vld [vmem:[%s14566_s3 + $0x608] sm:$0xff] }
 0x631   : > { %v3294_v55 = vadd.f32 %v3293_v7, %v3256_v19  ;;  %6517 = vmatmul.msk.f32.vlgmr.msrb.gmra.mxu1 %vm3744_vm5, %v11397_v44  ;;  %v3573_v7 = vld [vmem:[%s14566_s3 + $0x7e8] sm:$0xff]  ;;  %4374 = vmatpush.msra.mxu2 %v3635_v23  ;;  %v3355_v19 = vld [vmem:[%s14566_s3 + $0x118] sm:$0xff] }
 0x632   : > { %4345 = vmatpush.msra.mxu1 %v3385_v50  ;;  %4152 = vmatpush.msrb.mxu0 %v3573_v7  ;;  %v3503_v7 = vld [vmem:[%s14566_s3 + $0x5b8] sm:$0xff] }
 0x633   : > { %v11635_v2 = vmax.f32 %v3294_v55, 0.0  ;;  %4375 = vmatpush.msra.mxu2 %v3625_v40  ;;  %4268 = vmatpush.msrb.mxu3 %v3554_v26  ;;  %v3544_v55 = vld [vmem:[%s14566_s3 + $0x700] sm:$0xff]  ;;  %v3535_v40 = vld [vmem:[%s14566_s3 + $0x6b8] sm:$0xff] }
 0x634   : > { %4346 = vmatpush.msra.mxu1 %v3375_v10  ;;  %4153 = vmatpush.msrb.mxu0 %v3563_v53  ;;  %v3494_v10 = vld [vmem:[%s14566_s3 + $0x570] sm:$0xff]  ;;  %v3484_v26 = vld [vmem:[%s14566_s3 + $0x520] sm:$0xff] }
 0x635   : > { %6501 = vmatmul.msk.f32.gmra.mxu0 %vm3744_vm5, %v11635_v2  ;;  %6508 = vmatmul.msk.f32.gmra.mxu3 %vm3744_vm5, %v11635_v2  ;;  %v11664_v30 = vpop.f32.mrf.mxu2 }
 0x636   : > { %6515 = vmatmul.msk.f32.gmra.mxu2 %vm3744_vm5, %v11635_v2  ;;  %v3258_v32 = vpop.f32.mrf.mxu0  ;;  %v3296_v49 = vpop.f32.mrf.mxu1  ;;  %4347 = vmatpush.msra.mxu1 %v3365_v35  ;;  %v3493_v35 = vld [vmem:[%s14566_s3 + $0x568] sm:$0xff] }
 0x637   : > { %v3259_v43 = vadd.f32 %v3258_v32, %v3221_v0  ;;  %4376 = vmatpush.msra.mxu2 %v3615_v62  ;;  %4269 = vmatpush.msrb.mxu3 %v3544_v55  ;;  %v11761_v0 = vpop.f32.mrf.mxu3  ;;  %v3585_v32 = vld [vmem:[%s14566_s3 + $0x848] sm:$0xff] }
 0x638   : > { %4348 = vmatpush.msra.mxu1 %v3355_v19  ;;  %4154 = vmatpush.msrb.mxu0 %v3553_v4  ;;  %v3483_v19 = vld [vmem:[%s14566_s3 + $0x518] sm:$0xff]  ;;  %v3525_v62 = vld [vmem:[%s14566_s3 + $0x668] sm:$0xff]  ;;  %v3636_v4 = vld [vmem:[%s14566_s3 + $0x9e0] sm:$0xff] }
 0x639   : > { %v3297_v34 = vadd.f32 %v3296_v49, %v3259_v43  ;;  %6518 = vmatmul.msk.f32.gmra.mxu1 %vm3744_vm5, %v11450_v42  ;;  %4377 = vmatpush.msra.mxu2 %v3605_v45  ;;  %v3575_v43 = vld [vmem:[%s14566_s3 + $0x7f8] sm:$0xff] }
 0x63a   : > { %4349 = vmatpush.msra.mxu1 %v3345_v1  ;;  %4270 = vmatpush.msrb.mxu3 %v3534_v38  ;;  %v3515_v1 = vld [vmem:[%s14566_s3 + $0x618] sm:$0xff]  ;;  %v3714_v38 = vld [vmem:[%s14566_s3 + $0xc50] sm:$0xff] }
 0x63b   : > { %v11674_v52 = vmax.f32 %v3297_v34, 0.0  ;;  %4378 = vmatpush.msra.mxu2 %v3595_v31  ;;  %4155 = vmatpush.msrb.mxu0 %v3543_v11  ;;  %v3523_v34 = vld [vmem:[%s14566_s3 + $0x658] sm:$0xff]  ;;  %v3626_v11 = vld [vmem:[%s14566_s3 + $0x990] sm:$0xff] }
 0x63c   : > { %4350 = vmatpush.msra.mxu1 %v3335_v27  ;;  %4271 = vmatpush.msrb.mxu3 %v3524_v20  ;;  %v3715_v45 = vld [vmem:[%s14566_s3 + $0xc58] sm:$0xff]  ;;  %v3505_v27 = vld [vmem:[%s14566_s3 + $0x5c8] sm:$0xff] }
 0x63d   : > { %6502 = vmatmul.msk.f32.gmra.mxu0 %vm3744_vm5, %v11674_v52  ;;  %6509 = vmatmul.msk.f32.gmra.mxu3 %vm3744_vm5, %v11674_v52  ;;  %v11716_v36 = vpop.f32.mrf.mxu2  ;;  %v3485_v20 = vld [vmem:[%s14566_s3 + $0x528] sm:$0xff] }
 0x63e   : > { %6516 = vmatmul.msk.f32.gmra.mxu2 %vm3744_vm5, %v11674_v52  ;;  %v11685_v16 = vpop.f32.mrf.mxu1  ;;  %4351 = vmatpush.msra.mxu1 %v3325_v48  ;;  %v3705_v48 = vld [vmem:[%s14566_s3 + $0xc08] sm:$0xff] }
 0x63f   : > { %4379 = vmatpush.msra.mxu2 %v3585_v32  ;;  %4156 = vmatpush.msrb.mxu0 %v3533_v58  ;;  %v11801_v46 = vpop.f32.mrf.mxu3  ;;  %v3495_v32 = vld [vmem:[%s14566_s3 + $0x578] sm:$0xff]  ;;  %v3616_v58 = vld [vmem:[%s14566_s3 + $0x940] sm:$0xff] }
 0x640   : > { %4272 = vmatpush.msrb.mxu3 %v3514_v5  ;;  %4488 = vmatpush.msrb.mxu1 %v3636_v4  ;;  %v3606_v5 = vld [vmem:[%s14566_s3 + $0x8f0] sm:$0xff]  ;;  %v3536_v4 = vld [vmem:[%s14566_s3 + $0x6c0] sm:$0xff] }
 0x641   : > { %6519 = vmatmul.msk.f32.gmra.mxu1 %vm3744_vm5, %v11494_v15  ;;  %4380 = vmatpush.msra.mxu2 %v3575_v43 }
 0x642   : > { %4157 = vmatpush.msrb.mxu0 %v3523_v34  ;;  %4273 = vmatpush.msrb.mxu3 %v3504_v33  ;;  %v3704_v33 = vld [vmem:[%s14566_s3 + $0xc00] sm:$0xff] }
 0x643   : > { %4381 = vmatpush.msra.mxu2 %v3565_v29  ;;  %4489 = vmatpush.msrb.mxu1 %v3626_v11  ;;  %v3675_v11 = vld [vmem:[%s14566_s3 + $0xb18] sm:$0xff] }
 0x644   : > { %4158 = vmatpush.msrb.mxu0 %v3513_v28  ;;  %4274 = vmatpush.msrb.mxu3 %v3494_v10  ;;  %v3586_v10 = vld [vmem:[%s14566_s3 + $0x850] sm:$0xff] }
 0x645   : > { %4010 = vmatmul.f32.vlgmr.msra.gmra.mxu0 %v10923_v24  ;;  %4124 = vmatmul.f32.vlgmr.msra.gmra.mxu3 %v10923_v24  ;;  %v11766_v49 = vpop.f32.mrf.mxu2 }
 0x646   : > { %4238 = vmatmul.f32.vlgmr.msrb.gmra.mxu2 %v10923_v24  ;;  %v11727_v6 = vpop.f32.mrf.mxu1  ;;  %4159 = vmatpush.msrb.mxu0 %v3503_v7  ;;  %v3576_v7 = vld [vmem:[%s14566_s3 + $0x800] sm:$0xff] }
 0x647   : > { %4382 = vmatpush.msra.mxu2 %v3555_v59  ;;  %4275 = vmatpush.msrb.mxu3 %v3484_v26  ;;  %v11848_v55 = vpop.f32.mrf.mxu3  ;;  %v3596_v59 = vld [vmem:[%s14566_s3 + $0x8a0] sm:$0xff] }
 0x648   : > { %4160 = vmatpush.msrb.mxu0 %v3493_v35  ;;  %4490 = vmatpush.msrb.mxu1 %v3616_v58  ;;  %v3694_v35 = vld [vmem:[%s14566_s3 + $0xbb0] sm:$0xff] }
 0x649   : > { %6520 = vmatmul.msk.f32.gmra.mxu1 %vm3744_vm5, %v11544_v56  ;;  %4383 = vmatpush.msra.mxu2 %v3545_v60  ;;  %v3695_v60 = vld [vmem:[%s14566_s3 + $0xbb8] sm:$0xff] }
 0x64a   : > { %4161 = vmatpush.msrb.mxu0 %v3483_v19  ;;  %4420 = vmatpush.msra.mxu3 %v3715_v45 }
 0x64b   : > { %4384 = vmatpush.msra.mxu2 %v3535_v40  ;;  %4491 = vmatpush.msrb.mxu1 %v3606_v5  ;;  %v3566_v40 = vld [vmem:[%s14566_s3 + $0x7b0] sm:$0xff] }
 0x64c   : > { %4306 = vmatpush.msra.mxu0 %v3714_v38  ;;  %4421 = vmatpush.msra.mxu3 %v3705_v48  ;;  %v3684_v38 = vld [vmem:[%s14566_s3 + $0xb60] sm:$0xff]  ;;  %v3526_v48 = vld [vmem:[%s14566_s3 + $0x670] sm:$0xff] }
 0x64d   : > { %4013 = vmatmul.f32.gmra.mxu0 %v10956_v14  ;;  %4127 = vmatmul.f32.gmra.mxu3 %v10956_v14  ;;  %v11815_v23 = vpop.f32.mrf.mxu2 }
 0x64e   : > { %4241 = vmatmul.f32.gmra.mxu2 %v10956_v14  ;;  %v11771_v63 = vpop.f32.mrf.mxu1  ;;  %4307 = vmatpush.msra.mxu0 %v3704_v33  ;;  %v3674_v33 = vld [vmem:[%s14566_s3 + $0xb10] sm:$0xff] }
 0x64f   : > { %4385 = vmatpush.msra.mxu2 %v3525_v62  ;;  %v11887_v29 = vpop.f32.mrf.mxu3  ;;  %4492 = vmatpush.msrb.mxu1 %v3596_v59  ;;  %v3685_v62 = vld [vmem:[%s14566_s3 + $0xb68] sm:$0xff] }
 0x650   : > { %4422 = vmatpush.msra.mxu3 %v3695_v60  ;;  %4308 = vmatpush.msra.mxu0 %v3694_v35  ;;  %v3506_v60 = vld [vmem:[%s14566_s3 + $0x5d0] sm:$0xff] }
 0x651   : > { %6521 = vmatmul.msk.f32.gmra.mxu1 %vm3744_vm5, %v11588_v12  ;;  %4386 = vmatpush.msra.mxu2 %v3515_v1  ;;  %v3556_v1 = vld [vmem:[%s14566_s3 + $0x760] sm:$0xff]  ;;  %v3486_v35 = vld [vmem:[%s14566_s3 + $0x530] sm:$0xff] }
 0x652   : > { %4493 = vmatpush.msrb.mxu1 %v3586_v10  ;;  %4423 = vmatpush.msra.mxu3 %v3685_v62 }
 0x653   : > { %4387 = vmatpush.msra.mxu2 %v3505_v27  ;;  %v3546_v27 = vld [vmem:[%s14566_s3 + $0x710] sm:$0xff]  ;;  %4309 = vmatpush.msra.mxu0 %v3684_v38 }
 0x654   : > { %4494 = vmatpush.msrb.mxu1 %v3576_v7  ;;  %4424 = vmatpush.msra.mxu3 %v3675_v11  ;;  %v3496_v7 = vld [vmem:[%s14566_s3 + $0x580] sm:$0xff] }
 0x655   : > { %4016 = vmatmul.f32.gmra.mxu0 %v10992_v25  ;;  %4130 = vmatmul.f32.gmra.mxu3 %v10992_v25  ;;  %v11853_v31 = vpop.f32.mrf.mxu2 }
 0x656   : > { %4244 = vmatmul.f32.gmra.mxu2 %v10992_v25  ;;  %v11804_v50 = vpop.f32.mrf.mxu1  ;;  %4495 = vmatpush.msrb.mxu1 %v3566_v40  ;;  %v3665_v40 = vld [vmem:[%s14566_s3 + $0xac8] sm:$0xff] }
 0x657   : > { %4388 = vmatpush.msra.mxu2 %v3495_v32  ;;  %v11918_v26 = vpop.f32.mrf.mxu3  ;;  %v3516_v32 = vld [vmem:[%s14566_s3 + $0x620] sm:$0xff]  ;;  %4310 = vmatpush.msra.mxu0 %v3674_v33 }
 0x658   : > { %4496 = vmatpush.msrb.mxu1 %v3556_v1  ;;  %4425 = vmatpush.msra.mxu3 %v3665_v40 }
 0x659   : > { %6522 = vmatmul.msk.f32.gmra.mxu1 %vm3744_vm5, %v11635_v2  ;;  %4389 = vmatpush.msra.mxu2 %v3485_v20  ;;  %v11957_v20 = vld [vmem:[%s14568_s5] sm:$0xff] }
 0x65a   : > { %4497 = vmatpush.msrb.mxu1 %v3546_v27  ;;  %v11973_v10 = vperm.slane %v11957_v20, 0  ;;  %v3664_v27 = vld [vmem:[%s14566_s3 + $0xac0] sm:$0xff]  ;;  %v12005_v11 = vperm.slane %v11957_v20, 1 }
 0x65b   : > { %4311 = vmatpush.msra.mxu0 %v3664_v27 }
 0x65c   : > { %4498 = vmatpush.msrb.mxu1 %v3536_v4  ;;  %v3784_v62 = vadd.f32 %v11416_v54, %v11973_v10  ;;  %v3716_v4 = vld [vmem:[%s14566_s3 + $0xc60] sm:$0xff]  ;;  %v3655_v54 = vld [vmem:[%s14566_s3 + $0xa78] sm:$0xff]  ;;  %v3787_v40 = vadd.f32 %v11466_v51, %v11973_v10  ;;  %v3686_v51 = vld [vmem:[%s14566_s3 + $0xb70] sm:$0xff] }
 0x65d   : > { %4019 = vmatmul.f32.gmra.mxu0 %v11029_v13  ;;  %4133 = vmatmul.f32.gmra.mxu3 %v11029_v13  ;;  %v11889_v34 = vpop.f32.mrf.mxu2 }
 0x65e   : > { %4247 = vmatmul.f32.gmra.mxu2 %v11029_v13  ;;  %v11840_v53 = vpop.f32.mrf.mxu1  ;;  %4499 = vmatpush.msrb.mxu1 %v3526_v48  ;;  %v3822_v48 = vadd.f32 %v11761_v0, %v3784_v62  ;;  %v3898_v0 = vadd.f32 %v11685_v16, %v12005_v11  ;;  %v3654_v62 = vld [vmem:[%s14566_s3 + $0xa70] sm:$0xff]  ;;  %v3645_v16 = vld [vmem:[%s14566_s3 + $0xa28] sm:$0xff] }
 0x65f   : > { %v11959_v58 = vpop.f32.mrf.mxu3  ;;  %4534 = vmatpush.msrb.mxu2 %v3716_v4  ;;  %4426 = vmatpush.msra.mxu3 %v3655_v54 }
 0x660   : > { %4500 = vmatpush.msrb.mxu1 %v3516_v32  ;;  %4312 = vmatpush.msra.mxu0 %v3654_v62  ;;  %v3936_v4 = vadd.f32 %v11766_v49, %v3898_v0  ;;  %v3666_v49 = vld [vmem:[%s14566_s3 + $0xad0] sm:$0xff]  ;;  %v3790_v0 = vadd.f32 %v11510_v41, %v11973_v10  ;;  %v3477_v41 = vld [vmem:[%s14566_s3 + $0x4e8] sm:$0xff] }
 0x661   : > { %6523 = vmatmul.msk.f32.gmra.mxu1 %vm3744_vm5, %v11674_v52  ;;  %4427 = vmatpush.msra.mxu3 %v3645_v16  ;;  %v3646_v16 = vld [vmem:[%s14566_s3 + $0xa30] sm:$0xff] }
 0x662   : > { %4501 = vmatpush.msrb.mxu1 %v3506_v60 }
 0x664   : > { %4502 = vmatpush.msrb.mxu1 %v3496_v7  ;;  %v3706_v7 = vld [vmem:[%s14566_s3 + $0xc10] sm:$0xff] }
 0x665   : > { %4022 = vmatmul.f32.gmra.mxu0 %v11066_v17  ;;  %4136 = vmatmul.f32.gmra.mxu3 %v11066_v17  ;;  %v11920_v19 = vpop.f32.mrf.mxu2 }
 0x666   : > { %4250 = vmatmul.f32.gmra.mxu2 %v11066_v17  ;;  %v11875_v43 = vpop.f32.mrf.mxu1  ;;  %4503 = vmatpush.msrb.mxu1 %v3486_v35  ;;  %v3696_v35 = vld [vmem:[%s14566_s3 + $0xbc0] sm:$0xff] }
 0x667   : > { %v12001_v38 = vpop.f32.mrf.mxu3  ;;  %4535 = vmatpush.msrb.mxu2 %v3706_v7 }
 0x669   : > { %4352 = vmatmul.f32.vlgmr.msra.gmra.mxu1 %v10923_v24  ;;  %4536 = vmatpush.msrb.mxu2 %v3696_v35  ;;  %v3656_v35 = vld [vmem:[%s14566_s3 + $0xa80] sm:$0xff] }
 0x66b   : > { %4537 = vmatpush.msrb.mxu2 %v3686_v51 }
 0x66d   : > { %4025 = vmatmul.f32.gmra.mxu0 %v11101_v8  ;;  %4139 = vmatmul.f32.gmra.mxu3 %v11101_v8  ;;  %v11967_v59 = vpop.f32.mrf.mxu2 }
 0x66e   : > { %4253 = vmatmul.f32.gmra.mxu2 %v11101_v8  ;;  %v11903_v28 = vpop.f32.mrf.mxu1 }
 0x671   : > { %4355 = vmatmul.f32.gmra.mxu1 %v10956_v14 }
 0x675   : > { %4028 = vmatmul.f32.gmra.mxu0 %v11121_v57  ;;  %4142 = vmatmul.f32.gmra.mxu3 %v11121_v57  ;;  %v12007_v32 = vpop.f32.mrf.mxu2 }
 0x676   : > { %4256 = vmatmul.f32.gmra.mxu2 %v11121_v57  ;;  %v11931_v45 = vpop.f32.mrf.mxu1 }
 0x679   : > { %4358 = vmatmul.f32.gmra.mxu1 %v10992_v25 }
 0x67d   : > { %4162 = vmatmul.f32.vlgmr.msrb.gmra.mxu0 %v10925_v18  ;;  %4276 = vmatmul.f32.vlgmr.msrb.gmra.mxu3 %v10925_v18 }
 0x67e   : > { %4390 = vmatmul.f32.vlgmr.msra.gmra.mxu2 %v10925_v18  ;;  %v11962_v5 = vpop.f32.mrf.mxu1  ;;  %4564 = vmatpush.msrb.mxu3 %v3477_v41 }
 0x681   : > { %4361 = vmatmul.f32.gmra.mxu1 %v11029_v13 }
 0x685   : > { %4165 = vmatmul.f32.gmra.mxu0 %v10958_v3  ;;  %4279 = vmatmul.f32.gmra.mxu3 %v10958_v3 }
 0x686   : > { %4393 = vmatmul.f32.gmra.mxu2 %v10958_v3  ;;  %v11990_v1 = vpop.f32.mrf.mxu1 }
 0x689   : > { %4364 = vmatmul.f32.gmra.mxu1 %v11066_v17 }
 0x68a   : > { %v3859_v33 = vpop.f32.mrf.mxu0 }
 0x68b   : > { %v3860_v60 = vadd.f32 %v3859_v33, %v3822_v48  ;;  %v3676_v48 = vld [vmem:[%s14566_s3 + $0xb20] sm:$0xff]  ;;  %v3825_v33 = vadd.f32 %v11801_v46, %v3787_v40  ;;  %v3901_v46 = vadd.f32 %v11727_v6, %v12005_v11 }
 0x68c   : > { %4538 = vmatpush.msrb.mxu2 %v3676_v48  ;;  %v3644_v40 = vld [vmem:[%s14566_s3 + $0xa20] sm:$0xff] }
 0x68d   : > { %4906 = vst [vmem:[#allocation2] sm:$0xff] %v3860_v60  ;;  %4168 = vmatmul.f32.gmra.mxu0 %v10994_v21  ;;  %4282 = vmatmul.f32.gmra.mxu3 %v10994_v21 }
 0x68e   : > { %4396 = vmatmul.f32.gmra.mxu2 %v10994_v21  ;;  %v12026_v27 = vpop.f32.mrf.mxu1  ;;  %4313 = vmatpush.msra.mxu0 %v3644_v40 }
 0x68f   : > { %4539 = vmatpush.msrb.mxu2 %v3666_v49  ;;  %v3476_v49 = vld [vmem:[%s14566_s3 + $0x4e0] sm:$0xff] }
 0x690   : > { %v3973_v54 = vpop.f32.mrf.mxu3  ;;  %4450 = vmatpush.msrb.mxu0 %v3476_v49 }
 0x691   : > { %v3974_v60 = vadd.f32 %v3973_v54, %v3936_v4  ;;  %v12039_v7 = vpop.f32.mrf.mxu2  ;;  %4367 = vmatmul.f32.gmra.mxu1 %v11101_v8  ;;  %v3828_v4 = vadd.f32 %v11848_v55, %v3790_v0  ;;  %4540 = vmatpush.msrb.mxu2 %v3656_v35  ;;  %v3904_v55 = vadd.f32 %v11771_v63, %v12005_v11  ;;  %v3457_v0 = vld [vmem:[%s14566_s3 + $0x448] sm:$0xff] }
 0x692   : > { %v3862_v62 = vpop.f32.mrf.mxu0 }
 0x693   : > { %4907 = vst [vmem:[#allocation2 + $0x8] sm:$0xff] %v3974_v60  ;;  %v3863_v17 = vadd.f32 %v3862_v62, %v3825_v33  ;;  %4541 = vmatpush.msrb.mxu2 %v3646_v16  ;;  %v3467_v60 = vld [vmem:[%s14566_s3 + $0x498] sm:$0xff]  ;;  %v3793_v62 = vadd.f32 %v11554_v22, %v11973_v10  ;;  %v3466_v22 = vld [vmem:[%s14566_s3 + $0x490] sm:$0xff]  ;;  %v3942_v63 = vadd.f32 %v11853_v31, %v3904_v55 }
 0x694   : > { %4565 = vmatpush.msrb.mxu3 %v3467_v60  ;;  %4451 = vmatpush.msrb.mxu0 %v3466_v22  ;;  %v3796_v31 = vadd.f32 %v11609_v39, %v11973_v10  ;;  %v3456_v39 = vld [vmem:[%s14566_s3 + $0x440] sm:$0xff] }
 0x695   : > { %4916 = vst [vmem:[#allocation2 + $0x50] sm:$0xff] %v3863_v17  ;;  %4171 = vmatmul.f32.gmra.mxu0 %v11031_v61  ;;  %4285 = vmatmul.f32.gmra.mxu3 %v11031_v61  ;;  %v3939_v17 = vadd.f32 %v11815_v23, %v3901_v46  ;;  %v3831_v40 = vadd.f32 %v11887_v29, %v3793_v62 }
 0x696   : > { %4399 = vmatmul.f32.gmra.mxu2 %v11031_v61  ;;  %v12062_v6 = vpop.f32.mrf.mxu1  ;;  %4566 = vmatpush.msrb.mxu3 %v3457_v0  ;;  %v3907_v29 = vadd.f32 %v11804_v50, %v12005_v11  ;;  %v3437_v50 = vld [vmem:[%s14566_s3 + $0x3a8] sm:$0xff]  ;;  %v3436_v0 = vld [vmem:[%s14566_s3 + $0x3a0] sm:$0xff] }
 0x697   : > { %4452 = vmatpush.msrb.mxu0 %v3456_v39  ;;  %v3802_v39 = vadd.f32 %v11716_v36, %v11973_v10  ;;  %v3468_v36 = vld [vmem:[%s14566_s3 + $0x4a0] sm:$0xff] }
 0x698   : > { %v3976_v51 = vpop.f32.mrf.mxu3 }
 0x699   : > { %v3977_v54 = vadd.f32 %v3976_v51, %v3939_v17  ;;  %v12068_v48 = vpop.f32.mrf.mxu2  ;;  %4370 = vmatmul.f32.gmra.mxu1 %v11121_v57 }
 0x69a   : > { %v3865_v33 = vpop.f32.mrf.mxu0 }
 0x69b   : > { %4917 = vst [vmem:[#allocation2 + $0x58] sm:$0xff] %v3977_v54  ;;  %v3866_v23 = vadd.f32 %v3865_v33, %v3828_v4  ;;  %v3447_v4 = vld [vmem:[%s14566_s3 + $0x3f8] sm:$0xff]  ;;  %v3945_v54 = vadd.f32 %v11889_v34, %v3907_v29  ;;  %v3446_v34 = vld [vmem:[%s14566_s3 + $0x3f0] sm:$0xff] }
 0x69c   : > { %4567 = vmatpush.msrb.mxu3 %v3447_v4  ;;  %4453 = vmatpush.msrb.mxu0 %v3446_v34  ;;  %v3407_v29 = vld [vmem:[%s14566_s3 + $0x2b8] sm:$0xff] }
 0x69d   : > { %4926 = vst [vmem:[#allocation2 + $0xa0] sm:$0xff] %v3866_v23  ;;  %4174 = vmatmul.f32.gmra.mxu0 %v11068_v47  ;;  %4288 = vmatmul.f32.gmra.mxu3 %v11068_v47  ;;  %v3834_v23 = vadd.f32 %v11918_v26, %v3796_v31  ;;  %v3427_v26 = vld [vmem:[%s14566_s3 + $0x358] sm:$0xff] }
 0x69e   : > { %4402 = vmatmul.f32.gmra.mxu2 %v11068_v47  ;;  %v12095_v17 = vpop.f32.mrf.mxu1  ;;  %4568 = vmatpush.msrb.mxu3 %v3437_v50  ;;  %v3913_v50 = vadd.f32 %v11875_v43, %v12005_v11  ;;  %v3687_v34 = vld [vmem:[%s14566_s3 + $0xb78] sm:$0xff] }
 0x69f   : > { %4454 = vmatpush.msrb.mxu0 %v3436_v0 }
 0x6a0   : > { %v3979_v46 = vpop.f32.mrf.mxu3  ;;  %4569 = vmatpush.msrb.mxu3 %v3427_v26  ;;  %v3951_v43 = vadd.f32 %v11967_v59, %v3913_v50  ;;  %v3458_v59 = vld [vmem:[%s14566_s3 + $0x450] sm:$0xff] }
 0x6a1   : > { %v3980_v35 = vadd.f32 %v3979_v46, %v3942_v63  ;;  %v12092_v41 = vpop.f32.mrf.mxu2  ;;  %4504 = vmatmul.f32.vlgmr.msrb.gmra.mxu1 %v10925_v18  ;;  %v3799_v63 = vadd.f32 %v11664_v30, %v11973_v10  ;;  %v3910_v46 = vadd.f32 %v11840_v53, %v12005_v11  ;;  %v3417_v30 = vld [vmem:[%s14566_s3 + $0x308] sm:$0xff] }
 0x6a2   : > { %v3868_v51 = vpop.f32.mrf.mxu0  ;;  %v3717_v53 = vld [vmem:[%s14566_s3 + $0xc68] sm:$0xff]  ;;  %4570 = vmatpush.msrb.mxu3 %v3417_v30 }
 0x6a3   : > { %4927 = vst [vmem:[#allocation2 + $0xa8] sm:$0xff] %v3980_v35  ;;  %v3869_v16 = vadd.f32 %v3868_v51, %v3831_v40  ;;  %v3948_v40 = vadd.f32 %v11920_v19, %v3910_v46  ;;  %v3837_v51 = vadd.f32 %v11959_v58, %v3799_v63  ;;  %v3707_v19 = vld [vmem:[%s14566_s3 + $0xc18] sm:$0xff]  ;;  %4648 = vmatpush.msra.mxu1 %v3717_v53  ;;  %v3426_v58 = vld [vmem:[%s14566_s3 + $0x350] sm:$0xff]  ;;  %v3677_v46 = vld [vmem:[%s14566_s3 + $0xb28] sm:$0xff] }
 0x6a4   : > { %4455 = vmatpush.msrb.mxu0 %v3426_v58  ;;  %4571 = vmatpush.msrb.mxu3 %v3407_v29  ;;  %v3657_v30 = vld [vmem:[%s14566_s3 + $0xa88] sm:$0xff]  ;;  %v3396_v53 = vld [vmem:[%s14566_s3 + $0x260] sm:$0xff]  ;;  %v3916_v58 = vadd.f32 %v11903_v28, %v12005_v11  ;;  %v3647_v29 = vld [vmem:[%s14566_s3 + $0xa38] sm:$0xff]  ;;  %v12234_v11 = vperm.slane %v11957_v20, 2 }
 0x6a5   : > { %4936 = vst [vmem:[#allocation2 + $0xf0] sm:$0xff] %v3869_v16  ;;  %4177 = vmatmul.f32.gmra.mxu0 %v11103_v9  ;;  %4291 = vmatmul.f32.gmra.mxu3 %v11103_v9 }
 0x6a6   : > { %4405 = vmatmul.f32.gmra.mxu2 %v11103_v9  ;;  %v12127_v22 = vpop.f32.mrf.mxu1  ;;  %4649 = vmatpush.msra.mxu1 %v3707_v19  ;;  %v3448_v19 = vld [vmem:[%s14566_s3 + $0x400] sm:$0xff]  ;;  %v3954_v28 = vadd.f32 %v12007_v32, %v3916_v58  ;;  %v3386_v32 = vld [vmem:[%s14566_s3 + $0x210] sm:$0xff] }
 0x6a7   : > { %v3388_v58 = vld [vmem:[%s14566_s3 + $0x220] sm:$0xff] }
 0x6a8   : > { %v3982_v33 = vpop.f32.mrf.mxu3 }
 0x6a9   : > { %v3983_v60 = vadd.f32 %v3982_v33, %v3945_v54  ;;  %v12109_v62 = vpop.f32.mrf.mxu2  ;;  %4507 = vmatmul.f32.gmra.mxu1 %v10958_v3  ;;  %v3697_v33 = vld [vmem:[%s14566_s3 + $0xbc8] sm:$0xff] }
 0x6aa   : > { %v3871_v55 = vpop.f32.mrf.mxu0  ;;  %4650 = vmatpush.msra.mxu1 %v3697_v33 }
 0x6ab   : > { %4937 = vst [vmem:[#allocation2 + $0xf8] sm:$0xff] %v3983_v60  ;;  %v3872_v49 = vadd.f32 %v3871_v55, %v3834_v23  ;;  %v3478_v23 = vld [vmem:[%s14566_s3 + $0x4f0] sm:$0xff]  ;;  %v3416_v60 = vld [vmem:[%s14566_s3 + $0x300] sm:$0xff]  ;;  %v3397_v55 = vld [vmem:[%s14566_s3 + $0x268] sm:$0xff] }
 0x6ac   : > { %4678 = vmatpush.msra.mxu2 %v3478_v23  ;;  %4456 = vmatpush.msrb.mxu0 %v3416_v60  ;;  %v3428_v60 = vld [vmem:[%s14566_s3 + $0x360] sm:$0xff] }
 0x6ad   : > { %4946 = vst [vmem:[#allocation2 + $0x140] sm:$0xff] %v3872_v49  ;;  %4180 = vmatmul.f32.gmra.mxu0 %v11123_v37  ;;  %4294 = vmatmul.f32.gmra.mxu3 %v11123_v37  ;;  %v3840_v49 = vadd.f32 %v12001_v38, %v3802_v39  ;;  %v3667_v38 = vld [vmem:[%s14566_s3 + $0xad8] sm:$0xff] }
 0x6ae   : > { %4408 = vmatmul.f32.gmra.mxu2 %v11123_v37  ;;  %v12179_v26 = vpop.f32.mrf.mxu1  ;;  %4651 = vmatpush.msra.mxu1 %v3687_v34  ;;  %v3367_v34 = vld [vmem:[%s14566_s3 + $0x178] sm:$0xff] }
 0x6af   : > { %4572 = vmatpush.msrb.mxu3 %v3397_v55  ;;  %4679 = vmatpush.msra.mxu2 %v3468_v36  ;;  %v3376_v36 = vld [vmem:[%s14566_s3 + $0x1c0] sm:$0xff] }
 0x6b0   : > { %v3985_v35 = vpop.f32.mrf.mxu3  ;;  %4652 = vmatpush.msra.mxu1 %v3677_v46  ;;  %v3408_v46 = vld [vmem:[%s14566_s3 + $0x2c0] sm:$0xff] }
 0x6b1   : > { %v3986_v16 = vadd.f32 %v3985_v35, %v3948_v40  ;;  %v12138_v4 = vpop.f32.mrf.mxu2  ;;  %4510 = vmatmul.f32.gmra.mxu1 %v10994_v21  ;;  %v3406_v40 = vld [vmem:[%s14566_s3 + $0x2b0] sm:$0xff]  ;;  %4680 = vmatpush.msra.mxu2 %v3458_v59 }
 0x6b2   : > { %v3874_v31 = vpop.f32.mrf.mxu0  ;;  %4457 = vmatpush.msrb.mxu0 %v3406_v40  ;;  %4653 = vmatpush.msra.mxu1 %v3667_v38  ;;  %v3366_v38 = vld [vmem:[%s14566_s3 + $0x170] sm:$0xff] }
 0x6b3   : > { %4947 = vst [vmem:[#allocation2 + $0x148] sm:$0xff] %v3986_v16  ;;  %v3875_v54 = vadd.f32 %v3874_v31, %v3837_v51  ;;  %v3387_v51 = vld [vmem:[%s14566_s3 + $0x218] sm:$0xff]  ;;  %v3377_v31 = vld [vmem:[%s14566_s3 + $0x1c8] sm:$0xff]  ;;  %4681 = vmatpush.msra.mxu2 %v3448_v19 }
 0x6b4   : > { %4573 = vmatpush.msrb.mxu3 %v3387_v51  ;;  %4458 = vmatpush.msrb.mxu0 %v3396_v53  ;;  %v3337_v53 = vld [vmem:[%s14566_s3 + $0x88] sm:$0xff] }
 0x6b5   : > { %4956 = vst [vmem:[#allocation2 + $0x190] sm:$0xff] %v3875_v54  ;;  %6524 = vmatmul.msk.f32.vlgmr.msra.gmra.mxu0 %vm3744_vm5, %v11397_v44  ;;  %6531 = vmatmul.msk.f32.vlgmr.msra.gmra.mxu3 %vm3744_vm5, %v11397_v44  ;;  %v3438_v54 = vld [vmem:[%s14566_s3 + $0x3b0] sm:$0xff] }
 0x6b6   : > { %6538 = vmatmul.msk.f32.vlgmr.msrb.gmra.mxu2 %vm3744_vm5, %v11397_v44  ;;  %4654 = vmatpush.msra.mxu1 %v3657_v30  ;;  %v12236_v33 = vpop.f32.mrf.mxu1  ;;  %v3356_v30 = vld [vmem:[%s14566_s3 + $0x120] sm:$0xff] }
 0x6b7   : > { %4574 = vmatpush.msrb.mxu3 %v3377_v31  ;;  %4682 = vmatpush.msra.mxu2 %v3438_v54  ;;  %v3346_v31 = vld [vmem:[%s14566_s3 + $0xd0] sm:$0xff] }
 0x6b8   : > { %v3988_v10 = vpop.f32.mrf.mxu3  ;;  %4655 = vmatpush.msra.mxu1 %v3647_v29  ;;  %4459 = vmatpush.msrb.mxu0 %v3386_v32  ;;  %v3378_v54 = vld [vmem:[%s14566_s3 + $0x1d0] sm:$0xff] }
 0x6b9   : > { %v3989_v0 = vadd.f32 %v3988_v10, %v3951_v43  ;;  %v12188_v63 = vpop.f32.mrf.mxu2  ;;  %4513 = vmatmul.f32.gmra.mxu1 %v11031_v61  ;;  %4575 = vmatpush.msrb.mxu3 %v3367_v34  ;;  %v3357_v10 = vld [vmem:[%s14566_s3 + $0x128] sm:$0xff]  ;;  %v3326_v34 = vld [vmem:[%s14566_s3 + $0x30] sm:$0xff] }
 0x6ba   : > { %v3877_v35 = vpop.f32.mrf.mxu0  ;;  %4683 = vmatpush.msra.mxu2 %v3428_v60  ;;  %4460 = vmatpush.msrb.mxu0 %v3376_v36 }
 0x6bb   : > { %4957 = vst [vmem:[#allocation2 + $0x198] sm:$0xff] %v3989_v0  ;;  %v3878_v16 = vadd.f32 %v3877_v35, %v3840_v49  ;;  %v3418_v49 = vld [vmem:[%s14566_s3 + $0x310] sm:$0xff]  ;;  %4576 = vmatpush.msrb.mxu3 %v3357_v10 }
 0x6bc   : > { %4684 = vmatpush.msra.mxu2 %v3418_v49  ;;  %4461 = vmatpush.msrb.mxu0 %v3366_v38  ;;  %v3358_v49 = vld [vmem:[%s14566_s3 + $0x130] sm:$0xff] }
 0x6bd   : > { %4966 = vst [vmem:[#allocation2 + $0x1e0] sm:$0x3] %v3878_v16  ;;  %6525 = vmatmul.msk.f32.gmra.mxu0 %vm3744_vm5, %v11450_v42  ;;  %6532 = vmatmul.msk.f32.gmra.mxu3 %vm3744_vm5, %v11450_v42 }
 0x6be   : > { %6539 = vmatmul.msk.f32.gmra.mxu2 %vm3744_vm5, %v11450_v42  ;;  %v12285_v51 = vpop.f32.mrf.mxu1  ;;  %4462 = vmatpush.msrb.mxu0 %v3356_v30 }
 0x6bf   : > { %4685 = vmatpush.msra.mxu2 %v3408_v46  ;;  %v3348_v46 = vld [vmem:[%s14566_s3 + $0xe0] sm:$0xff] }
 0x6c0   : > { %v3991_v23 = vpop.f32.mrf.mxu3  ;;  %4463 = vmatpush.msrb.mxu0 %v3346_v31 }
 0x6c1   : > { %v3992_v39 = vadd.f32 %v3991_v23, %v3954_v28  ;;  %v12241_v50 = vpop.f32.mrf.mxu2  ;;  %4516 = vmatmul.f32.gmra.mxu1 %v11068_v47 }
 0x6c2   : > { %v4011_v55 = vpop.f32.mrf.mxu0 }
 0x6c3   : > { %4967 = vst [vmem:[#allocation2 + $0x1e8] sm:$0x3] %v3992_v39  ;;  %v4012_v43 = vadd.f32 %v4011_v55, %v12234_v11  ;;  %v3336_v39 = vld [vmem:[%s14566_s3 + $0x80] sm:$0xff]  ;;  %v3638_v55 = vld [vmem:[%s14566_s3 + $0x9f0] sm:$0xff] }
 0x6c4   : > { %4464 = vmatpush.msrb.mxu0 %v3336_v39 }
 0x6c5   : > { %v4050_v0 = vadd.f32 %v11931_v45, %v4012_v43  ;;  %6526 = vmatmul.msk.f32.gmra.mxu0 %vm3744_vm5, %v11494_v15  ;;  %6533 = vmatmul.msk.f32.gmra.mxu3 %vm3744_vm5, %v11494_v15  ;;  %v3398_v45 = vld [vmem:[%s14566_s3 + $0x270] sm:$0xff]  ;;  %v3628_v43 = vld [vmem:[%s14566_s3 + $0x9a0] sm:$0xff] }
 0x6c6   : > { %6540 = vmatmul.msk.f32.gmra.mxu2 %vm3744_vm5, %v11494_v15  ;;  %v12335_v10 = vpop.f32.mrf.mxu1  ;;  %4465 = vmatpush.msrb.mxu0 %v3326_v34  ;;  %v3598_v34 = vld [vmem:[%s14566_s3 + $0x8b0] sm:$0xff] }
 0x6c7   : > { %v4088_v59 = vadd.f32 %v12039_v7, %v4050_v0  ;;  %v3347_v7 = vld [vmem:[%s14566_s3 + $0xd8] sm:$0xff]  ;;  %4686 = vmatpush.msra.mxu2 %v3398_v45 }
 0x6c8   : > { %v12271_v40 = vpop.f32.mrf.mxu3  ;;  %4577 = vmatpush.msrb.mxu3 %v3347_v7  ;;  %v3479_v7 = vld [vmem:[%s14566_s3 + $0x4f8] sm:$0xff] }
 0x6c9   : > { %4908 = vst [vmem:[#allocation2 + $0x10] sm:$0xff] %v4088_v59  ;;  %v12276_v35 = vpop.f32.mrf.mxu2  ;;  %4519 = vmatmul.f32.gmra.mxu1 %v11103_v9  ;;  %4687 = vmatpush.msra.mxu2 %v3388_v58  ;;  %v3459_v58 = vld [vmem:[%s14566_s3 + $0x458] sm:$0xff] }
 0x6ca   : > { %v4014_v16 = vpop.f32.mrf.mxu0  ;;  %4578 = vmatpush.msrb.mxu3 %v3337_v53  ;;  %4792 = vmatpush.msrb.mxu1 %v3479_v7  ;;  %v3469_v53 = vld [vmem:[%s14566_s3 + $0x4a8] sm:$0xff] }
 0x6cb   : > { %v4015_v19 = vadd.f32 %v4014_v16, %v12234_v11  ;;  %4688 = vmatpush.msra.mxu2 %v3378_v54  ;;  %v3618_v16 = vld [vmem:[%s14566_s3 + $0x950] sm:$0xff]  ;;  %v3608_v54 = vld [vmem:[%s14566_s3 + $0x900] sm:$0xff] }
 0x6cc   : > { %4793 = vmatpush.msrb.mxu1 %v3469_v53 }
 0x6cd   : > { %v4053_v29 = vadd.f32 %v11962_v5, %v4015_v19  ;;  %6527 = vmatmul.msk.f32.gmra.mxu0 %vm3744_vm5, %v11544_v56  ;;  %6534 = vmatmul.msk.f32.gmra.mxu3 %vm3744_vm5, %v11544_v56  ;;  %v3368_v5 = vld [vmem:[%s14566_s3 + $0x180] sm:$0xff]  ;;  %v3627_v19 = vld [vmem:[%s14566_s3 + $0x998] sm:$0xff] }
 0x6ce   : > { %6541 = vmatmul.msk.f32.gmra.mxu2 %vm3744_vm5, %v11544_v56  ;;  %v12393_v39 = vpop.f32.mrf.mxu1  ;;  %4794 = vmatpush.msrb.mxu1 %v3459_v58 }
 0x6cf   : > { %v4091_v28 = vadd.f32 %v12068_v48, %v4053_v29  ;;  %v3327_v48 = vld [vmem:[%s14566_s3 + $0x38] sm:$0xff]  ;;  %4689 = vmatpush.msra.mxu2 %v3368_v5  ;;  %v3328_v29 = vld [vmem:[%s14566_s3 + $0x40] sm:$0xff]  ;;  %v3449_v5 = vld [vmem:[%s14566_s3 + $0x408] sm:$0xff] }
 0x6d0   : > { %v12311_v23 = vpop.f32.mrf.mxu3  ;;  %4579 = vmatpush.msrb.mxu3 %v3327_v48  ;;  %4795 = vmatpush.msrb.mxu1 %v3449_v5  ;;  %v3577_v5 = vld [vmem:[%s14566_s3 + $0x808] sm:$0xff] }
 0x6d1   : > { %4918 = vst [vmem:[#allocation2 + $0x60] sm:$0xff] %v4091_v28  ;;  %v12316_v60 = vpop.f32.mrf.mxu2  ;;  %4522 = vmatmul.f32.gmra.mxu1 %v11123_v37  ;;  %4690 = vmatpush.msra.mxu2 %v3358_v49  ;;  %v3588_v49 = vld [vmem:[%s14566_s3 + $0x860] sm:$0xff] }
 0x6d2   : > { %v4017_v32 = vpop.f32.mrf.mxu0  ;;  %4716 = vmatpush.msra.mxu3 %v3638_v55 }
 0x6d3   : > { %v4018_v36 = vadd.f32 %v4017_v32, %v12234_v11  ;;  %4691 = vmatpush.msra.mxu2 %v3348_v46  ;;  %v3439_v32 = vld [vmem:[%s14566_s3 + $0x3b8] sm:$0xff]  ;;  %v3597_v46 = vld [vmem:[%s14566_s3 + $0x8a8] sm:$0xff] }
 0x6d4   : > { %4717 = vmatpush.msra.mxu3 %v3628_v43  ;;  %v3429_v43 = vld [vmem:[%s14566_s3 + $0x368] sm:$0xff]  ;;  %4796 = vmatpush.msrb.mxu1 %v3439_v32  ;;  %v3558_v32 = vld [vmem:[%s14566_s3 + $0x770] sm:$0xff] }
 0x6d5   : > { %v4056_v0 = vadd.f32 %v11990_v1, %v4018_v36  ;;  %6528 = vmatmul.msk.f32.gmra.mxu0 %vm3744_vm5, %v11588_v12  ;;  %6535 = vmatmul.msk.f32.gmra.mxu3 %vm3744_vm5, %v11588_v12  ;;  %v3338_v1 = vld [vmem:[%s14566_s3 + $0x90] sm:$0xff] }
 0x6d6   : > { %6542 = vmatmul.msk.f32.gmra.mxu2 %vm3744_vm5, %v11588_v12  ;;  %4718 = vmatpush.msra.mxu3 %v3618_v16  ;;  %v12446_v53 = vpop.f32.mrf.mxu1 }
 0x6d7   : > { %v4094_v59 = vadd.f32 %v12092_v41, %v4056_v0  ;;  %v3637_v41 = vld [vmem:[%s14566_s3 + $0x9e8] sm:$0xff]  ;;  %4692 = vmatpush.msra.mxu2 %v3338_v1  ;;  %v3419_v1 = vld [vmem:[%s14566_s3 + $0x318] sm:$0xff]  ;;  %4797 = vmatpush.msrb.mxu1 %v3429_v43 }
 0x6d8   : > { %v12351_v45 = vpop.f32.mrf.mxu3  ;;  %4602 = vmatpush.msra.mxu0 %v3637_v41  ;;  %4719 = vmatpush.msra.mxu3 %v3608_v54  ;;  %v3409_v41 = vld [vmem:[%s14566_s3 + $0x2c8] sm:$0xff]  ;;  %v3639_v54 = vld [vmem:[%s14566_s3 + $0x9f8] sm:$0xff] }
 0x6d9   : > { %4928 = vst [vmem:[#allocation2 + $0xb0] sm:$0xff] %v4094_v59  ;;  %v12356_v38 = vpop.f32.mrf.mxu2  ;;  %6545 = vmatmul.msk.f32.vlgmr.msra.gmra.mxu1 %vm3744_vm5, %v11397_v44  ;;  %4693 = vmatpush.msra.mxu2 %v3328_v29  ;;  %v3389_v29 = vld [vmem:[%s14566_s3 + $0x228] sm:$0xff] }
 0x6da   : > { %v4020_v30 = vpop.f32.mrf.mxu0  ;;  %4603 = vmatpush.msra.mxu0 %v3627_v19  ;;  %4720 = vmatpush.msra.mxu3 %v3598_v34  ;;  %v3629_v34 = vld [vmem:[%s14566_s3 + $0x9a8] sm:$0xff] }
 0x6db   : > { %v4021_v31 = vadd.f32 %v4020_v30, %v12234_v11  ;;  %4798 = vmatpush.msrb.mxu1 %v3419_v1  ;;  %v3399_v30 = vld [vmem:[%s14566_s3 + $0x278] sm:$0xff]  ;;  %4830 = vmatpush.msrb.mxu2 %v3639_v54  ;;  %v3369_v43 = vld [vmem:[%s14566_s3 + $0x188] sm:$0xff]  ;;  %v3548_v1 = vld [vmem:[%s14566_s3 + $0x720] sm:$0xff] }
 0x6dc   : > { %4721 = vmatpush.msra.mxu3 %v3588_v49  ;;  %v3599_v54 = vld [vmem:[%s14566_s3 + $0x8b8] sm:$0xff] }
 0x6dd   : > { %v4059_v28 = vadd.f32 %v12026_v27, %v4021_v31  ;;  %6529 = vmatmul.msk.f32.gmra.mxu0 %vm3744_vm5, %v11635_v2  ;;  %6536 = vmatmul.msk.f32.gmra.mxu3 %vm3744_vm5, %v11635_v2  ;;  %v3617_v27 = vld [vmem:[%s14566_s3 + $0x948] sm:$0xff]  ;;  %v3587_v31 = vld [vmem:[%s14566_s3 + $0x858] sm:$0xff] }
 0x6de   : > { %6543 = vmatmul.msk.f32.gmra.mxu2 %vm3744_vm5, %v11635_v2  ;;  %4604 = vmatpush.msra.mxu0 %v3617_v27  ;;  %v3379_v27 = vld [vmem:[%s14566_s3 + $0x1d8] sm:$0xff] }
 0x6df   : > { %v4097_v48 = vadd.f32 %v12109_v62, %v4059_v28  ;;  %v3607_v62 = vld [vmem:[%s14566_s3 + $0x8f8] sm:$0xff]  ;;  %4799 = vmatpush.msrb.mxu1 %v3409_v41  ;;  %4831 = vmatpush.msrb.mxu2 %v3629_v34  ;;  %v3349_v41 = vld [vmem:[%s14566_s3 + $0xe8] sm:$0xff] }
 0x6e0   : > { %v12407_v55 = vpop.f32.mrf.mxu3  ;;  %4605 = vmatpush.msra.mxu0 %v3607_v62  ;;  %v3579_v34 = vld [vmem:[%s14566_s3 + $0x818] sm:$0xff] }
 0x6e1   : > { %4938 = vst [vmem:[#allocation2 + $0x100] sm:$0xff] %v4097_v48  ;;  %v12412_v36 = vpop.f32.mrf.mxu2  ;;  %6546 = vmatmul.msk.f32.gmra.mxu1 %vm3744_vm5, %v11450_v42 }
 0x6e2   : > { %v4023_v0 = vpop.f32.mrf.mxu0  ;;  %4606 = vmatpush.msra.mxu0 %v3597_v46  ;;  %4800 = vmatpush.msrb.mxu1 %v3399_v30  ;;  %v3567_v46 = vld [vmem:[%s14566_s3 + $0x7b8] sm:$0xff] }
 0x6e3   : > { %v4024_v59 = vadd.f32 %v4023_v0, %v12234_v11  ;;  %v3359_v0 = vld [vmem:[%s14566_s3 + $0x138] sm:$0xff] }
 0x6e4   : > { %4607 = vmatpush.msra.mxu0 %v3587_v31  ;;  %4801 = vmatpush.msrb.mxu1 %v3389_v29  ;;  %v3538_v31 = vld [vmem:[%s14566_s3 + $0x6d0] sm:$0xff]  ;;  %v3339_v29 = vld [vmem:[%s14566_s3 + $0x98] sm:$0xff] }
 0x6e5   : > { %v4062_v7 = vadd.f32 %v12062_v6, %v4024_v59  ;;  %6530 = vmatmul.msk.f32.gmra.mxu0 %vm3744_vm5, %v11674_v52  ;;  %6537 = vmatmul.msk.f32.gmra.mxu3 %vm3744_vm5, %v11674_v52  ;;  %v3578_v6 = vld [vmem:[%s14566_s3 + $0x810] sm:$0xff] }
 0x6e6   : > { %6544 = vmatmul.msk.f32.gmra.mxu2 %vm3744_vm5, %v11674_v52  ;;  %4722 = vmatpush.msra.mxu3 %v3578_v6  ;;  %v12514_v6 = vpop.f32.mrf.mxu1 }
 0x6e7   : > { %v4100_v16 = vadd.f32 %v12138_v4, %v4062_v7  ;;  %v3568_v4 = vld [vmem:[%s14566_s3 + $0x7c0] sm:$0xff]  ;;  %4608 = vmatpush.msra.mxu0 %v3577_v5  ;;  %4802 = vmatpush.msrb.mxu1 %v3379_v27 }
 0x6e8   : > { %v12448_v19 = vpop.f32.mrf.mxu3  ;;  %4723 = vmatpush.msra.mxu3 %v3568_v4  ;;  %v3528_v27 = vld [vmem:[%s14566_s3 + $0x680] sm:$0xff] }
 0x6e9   : > { %4948 = vst [vmem:[#allocation2 + $0x150] sm:$0xff] %v4100_v16  ;;  %v12456_v58 = vpop.f32.mrf.mxu2  ;;  %6547 = vmatmul.msk.f32.gmra.mxu1 %vm3744_vm5, %v11494_v15  ;;  %4609 = vmatpush.msra.mxu0 %v3567_v46  ;;  %v3557_v16 = vld [vmem:[%s14566_s3 + $0x768] sm:$0xff] }
 0x6ea   : > { %v4026_v28 = vpop.f32.mrf.mxu0  ;;  %4724 = vmatpush.msra.mxu3 %v3558_v32  ;;  %4803 = vmatpush.msrb.mxu1 %v3369_v43 }
 0x6eb   : > { %v4027_v48 = vadd.f32 %v4026_v28, %v12234_v11  ;;  %4610 = vmatpush.msra.mxu0 %v3557_v16  ;;  %v12527_v28 = vperm.slane %v11957_v20, 3 }
 0x6ec   : > { %4804 = vmatpush.msrb.mxu1 %v3359_v0  ;;  %4725 = vmatpush.msra.mxu3 %v3548_v1  ;;  %v3559_v1 = vld [vmem:[%s14566_s3 + $0x778] sm:$0xff] }
 0x6ed   : > { %v4065_v62 = vadd.f32 %v12095_v17, %v4027_v48  ;;  %4466 = vmatmul.f32.vlgmr.msrb.gmra.mxu0 %v10923_v24  ;;  %4580 = vmatmul.f32.vlgmr.msrb.gmra.mxu3 %v10923_v24  ;;  %v3619_v17 = vld [vmem:[%s14566_s3 + $0x958] sm:$0xff]  ;;  %v3589_v48 = vld [vmem:[%s14566_s3 + $0x868] sm:$0xff] }
 0x6ee   : > { %4694 = vmatmul.f32.vlgmr.msra.gmra.mxu2 %v10923_v24  ;;  %4805 = vmatpush.msrb.mxu1 %v3349_v41  ;;  %v12563_v46 = vpop.f32.mrf.mxu1  ;;  %v3527_v41 = vld [vmem:[%s14566_s3 + $0x678] sm:$0xff] }
 0x6ef   : > { %v4103_v49 = vadd.f32 %v12188_v63, %v4065_v62  ;;  %v3609_v63 = vld [vmem:[%s14566_s3 + $0x908] sm:$0xff]  ;;  %4832 = vmatpush.msrb.mxu2 %v3619_v17  ;;  %4726 = vmatpush.msra.mxu3 %v3538_v31  ;;  %v4126_v62 = vadd.f32 %v12271_v40, %v12527_v28 }
 0x6f0   : > { %v12496_v59 = vpop.f32.mrf.mxu3  ;;  %4806 = vmatpush.msrb.mxu1 %v3339_v29  ;;  %v3569_v40 = vld [vmem:[%s14566_s3 + $0x7c8] sm:$0xff]  ;;  %v4129_v29 = vadd.f32 %v12311_v23, %v12527_v28 }
 0x6f1   : > { %4958 = vst [vmem:[#allocation2 + $0x1a0] sm:$0xff] %v4103_v49  ;;  %v12504_v7 = vpop.f32.mrf.mxu2  ;;  %6548 = vmatmul.msk.f32.gmra.mxu1 %vm3744_vm5, %v11544_v56  ;;  %4833 = vmatpush.msrb.mxu2 %v3609_v63  ;;  %v3518_v49 = vld [vmem:[%s14566_s3 + $0x630] sm:$0xff]  ;;  %v3517_v31 = vld [vmem:[%s14566_s3 + $0x628] sm:$0xff] }
 0x6f2   : > { %v4029_v30 = vpop.f32.mrf.mxu0  ;;  %4727 = vmatpush.msra.mxu3 %v3528_v27  ;;  %v3529_v27 = vld [vmem:[%s14566_s3 + $0x688] sm:$0xff] }
 0x6f3   : > { %v4030_v4 = vadd.f32 %v4029_v30, %v12234_v11  ;;  %v3329_v11 = vld [vmem:[%s14566_s3 + $0x48] sm:$0xff]  ;;  %4834 = vmatpush.msrb.mxu2 %v3599_v54 }
 0x6f4   : > { %4807 = vmatpush.msrb.mxu1 %v3329_v11  ;;  %4728 = vmatpush.msra.mxu3 %v3518_v49  ;;  %v3549_v30 = vld [vmem:[%s14566_s3 + $0x728] sm:$0xff]  ;;  %v3507_v11 = vld [vmem:[%s14566_s3 + $0x5d8] sm:$0xff] }
 0x6f5   : > { %v4068_v5 = vadd.f32 %v12127_v22, %v4030_v4  ;;  %4469 = vmatmul.f32.gmra.mxu0 %v10956_v14  ;;  %4583 = vmatmul.f32.gmra.mxu3 %v10956_v14  ;;  %v3547_v22 = vld [vmem:[%s14566_s3 + $0x718] sm:$0xff]  ;;  %v3498_v4 = vld [vmem:[%s14566_s3 + $0x590] sm:$0xff] }
 0x6f6   : > { %4697 = vmatmul.f32.gmra.mxu2 %v10956_v14  ;;  %4611 = vmatpush.msra.mxu0 %v3547_v22  ;;  %v12607_v22 = vpop.f32.mrf.mxu1  ;;  %v3487_v49 = vld [vmem:[%s14566_s3 + $0x538] sm:$0xff] }
 0x6f7   : > { %v4106_v20 = vadd.f32 %v12241_v50, %v4068_v5  ;;  %v3537_v50 = vld [vmem:[%s14566_s3 + $0x6c8] sm:$0xff]  ;;  %4835 = vmatpush.msrb.mxu2 %v3589_v48 }
 0x6f8   : > { %v12546_v32 = vpop.f32.mrf.mxu3  ;;  %4612 = vmatpush.msra.mxu0 %v3537_v50 }
 0x6f9   : > { %4968 = vst [vmem:[#allocation2 + $0x1f0] sm:$0x3] %v4106_v20  ;;  %v12556_v43 = vpop.f32.mrf.mxu2  ;;  %6549 = vmatmul.msk.f32.gmra.mxu1 %vm3744_vm5, %v11588_v12  ;;  %4836 = vmatpush.msrb.mxu2 %v3579_v34  ;;  %v3539_v20 = vld [vmem:[%s14566_s3 + $0x6d8] sm:$0xff]  ;;  %v3497_v34 = vld [vmem:[%s14566_s3 + $0x588] sm:$0xff] }
 0x6fa   : > { %v4163_v0 = vpop.f32.mrf.mxu0  ;;  %4613 = vmatpush.msra.mxu0 %v3527_v41  ;;  %v3509_v41 = vld [vmem:[%s14566_s3 + $0x5e8] sm:$0xff] }
 0x6fb   : > { %v4164_v17 = vadd.f32 %v4163_v0, %v4126_v62  ;;  %4837 = vmatpush.msrb.mxu2 %v3569_v40  ;;  %v3519_v62 = vld [vmem:[%s14566_s3 + $0x638] sm:$0xff] }
 0x6fc   : > { %4614 = vmatpush.msra.mxu0 %v3517_v31  ;;  %v3719_v0 = vld [vmem:[%s14566_s3 + $0xc78] sm:$0xff]  ;;  %v3718_v31 = vld [vmem:[%s14566_s3 + $0xc70] sm:$0xff] }
 0x6fd   : > { %v4202_v63 = vadd.f32 %v12179_v26, %v4164_v17  ;;  %4472 = vmatmul.f32.gmra.mxu0 %v10992_v25  ;;  %4586 = vmatmul.f32.gmra.mxu3 %v10992_v25  ;;  %v3508_v26 = vld [vmem:[%s14566_s3 + $0x5e0] sm:$0xff]  ;;  %v4132_v17 = vadd.f32 %v12351_v45, %v12527_v28  ;;  %v3499_v45 = vld [vmem:[%s14566_s3 + $0x598] sm:$0xff] }
 0x6fe   : > { %4700 = vmatmul.f32.gmra.mxu2 %v10992_v25  ;;  %4729 = vmatpush.msra.mxu3 %v3508_v26 }
 0x6ff   : > { %4909 = vst [vmem:[#allocation2 + $0x18] sm:$0xff] %v4202_v63  ;;  %4838 = vmatpush.msrb.mxu2 %v3559_v1  ;;  %4615 = vmatpush.msra.mxu0 %v3507_v11  ;;  %v4135_v11 = vadd.f32 %v12407_v55, %v12527_v28 }
 0x700   : > { %v12581_v16 = vpop.f32.mrf.mxu3  ;;  %4730 = vmatpush.msra.mxu3 %v3498_v4  ;;  %v12652_v4 = vpop.f32.mrf.mxu1 }
 0x701   : > { %v12594_v54 = vpop.f32.mrf.mxu2  ;;  %6550 = vmatmul.msk.f32.gmra.mxu1 %vm3744_vm5, %v11635_v2  ;;  %4839 = vmatpush.msrb.mxu2 %v3549_v30  ;;  %v15205_v30 = vld [vmem:[#allocation56_spill] sm:$0xff] }
 0x702   : > { %v4166_v5 = vpop.f32.mrf.mxu0  ;;  %4616 = vmatpush.msra.mxu0 %v3497_v34  ;;  %v3708_v34 = vld [vmem:[%s14566_s3 + $0xc20] sm:$0xff] }
 0x703   : > { %v4167_v48 = vadd.f32 %v4166_v5, %v4129_v29  ;;  %4840 = vmatpush.msrb.mxu2 %v3539_v20  ;;  %v3489_v5 = vld [vmem:[%s14566_s3 + $0x548] sm:$0xff] }
 0x704   : > { %4617 = vmatpush.msra.mxu0 %v3487_v49 }
 0x705   : > { %v4205_v23 = vadd.f32 %v12236_v33, %v4167_v48  ;;  %4475 = vmatmul.f32.gmra.mxu0 %v11029_v13  ;;  %4589 = vmatmul.f32.gmra.mxu3 %v11029_v13  ;;  %v3488_v33 = vld [vmem:[%s14566_s3 + $0x540] sm:$0xff] }
 0x706   : > { %4703 = vmatmul.f32.gmra.mxu2 %v11029_v13  ;;  %4731 = vmatpush.msra.mxu3 %v3488_v33 }
 0x707   : > { %4919 = vst [vmem:[#allocation2 + $0x68] sm:$0xff] %v4205_v23  ;;  %4841 = vmatpush.msrb.mxu2 %v3529_v27  ;;  %4762 = vmatpush.msrb.mxu0 %v3718_v31 }
 0x708   : > { %v12619_v50 = vpop.f32.mrf.mxu3  ;;  %4876 = vmatpush.msrb.mxu3 %v3719_v0  ;;  %v12679_v33 = vpop.f32.mrf.mxu1  ;;  %v3698_v0 = vld [vmem:[%s14566_s3 + $0xbd0] sm:$0xff] }
 0x709   : > { %v12632_v40 = vpop.f32.mrf.mxu2  ;;  %6551 = vmatmul.msk.f32.gmra.mxu1 %vm3744_vm5, %v11674_v52  ;;  %4842 = vmatpush.msrb.mxu2 %v3519_v62 }
 0x70a   : > { %v4169_v63 = vpop.f32.mrf.mxu0  ;;  %4763 = vmatpush.msrb.mxu0 %v3708_v34 }
 0x70b   : > { %v4170_v1 = vadd.f32 %v4169_v63, %v4132_v17  ;;  %4843 = vmatpush.msrb.mxu2 %v3509_v41 }
 0x70c   : > { %4764 = vmatpush.msrb.mxu0 %v3698_v0 }
 0x70d   : > { %v4208_v26 = vadd.f32 %v12285_v51, %v4170_v1  ;;  %4478 = vmatmul.f32.gmra.mxu0 %v15205_v30  ;;  %4592 = vmatmul.f32.gmra.mxu3 %v15205_v30  ;;  %v3709_v51 = vld [vmem:[%s14566_s3 + $0xc28] sm:$0xff]  ;;  %v4141_v1 = vadd.f32 %v12496_v59, %v12527_v28  ;;  %v3678_v59 = vld [vmem:[%s14566_s3 + $0xb30] sm:$0xff] }
 0x70e   : > { %4706 = vmatmul.f32.gmra.mxu2 %v15205_v30  ;;  %4877 = vmatpush.msrb.mxu3 %v3709_v51 }
 0x70f   : > { %4929 = vst [vmem:[#allocation2 + $0xb8] sm:$0xff] %v4208_v26  ;;  %4844 = vmatpush.msrb.mxu2 %v3499_v45  ;;  %v3688_v26 = vld [vmem:[%s14566_s3 + $0xb80] sm:$0xff]  ;;  %v3679_v45 = vld [vmem:[%s14566_s3 + $0xb38] sm:$0xff] }
 0x710   : > { %v12654_v29 = vpop.f32.mrf.mxu3  ;;  %v12704_v31 = vpop.f32.mrf.mxu1  ;;  %4765 = vmatpush.msrb.mxu0 %v3688_v26 }
 0x711   : > { %4808 = vmatmul.f32.vlgmr.msrb.gmra.mxu1 %v10923_v24  ;;  %v12662_v48 = vpop.f32.mrf.mxu2  ;;  %4845 = vmatpush.msrb.mxu2 %v3489_v5  ;;  %v3699_v24 = vld [vmem:[%s14566_s3 + $0xbd8] sm:$0xff] }
 0x712   : > { %v4172_v20 = vpop.f32.mrf.mxu0  ;;  %4878 = vmatpush.msrb.mxu3 %v3699_v24  ;;  %4766 = vmatpush.msrb.mxu0 %v3678_v59 }
 0x713   : > { %v4173_v23 = vadd.f32 %v4172_v20, %v4135_v11  ;;  %v4144_v11 = vadd.f32 %v12546_v32, %v12527_v28  ;;  %v12723_v20 = vld [vmem:[%s14568_s5] sm:$0xff]  ;;  %v3659_v32 = vld [vmem:[%s14566_s3 + $0xa98] sm:$0xff] }
 0x715   : > { %v4211_v27 = vadd.f32 %v12335_v10, %v4173_v23  ;;  %4481 = vmatmul.f32.gmra.mxu0 %v11101_v8  ;;  %4595 = vmatmul.f32.gmra.mxu3 %v11101_v8  ;;  %v4138_v10 = vadd.f32 %v12448_v19, %v12527_v28  ;;  %v3668_v28 = vld [vmem:[%s14566_s3 + $0xae0] sm:$0xff] }
 0x716   : > { %4709 = vmatmul.f32.gmra.mxu2 %v11101_v8  ;;  %4767 = vmatpush.msrb.mxu0 %v3668_v28 }
 0x717   : > { %4939 = vst [vmem:[#allocation2 + $0x108] sm:$0xff] %v4211_v27  ;;  %v3669_v27 = vld [vmem:[%s14566_s3 + $0xae8] sm:$0xff] }
 0x718   : > { %v12674_v55 = vpop.f32.mrf.mxu3 }
 0x719   : > { %4811 = vmatmul.f32.gmra.mxu1 %v10956_v14  ;;  %v12684_v17 = vpop.f32.mrf.mxu2  ;;  %v3689_v14 = vld [vmem:[%s14566_s3 + $0xb88] sm:$0xff] }
 0x71a   : > { %v4175_v62 = vpop.f32.mrf.mxu0  ;;  %4879 = vmatpush.msrb.mxu3 %v3689_v14 }
 0x71b   : > { %v4176_v49 = vadd.f32 %v4175_v62, %v4138_v10 }
 0x71c   : > { %4880 = vmatpush.msrb.mxu3 %v3679_v45 }
 0x71d   : > { %v4214_v63 = vadd.f32 %v12393_v39, %v4176_v49  ;;  %4484 = vmatmul.f32.gmra.mxu0 %v11121_v57  ;;  %4598 = vmatmul.f32.gmra.mxu3 %v11121_v57 }
 0x71e   : > { %4712 = vmatmul.f32.gmra.mxu2 %v11121_v57  ;;  %4881 = vmatpush.msrb.mxu3 %v3669_v27 }
 0x71f   : > { %4949 = vst [vmem:[#allocation2 + $0x158] sm:$0xff] %v4214_v63 }
 0x720   : > { %v12693_v19 = vpop.f32.mrf.mxu3  ;;  %4882 = vmatpush.msrb.mxu3 %v3659_v32 }
 0x721   : > { %4814 = vmatmul.f32.gmra.mxu1 %v10992_v25  ;;  %v12709_v25 = vpop.f32.mrf.mxu2 }
 0x722   : > { %v4178_v39 = vpop.f32.mrf.mxu0 }
 0x723   : > { %v4179_v41 = vadd.f32 %v4178_v39, %v4141_v1 }
 0x725   : > { %v4217_v51 = vadd.f32 %v12446_v53, %v4179_v41  ;;  %4618 = vmatmul.f32.vlgmr.msra.gmra.mxu0 %v10925_v18  ;;  %4732 = vmatmul.f32.vlgmr.msra.gmra.mxu3 %v10925_v18 }
 0x726   : > { %4846 = vmatmul.f32.vlgmr.msrb.gmra.mxu2 %v10925_v18  ;;  %v12726_v18 = vperm.slane %v12723_v20, 4 }
 0x727   : > { %4959 = vst [vmem:[#allocation2 + $0x1a8] sm:$0xff] %v4217_v51 }
 0x728   : > { %v12715_v5 = vpop.f32.mrf.mxu3  ;;  %v4240_v24 = vadd.f32 %v12276_v35, %v12726_v18  ;;  %v3658_v35 = vld [vmem:[%s14566_s3 + $0xa90] sm:$0xff] }
 0x729   : > { %4817 = vmatmul.f32.gmra.mxu1 %v11029_v13  ;;  %v12734_v13 = vpop.f32.mrf.mxu1  ;;  %4768 = vmatpush.msrb.mxu0 %v3658_v35 }
 0x72a   : > { %v4181_v53 = vpop.f32.mrf.mxu0  ;;  %v4278_v62 = vadd.f32 %v12581_v16, %v4240_v24  ;;  %v3649_v16 = vld [vmem:[%s14566_s3 + $0xa48] sm:$0xff] }
 0x72b   : > { %v4182_v23 = vadd.f32 %v4181_v53, %v4144_v11  ;;  %4883 = vmatpush.msrb.mxu3 %v3649_v16 }
 0x72d   : > { %v4220_v34 = vadd.f32 %v12514_v6, %v4182_v23  ;;  %4621 = vmatmul.f32.gmra.mxu0 %v10958_v3  ;;  %4735 = vmatmul.f32.gmra.mxu3 %v10958_v3  ;;  %v12745_v6 = vpop.f32.mrf.mxu2 }
 0x72e   : > { %4849 = vmatmul.f32.gmra.mxu2 %v10958_v3  ;;  %v12750_v3 = vperm.slane %v12723_v20, 5 }
 0x72f   : > { %4969 = vst [vmem:[#allocation2 + $0x1f8] sm:$0x3] %v4220_v34 }
 0x730   : > { %v12747_v10 = vpop.f32.mrf.mxu3  ;;  %v4354_v63 = vadd.f32 %v12563_v46, %v12750_v3  ;;  %v4357_v51 = vadd.f32 %v12607_v22, %v12750_v3  ;;  %v4363_v24 = vadd.f32 %v12679_v33, %v12750_v3 }
 0x731   : > { %4820 = vmatmul.f32.gmra.mxu1 %v15205_v30  ;;  %v4243_v30 = vadd.f32 %v12316_v60, %v12726_v18  ;;  %v12768_v14 = vpop.f32.mrf.mxu1  ;;  %v3648_v60 = vld [vmem:[%s14566_s3 + $0xa40] sm:$0xff] }
 0x732   : > { %v4315_v49 = vpop.f32.mrf.mxu0  ;;  %v4392_v46 = vadd.f32 %v12594_v54, %v4354_v63  ;;  %4769 = vmatpush.msrb.mxu0 %v3648_v60  ;;  %v4395_v54 = vadd.f32 %v12632_v40, %v4357_v51  ;;  %v4366_v63 = vadd.f32 %v12704_v31, %v12750_v3  ;;  %v4372_v51 = vadd.f32 %v12768_v14, %v12750_v3 }
 0x733   : > { %v4316_v0 = vadd.f32 %v4315_v49, %v4278_v62  ;;  %v4281_v39 = vadd.f32 %v12619_v50, %v4243_v30 }
 0x735   : > { %4910 = vst [vmem:[#allocation2 + $0x20] sm:$0xff] %v4316_v0  ;;  %4624 = vmatmul.f32.gmra.mxu0 %v10994_v21  ;;  %4738 = vmatmul.f32.gmra.mxu3 %v10994_v21 }
 0x736   : > { %4852 = vmatmul.f32.gmra.mxu2 %v10994_v21  ;;  %v12772_v21 = vpop.f32.mrf.mxu2 }
 0x738   : > { %v4429_v1 = vpop.f32.mrf.mxu3 }
 0x739   : > { %v4430_v41 = vadd.f32 %v4429_v1, %v4392_v46  ;;  %4823 = vmatmul.f32.gmra.mxu1 %v11101_v8  ;;  %v4246_v8 = vadd.f32 %v12356_v38, %v12726_v18  ;;  %v12787_v11 = vpop.f32.mrf.mxu1  ;;  %v4369_v1 = vadd.f32 %v12734_v13, %v12750_v3 }
 0x73a   : > { %v4318_v26 = vpop.f32.mrf.mxu0 }
 0x73b   : > { %4911 = vst [vmem:[#allocation2 + $0x28] sm:$0xff] %v4430_v41  ;;  %v4319_v45 = vadd.f32 %v4318_v26, %v4281_v39  ;;  %v4284_v22 = vadd.f32 %v12654_v29, %v4246_v8 }
 0x73d   : > { %4920 = vst [vmem:[#allocation2 + $0x70] sm:$0xff] %v4319_v45  ;;  %4627 = vmatmul.f32.gmra.mxu0 %v11031_v61  ;;  %4741 = vmatmul.f32.gmra.mxu3 %v11031_v61 }
 0x73e   : > { %4855 = vmatmul.f32.gmra.mxu2 %v11031_v61  ;;  %v12789_v27 = vpop.f32.mrf.mxu2  ;;  %v4360_v61 = vadd.f32 %v12652_v4, %v12750_v3 }
 0x740   : > { %v4432_v50 = vpop.f32.mrf.mxu3  ;;  %v4398_v38 = vadd.f32 %v12662_v48, %v4360_v61  ;;  %v4401_v48 = vadd.f32 %v12684_v17, %v4363_v24  ;;  %v4404_v17 = vadd.f32 %v12709_v25, %v4366_v63 }
 0x741   : > { %v4433_v59 = vadd.f32 %v4432_v50, %v4395_v54  ;;  %4826 = vmatmul.f32.gmra.mxu1 %v11121_v57  ;;  %v4249_v57 = vadd.f32 %v12412_v36, %v12726_v18  ;;  %v12800_v4 = vpop.f32.mrf.mxu1  ;;  %v4252_v36 = vadd.f32 %v12456_v58, %v12726_v18  ;;  %v4255_v58 = vadd.f32 %v12504_v7, %v12726_v18 }
 0x742   : > { %v4321_v53 = vpop.f32.mrf.mxu0  ;;  %v4407_v7 = vadd.f32 %v12745_v6, %v4369_v1 }
 0x743   : > { %4921 = vst [vmem:[#allocation2 + $0x78] sm:$0xff] %v4433_v59  ;;  %v4322_v23 = vadd.f32 %v4321_v53, %v4284_v22  ;;  %v4287_v29 = vadd.f32 %v12674_v55, %v4249_v57  ;;  %v4290_v62 = vadd.f32 %v12693_v19, %v4252_v36  ;;  %v4293_v16 = vadd.f32 %v12715_v5, %v4255_v58 }
 0x745   : > { %4930 = vst [vmem:[#allocation2 + $0xc0] sm:$0xff] %v4322_v23  ;;  %4630 = vmatmul.f32.gmra.mxu0 %v11068_v47  ;;  %4744 = vmatmul.f32.gmra.mxu3 %v11068_v47 }
 0x746   : > { %4858 = vmatmul.f32.gmra.mxu2 %v11068_v47  ;;  %v12806_v47 = vpop.f32.mrf.mxu2 }
 0x748   : > { %v4435_v40 = vpop.f32.mrf.mxu3 }
 0x749   : > { %v4436_v34 = vadd.f32 %v4435_v40, %v4398_v38 }
 0x74a   : > { %v4324_v28 = vpop.f32.mrf.mxu0 }
 0x74b   : > { %4931 = vst [vmem:[#allocation2 + $0xc8] sm:$0xff] %v4436_v34  ;;  %v4325_v32 = vadd.f32 %v4324_v28, %v4287_v29 }
 0x74d   : > { %4940 = vst [vmem:[#allocation2 + $0x110] sm:$0xff] %v4325_v32  ;;  %4633 = vmatmul.f32.gmra.mxu0 %v11103_v9  ;;  %4747 = vmatmul.f32.gmra.mxu3 %v11103_v9 }
 0x74e   : > { %4861 = vmatmul.f32.gmra.mxu2 %v11103_v9  ;;  %v4511_v9 = vpop.f32.mrf.mxu1  ;;  %v4549_v19 = vpop.f32.mrf.mxu2 }
 0x750   : > { %v4438_v55 = vpop.f32.mrf.mxu3 }
 0x751   : > { %v4439_v49 = vadd.f32 %v4438_v55, %v4401_v48 }
 0x752   : > { %v4327_v0 = vpop.f32.mrf.mxu0 }
 0x753   : > { %4941 = vst [vmem:[#allocation2 + $0x118] sm:$0xff] %v4439_v49  ;;  %v4328_v33 = vadd.f32 %v4327_v0, %v4290_v62 }
 0x755   : > { %4950 = vst [vmem:[#allocation2 + $0x160] sm:$0xff] %v4328_v33  ;;  %4636 = vmatmul.f32.gmra.mxu0 %v11123_v37  ;;  %4750 = vmatmul.f32.gmra.mxu3 %v11123_v37 }
 0x756   : > { %4864 = vmatmul.f32.gmra.mxu2 %v11123_v37  ;;  %v4258_v37 = vadd.f32 %v12556_v43, %v12726_v18  ;;  %v4514_v25 = vpop.f32.mrf.mxu1  ;;  %v4552_v26 = vpop.f32.mrf.mxu2  ;;  %v3730_v43 = vperm.slane %v12723_v20, 6 }
 0x758   : > { %v4441_v35 = vpop.f32.mrf.mxu3  ;;  %v4296_v39 = vadd.f32 %v12747_v10, %v4258_v37 }
 0x759   : > { %v4442_v30 = vadd.f32 %v4441_v35, %v4404_v17 }
 0x75a   : > { %v4330_v46 = vpop.f32.mrf.mxu0 }
 0x75b   : > { %4951 = vst [vmem:[#allocation2 + $0x168] sm:$0xff] %v4442_v30  ;;  %v4331_v31 = vadd.f32 %v4330_v46, %v4293_v16  ;;  %v3731_v16 = vperm.slane %v12723_v20, 7 }
 0x75d   : > { %4960 = vst [vmem:[#allocation2 + $0x1b0] sm:$0xff] %v4331_v31  ;;  %6552 = vmatmul.msk.f32.vlgmr.msrb.gmra.mxu0 %vm3744_vm5, %v11397_v44  ;;  %6559 = vmatmul.msk.f32.vlgmr.msrb.gmra.mxu3 %vm3744_vm5, %v11397_v44  ;;  %v4410_v44 = vadd.f32 %v12772_v21, %v4372_v51 }
 0x75e   : > { %v4517_v10 = vpop.f32.mrf.mxu1  ;;  %v4555_v54 = vpop.f32.mrf.mxu2 }
 0x760   : > { %v4444_v5 = vpop.f32.mrf.mxu3 }
 0x761   : > { %v4445_v41 = vadd.f32 %v4444_v5, %v4407_v7 }
 0x762   : > { %v4333_v45 = vpop.f32.mrf.mxu0 }
 0x763   : > { %4961 = vst [vmem:[#allocation2 + $0x1b8] sm:$0xff] %v4445_v41  ;;  %v4334_v13 = vadd.f32 %v4333_v45, %v4296_v39 }
 0x765   : > { %4970 = vst [vmem:[#allocation2 + $0x200] sm:$0x3] %v4334_v13  ;;  %6553 = vmatmul.msk.f32.gmra.mxu0 %vm3744_vm5, %v11450_v42  ;;  %6560 = vmatmul.msk.f32.gmra.mxu3 %vm3744_vm5, %v11450_v42 }
 0x766   : > { %v4520_v22 = vpop.f32.mrf.mxu1 }
 0x768   : > { %v4447_v18 = vpop.f32.mrf.mxu3 }
 0x769   : > { %v4448_v6 = vadd.f32 %v4447_v18, %v4410_v44 }
 0x76a   : > { %v4467_v60 = vpop.f32.mrf.mxu0 }
 0x76b   : > { %4971 = vst [vmem:[#allocation2 + $0x208] sm:$0x3] %v4448_v6  ;;  %v4468_v8 = vadd.f32 %v4467_v60, %v3730_v43 }
 0x76d   : > { %v4506_v3 = vadd.f32 %v12787_v11, %v4468_v8  ;;  %6554 = vmatmul.msk.f32.gmra.mxu0 %vm3744_vm5, %v11494_v15  ;;  %6561 = vmatmul.msk.f32.gmra.mxu3 %vm3744_vm5, %v11494_v15  ;;  %v4558_v11 = vpop.f32.mrf.mxu2 }
 0x76e   : > { %v4523_v57 = vpop.f32.mrf.mxu1 }
 0x76f   : > { %v4544_v42 = vadd.f32 %v12789_v27, %v4506_v3 }
 0x770   : > { %v4581_v14 = vpop.f32.mrf.mxu3 }
 0x771   : > { %4912 = vst [vmem:[#allocation2 + $0x30] sm:$0xff] %v4544_v42  ;;  %v4582_v1 = vadd.f32 %v4581_v14, %v3731_v16 }
 0x772   : > { %v4470_v21 = vpop.f32.mrf.mxu0 }
 0x773   : > { %v4471_v50 = vadd.f32 %v4470_v21, %v3730_v43 }
 0x775   : > { %v4509_v59 = vadd.f32 %v12800_v4, %v4471_v50  ;;  %6555 = vmatmul.msk.f32.gmra.mxu0 %vm3744_vm5, %v11544_v56  ;;  %6562 = vmatmul.msk.f32.gmra.mxu3 %vm3744_vm5, %v11544_v56  ;;  %v4561_v40 = vpop.f32.mrf.mxu2 }
 0x776   : > { %v4657_v4 = vpop.f32.mrf.mxu1 }
 0x777   : > { %v4547_v53 = vadd.f32 %v12806_v47, %v4509_v59 }
 0x778   : > { %v4584_v23 = vpop.f32.mrf.mxu3 }
 0x779   : > { %4922 = vst [vmem:[#allocation2 + $0x80] sm:$0xff] %v4547_v53 }
 0x77a   : > { %v4473_v15 = vpop.f32.mrf.mxu0 }
 0x77b   : > { %v4474_v27 = vadd.f32 %v4473_v15, %v3730_v43 }
 0x77d   : > { %v4512_v61 = vadd.f32 %v4511_v9, %v4474_v27  ;;  %6556 = vmatmul.msk.f32.gmra.mxu0 %vm3744_vm5, %v11588_v12  ;;  %6563 = vmatmul.msk.f32.gmra.mxu3 %vm3744_vm5, %v11588_v12  ;;  %v12860_v47 = vpop.f32.mrf.mxu2 }
 0x77e   : > { %v4660_v49 = vpop.f32.mrf.mxu1 }
 0x77f   : > { %v4550_v38 = vadd.f32 %v4549_v19, %v4512_v61 }
 0x780   : > { %v4587_v29 = vpop.f32.mrf.mxu3 }
 0x781   : > { %4932 = vst [vmem:[#allocation2 + $0xd0] sm:$0xff] %v4550_v38 }
 0x782   : > { %v4476_v56 = vpop.f32.mrf.mxu0 }
 0x783   : > { %v4477_v34 = vadd.f32 %v4476_v56, %v3730_v43 }
 0x785   : > { %v4515_v28 = vadd.f32 %v4514_v25, %v4477_v34  ;;  %6557 = vmatmul.msk.f32.gmra.mxu0 %vm3744_vm5, %v11635_v2  ;;  %6564 = vmatmul.msk.f32.gmra.mxu3 %vm3744_vm5, %v11635_v2  ;;  %v12866_v33 = vpop.f32.mrf.mxu2  ;;  %v3721_v34 = vld [vmem:[%s14568_s5 + $0x8] sm:$0x3] }
 0x786   : > { %v4663_v35 = vpop.f32.mrf.mxu1 }
 0x787   : > { %v4553_v32 = vadd.f32 %v4552_v26, %v4515_v28  ;;  %v4585_v26 = vadd.f32 %v4584_v23, %v3731_v16 }
 0x788   : > { %v4590_v24 = vpop.f32.mrf.mxu3 }
 0x789   : > { %4942 = vst [vmem:[#allocation2 + $0x120] sm:$0xff] %v4553_v32 }
 0x78a   : > { %v4479_v12 = vpop.f32.mrf.mxu0 }
 0x78b   : > { %v4480_v36 = vadd.f32 %v4479_v12, %v3730_v43  ;;  %v12886_v12 = vperm.slane %v3721_v34, 0 }
 0x78d   : > { %v4518_v48 = vadd.f32 %v4517_v10, %v4480_v36  ;;  %6558 = vmatmul.msk.f32.gmra.mxu0 %vm3744_vm5, %v11674_v52  ;;  %6565 = vmatmul.msk.f32.gmra.mxu3 %vm3744_vm5, %v11674_v52  ;;  %v12869_v46 = vpop.f32.mrf.mxu2 }
 0x78e   : > { %v4666_v5 = vpop.f32.mrf.mxu1 }
 0x78f   : > { %v4556_v55 = vadd.f32 %v4555_v54, %v4518_v48  ;;  %v4591_v54 = vadd.f32 %v4590_v24, %v3731_v16 }
 0x790   : > { %v4593_v62 = vpop.f32.mrf.mxu3 }
 0x791   : > { %4952 = vst [vmem:[#allocation2 + $0x170] sm:$0xff] %v4556_v55  ;;  %v4594_v59 = vadd.f32 %v4593_v62, %v3731_v16  ;;  %v4696_v55 = vadd.f32 %v12860_v47, %v12886_v12 }
 0x792   : > { %v4482_v2 = vpop.f32.mrf.mxu0 }
 0x793   : > { %v4483_v0 = vadd.f32 %v4482_v2, %v3730_v43  ;;  %v12892_v2 = vperm.slane %v3721_v34, 1 }
 0x795   : > { %v4521_v63 = vadd.f32 %v4520_v22, %v4483_v0  ;;  %v12871_v39 = vpop.f32.mrf.mxu2 }
 0x796   : > { %v4669_v20 = vpop.f32.mrf.mxu1 }
 0x797   : > { %v4559_v9 = vadd.f32 %v4558_v11, %v4521_v63 }
 0x798   : > { %v4596_v58 = vpop.f32.mrf.mxu3 }
 0x799   : > { %4962 = vst [vmem:[#allocation2 + $0x1c0] sm:$0xff] %v4559_v9 }
 0x79a   : > { %v4485_v17 = vpop.f32.mrf.mxu0 }
 0x79b   : > { %v4486_v19 = vadd.f32 %v4485_v17, %v3730_v43  ;;  %v4588_v43 = vadd.f32 %v4587_v29, %v3731_v16 }
 0x79d   : > { %v4524_v30 = vadd.f32 %v4523_v57, %v4486_v19  ;;  %v12873_v18 = vpop.f32.mrf.mxu2  ;;  %v4597_v57 = vadd.f32 %v4596_v58, %v3731_v16  ;;  %v4699_v19 = vadd.f32 %v12866_v33, %v12886_v12 }
 0x79e   : > { %v4672_v3 = vpop.f32.mrf.mxu1 }
 0x79f   : > { %v4562_v52 = vadd.f32 %v4561_v40, %v4524_v30 }
 0x7a0   : > { %v4599_v31 = vpop.f32.mrf.mxu3 }
 0x7a1   : > { %4972 = vst [vmem:[#allocation2 + $0x210] sm:$0x3] %v4562_v52 }
 0x7a2   : > { %v4619_v37 = vpop.f32.mrf.mxu0 }
 0x7a3   : > { %v4620_v7 = vadd.f32 %v4619_v37, %v4582_v1 }
 0x7a5   : > { %v4658_v25 = vadd.f32 %v4657_v4, %v4620_v7  ;;  %v12875_v21 = vpop.f32.mrf.mxu2  ;;  %v4600_v4 = vadd.f32 %v4599_v31, %v3731_v16 }
 0x7a6   : > { %v4675_v23 = vpop.f32.mrf.mxu1 }
 0x7a7   : > { %4913 = vst [vmem:[#allocation2 + $0x38] sm:$0xff] %v4658_v25  ;;  %v4702_v25 = vadd.f32 %v12869_v46, %v12886_v12 }
 0x7a8   : > { %v4733_v41 = vpop.f32.mrf.mxu3 }
 0x7a9   : > { %v4734_v0 = vadd.f32 %v4733_v41, %v4696_v55 }
 0x7aa   : > { %v4622_v45 = vpop.f32.mrf.mxu0 }
 0x7ab   : > { %v4623_v13 = vadd.f32 %v4622_v45, %v4585_v26 }
 0x7ad   : > { %v4661_v51 = vadd.f32 %v4660_v49, %v4623_v13  ;;  %v12877_v27 = vpop.f32.mrf.mxu2 }
 0x7ae   : > { %v4809_v56 = vpop.f32.mrf.mxu1 }
 0x7af   : > { %4923 = vst [vmem:[#allocation2 + $0x88] sm:$0xff] %v4661_v51  ;;  %v4810_v17 = vadd.f32 %v4809_v56, %v12892_v2 }
 0x7b0   : > { %v4736_v44 = vpop.f32.mrf.mxu3 }
 0x7b1   : > { %v4737_v30 = vadd.f32 %v4736_v44, %v4699_v19 }
 0x7b2   : > { %v4625_v6 = vpop.f32.mrf.mxu0 }
 0x7b3   : > { %v4626_v10 = vadd.f32 %v4625_v6, %v4588_v43  ;;  %v4705_v43 = vadd.f32 %v12871_v39, %v12886_v12 }
 0x7b5   : > { %v4664_v60 = vadd.f32 %v4663_v35, %v4626_v10  ;;  %v4847_v28 = vpop.f32.mrf.mxu2 }
 0x7b6   : > { %v4812_v62 = vpop.f32.mrf.mxu1  ;;  %v4848_v35 = vadd.f32 %v4847_v28, %v4810_v17 }
 0x7b7   : > { %4933 = vst [vmem:[#allocation2 + $0xd8] sm:$0xff] %v4664_v60  ;;  %v4813_v7 = vadd.f32 %v4812_v62, %v12892_v2 }
 0x7b8   : > { %v4739_v8 = vpop.f32.mrf.mxu3 }
 0x7b9   : > { %v4740_v26 = vadd.f32 %v4739_v8, %v4702_v25 }
 0x7ba   : > { %v4628_v42 = vpop.f32.mrf.mxu0 }
 0x7bb   : > { %v4629_v14 = vadd.f32 %v4628_v42, %v4591_v54 }
 0x7bd   : > { %v4667_v50 = vadd.f32 %v4666_v5, %v4629_v14  ;;  %v4850_v63 = vpop.f32.mrf.mxu2  ;;  %v4708_v14 = vadd.f32 %v12873_v18, %v12886_v12 }
 0x7be   : > { %v4815_v52 = vpop.f32.mrf.mxu1  ;;  %v4851_v5 = vadd.f32 %v4850_v63, %v4813_v7 }
 0x7bf   : > { %4943 = vst [vmem:[#allocation2 + $0x128] sm:$0xff] %v4667_v50 }
 0x7c0   : > { %v4742_v22 = vpop.f32.mrf.mxu3 }
 0x7c1   : > { %v4743_v60 = vadd.f32 %v4742_v22, %v4705_v43 }
 0x7c2   : > { %v4631_v11 = vpop.f32.mrf.mxu0 }
 0x7c3   : > { %v4632_v53 = vadd.f32 %v4631_v11, %v4594_v59 }
 0x7c5   : > { %v4670_v15 = vadd.f32 %v4669_v20, %v4632_v53  ;;  %v4853_v37 = vpop.f32.mrf.mxu2  ;;  %v4816_v20 = vadd.f32 %v4815_v52, %v12892_v2 }
 0x7c6   : > { %v4818_v51 = vpop.f32.mrf.mxu1 }
 0x7c7   : > { %4953 = vst [vmem:[#allocation2 + $0x178] sm:$0xff] %v4670_v15  ;;  %v4854_v6 = vadd.f32 %v4853_v37, %v4816_v20  ;;  %v4819_v8 = vadd.f32 %v4818_v51, %v12892_v2 }
 0x7c8   : > { %v12879_v61 = vpop.f32.mrf.mxu3 }
 0x7c9   : > { %v4746_v53 = vadd.f32 %v12879_v61, %v4708_v14 }
 0x7ca   : > { %v4634_v38 = vpop.f32.mrf.mxu0 }
 0x7cb   : > { %v4635_v40 = vadd.f32 %v4634_v38, %v4597_v57  ;;  %v4711_v57 = vadd.f32 %v12875_v21, %v12886_v12 }
 0x7cd   : > { %v4673_v29 = vadd.f32 %v4672_v3, %v4635_v40  ;;  %v4856_v44 = vpop.f32.mrf.mxu2 }
 0x7ce   : > { %v4821_v42 = vpop.f32.mrf.mxu1  ;;  %v4857_v50 = vadd.f32 %v4856_v44, %v4819_v8 }
 0x7cf   : > { %4963 = vst [vmem:[#allocation2 + $0x1c8] sm:$0xff] %v4673_v29  ;;  %v4822_v15 = vadd.f32 %v4821_v42, %v12892_v2 }
 0x7d0   : > { %v12884_v32 = vpop.f32.mrf.mxu3 }
 0x7d1   : > { %v4749_v18 = vadd.f32 %v12884_v32, %v4711_v57 }
 0x7d2   : > { %v4637_v24 = vpop.f32.mrf.mxu0 }
 0x7d3   : > { %v4638_v36 = vadd.f32 %v4637_v24, %v4600_v4  ;;  %v4714_v24 = vadd.f32 %v12877_v27, %v12886_v12  ;;  %v12920_v27 = vmov 0.0   ;;  %v12922_v12 = vmov 0.0  }
 0x7d5   : > { %v4676_v48 = vadd.f32 %v4675_v23, %v4638_v36  ;;  %v4859_v59 = vpop.f32.mrf.mxu2 }
 0x7d6   : > { %v4860_v38 = vadd.f32 %v4859_v59, %v4822_v15  ;;  %v4824_v40 = vpop.f32.mrf.mxu1 }
 0x7d7   : > { %4973 = vst [vmem:[#allocation2 + $0x218] sm:$0x3] %v4676_v48  ;;  %v4825_v4 = vadd.f32 %v4824_v40, %v12892_v2 }
 0x7d8   : > { %v12890_v49 = vpop.f32.mrf.mxu3 }
 0x7d9   : > { %v4752_v21 = vadd.f32 %v12890_v49, %v4714_v24 }
 0x7da   : > { %v4771_v9 = vpop.f32.mrf.mxu0 }
 0x7db   : > { %v4772_v58 = vadd.f32 %v4771_v9, %v4734_v0 }
 0x7dd   : > { %4914 = vst [vmem:[#allocation2 + $0x40] sm:$0xff] %v4772_v58  ;;  %v4862_v34 = vpop.f32.mrf.mxu2 }
 0x7de   : > { %v4863_v36 = vadd.f32 %v4862_v34, %v4825_v4  ;;  %v4827_v62 = vpop.f32.mrf.mxu1 }
 0x7df   : > { %v4828_v9 = vadd.f32 %v4827_v62, %v12892_v2 }
 0x7e0   : > { %v4885_v16 = vpop.f32.mrf.mxu3 }
 0x7e1   : > { %v4886_v47 = vadd.f32 %v4885_v16, %v4848_v35 }
 0x7e2   : > { %v4774_v31 = vpop.f32.mrf.mxu0 }
 0x7e3   : > { %4915 = vst [vmem:[#allocation2 + $0x48] sm:$0xff] %v4886_v47  ;;  %v4775_v1 = vadd.f32 %v4774_v31, %v4737_v30 }
 0x7e5   : > { %4924 = vst [vmem:[#allocation2 + $0x90] sm:$0xff] %v4775_v1  ;;  %v4865_v63 = vpop.f32.mrf.mxu2 }
 0x7e6   : > { %v4866_v58 = vadd.f32 %v4865_v63, %v4828_v9 }
 0x7e8   : > { %v4888_v41 = vpop.f32.mrf.mxu3 }
 0x7e9   : > { %v4889_v45 = vadd.f32 %v4888_v41, %v4851_v5 }
 0x7ea   : > { %v4777_v33 = vpop.f32.mrf.mxu0 }
 0x7eb   : > { %4925 = vst [vmem:[#allocation2 + $0x98] sm:$0xff] %v4889_v45  ;;  %v4778_v13 = vadd.f32 %v4777_v33, %v4740_v26 }
 0x7ed   : > { %4934 = vst [vmem:[#allocation2 + $0xe0] sm:$0xff] %v4778_v13 }
 0x7f0   : > { %v4891_v10 = vpop.f32.mrf.mxu3 }
 0x7f1   : > { %v4892_v54 = vadd.f32 %v4891_v10, %v4854_v6 }
 0x7f2   : > { %v4780_v46 = vpop.f32.mrf.mxu0 }
 0x7f3   : > { %4935 = vst [vmem:[#allocation2 + $0xe8] sm:$0xff] %v4892_v54  ;;  %v4781_v3 = vadd.f32 %v4780_v46, %v4743_v60 }
 0x7f5   : > { %4944 = vst [vmem:[#allocation2 + $0x130] sm:$0xff] %v4781_v3 }
 0x7f8   : > { %v4894_v11 = vpop.f32.mrf.mxu3 }
 0x7f9   : > { %v4895_v39 = vadd.f32 %v4894_v11, %v4857_v50 }
 0x7fa   : > { %v4783_v23 = vpop.f32.mrf.mxu0 }
 0x7fb   : > { %4945 = vst [vmem:[#allocation2 + $0x138] sm:$0xff] %v4895_v39  ;;  %v4784_v22 = vadd.f32 %v4783_v23, %v4746_v53 }
 0x7fd   : > { %4954 = vst [vmem:[#allocation2 + $0x180] sm:$0xff] %v4784_v22 }
 0x800   : > { %v4897_v29 = vpop.f32.mrf.mxu3 }
 0x801   : > { %v4898_v56 = vadd.f32 %v4897_v29, %v4860_v38 }
 0x802   : > { %v4786_v28 = vpop.f32.mrf.mxu0 }
 0x803   : > { %4955 = vst [vmem:[#allocation2 + $0x188] sm:$0xff] %v4898_v56  ;;  %v4787_v61 = vadd.f32 %v4786_v28, %v4749_v18 }
 0x805   : > { %4964 = vst [vmem:[#allocation2 + $0x1d0] sm:$0xff] %v4787_v61 }
 0x808   : > { %v4900_v48 = vpop.f32.mrf.mxu3 }
 0x809   : > { %v4901_v55 = vadd.f32 %v4900_v48, %v4863_v36 }
 0x80a   : > { %v4789_v0 = vpop.f32.mrf.mxu0 }
 0x80b   : > { %4965 = vst [vmem:[#allocation2 + $0x1d8] sm:$0xff] %v4901_v55  ;;  %v4790_v32 = vadd.f32 %v4789_v0, %v4752_v21 }
 0x80d   : > { %4974 = vst [vmem:[#allocation2 + $0x220] sm:$0x3] %v4790_v32 }
 0x810   : > { %v4903_v17 = vpop.f32.mrf.mxu3 }
 0x811   : > { %v4904_v19 = vadd.f32 %v4903_v17, %v4866_v58 }
 0x813   : > { %4975 = vst [vmem:[#allocation2 + $0x228] sm:$0x3] %v4904_v19 }
 0x814 LB: >> { %v5150_v49 = vld [vmem:[%s14567_s4 + $0x4b0] sm:$0xff]  ;;  %v5140_v35 = vld [vmem:[%s14567_s4 + $0x460] sm:$0xff]  ;;  %v5151_v5 = vld [vmem:[%s14567_s4 + $0x4b8] sm:$0xff]  ;;  %v13113_v58 = vperm.slane %v6763_v12, 2  ;;  %s4984_s28 = sshra.s32 %s6767_s21, 3  ;;  %s4987_s26 = sand.u32 7, %s6767_s21  ;;  %s6767_s21 = sphi %s12924_s21, %s4981_s21   ;;  %v6763_v12 = vphi %v12922_v12, %v15208_v12   ;;  %v6759_v27 = vphi %v12920_v27, %v6118_v27  }
 0x815   : >> { %v5390_v2 = vld [vmem:[%s14567_s4 + $0xc30] sm:$0xff]  ;;  %5408 = vmatpush.msra.mxu0 %v5150_v49  ;;  %v5380_v16 = vld [vmem:[%s14567_s4 + $0xbe0] sm:$0xff]  ;;  %v5141_v26 = vld [vmem:[%s14567_s4 + $0x468] sm:$0xff]  ;;  %5468 = vmatpush.msra.mxu3 %v5151_v5  ;;  %s6566_s25 = smul.u32 80, %s4984_s28  ;;  %vm6026_vm6 = vcmask 1040384   ;;  %vm6028_vm7 = vcmask 1042434  }
 0x816   : >> { %5456 = vmatpush.msra.mxu2 %v5390_v2  ;;  %v5130_v30 = vld [vmem:[%s14567_s4 + $0x410] sm:$0xff]  ;;  %v5120_v52 = vld [vmem:[%s14567_s4 + $0x3c0] sm:$0xff]  ;;  %v5131_v51 = vld [vmem:[%s14567_s4 + $0x418] sm:$0xff]  ;;  %vm6031_vm8 = vcmask 1044484   ;;  %vm6033_vm9 = vcmask 1046534   ;;  %vm6035_vm10 = vcmask 1045508  }
 0x817   : >> { %v5370_v47 = vld [vmem:[%s14567_s4 + $0xb90] sm:$0xff]  ;;  %5409 = vmatpush.msra.mxu0 %v5140_v35  ;;  %v5360_v31 = vld [vmem:[%s14567_s4 + $0xb40] sm:$0xff]  ;;  %5469 = vmatpush.msra.mxu3 %v5141_v26  ;;  %v5121_v6 = vld [vmem:[%s14567_s4 + $0x3c8] sm:$0xff]  ;;  %s4990_s20 = sadd.s32 %s6566_s25, %s4987_s26  ;;  %vm6037_vm11 = vcmask 1043456   ;;  %s6770_s29 = smov 64  }
 0x818   : >> { %5457 = vmatpush.msra.mxu2 %v5380_v16  ;;  %v5310_v1 = vld [vmem:[%s14567_s4 + $0x9b0] sm:$0xff]  ;;  %v5300_v37 = vld [vmem:[%s14567_s4 + $0x960] sm:$0xff]  ;;  %v5311_v54 = vld [vmem:[%s14567_s4 + $0x9b8] sm:$0xff]  ;;  %s14186_s27 = scalar_lea.vmem [#allocation2], %s4990_s20  ;;  %s4981_s21 = sadd.s32 1, %s6767_s21  }
 0x819   : >> { %5410 = vmatpush.msra.mxu0 %v5130_v30  ;;  %v5110_v7 = vld [vmem:[%s14567_s4 + $0x370] sm:$0xff]  ;;  %5428 = vmatpush.msra.mxu1 %v5310_v1  ;;  %v5100_v45 = vld [vmem:[%s14567_s4 + $0x320] sm:$0xff]  ;;  %v5111_v8 = vld [vmem:[%s14567_s4 + $0x378] sm:$0xff]  ;;  %p4978_p11 = scmp.ge.s32.totalorder %s4981_s21, 50  }
 0x81a   : >> { %5458 = vmatpush.msra.mxu2 %v5370_v47  ;;  %v5350_v25 = vld [vmem:[%s14567_s4 + $0xaf0] sm:$0xff]  ;;  %v5340_v33 = vld [vmem:[%s14567_s4 + $0xaa0] sm:$0xff]  ;;  %5470 = vmatpush.msra.mxu3 %v5131_v51  ;;  %v5301_v42 = vld [vmem:[%s14567_s4 + $0x968] sm:$0xff]  ;;  %s6413_s26 = scalar_lea.hbm (%p4978_p11), %s14573_s10, %s6847_s17  ;;  %s15209_s12 = sand.u32 (%p4978_p11), 1, %s6747_s14  }
 0x81b   : >> { %5411 = vmatpush.msra.mxu0 %v5120_v52  ;;  %v5290_v41 = vld [vmem:[%s14567_s4 + $0x910] sm:$0xff]  ;;  %5429 = vmatpush.msra.mxu1 %v5300_v37  ;;  %v5280_v13 = vld [vmem:[%s14567_s4 + $0x8c0] sm:$0xff]  ;;  %v5101_v59 = vld [vmem:[%s14567_s4 + $0x328] sm:$0xff]  ;;  %s6405_s11 = scalar_lea.sflag (%p4978_p11), [#allocation4], %s15209_s12  ;;  %s6701_s25 = scalar_lea.hbm (%p4978_p11), %s14573_s10, 2 }
 0x81c   : >> { %5459 = vmatpush.msra.mxu2 %v5360_v31  ;;  %v5090_v20 = vld [vmem:[%s14567_s4 + $0x2d0] sm:$0xff]  ;;  %v5080_v10 = vld [vmem:[%s14567_s4 + $0x280] sm:$0xff]  ;;  %5471 = vmatpush.msra.mxu3 %v5121_v6  ;;  %v5291_v11 = vld [vmem:[%s14567_s4 + $0x918] sm:$0xff] }
 0x81d   : >> { %5412 = vmatpush.msra.mxu0 %v5110_v7  ;;  %v5330_v44 = vld [vmem:[%s14567_s4 + $0xa50] sm:$0xff]  ;;  %5430 = vmatpush.msra.mxu1 %v5290_v41  ;;  %v5320_v60 = vld [vmem:[%s14567_s4 + $0xa00] sm:$0xff]  ;;  %v5091_v23 = vld [vmem:[%s14567_s4 + $0x2d8] sm:$0xff] }
 0x81e   : >> { %5460 = vmatpush.msra.mxu2 %v5350_v25  ;;  %v5270_v43 = vld [vmem:[%s14567_s4 + $0x870] sm:$0xff]  ;;  %v5260_v46 = vld [vmem:[%s14567_s4 + $0x820] sm:$0xff]  ;;  %5472 = vmatpush.msra.mxu3 %v5111_v8  ;;  %v5281_v22 = vld [vmem:[%s14567_s4 + $0x8c8] sm:$0xff] }
 0x81f   : >> { %5413 = vmatpush.msra.mxu0 %v5100_v45  ;;  %5431 = vmatpush.msra.mxu1 %v5280_v13  ;;  %v5070_v3 = vld [vmem:[%s14567_s4 + $0x230] sm:$0xff]  ;;  %v5060_v50 = vld [vmem:[%s14567_s4 + $0x1e0] sm:$0xff]  ;;  %v5081_v38 = vld [vmem:[%s14567_s4 + $0x288] sm:$0xff]  ;;  %v13175_v13 = vperm.slane %v6763_v12, 0 }
 0x820   : >> { %5461 = vmatpush.msra.mxu2 %v5340_v33  ;;  %v5250_v14 = vld [vmem:[%s14567_s4 + $0x7d0] sm:$0xff]  ;;  %v5240_v53 = vld [vmem:[%s14567_s4 + $0x780] sm:$0xff]  ;;  %5473 = vmatpush.msra.mxu3 %v5101_v59  ;;  %v5271_v40 = vld [vmem:[%s14567_s4 + $0x878] sm:$0xff] }
 0x821   : >> { %5414 = vmatpush.msra.mxu0 %v5090_v20  ;;  %5432 = vmatpush.msra.mxu1 %v5270_v43  ;;  %v5050_v39 = vld [vmem:[%s14567_s4 + $0x190] sm:$0xff]  ;;  %v5040_v57 = vld [vmem:[%s14567_s4 + $0x140] sm:$0xff]  ;;  %v5071_v56 = vld [vmem:[%s14567_s4 + $0x238] sm:$0xff] }
 0x822   : >> { %5462 = vmatpush.msra.mxu2 %v5330_v44  ;;  %v5230_v15 = vld [vmem:[%s14567_s4 + $0x730] sm:$0xff]  ;;  %5474 = vmatpush.msra.mxu3 %v5091_v23  ;;  %v5220_v29 = vld [vmem:[%s14567_s4 + $0x6e0] sm:$0xff]  ;;  %v5261_v34 = vld [vmem:[%s14567_s4 + $0x828] sm:$0xff] }
 0x823   : >> { %5415 = vmatpush.msra.mxu0 %v5080_v10  ;;  %5433 = vmatpush.msra.mxu1 %v5260_v46  ;;  %v5030_v18 = vld [vmem:[%s14567_s4 + $0xf0] sm:$0xff]  ;;  %v5020_v61 = vld [vmem:[%s14567_s4 + $0xa0] sm:$0xff]  ;;  %v5061_v4 = vld [vmem:[%s14567_s4 + $0x1e8] sm:$0xff] }
 0x824   : >> { %5463 = vmatpush.msra.mxu2 %v5320_v60  ;;  %5475 = vmatpush.msra.mxu3 %v5081_v38  ;;  %v5210_v28 = vld [vmem:[%s14567_s4 + $0x690] sm:$0xff]  ;;  %v5251_v24 = vld [vmem:[%s14567_s4 + $0x7d8] sm:$0xff]  ;;  %v5200_v36 = vld [vmem:[%s14567_s4 + $0x640] sm:$0xff]  ;;  %v13198_v60 = vperm.slane %v6763_v12, 1 }
 0x825   : >> { %5416 = vmatpush.msra.mxu0 %v5070_v3  ;;  %5434 = vmatpush.msra.mxu1 %v5250_v14  ;;  %v5010_v48 = vld [vmem:[%s14567_s4 + $0x50] sm:$0xff]  ;;  %v5051_v21 = vld [vmem:[%s14567_s4 + $0x198] sm:$0xff]  ;;  %v5241_v55 = vld [vmem:[%s14567_s4 + $0x788] sm:$0xff] }
 0x826   : >> { %5488 = vmatpush.msrb.mxu2 %v5311_v54  ;;  %5476 = vmatpush.msra.mxu3 %v5071_v56  ;;  %v5190_v62 = vld [vmem:[%s14567_s4 + $0x5f0] sm:$0xff]  ;;  %v5000_v0 = vld [vmem:[%s14567_s4] sm:$0xff]  ;;  %v5041_v32 = vld [vmem:[%s14567_s4 + $0x148] sm:$0xff] }
 0x827   : >> { %5417 = vmatpush.msra.mxu0 %v5060_v50  ;;  %5435 = vmatpush.msra.mxu1 %v5240_v53  ;;  %v5231_v63 = vld [vmem:[%s14567_s4 + $0x738] sm:$0xff]  ;;  %v5180_v17 = vld [vmem:[%s14567_s4 + $0x5a0] sm:$0xff]  ;;  %v5221_v19 = vld [vmem:[%s14567_s4 + $0x6e8] sm:$0xff] }
 0x828   : >> { %5489 = vmatpush.msrb.mxu2 %v5301_v42  ;;  %5477 = vmatpush.msra.mxu3 %v5061_v4  ;;  %v5391_v9 = vld [vmem:[%s14567_s4 + $0xc38] sm:$0xff]  ;;  %v5381_v49 = vld [vmem:[%s14567_s4 + $0xbe8] sm:$0xff]  ;;  %v5170_v2 = vld [vmem:[%s14567_s4 + $0x550] sm:$0xff] }
 0x829   : >> { %5418 = vmatpush.msra.mxu0 %v5050_v39  ;;  %5436 = vmatpush.msra.mxu1 %v5230_v15  ;;  %v5031_v35 = vld [vmem:[%s14567_s4 + $0xf8] sm:$0xff]  ;;  %v5160_v47 = vld [vmem:[%s14567_s4 + $0x500] sm:$0xff]  ;;  %v5021_v52 = vld [vmem:[%s14567_s4 + $0xa8] sm:$0xff] }
 0x82a   : >> { %5490 = vmatpush.msrb.mxu2 %v5291_v11  ;;  %5478 = vmatpush.msra.mxu3 %v5051_v21  ;;  %v5211_v16 = vld [vmem:[%s14567_s4 + $0x698] sm:$0xff]  ;;  %v5201_v31 = vld [vmem:[%s14567_s4 + $0x648] sm:$0xff]  ;;  %v5152_v37 = vld [vmem:[%s14567_s4 + $0x4c0] sm:$0xff] }
 0x82b   : >> { %5419 = vmatpush.msra.mxu0 %v5040_v57  ;;  %5437 = vmatpush.msra.mxu1 %v5220_v29  ;;  %v5371_v30 = vld [vmem:[%s14567_s4 + $0xb98] sm:$0xff]  ;;  %v5361_v1 = vld [vmem:[%s14567_s4 + $0xb48] sm:$0xff]  ;;  %v5142_v41 = vld [vmem:[%s14567_s4 + $0x470] sm:$0xff] }
 0x82c   : >> { %5491 = vmatpush.msrb.mxu2 %v5281_v22  ;;  %5479 = vmatpush.msra.mxu3 %v5041_v32  ;;  %v5011_v7 = vld [vmem:[%s14567_s4 + $0x58] sm:$0xff]  ;;  %v5001_v26 = vld [vmem:[%s14567_s4 + $0x8] sm:$0xff]  ;;  %v5132_v44 = vld [vmem:[%s14567_s4 + $0x420] sm:$0xff] }
 0x82d   : >> { %5420 = vmatpush.msra.mxu0 %v5030_v18  ;;  %5438 = vmatpush.msra.mxu1 %v5210_v28  ;;  %v5191_v25 = vld [vmem:[%s14567_s4 + $0x5f8] sm:$0xff]  ;;  %v5181_v45 = vld [vmem:[%s14567_s4 + $0x5a8] sm:$0xff]  ;;  %v5312_v43 = vld [vmem:[%s14567_s4 + $0x9c0] sm:$0xff] }
 0x82e   : >> { %5492 = vmatpush.msrb.mxu2 %v5271_v40  ;;  %5480 = vmatpush.msra.mxu3 %v5031_v35  ;;  %v5351_v5 = vld [vmem:[%s14567_s4 + $0xaf8] sm:$0xff]  ;;  %v5341_v33 = vld [vmem:[%s14567_s4 + $0xaa8] sm:$0xff]  ;;  %v5392_v54 = vld [vmem:[%s14567_s4 + $0xc40] sm:$0xff] }
 0x82f   : >> { %5421 = vmatpush.msra.mxu0 %v5020_v61  ;;  %5439 = vmatpush.msra.mxu1 %v5200_v36  ;;  %v5171_v51 = vld [vmem:[%s14567_s4 + $0x558] sm:$0xff]  ;;  %v5161_v6 = vld [vmem:[%s14567_s4 + $0x508] sm:$0xff]  ;;  %v5122_v3 = vld [vmem:[%s14567_s4 + $0x3d0] sm:$0xff] }
 0x830   : >> { %5493 = vmatpush.msrb.mxu2 %v5261_v34  ;;  %5481 = vmatpush.msra.mxu3 %v5021_v52  ;;  %v5331_v20 = vld [vmem:[%s14567_s4 + $0xa58] sm:$0xff]  ;;  %v5321_v10 = vld [vmem:[%s14567_s4 + $0xa08] sm:$0xff]  ;;  %v5382_v12 = vld [vmem:[%s14567_s4 + $0xbf0] sm:$0xff] }
 0x831   : >> { %5422 = vmatpush.msra.mxu0 %v5010_v48  ;;  %5440 = vmatpush.msra.mxu1 %v5190_v62  ;;  %v5153_v46 = vld [vmem:[%s14567_s4 + $0x4c8] sm:$0xff]  ;;  %v5143_v8 = vld [vmem:[%s14567_s4 + $0x478] sm:$0xff]  ;;  %v5112_v42 = vld [vmem:[%s14567_s4 + $0x380] sm:$0xff] }
 0x832   : >> { %5494 = vmatpush.msrb.mxu2 %v5251_v24  ;;  %5482 = vmatpush.msra.mxu3 %v5011_v7  ;;  %v5302_v14 = vld [vmem:[%s14567_s4 + $0x970] sm:$0xff]  ;;  %v5372_v50 = vld [vmem:[%s14567_s4 + $0xba0] sm:$0xff]  ;;  %v5133_v59 = vld [vmem:[%s14567_s4 + $0x428] sm:$0xff] }
 0x833   : >> { %5423 = vmatpush.msra.mxu0 %v5000_v0  ;;  %5441 = vmatpush.msra.mxu1 %v5180_v17  ;;  %v5102_v11 = vld [vmem:[%s14567_s4 + $0x330] sm:$0xff]  ;;  %v5292_v53 = vld [vmem:[%s14567_s4 + $0x920] sm:$0xff]  ;;  %v5123_v23 = vld [vmem:[%s14567_s4 + $0x3d8] sm:$0xff] }
 0x834   : >> { %5495 = vmatpush.msrb.mxu2 %v5241_v55  ;;  %5483 = vmatpush.msra.mxu3 %v5001_v26  ;;  %v5362_v39 = vld [vmem:[%s14567_s4 + $0xb50] sm:$0xff]  ;;  %v5092_v22 = vld [vmem:[%s14567_s4 + $0x2e0] sm:$0xff]  ;;  %v5113_v38 = vld [vmem:[%s14567_s4 + $0x388] sm:$0xff] }
 0x835   : >> { %5516 = vmatpush.msrb.mxu0 %v5391_v9  ;;  %6569 = vmatmul.msk.f32.vlgmr.msra.gmra.mxu2 %vm3744_vm5, %v13113_v58  ;;  %v5282_v15 = vld [vmem:[%s14567_s4 + $0x8d0] sm:$0xff]  ;;  %v5352_v57 = vld [vmem:[%s14567_s4 + $0xb00] sm:$0xff]  ;;  %v5103_v56 = vld [vmem:[%s14567_s4 + $0x338] sm:$0xff] }
 0x836   : >> { %5496 = vmatpush.msrb.mxu2 %v5231_v63  ;;  %5442 = vmatpush.msra.mxu1 %v5170_v2  ;;  %v5082_v40 = vld [vmem:[%s14567_s4 + $0x290] sm:$0xff]  ;;  %v5272_v29 = vld [vmem:[%s14567_s4 + $0x880] sm:$0xff]  ;;  %v5093_v4 = vld [vmem:[%s14567_s4 + $0x2e8] sm:$0xff] }
 0x837   : >> { %5517 = vmatpush.msrb.mxu0 %v5381_v49  ;;  %5484 = vmatmul.f32.vlgmr.msra.gmra.mxu3 %v13175_v13  ;;  %v5342_v18 = vld [vmem:[%s14567_s4 + $0xab0] sm:$0xff]  ;;  %v5072_v34 = vld [vmem:[%s14567_s4 + $0x240] sm:$0xff]  ;;  %v5083_v21 = vld [vmem:[%s14567_s4 + $0x298] sm:$0xff] }
 0x838   : >> { %5497 = vmatpush.msrb.mxu2 %v5221_v19  ;;  %5443 = vmatpush.msra.mxu1 %v5160_v47  ;;  %v5262_v28 = vld [vmem:[%s14567_s4 + $0x830] sm:$0xff]  ;;  %v5332_v61 = vld [vmem:[%s14567_s4 + $0xa60] sm:$0xff]  ;;  %v5313_v55 = vld [vmem:[%s14567_s4 + $0x9c8] sm:$0xff] }
 0x839   : >> { %5518 = vmatpush.msrb.mxu0 %v5371_v30  ;;  %5548 = vmatpush.msrb.mxu3 %v5312_v43  ;;  %v5062_v24 = vld [vmem:[%s14567_s4 + $0x1f0] sm:$0xff]  ;;  %v5252_v36 = vld [vmem:[%s14567_s4 + $0x7e0] sm:$0xff]  ;;  %v5073_v32 = vld [vmem:[%s14567_s4 + $0x248] sm:$0xff] }
 0x83a   : >> { %5498 = vmatpush.msrb.mxu2 %v5211_v16  ;;  %5528 = vmatpush.msrb.mxu1 %v5152_v37  ;;  %v5322_v48 = vld [vmem:[%s14567_s4 + $0xa10] sm:$0xff]  ;;  %v5052_v62 = vld [vmem:[%s14567_s4 + $0x1a0] sm:$0xff]  ;;  %v5303_v63 = vld [vmem:[%s14567_s4 + $0x978] sm:$0xff] }
 0x83b   : >> { %5519 = vmatpush.msrb.mxu0 %v5361_v1  ;;  %5444 = vmatmul.f32.vlgmr.msra.gmra.mxu1 %v13198_v60  ;;  %v5242_v0 = vld [vmem:[%s14567_s4 + $0x790] sm:$0xff]  ;;  %v5232_v17 = vld [vmem:[%s14567_s4 + $0x740] sm:$0xff]  ;;  %v5063_v19 = vld [vmem:[%s14567_s4 + $0x1f8] sm:$0xff] }
 0x83c   : >> { %5499 = vmatpush.msrb.mxu2 %v5201_v31  ;;  %5529 = vmatpush.msrb.mxu1 %v5142_v41  ;;  %v5042_v9 = vld [vmem:[%s14567_s4 + $0x150] sm:$0xff]  ;;  %v5293_v49 = vld [vmem:[%s14567_s4 + $0x928] sm:$0xff]  ;;  %v5032_v2 = vld [vmem:[%s14567_s4 + $0x100] sm:$0xff] }
 0x83d   : >> { %5520 = vmatpush.msrb.mxu0 %v5351_v5  ;;  %5549 = vmatpush.msrb.mxu3 %v5302_v14  ;;  %v5222_v35 = vld [vmem:[%s14567_s4 + $0x6f0] sm:$0xff]  ;;  %v5053_v16 = vld [vmem:[%s14567_s4 + $0x1a8] sm:$0xff]  ;;  %v5283_v30 = vld [vmem:[%s14567_s4 + $0x8d8] sm:$0xff] }
 0x83e   : >> { %5500 = vmatpush.msrb.mxu2 %v5191_v25  ;;  %5424 = vmatmul.f32.vlgmr.msra.gmra.mxu0 %v13175_v13  ;;  %v5022_v47 = vld [vmem:[%s14567_s4 + $0xb0] sm:$0xff]  ;;  %v5212_v52 = vld [vmem:[%s14567_s4 + $0x6a0] sm:$0xff]  ;;  %v5043_v31 = vld [vmem:[%s14567_s4 + $0x158] sm:$0xff] }
 0x83f   : >> { %5521 = vmatpush.msrb.mxu0 %v5341_v33  ;;  %5530 = vmatpush.msrb.mxu1 %v5132_v44  ;;  %v5273_v1 = vld [vmem:[%s14567_s4 + $0x888] sm:$0xff]  ;;  %v5012_v37 = vld [vmem:[%s14567_s4 + $0x60] sm:$0xff]  ;;  %v5202_v7 = vld [vmem:[%s14567_s4 + $0x650] sm:$0xff] }
 0x840   : >> { %5501 = vmatpush.msrb.mxu2 %v5181_v45  ;;  %5550 = vmatpush.msrb.mxu3 %v5292_v53  ;;  %v5033_v25 = vld [vmem:[%s14567_s4 + $0x108] sm:$0xff]  ;;  %v5263_v5 = vld [vmem:[%s14567_s4 + $0x838] sm:$0xff]  ;;  %v5002_v41 = vld [vmem:[%s14567_s4 + $0x10] sm:$0xff] }
 0x841   : >> { %5522 = vmatpush.msrb.mxu0 %v5331_v20  ;;  %5531 = vmatpush.msrb.mxu1 %v5122_v3  ;;  %v5192_v26 = vld [vmem:[%s14567_s4 + $0x600] sm:$0xff]  ;;  %v5023_v45 = vld [vmem:[%s14567_s4 + $0xb8] sm:$0xff]  ;;  %v5253_v33 = vld [vmem:[%s14567_s4 + $0x7e8] sm:$0xff] }
 0x842   : >> { %5502 = vmatpush.msrb.mxu2 %v5171_v51  ;;  %5551 = vmatpush.msrb.mxu3 %v5282_v15  ;;  %v5393_v51 = vld [vmem:[%s14567_s4 + $0xc48] sm:$0xff]  ;;  %v5182_v20 = vld [vmem:[%s14567_s4 + $0x5b0] sm:$0xff]  ;;  %v5243_v43 = vld [vmem:[%s14567_s4 + $0x798] sm:$0xff] }
 0x843   : >> { %5523 = vmatpush.msrb.mxu0 %v5321_v10  ;;  %5532 = vmatpush.msrb.mxu1 %v5112_v42  ;;  %v5013_v44 = vld [vmem:[%s14567_s4 + $0x68] sm:$0xff]  ;;  %v5172_v10 = vld [vmem:[%s14567_s4 + $0x560] sm:$0xff]  ;;  %v5223_v42 = vld [vmem:[%s14567_s4 + $0x6f8] sm:$0xff] }
 0x844   : >> { %5503 = vmatpush.msrb.mxu2 %v5161_v6  ;;  %5552 = vmatpush.msrb.mxu3 %v5272_v29  ;;  %v5383_v6 = vld [vmem:[%s14567_s4 + $0xbf8] sm:$0xff]  ;;  %v5373_v3 = vld [vmem:[%s14567_s4 + $0xba8] sm:$0xff] }
 0x845   : >> { %5504 = vmatmul.f32.vlgmr.msrb.gmra.mxu2 %v13198_v60  ;;  %5576 = vmatpush.msra.mxu0 %v5392_v54  ;;  %v5003_v54 = vld [vmem:[%s14567_s4 + $0x18] sm:$0xff]  ;;  %v5353_v53 = vld [vmem:[%s14567_s4 + $0xb08] sm:$0xff] }
 0x846   : >> { %5588 = vmatpush.msra.mxu2 %v5153_v46  ;;  %5533 = vmatpush.msrb.mxu1 %v5102_v11  ;;  %v5233_v46 = vld [vmem:[%s14567_s4 + $0x748] sm:$0xff]  ;;  %v5363_v14 = vld [vmem:[%s14567_s4 + $0xb58] sm:$0xff] }
 0x847   : >> { %5577 = vmatpush.msra.mxu0 %v5382_v12  ;;  %5553 = vmatpush.msrb.mxu3 %v5262_v28  ;;  %v5394_v12 = vld [vmem:[%s14567_s4 + $0xc50] sm:$0xff]  ;;  %v5213_v11 = vld [vmem:[%s14567_s4 + $0x6a8] sm:$0xff]  ;;  %v5343_v15 = vld [vmem:[%s14567_s4 + $0xab8] sm:$0xff] }
 0x848   : >> { %5589 = vmatpush.msra.mxu2 %v5143_v8  ;;  %6570 = vmatmul.msk.f32.vlgmr.msrb.gmra.mxu0 %vm3744_vm5, %v13113_v58  ;;  %v5162_v8 = vld [vmem:[%s14567_s4 + $0x510] sm:$0xff]  ;;  %v5193_v29 = vld [vmem:[%s14567_s4 + $0x608] sm:$0xff]  ;;  %v5323_v28 = vld [vmem:[%s14567_s4 + $0xa18] sm:$0xff] }
 0x849   : >> { %5578 = vmatpush.msra.mxu0 %v5372_v50  ;;  %5534 = vmatpush.msrb.mxu1 %v5092_v22  ;;  %v5154_v50 = vld [vmem:[%s14567_s4 + $0x4d0] sm:$0xff]  ;;  %v5203_v22 = vld [vmem:[%s14567_s4 + $0x658] sm:$0xff] }
 0x84a   : >> { %5590 = vmatpush.msra.mxu2 %v5133_v59  ;;  %5554 = vmatpush.msrb.mxu3 %v5252_v36  ;;  %v5384_v59 = vld [vmem:[%s14567_s4 + $0xc00] sm:$0xff]  ;;  %v5173_v36 = vld [vmem:[%s14567_s4 + $0x568] sm:$0xff] }
 0x84b   : >> { %5579 = vmatpush.msra.mxu0 %v5362_v39  ;;  %5535 = vmatpush.msrb.mxu1 %v5082_v40  ;;  %v5144_v39 = vld [vmem:[%s14567_s4 + $0x480] sm:$0xff]  ;;  %v5333_v40 = vld [vmem:[%s14567_s4 + $0xa68] sm:$0xff] }
 0x84c   : >> { %5591 = vmatpush.msra.mxu2 %v5123_v23  ;;  %5555 = vmatpush.msrb.mxu3 %v5242_v0  ;;  %v5374_v23 = vld [vmem:[%s14567_s4 + $0xbb0] sm:$0xff] }
 0x84d   : >> { %5580 = vmatpush.msra.mxu0 %v5352_v57  ;;  %5536 = vmatpush.msrb.mxu1 %v5072_v34  ;;  %v5134_v57 = vld [vmem:[%s14567_s4 + $0x430] sm:$0xff]  ;;  %v5183_v34 = vld [vmem:[%s14567_s4 + $0x5b8] sm:$0xff] }
 0x84e   : >> { %5592 = vmatpush.msra.mxu2 %v5113_v38  ;;  %5556 = vmatpush.msrb.mxu3 %v5232_v17  ;;  %v5364_v38 = vld [vmem:[%s14567_s4 + $0xb60] sm:$0xff]  ;;  %v5094_v0 = vld [vmem:[%s14567_s4 + $0x2f0] sm:$0xff]  ;;  %v5315_v17 = vld [vmem:[%s14567_s4 + $0x9d8] sm:$0xff] }
 0x84f   : >> { %5581 = vmatpush.msra.mxu0 %v5342_v18  ;;  %5537 = vmatpush.msrb.mxu1 %v5062_v24  ;;  %v5124_v18 = vld [vmem:[%s14567_s4 + $0x3e0] sm:$0xff]  ;;  %v5314_v24 = vld [vmem:[%s14567_s4 + $0x9d0] sm:$0xff] }
 0x850   : >> { %5593 = vmatpush.msra.mxu2 %v5103_v56  ;;  %5557 = vmatpush.msrb.mxu3 %v5222_v35  ;;  %v5354_v56 = vld [vmem:[%s14567_s4 + $0xb10] sm:$0xff]  ;;  %v5305_v35 = vld [vmem:[%s14567_s4 + $0x988] sm:$0xff] }
 0x851   : >> { %5582 = vmatpush.msra.mxu0 %v5332_v61  ;;  %5538 = vmatpush.msrb.mxu1 %v5052_v62  ;;  %v5114_v61 = vld [vmem:[%s14567_s4 + $0x390] sm:$0xff]  ;;  %v5163_v62 = vld [vmem:[%s14567_s4 + $0x518] sm:$0xff] }
 0x852   : >> { %5594 = vmatpush.msra.mxu2 %v5093_v4  ;;  %5558 = vmatpush.msrb.mxu3 %v5212_v52  ;;  %v5344_v4 = vld [vmem:[%s14567_s4 + $0xac0] sm:$0xff]  ;;  %v5295_v52 = vld [vmem:[%s14567_s4 + $0x938] sm:$0xff] }
 0x853   : >> { %5583 = vmatpush.msra.mxu0 %v5322_v48  ;;  %5539 = vmatpush.msrb.mxu1 %v5042_v9  ;;  %v5104_v48 = vld [vmem:[%s14567_s4 + $0x340] sm:$0xff]  ;;  %v5155_v9 = vld [vmem:[%s14567_s4 + $0x4d8] sm:$0xff] }
 0x854   : >> { %5595 = vmatpush.msra.mxu2 %v5083_v21  ;;  %5559 = vmatpush.msrb.mxu3 %v5202_v7  ;;  %v5334_v21 = vld [vmem:[%s14567_s4 + $0xa70] sm:$0xff]  ;;  %v5285_v7 = vld [vmem:[%s14567_s4 + $0x8e8] sm:$0xff] }
 0x855   : >> { %5608 = vmatpush.msrb.mxu0 %v5313_v55  ;;  %5540 = vmatpush.msrb.mxu1 %v5032_v2  ;;  %v5304_v55 = vld [vmem:[%s14567_s4 + $0x980] sm:$0xff]  ;;  %v5145_v2 = vld [vmem:[%s14567_s4 + $0x488] sm:$0xff] }
 0x856   : >> { %5596 = vmatpush.msra.mxu2 %v5073_v32  ;;  %5560 = vmatpush.msrb.mxu3 %v5192_v26  ;;  %v5324_v32 = vld [vmem:[%s14567_s4 + $0xa20] sm:$0xff]  ;;  %v5275_v26 = vld [vmem:[%s14567_s4 + $0x898] sm:$0xff] }
 0x857   : >> { %5609 = vmatpush.msrb.mxu0 %v5303_v63  ;;  %5541 = vmatpush.msrb.mxu1 %v5022_v47  ;;  %v5294_v63 = vld [vmem:[%s14567_s4 + $0x930] sm:$0xff]  ;;  %v5135_v47 = vld [vmem:[%s14567_s4 + $0x438] sm:$0xff] }
 0x858   : >> { %5597 = vmatpush.msra.mxu2 %v5063_v19  ;;  %5561 = vmatpush.msrb.mxu3 %v5182_v20  ;;  %v5084_v19 = vld [vmem:[%s14567_s4 + $0x2a0] sm:$0xff]  ;;  %v5265_v20 = vld [vmem:[%s14567_s4 + $0x848] sm:$0xff] }
 0x859   : >> { %5610 = vmatpush.msrb.mxu0 %v5293_v49  ;;  %5542 = vmatpush.msrb.mxu1 %v5012_v37  ;;  %v5284_v49 = vld [vmem:[%s14567_s4 + $0x8e0] sm:$0xff]  ;;  %v5125_v37 = vld [vmem:[%s14567_s4 + $0x3e8] sm:$0xff] }
 0x85a   : >> { %5598 = vmatpush.msra.mxu2 %v5053_v16  ;;  %5562 = vmatpush.msrb.mxu3 %v5172_v10  ;;  %v5074_v16 = vld [vmem:[%s14567_s4 + $0x250] sm:$0xff]  ;;  %v5255_v10 = vld [vmem:[%s14567_s4 + $0x7f8] sm:$0xff] }
 0x85b   : >> { %5611 = vmatpush.msrb.mxu0 %v5283_v30  ;;  %5543 = vmatpush.msrb.mxu1 %v5002_v41  ;;  %v5274_v30 = vld [vmem:[%s14567_s4 + $0x890] sm:$0xff]  ;;  %v5115_v41 = vld [vmem:[%s14567_s4 + $0x398] sm:$0xff] }
 0x85c   : >> { %5599 = vmatpush.msra.mxu2 %v5043_v31  ;;  %5563 = vmatpush.msrb.mxu3 %v5162_v8  ;;  %v5064_v31 = vld [vmem:[%s14567_s4 + $0x200] sm:$0xff]  ;;  %v5014_v8 = vld [vmem:[%s14567_s4 + $0x70] sm:$0xff] }
 0x85d   : >> { %5612 = vmatpush.msrb.mxu0 %v5273_v1  ;;  %5636 = vmatpush.msra.mxu1 %v5393_v51  ;;  %v5264_v1 = vld [vmem:[%s14567_s4 + $0x840] sm:$0xff]  ;;  %v5105_v51 = vld [vmem:[%s14567_s4 + $0x348] sm:$0xff] }
 0x85e   : >> { %5600 = vmatpush.msra.mxu2 %v5033_v25  ;;  %5648 = vmatpush.msra.mxu3 %v5154_v50  ;;  %v5054_v25 = vld [vmem:[%s14567_s4 + $0x1b0] sm:$0xff]  ;;  %v5235_v50 = vld [vmem:[%s14567_s4 + $0x758] sm:$0xff] }
 0x85f   : >> { %5613 = vmatpush.msrb.mxu0 %v5263_v5  ;;  %5637 = vmatpush.msra.mxu1 %v5383_v6  ;;  %v5254_v5 = vld [vmem:[%s14567_s4 + $0x7f0] sm:$0xff]  ;;  %v5095_v6 = vld [vmem:[%s14567_s4 + $0x2f8] sm:$0xff] }
 0x860   : >> { %5601 = vmatpush.msra.mxu2 %v5023_v45  ;;  %5649 = vmatpush.msra.mxu3 %v5144_v39  ;;  %v5044_v45 = vld [vmem:[%s14567_s4 + $0x160] sm:$0xff]  ;;  %v5225_v39 = vld [vmem:[%s14567_s4 + $0x708] sm:$0xff] }
 0x861   : >> { %5614 = vmatpush.msrb.mxu0 %v5253_v33  ;;  %5638 = vmatpush.msra.mxu1 %v5373_v3  ;;  %v5244_v33 = vld [vmem:[%s14567_s4 + $0x7a0] sm:$0xff]  ;;  %v5085_v3 = vld [vmem:[%s14567_s4 + $0x2a8] sm:$0xff] }
 0x862   : >> { %5602 = vmatpush.msra.mxu2 %v5013_v44  ;;  %5650 = vmatpush.msra.mxu3 %v5134_v57  ;;  %v5034_v44 = vld [vmem:[%s14567_s4 + $0x110] sm:$0xff]  ;;  %v5215_v57 = vld [vmem:[%s14567_s4 + $0x6b8] sm:$0xff] }
 0x863   : >> { %5615 = vmatpush.msrb.mxu0 %v5243_v43  ;;  %5639 = vmatpush.msra.mxu1 %v5363_v14  ;;  %v5234_v43 = vld [vmem:[%s14567_s4 + $0x750] sm:$0xff]  ;;  %v5075_v14 = vld [vmem:[%s14567_s4 + $0x258] sm:$0xff] }
 0x864   : >> { %5603 = vmatpush.msra.mxu2 %v5003_v54  ;;  %6571 = vmatmul.msk.f32.vlgmr.msra.gmra.mxu0 %vm3744_vm5, %v13113_v58  ;;  %v5024_v54 = vld [vmem:[%s14567_s4 + $0xc0] sm:$0xff] }
 0x865   : >> { %5616 = vmatpush.msrb.mxu0 %v5233_v46  ;;  %5640 = vmatpush.msra.mxu1 %v5353_v53  ;;  %v5224_v46 = vld [vmem:[%s14567_s4 + $0x700] sm:$0xff]  ;;  %v5065_v53 = vld [vmem:[%s14567_s4 + $0x208] sm:$0xff] }
 0x866   : >> { %5696 = vmatpush.msrb.mxu2 %v5394_v12  ;;  %5651 = vmatpush.msra.mxu3 %v5124_v18  ;;  %v5245_v12 = vld [vmem:[%s14567_s4 + $0x7a8] sm:$0xff] }
 0x867   : >> { %5617 = vmatpush.msrb.mxu0 %v5223_v42  ;;  %5641 = vmatpush.msra.mxu1 %v5343_v15  ;;  %v5214_v42 = vld [vmem:[%s14567_s4 + $0x6b0] sm:$0xff]  ;;  %v5055_v15 = vld [vmem:[%s14567_s4 + $0x1b8] sm:$0xff]  ;;  %v5205_v18 = vld [vmem:[%s14567_s4 + $0x668] sm:$0xff] }
 0x868   : >> { %5697 = vmatpush.msrb.mxu2 %v5384_v59  ;;  %5544 = vmatmul.f32.vlgmr.msrb.gmra.mxu1 %v13175_v13  ;;  %v5004_v59 = vld [vmem:[%s14567_s4 + $0x20] sm:$0xff] }
 0x869   : >> { %5618 = vmatpush.msrb.mxu0 %v5213_v11  ;;  %5642 = vmatpush.msra.mxu1 %v5333_v40  ;;  %v5204_v11 = vld [vmem:[%s14567_s4 + $0x660] sm:$0xff] }
 0x86a   : >> { %5698 = vmatpush.msrb.mxu2 %v5374_v23  ;;  %5564 = vmatmul.f32.vlgmr.msrb.gmra.mxu3 %v13198_v60  ;;  %v5395_v23 = vld [vmem:[%s14567_s4 + $0xc58] sm:$0xff]  ;;  %v5184_v40 = vld [vmem:[%s14567_s4 + $0x5c0] sm:$0xff] }
 0x86b   : >> { %5619 = vmatpush.msrb.mxu0 %v5203_v22  ;;  %5604 = vmatmul.f32.vlgmr.msra.gmra.mxu2 %v13175_v13  ;;  %v5194_v22 = vld [vmem:[%s14567_s4 + $0x610] sm:$0xff] }
 0x86c   : >> { %5699 = vmatpush.msrb.mxu2 %v5364_v38  ;;  %5643 = vmatpush.msra.mxu1 %v5323_v28  ;;  %v5385_v38 = vld [vmem:[%s14567_s4 + $0xc08] sm:$0xff]  ;;  %v5035_v28 = vld [vmem:[%s14567_s4 + $0x118] sm:$0xff] }
 0x86d   : >> { %5620 = vmatpush.msrb.mxu0 %v5193_v29  ;;  %5652 = vmatpush.msra.mxu3 %v5114_v61  ;;  %v5045_v29 = vld [vmem:[%s14567_s4 + $0x168] sm:$0xff]  ;;  %v5195_v61 = vld [vmem:[%s14567_s4 + $0x618] sm:$0xff] }
 0x86e   : >> { %5700 = vmatpush.msrb.mxu2 %v5354_v56  ;;  %5668 = vmatpush.msrb.mxu1 %v5314_v24  ;;  %v5375_v56 = vld [vmem:[%s14567_s4 + $0xbb8] sm:$0xff]  ;;  %v5164_v24 = vld [vmem:[%s14567_s4 + $0x520] sm:$0xff] }
 0x86f   : >> { %5621 = vmatpush.msrb.mxu0 %v5183_v34  ;;  %5653 = vmatpush.msra.mxu3 %v5104_v48  ;;  %v5174_v34 = vld [vmem:[%s14567_s4 + $0x570] sm:$0xff]  ;;  %v5185_v48 = vld [vmem:[%s14567_s4 + $0x5c8] sm:$0xff] }
 0x870   : >> { %5701 = vmatpush.msrb.mxu2 %v5344_v4  ;;  %5669 = vmatpush.msrb.mxu1 %v5304_v55  ;;  %v5365_v4 = vld [vmem:[%s14567_s4 + $0xb68] sm:$0xff]  ;;  %v5156_v55 = vld [vmem:[%s14567_s4 + $0x4e0] sm:$0xff] }
 0x871   : >> { %5622 = vmatpush.msrb.mxu0 %v5173_v36  ;;  %5654 = vmatpush.msra.mxu3 %v5094_v0  ;;  %v5025_v36 = vld [vmem:[%s14567_s4 + $0xc8] sm:$0xff]  ;;  %v5175_v0 = vld [vmem:[%s14567_s4 + $0x578] sm:$0xff] }
 0x872   : >> { %5702 = vmatpush.msrb.mxu2 %v5334_v21  ;;  %5670 = vmatpush.msrb.mxu1 %v5294_v63  ;;  %v5355_v21 = vld [vmem:[%s14567_s4 + $0xb18] sm:$0xff]  ;;  %v5146_v63 = vld [vmem:[%s14567_s4 + $0x490] sm:$0xff] }
 0x873   : >> { %5623 = vmatpush.msrb.mxu0 %v5163_v62  ;;  %5655 = vmatpush.msra.mxu3 %v5084_v19  ;;  %v5015_v62 = vld [vmem:[%s14567_s4 + $0x78] sm:$0xff] }
 0x874   : >> { %5703 = vmatpush.msrb.mxu2 %v5324_v32  ;;  %5624 = vmatmul.f32.vlgmr.msrb.gmra.mxu0 %v13198_v60  ;;  %v5345_v32 = vld [vmem:[%s14567_s4 + $0xac8] sm:$0xff]  ;;  %v5335_v19 = vld [vmem:[%s14567_s4 + $0xa78] sm:$0xff] }
 0x875   : >> { %5708 = vmatpush.msra.mxu0 %v5155_v9  ;;  %6572 = vmatmul.msk.f32.vlgmr.msra.gmra.mxu1 %vm3744_vm5, %v13113_v58  ;;  %v5005_v9 = vld [vmem:[%s14567_s4 + $0x28] sm:$0xff] }
 0x876   : >> { %5728 = vmatpush.msra.mxu2 %v5315_v17  ;;  %5671 = vmatpush.msrb.mxu1 %v5284_v49  ;;  %v5165_v17 = vld [vmem:[%s14567_s4 + $0x528] sm:$0xff]  ;;  %v5136_v49 = vld [vmem:[%s14567_s4 + $0x440] sm:$0xff] }
 0x877   : >> { %5709 = vmatpush.msra.mxu0 %v5145_v2  ;;  %5656 = vmatpush.msra.mxu3 %v5074_v16  ;;  %v5396_v2 = vld [vmem:[%s14567_s4 + $0xc60] sm:$0xff]  ;;  %v5325_v16 = vld [vmem:[%s14567_s4 + $0xa28] sm:$0xff] }
 0x878   : >> { %5729 = vmatpush.msra.mxu2 %v5305_v35  ;;  %5672 = vmatpush.msrb.mxu1 %v5274_v30  ;;  %v5157_v35 = vld [vmem:[%s14567_s4 + $0x4e8] sm:$0xff]  ;;  %v5126_v30 = vld [vmem:[%s14567_s4 + $0x3f0] sm:$0xff] }
 0x879   : >> { %5710 = vmatpush.msra.mxu0 %v5135_v47  ;;  %5657 = vmatpush.msra.mxu3 %v5064_v31  ;;  %v5386_v47 = vld [vmem:[%s14567_s4 + $0xc10] sm:$0xff]  ;;  %v5147_v31 = vld [vmem:[%s14567_s4 + $0x498] sm:$0xff] }
 0x87a   : >> { %5730 = vmatpush.msra.mxu2 %v5295_v52  ;;  %5673 = vmatpush.msrb.mxu1 %v5264_v1  ;;  %v5316_v52 = vld [vmem:[%s14567_s4 + $0x9e0] sm:$0xff] }
 0x87b   : >> { %5711 = vmatpush.msra.mxu0 %v5125_v37  ;;  %5658 = vmatpush.msra.mxu3 %v5054_v25  ;;  %v5376_v1 = vld [vmem:[%s14567_s4 + $0xbc0] sm:$0xff]  ;;  %v5137_v25 = vld [vmem:[%s14567_s4 + $0x448] sm:$0xff] }
 0x87c   : >> { %5731 = vmatpush.msra.mxu2 %v5285_v7  ;;  %5674 = vmatpush.msrb.mxu1 %v5254_v5  ;;  %v5116_v37 = vld [vmem:[%s14567_s4 + $0x3a0] sm:$0xff]  ;;  %v5306_v7 = vld [vmem:[%s14567_s4 + $0x990] sm:$0xff] }
 0x87d   : >> { %5712 = vmatpush.msra.mxu0 %v5115_v41  ;;  %5659 = vmatpush.msra.mxu3 %v5044_v45  ;;  %v5106_v5 = vld [vmem:[%s14567_s4 + $0x350] sm:$0xff]  ;;  %v5296_v41 = vld [vmem:[%s14567_s4 + $0x940] sm:$0xff]  ;;  %v5127_v45 = vld [vmem:[%s14567_s4 + $0x3f8] sm:$0xff] }
 0x87e   : >> { %5732 = vmatpush.msra.mxu2 %v5275_v26  ;;  %5675 = vmatpush.msrb.mxu1 %v5244_v33  ;;  %v5366_v26 = vld [vmem:[%s14567_s4 + $0xb70] sm:$0xff]  ;;  %v5096_v33 = vld [vmem:[%s14567_s4 + $0x300] sm:$0xff] }
 0x87f   : >> { %5713 = vmatpush.msra.mxu0 %v5105_v51  ;;  %5660 = vmatpush.msra.mxu3 %v5034_v44  ;;  %v5286_v51 = vld [vmem:[%s14567_s4 + $0x8f0] sm:$0xff]  ;;  %v5117_v44 = vld [vmem:[%s14567_s4 + $0x3a8] sm:$0xff] }
 0x880   : >> { %5733 = vmatpush.msra.mxu2 %v5265_v20  ;;  %5676 = vmatpush.msrb.mxu1 %v5234_v43  ;;  %v5356_v20 = vld [vmem:[%s14567_s4 + $0xb20] sm:$0xff]  ;;  %v5086_v43 = vld [vmem:[%s14567_s4 + $0x2b0] sm:$0xff] }
 0x881   : >> { %5714 = vmatpush.msra.mxu0 %v5095_v6  ;;  %5661 = vmatpush.msra.mxu3 %v5024_v54  ;;  %v5276_v6 = vld [vmem:[%s14567_s4 + $0x8a0] sm:$0xff]  ;;  %v5107_v54 = vld [vmem:[%s14567_s4 + $0x358] sm:$0xff] }
 0x882   : >> { %5734 = vmatpush.msra.mxu2 %v5255_v10  ;;  %5677 = vmatpush.msrb.mxu1 %v5224_v46  ;;  %v5346_v10 = vld [vmem:[%s14567_s4 + $0xad0] sm:$0xff]  ;;  %v5076_v46 = vld [vmem:[%s14567_s4 + $0x260] sm:$0xff] }
 0x883   : >> { %5715 = vmatpush.msra.mxu0 %v5085_v3  ;;  %5662 = vmatpush.msra.mxu3 %v5014_v8  ;;  %v5266_v3 = vld [vmem:[%s14567_s4 + $0x850] sm:$0xff]  ;;  %v5097_v8 = vld [vmem:[%s14567_s4 + $0x308] sm:$0xff] }
 0x884   : >> { %5735 = vmatpush.msra.mxu2 %v5245_v12  ;;  %5678 = vmatpush.msrb.mxu1 %v5214_v42  ;;  %v5336_v12 = vld [vmem:[%s14567_s4 + $0xa80] sm:$0xff]  ;;  %v5066_v42 = vld [vmem:[%s14567_s4 + $0x210] sm:$0xff] }
 0x885   : >> { %5716 = vmatpush.msra.mxu0 %v5075_v14  ;;  %5663 = vmatpush.msra.mxu3 %v5004_v59  ;;  %v5256_v14 = vld [vmem:[%s14567_s4 + $0x800] sm:$0xff]  ;;  %v5087_v59 = vld [vmem:[%s14567_s4 + $0x2b8] sm:$0xff] }
 0x886   : >> { %5736 = vmatpush.msra.mxu2 %v5235_v50  ;;  %5679 = vmatpush.msrb.mxu1 %v5204_v11  ;;  %v5326_v50 = vld [vmem:[%s14567_s4 + $0xa30] sm:$0xff]  ;;  %v5317_v11 = vld [vmem:[%s14567_s4 + $0x9e8] sm:$0xff] }
 0x887   : >> { %5717 = vmatpush.msra.mxu0 %v5065_v53  ;;  %5756 = vmatpush.msrb.mxu3 %v5395_v23  ;;  %v5056_v53 = vld [vmem:[%s14567_s4 + $0x1c0] sm:$0xff]  ;;  %v5077_v23 = vld [vmem:[%s14567_s4 + $0x268] sm:$0xff] }
 0x888   : >> { %5737 = vmatpush.msra.mxu2 %v5225_v39  ;;  %5680 = vmatpush.msrb.mxu1 %v5194_v22  ;;  %v5246_v39 = vld [vmem:[%s14567_s4 + $0x7b0] sm:$0xff]  ;;  %v5307_v22 = vld [vmem:[%s14567_s4 + $0x998] sm:$0xff] }
 0x889   : >> { %5718 = vmatpush.msra.mxu0 %v5055_v15  ;;  %5757 = vmatpush.msrb.mxu3 %v5385_v38  ;;  %v5046_v15 = vld [vmem:[%s14567_s4 + $0x170] sm:$0xff]  ;;  %v5067_v38 = vld [vmem:[%s14567_s4 + $0x218] sm:$0xff] }
 0x88a   : >> { %5738 = vmatpush.msra.mxu2 %v5215_v57  ;;  %5681 = vmatpush.msrb.mxu1 %v5184_v40  ;;  %v5236_v57 = vld [vmem:[%s14567_s4 + $0x760] sm:$0xff]  ;;  %v5297_v40 = vld [vmem:[%s14567_s4 + $0x948] sm:$0xff] }
 0x88b   : >> { %5719 = vmatpush.msra.mxu0 %v5045_v29  ;;  %5758 = vmatpush.msrb.mxu3 %v5375_v56  ;;  %v5036_v29 = vld [vmem:[%s14567_s4 + $0x120] sm:$0xff]  ;;  %v5057_v56 = vld [vmem:[%s14567_s4 + $0x1c8] sm:$0xff] }
 0x88c   : >> { %5739 = vmatpush.msra.mxu2 %v5205_v18  ;;  %5682 = vmatpush.msrb.mxu1 %v5174_v34  ;;  %v5226_v18 = vld [vmem:[%s14567_s4 + $0x710] sm:$0xff]  ;;  %v5287_v34 = vld [vmem:[%s14567_s4 + $0x8f8] sm:$0xff] }
 0x88d   : >> { %6573 = vmatmul.msk.f32.vlgmr.msrb.gmra.mxu2 %vm3744_vm5, %v13113_v58  ;;  %5720 = vmatpush.msra.mxu0 %v5035_v28  ;;  %v5026_v28 = vld [vmem:[%s14567_s4 + $0xd0] sm:$0xff] }
 0x88e   : >> { %5740 = vmatpush.msra.mxu2 %v5195_v61  ;;  %5759 = vmatpush.msrb.mxu3 %v5365_v4  ;;  %v5216_v61 = vld [vmem:[%s14567_s4 + $0x6c0] sm:$0xff]  ;;  %v5047_v4 = vld [vmem:[%s14567_s4 + $0x178] sm:$0xff] }
 0x88f   : >> { %5683 = vmatpush.msrb.mxu1 %v5164_v24  ;;  %5664 = vmatmul.f32.vlgmr.msra.gmra.mxu3 %v13175_v13  ;;  %v5277_v24 = vld [vmem:[%s14567_s4 + $0x8a8] sm:$0xff] }
 0x890   : >> { %5721 = vmatpush.msra.mxu0 %v5025_v36  ;;  %5741 = vmatpush.msra.mxu2 %v5185_v48  ;;  %v5016_v36 = vld [vmem:[%s14567_s4 + $0x80] sm:$0xff]  ;;  %v5206_v48 = vld [vmem:[%s14567_s4 + $0x670] sm:$0xff] }
 0x891   : >> { %5760 = vmatpush.msrb.mxu3 %v5355_v21  ;;  %5768 = vmatpush.msra.mxu1 %v5156_v55  ;;  %v5037_v21 = vld [vmem:[%s14567_s4 + $0x128] sm:$0xff]  ;;  %v5267_v55 = vld [vmem:[%s14567_s4 + $0x858] sm:$0xff] }
 0x892   : >> { %5722 = vmatpush.msra.mxu0 %v5015_v62  ;;  %5742 = vmatpush.msra.mxu2 %v5175_v0  ;;  %v5006_v62 = vld [vmem:[%s14567_s4 + $0x30] sm:$0xff]  ;;  %v5196_v0 = vld [vmem:[%s14567_s4 + $0x620] sm:$0xff] }
 0x893   : >> { %5761 = vmatpush.msrb.mxu3 %v5345_v32  ;;  %5769 = vmatpush.msra.mxu1 %v5146_v63  ;;  %v5027_v32 = vld [vmem:[%s14567_s4 + $0xd8] sm:$0xff]  ;;  %v5257_v63 = vld [vmem:[%s14567_s4 + $0x808] sm:$0xff] }
 0x894   : >> { %5723 = vmatpush.msra.mxu0 %v5005_v9  ;;  %5743 = vmatpush.msra.mxu2 %v5165_v17  ;;  %v5397_v9 = vld [vmem:[%s14567_s4 + $0xc68] sm:$0xff]  ;;  %v5186_v17 = vld [vmem:[%s14567_s4 + $0x5d0] sm:$0xff] }
 0x895   : >> { %5762 = vmatpush.msrb.mxu3 %v5335_v19  ;;  %5744 = vmatmul.f32.vlgmr.msra.gmra.mxu2 %v13198_v60  ;;  %v5017_v19 = vld [vmem:[%s14567_s4 + $0x88] sm:$0xff] }
 0x896   : >> { %5770 = vmatpush.msra.mxu1 %v5136_v49  ;;  %5816 = vmatpush.msrb.mxu0 %v5396_v2  ;;  %v5247_v49 = vld [vmem:[%s14567_s4 + $0x7b8] sm:$0xff] }
 0x897   : >> { %5828 = vmatpush.msrb.mxu2 %v5157_v35  ;;  %5763 = vmatpush.msrb.mxu3 %v5325_v16  ;;  %v5387_v2 = vld [vmem:[%s14567_s4 + $0xc18] sm:$0xff]  ;;  %v5176_v35 = vld [vmem:[%s14567_s4 + $0x580] sm:$0xff] }
 0x898   : >> { %5771 = vmatpush.msra.mxu1 %v5126_v30  ;;  %6574 = vmatmul.msk.f32.vlgmr.msrb.gmra.mxu3 %vm3744_vm5, %v13113_v58  ;;  %v5007_v16 = vld [vmem:[%s14567_s4 + $0x38] sm:$0xff]  ;;  %v5237_v30 = vld [vmem:[%s14567_s4 + $0x768] sm:$0xff] }
 0x899   : >> { %5817 = vmatpush.msrb.mxu0 %v5386_v47  ;;  %5788 = vmatpush.msra.mxu3 %v5316_v52  ;;  %v5377_v47 = vld [vmem:[%s14567_s4 + $0xbc8] sm:$0xff]  ;;  %v5398_v52 = vld [vmem:[%s14567_s4 + $0xc70] sm:$0xff] }
 0x89a   : >> { %5829 = vmatpush.msrb.mxu2 %v5147_v31  ;;  %5684 = vmatmul.f32.vlgmr.msrb.gmra.mxu1 %v13198_v60  ;;  %v5166_v31 = vld [vmem:[%s14567_s4 + $0x530] sm:$0xff] }
 0x89b   : >> { %5818 = vmatpush.msrb.mxu0 %v5376_v1  ;;  %5772 = vmatpush.msra.mxu1 %v5116_v37  ;;  %v5227_v1 = vld [vmem:[%s14567_s4 + $0x718] sm:$0xff] }
 0x89c   : >> { %5789 = vmatpush.msra.mxu3 %v5306_v7  ;;  %5830 = vmatpush.msrb.mxu2 %v5137_v25  ;;  %v5367_v37 = vld [vmem:[%s14567_s4 + $0xb78] sm:$0xff]  ;;  %v5158_v7 = vld [vmem:[%s14567_s4 + $0x4f0] sm:$0xff]  ;;  %v5388_v25 = vld [vmem:[%s14567_s4 + $0xc20] sm:$0xff] }
 0x89d   : >> { %5724 = vmatmul.f32.vlgmr.msra.gmra.mxu0 %v13175_v13  ;;  %5773 = vmatpush.msra.mxu1 %v5106_v5  ;;  %v5217_v5 = vld [vmem:[%s14567_s4 + $0x6c8] sm:$0xff] }
 0x89e   : >> { %5790 = vmatpush.msra.mxu3 %v5296_v41  ;;  %5819 = vmatpush.msrb.mxu0 %v5366_v26  ;;  %v5357_v41 = vld [vmem:[%s14567_s4 + $0xb28] sm:$0xff]  ;;  %v5148_v26 = vld [vmem:[%s14567_s4 + $0x4a0] sm:$0xff] }
 0x89f   : >> { %5831 = vmatpush.msrb.mxu2 %v5127_v45  ;;  %5774 = vmatpush.msra.mxu1 %v5096_v33  ;;  %v5378_v45 = vld [vmem:[%s14567_s4 + $0xbd0] sm:$0xff]  ;;  %v5207_v33 = vld [vmem:[%s14567_s4 + $0x678] sm:$0xff] }
 0x8a0   : >> { %5791 = vmatpush.msra.mxu3 %v5286_v51  ;;  %5820 = vmatpush.msrb.mxu0 %v5356_v20  ;;  %v5347_v51 = vld [vmem:[%s14567_s4 + $0xad8] sm:$0xff]  ;;  %v5138_v20 = vld [vmem:[%s14567_s4 + $0x450] sm:$0xff] }
 0x8a1   : >> { %5832 = vmatpush.msrb.mxu2 %v5117_v44  ;;  %5775 = vmatpush.msra.mxu1 %v5086_v43  ;;  %v5368_v44 = vld [vmem:[%s14567_s4 + $0xb80] sm:$0xff]  ;;  %v5337_v43 = vld [vmem:[%s14567_s4 + $0xa88] sm:$0xff] }
 0x8a2   : >> { %5792 = vmatpush.msra.mxu3 %v5276_v6  ;;  %5821 = vmatpush.msrb.mxu0 %v5346_v10  ;;  %v5197_v6 = vld [vmem:[%s14567_s4 + $0x628] sm:$0xff]  ;;  %v5128_v10 = vld [vmem:[%s14567_s4 + $0x400] sm:$0xff] }
 0x8a3   : >> { %5833 = vmatpush.msrb.mxu2 %v5107_v54  ;;  %5776 = vmatpush.msra.mxu1 %v5076_v46  ;;  %v5358_v54 = vld [vmem:[%s14567_s4 + $0xb30] sm:$0xff]  ;;  %v5187_v46 = vld [vmem:[%s14567_s4 + $0x5d8] sm:$0xff] }
 0x8a4   : >> { %5793 = vmatpush.msra.mxu3 %v5266_v3  ;;  %5822 = vmatpush.msrb.mxu0 %v5336_v12  ;;  %v5327_v3 = vld [vmem:[%s14567_s4 + $0xa38] sm:$0xff]  ;;  %v5118_v12 = vld [vmem:[%s14567_s4 + $0x3b0] sm:$0xff] }
 0x8a5   : >> { %5834 = vmatpush.msrb.mxu2 %v5097_v8  ;;  %5777 = vmatpush.msra.mxu1 %v5066_v42  ;;  %v5348_v8 = vld [vmem:[%s14567_s4 + $0xae0] sm:$0xff]  ;;  %v5318_v42 = vld [vmem:[%s14567_s4 + $0x9f0] sm:$0xff] }
 0x8a6   : >> { %5794 = vmatpush.msra.mxu3 %v5256_v14  ;;  %5823 = vmatpush.msrb.mxu0 %v5326_v50  ;;  %v5177_v14 = vld [vmem:[%s14567_s4 + $0x588] sm:$0xff]  ;;  %v5108_v50 = vld [vmem:[%s14567_s4 + $0x360] sm:$0xff] }
 0x8a7   : >> { %5835 = vmatpush.msrb.mxu2 %v5087_v59  ;;  %5778 = vmatpush.msra.mxu1 %v5056_v53  ;;  %v5338_v59 = vld [vmem:[%s14567_s4 + $0xa90] sm:$0xff]  ;;  %v5167_v53 = vld [vmem:[%s14567_s4 + $0x538] sm:$0xff] }
 0x8a8   : >> { %5848 = vmatpush.msra.mxu0 %v5317_v11  ;;  %5795 = vmatpush.msra.mxu3 %v5246_v39  ;;  %v5308_v11 = vld [vmem:[%s14567_s4 + $0x9a0] sm:$0xff]  ;;  %v5098_v39 = vld [vmem:[%s14567_s4 + $0x310] sm:$0xff] }
 0x8a9   : >> { %5836 = vmatpush.msrb.mxu2 %v5077_v23  ;;  %5779 = vmatpush.msra.mxu1 %v5046_v15  ;;  %v5328_v23 = vld [vmem:[%s14567_s4 + $0xa40] sm:$0xff]  ;;  %v5319_v15 = vld [vmem:[%s14567_s4 + $0x9f8] sm:$0xff] }
 0x8aa   : >> { %5849 = vmatpush.msra.mxu0 %v5307_v22  ;;  %5796 = vmatpush.msra.mxu3 %v5236_v57  ;;  %v5298_v22 = vld [vmem:[%s14567_s4 + $0x950] sm:$0xff]  ;;  %v5088_v57 = vld [vmem:[%s14567_s4 + $0x2c0] sm:$0xff] }
 0x8ab   : >> { %5837 = vmatpush.msrb.mxu2 %v5067_v38  ;;  %5780 = vmatpush.msra.mxu1 %v5036_v29  ;;  %v5159_v38 = vld [vmem:[%s14567_s4 + $0x4f8] sm:$0xff]  ;;  %v5309_v29 = vld [vmem:[%s14567_s4 + $0x9a8] sm:$0xff] }
 0x8ac   : >> { %5850 = vmatpush.msra.mxu0 %v5297_v40  ;;  %5797 = vmatpush.msra.mxu3 %v5226_v18  ;;  %v5288_v40 = vld [vmem:[%s14567_s4 + $0x900] sm:$0xff]  ;;  %v5078_v18 = vld [vmem:[%s14567_s4 + $0x270] sm:$0xff] }
 0x8ad   : >> { %5838 = vmatpush.msrb.mxu2 %v5057_v56  ;;  %5781 = vmatpush.msra.mxu1 %v5026_v28  ;;  %v5149_v56 = vld [vmem:[%s14567_s4 + $0x4a8] sm:$0xff]  ;;  %v5299_v28 = vld [vmem:[%s14567_s4 + $0x958] sm:$0xff] }
 0x8ae   : >> { %5851 = vmatpush.msra.mxu0 %v5287_v34  ;;  %5798 = vmatpush.msra.mxu3 %v5216_v61  ;;  %v5278_v34 = vld [vmem:[%s14567_s4 + $0x8b0] sm:$0xff]  ;;  %v5068_v61 = vld [vmem:[%s14567_s4 + $0x220] sm:$0xff] }
 0x8af   : >> { %5839 = vmatpush.msrb.mxu2 %v5047_v4  ;;  %5782 = vmatpush.msra.mxu1 %v5016_v36  ;;  %v5139_v4 = vld [vmem:[%s14567_s4 + $0x458] sm:$0xff]  ;;  %v5289_v36 = vld [vmem:[%s14567_s4 + $0x908] sm:$0xff] }
 0x8b0   : >> { %5852 = vmatpush.msra.mxu0 %v5277_v24  ;;  %5799 = vmatpush.msra.mxu3 %v5206_v48  ;;  %v5268_v24 = vld [vmem:[%s14567_s4 + $0x860] sm:$0xff]  ;;  %v5058_v48 = vld [vmem:[%s14567_s4 + $0x1d0] sm:$0xff] }
 0x8b1   : >> { %5840 = vmatpush.msrb.mxu2 %v5037_v21  ;;  %5783 = vmatpush.msra.mxu1 %v5006_v62  ;;  %v5129_v21 = vld [vmem:[%s14567_s4 + $0x408] sm:$0xff]  ;;  %v5279_v62 = vld [vmem:[%s14567_s4 + $0x8b8] sm:$0xff] }
 0x8b2   : >> { %5853 = vmatpush.msra.mxu0 %v5267_v55  ;;  %5800 = vmatpush.msra.mxu3 %v5196_v0  ;;  %v5258_v55 = vld [vmem:[%s14567_s4 + $0x810] sm:$0xff]  ;;  %v5048_v0 = vld [vmem:[%s14567_s4 + $0x180] sm:$0xff] }
 0x8b3   : >> { %5841 = vmatpush.msrb.mxu2 %v5027_v32  ;;  %5876 = vmatpush.msrb.mxu1 %v5397_v9  ;;  %v5119_v32 = vld [vmem:[%s14567_s4 + $0x3b8] sm:$0xff]  ;;  %v5269_v9 = vld [vmem:[%s14567_s4 + $0x868] sm:$0xff] }
 0x8b4   : >> { %5854 = vmatpush.msra.mxu0 %v5257_v63  ;;  %5801 = vmatpush.msra.mxu3 %v5186_v17  ;;  %v5248_v63 = vld [vmem:[%s14567_s4 + $0x7c0] sm:$0xff]  ;;  %v5038_v17 = vld [vmem:[%s14567_s4 + $0x130] sm:$0xff] }
 0x8b5   : >> { %5842 = vmatpush.msrb.mxu2 %v5017_v19  ;;  %5877 = vmatpush.msrb.mxu1 %v5387_v2  ;;  %v5109_v19 = vld [vmem:[%s14567_s4 + $0x368] sm:$0xff]  ;;  %v5259_v2 = vld [vmem:[%s14567_s4 + $0x818] sm:$0xff] }
 0x8b6   : >> { %5855 = vmatpush.msra.mxu0 %v5247_v49  ;;  %5802 = vmatpush.msra.mxu3 %v5176_v35  ;;  %v5238_v49 = vld [vmem:[%s14567_s4 + $0x770] sm:$0xff]  ;;  %v5028_v35 = vld [vmem:[%s14567_s4 + $0xe0] sm:$0xff] }
 0x8b7   : >> { %5843 = vmatpush.msrb.mxu2 %v5007_v16  ;;  %5878 = vmatpush.msrb.mxu1 %v5377_v47  ;;  %v5099_v16 = vld [vmem:[%s14567_s4 + $0x318] sm:$0xff]  ;;  %v5249_v47 = vld [vmem:[%s14567_s4 + $0x7c8] sm:$0xff] }
 0x8b8   : >> { %5856 = vmatpush.msra.mxu0 %v5237_v30  ;;  %5803 = vmatpush.msra.mxu3 %v5166_v31  ;;  %v5228_v30 = vld [vmem:[%s14567_s4 + $0x720] sm:$0xff]  ;;  %v5089_v31 = vld [vmem:[%s14567_s4 + $0x2c8] sm:$0xff] }
 0x8b9   : >> { %5936 = vmatpush.msra.mxu2 %v5398_v52  ;;  %5879 = vmatpush.msrb.mxu1 %v5367_v37  ;;  %v5018_v52 = vld [vmem:[%s14567_s4 + $0x90] sm:$0xff]  ;;  %v5239_v37 = vld [vmem:[%s14567_s4 + $0x778] sm:$0xff] }
 0x8ba   : >> { %5857 = vmatpush.msra.mxu0 %v5227_v1  ;;  %5888 = vmatpush.msrb.mxu3 %v5158_v7  ;;  %v5218_v1 = vld [vmem:[%s14567_s4 + $0x6d0] sm:$0xff]  ;;  %v5008_v7 = vld [vmem:[%s14567_s4 + $0x40] sm:$0xff] }
 0x8bb   : >> { %5937 = vmatpush.msra.mxu2 %v5388_v25  ;;  %5880 = vmatpush.msrb.mxu1 %v5357_v41  ;;  %v5079_v25 = vld [vmem:[%s14567_s4 + $0x278] sm:$0xff]  ;;  %v5229_v41 = vld [vmem:[%s14567_s4 + $0x728] sm:$0xff] }
 0x8bc   : >> { %5858 = vmatpush.msra.mxu0 %v5217_v5  ;;  %5889 = vmatpush.msrb.mxu3 %v5148_v26  ;;  %v5208_v5 = vld [vmem:[%s14567_s4 + $0x680] sm:$0xff]  ;;  %v5399_v26 = vld [vmem:[%s14567_s4 + $0xc78] sm:$0xff] }
 0x8bd   : >> { %5938 = vmatpush.msra.mxu2 %v5378_v45  ;;  %5881 = vmatpush.msrb.mxu1 %v5347_v51  ;;  %v5198_v45 = vld [vmem:[%s14567_s4 + $0x630] sm:$0xff]  ;;  %v5389_v51 = vld [vmem:[%s14567_s4 + $0xc28] sm:$0xff] }
 0x8be   : >> { %5859 = vmatpush.msra.mxu0 %v5207_v33  ;;  %5890 = vmatpush.msrb.mxu3 %v5138_v20  ;;  %v5219_v33 = vld [vmem:[%s14567_s4 + $0x6d8] sm:$0xff]  ;;  %v5069_v20 = vld [vmem:[%s14567_s4 + $0x228] sm:$0xff] }
 0x8bf   : >> { %5939 = vmatpush.msra.mxu2 %v5368_v44  ;;  %6575 = vmatmul.msk.f32.vlgmr.msrb.gmra.mxu0 %vm3744_vm5, %v13113_v58  ;;  %v5188_v44 = vld [vmem:[%s14567_s4 + $0x5e0] sm:$0xff] }
 0x8c0   : >> { %5882 = vmatpush.msrb.mxu1 %v5337_v43  ;;  %5860 = vmatpush.msra.mxu0 %v5197_v6  ;;  %v5209_v43 = vld [vmem:[%s14567_s4 + $0x688] sm:$0xff]  ;;  %v5379_v6 = vld [vmem:[%s14567_s4 + $0xbd8] sm:$0xff] }
 0x8c1   : >> { %5891 = vmatpush.msrb.mxu3 %v5128_v10  ;;  %5940 = vmatpush.msra.mxu2 %v5358_v54  ;;  %v5178_v10 = vld [vmem:[%s14567_s4 + $0x590] sm:$0xff]  ;;  %v5059_v54 = vld [vmem:[%s14567_s4 + $0x1d8] sm:$0xff] }
 0x8c2   : >> { %5784 = vmatmul.f32.vlgmr.msra.gmra.mxu1 %v13175_v13  ;;  %5804 = vmatmul.f32.vlgmr.msra.gmra.mxu3 %v13198_v60 }
 0x8c3   : >> { %5844 = vmatmul.f32.vlgmr.msrb.gmra.mxu2 %v13175_v13  ;;  %5861 = vmatpush.msra.mxu0 %v5187_v46  ;;  %v5199_v46 = vld [vmem:[%s14567_s4 + $0x638] sm:$0xff] }
 0x8c4   : >> { %5883 = vmatpush.msrb.mxu1 %v5327_v3  ;;  %5892 = vmatpush.msrb.mxu3 %v5118_v12  ;;  %v5369_v3 = vld [vmem:[%s14567_s4 + $0xb88] sm:$0xff]  ;;  %v5168_v12 = vld [vmem:[%s14567_s4 + $0x540] sm:$0xff] }
 0x8c5   : >> { %5941 = vmatpush.msra.mxu2 %v5348_v8  ;;  %5862 = vmatpush.msra.mxu0 %v5177_v14  ;;  %v5049_v8 = vld [vmem:[%s14567_s4 + $0x188] sm:$0xff]  ;;  %v5359_v14 = vld [vmem:[%s14567_s4 + $0xb38] sm:$0xff] }
 0x8c6   : >> { %5908 = vmatpush.msra.mxu1 %v5318_v42  ;;  %5893 = vmatpush.msrb.mxu3 %v5108_v50  ;;  %v5189_v42 = vld [vmem:[%s14567_s4 + $0x5e8] sm:$0xff]  ;;  %v5039_v50 = vld [vmem:[%s14567_s4 + $0x138] sm:$0xff] }
 0x8c7   : >> { %5942 = vmatpush.msra.mxu2 %v5338_v59  ;;  %5863 = vmatpush.msra.mxu0 %v5167_v53  ;;  %v5179_v59 = vld [vmem:[%s14567_s4 + $0x598] sm:$0xff]  ;;  %v5029_v53 = vld [vmem:[%s14567_s4 + $0xe8] sm:$0xff] }
 0x8c8   : >> { %5909 = vmatpush.msra.mxu1 %v5308_v11  ;;  %5894 = vmatpush.msrb.mxu3 %v5098_v39  ;;  %v5349_v11 = vld [vmem:[%s14567_s4 + $0xae8] sm:$0xff] }
 0x8c9   : >> { %5943 = vmatpush.msra.mxu2 %v5328_v23  ;;  %5864 = vmatmul.f32.vlgmr.msra.gmra.mxu0 %v13198_v60  ;;  %v5169_v39 = vld [vmem:[%s14567_s4 + $0x548] sm:$0xff]  ;;  %v5339_v23 = vld [vmem:[%s14567_s4 + $0xa98] sm:$0xff] }
 0x8ca   : >> { %5910 = vmatpush.msra.mxu1 %v5298_v22  ;;  %5895 = vmatpush.msrb.mxu3 %v5088_v57  ;;  %v5019_v22 = vld [vmem:[%s14567_s4 + $0x98] sm:$0xff]  ;;  %v5009_v57 = vld [vmem:[%s14567_s4 + $0x48] sm:$0xff] }
 0x8cb   : >> { %5968 = vmatpush.msrb.mxu2 %v5319_v15  ;;  %6576 = vmatmul.msk.f32.vlgmr.msrb.gmra.mxu1 %vm3744_vm5, %v13113_v58  ;;  %v5329_v15 = vld [vmem:[%s14567_s4 + $0xa48] sm:$0xff] }
 0x8cc   : >> { %5948 = vmatpush.msrb.mxu0 %v5159_v38  ;;  %5911 = vmatpush.msra.mxu1 %v5288_v40  ;;  %v5425_v38 = vpop.f32.mrf.mxu0  ;;  %v5465_v40 = vpop.f32.mrf.mxu2 }
 0x8cd   : >> { %5969 = vmatpush.msrb.mxu2 %v5309_v29  ;;  %5896 = vmatpush.msrb.mxu3 %v5078_v18  ;;  %v5445_v18 = vpop.f32.mrf.mxu1 }
 0x8ce   : >> { %5949 = vmatpush.msrb.mxu0 %v5149_v56  ;;  %5912 = vmatpush.msra.mxu1 %v5278_v34  ;;  %v5485_v34 = vpop.f32.mrf.mxu3 }
 0x8cf   : >> { %5970 = vmatpush.msrb.mxu2 %v5299_v28  ;;  %5897 = vmatpush.msrb.mxu3 %v5068_v61 }
 0x8d0   : >> { %5950 = vmatpush.msrb.mxu0 %v5139_v4  ;;  %5913 = vmatpush.msra.mxu1 %v5268_v24 }
 0x8d1   : >> { %5971 = vmatpush.msrb.mxu2 %v5289_v36  ;;  %5898 = vmatpush.msrb.mxu3 %v5058_v48 }
 0x8d2   : >> { %5951 = vmatpush.msrb.mxu0 %v5129_v21  ;;  %5914 = vmatpush.msra.mxu1 %v5258_v55 }
 0x8d3   : >> { %5972 = vmatpush.msrb.mxu2 %v5279_v62  ;;  %5899 = vmatpush.msrb.mxu3 %v5048_v0 }
 0x8d4   : >> { %5952 = vmatpush.msrb.mxu0 %v5119_v32  ;;  %5915 = vmatpush.msra.mxu1 %v5248_v63  ;;  %v5525_v29 = vpop.f32.mrf.mxu0  ;;  %v5505_v28 = vpop.f32.mrf.mxu2 }
 0x8d5   : >> { %5973 = vmatpush.msrb.mxu2 %v5269_v9  ;;  %5900 = vmatpush.msrb.mxu3 %v5038_v17  ;;  %v5506_v17 = vadd.f32 %v5505_v28, %v5485_v34  ;;  %v6568_v28 = vld [vmem:[%s14186_s27 + $0x40] ss:$8 sm:$0x3] }
 0x8d6   : >> { %5953 = vmatpush.msrb.mxu0 %v5109_v19  ;;  %5916 = vmatpush.msra.mxu1 %v5238_v49 }
 0x8d7   : >> { %5974 = vmatpush.msrb.mxu2 %v5259_v2  ;;  %5901 = vmatpush.msrb.mxu3 %v5028_v35 }
 0x8d8   : >> { %5954 = vmatpush.msrb.mxu0 %v5099_v16  ;;  %5917 = vmatpush.msra.mxu1 %v5228_v30  ;;  %v5526_v16 = vadd.f32 %v5525_v29, %v5506_v17 }
 0x8d9   : >> { %5975 = vmatpush.msrb.mxu2 %v5249_v47  ;;  %5902 = vmatpush.msrb.mxu3 %v5018_v52 }
 0x8da   : >> { %5955 = vmatpush.msrb.mxu0 %v5089_v31  ;;  %5918 = vmatpush.msra.mxu1 %v5218_v1  ;;  %v5446_v31 = vadd.f32 %v5445_v18, %v5425_v38 }
 0x8db   : >> { %5976 = vmatpush.msrb.mxu2 %v5239_v37  ;;  %5903 = vmatpush.msrb.mxu3 %v5008_v7 }
 0x8dc   : >> { %5956 = vmatpush.msrb.mxu0 %v5079_v25  ;;  %5919 = vmatpush.msra.mxu1 %v5208_v5 }
 0x8dd   : >> { %5977 = vmatpush.msrb.mxu2 %v5229_v41  ;;  %5996 = vmatpush.msra.mxu3 %v5399_v26  ;;  %v6018_v26 = vrot.slane %v5526_v16, 7 }
 0x8de   : >> { %6577 = vmatmul.msk.f32.vlgmr.msra.gmra.mxu2 %vm3744_vm5, %v13113_v58  ;;  %5920 = vmatpush.msra.mxu1 %v5198_v45 }
 0x8df   : >> { %5978 = vmatpush.msrb.mxu2 %v5219_v33  ;;  %5997 = vmatpush.msra.mxu3 %v5389_v51 }
 0x8e0   : >> { %5957 = vmatpush.msrb.mxu0 %v5069_v20  ;;  %5904 = vmatmul.f32.vlgmr.msrb.gmra.mxu3 %v13175_v13 }
 0x8e1   : >> { %5921 = vmatpush.msra.mxu1 %v5188_v44  ;;  %5979 = vmatpush.msrb.mxu2 %v5209_v43  ;;  %v5585_v56 = vpop.f32.mrf.mxu0  ;;  %v4992_v44 = vld [vmem:[%s14186_s27] ss:$8 sm:$0xf] }
 0x8e2   : >> { %5998 = vmatpush.msra.mxu3 %v5379_v6  ;;  %5958 = vmatpush.msrb.mxu0 %v5059_v54  ;;  %v4993_v43 = vld [vmem:[%s14186_s27] ss:$8 sm:$0xf0]  ;;  %v5466_v6 = vadd.f32 %v5465_v40, %v5446_v31  ;;  %s6415_s27 = sshll.u32 (%p4978_p11), %s12918_s18, 4  ;;  %s6416_s27 = int_to_ptr.vmem [resolvable:$true] %s6415_s27 }
 0x8e3   : >> { %5922 = vmatpush.msra.mxu1 %v5178_v10  ;;  %5980 = vmatpush.msrb.mxu2 %v5199_v46 }
 0x8e4   : >> { %5999 = vmatpush.msra.mxu3 %v5369_v3  ;;  %5959 = vmatpush.msrb.mxu0 %v5049_v8  ;;  %v6027_v8 = vsel %vm6026_vm6, %v5466_v6, %v6018_v26 }
 0x8e5   : >> { %5923 = vmatpush.msra.mxu1 %v5168_v12  ;;  %5981 = vmatpush.msrb.mxu2 %v5189_v42  ;;  %v5545_v61 = vpop.f32.mrf.mxu1  ;;  %v4994_v12 = vor.u32 %v4993_v43, %v4992_v44 }
 0x8e6   : >> { %6000 = vmatpush.msra.mxu3 %v5359_v14  ;;  %5924 = vmatmul.f32.vlgmr.msra.gmra.mxu1 %v13198_v60 }
 0x8e7   : >> { %5960 = vmatpush.msrb.mxu0 %v5039_v50  ;;  %5982 = vmatpush.msrb.mxu2 %v5179_v59 }
 0x8e8   : >> { %6001 = vmatpush.msra.mxu3 %v5349_v11 }
 0x8e9   : >> { %5961 = vmatpush.msrb.mxu0 %v5029_v53  ;;  %5983 = vmatpush.msrb.mxu2 %v5169_v39 }
 0x8ea   : >> { %6002 = vmatpush.msra.mxu3 %v5339_v23  ;;  %5984 = vmatmul.f32.vlgmr.msrb.gmra.mxu2 %v13198_v60 }
 0x8eb   : >> { %5962 = vmatpush.msrb.mxu0 %v5019_v22 }
 0x8ec   : >> { %6003 = vmatpush.msra.mxu3 %v5329_v15 }
 0x8ed   : >> { %6578 = vmatmul.msk.f32.vlgmr.msra.gmra.mxu3 %vm3744_vm5, %v13113_v58  ;;  %5963 = vmatpush.msrb.mxu0 %v5009_v57  ;;  %v5565_v4 = vpop.f32.mrf.mxu3 }
 0x8ee   : >> { %5964 = vmatmul.f32.vlgmr.msrb.gmra.mxu0 %v13175_v13  ;;  %v5605_v24 = vpop.f32.mrf.mxu2  ;;  %v5566_v63 = vadd.f32 %v5565_v4, %v5545_v61 }
 0x8f0   : >> { %v5586_v49 = vadd.f32 %v5585_v56, %v5566_v63 }
 0x8f1   : >> { %v5625_v60 = vpop.f32.mrf.mxu0 }
 0x8f2   : >> { %v5645_v36 = vpop.f32.mrf.mxu1  ;;  %v5626_v9 = vadd.f32 %v5625_v60, %v5605_v24  ;;  %v6019_v7 = vrot.slane %v5586_v49, 6 }
 0x8f4   : >> { %v5646_v2 = vadd.f32 %v5645_v36, %v5626_v9 }
 0x8f6   : >> { %v6020_v25 = vrot.slane %v5646_v2, 5 }
 0x8f8   : >> { %v6029_v54 = vsel %vm6028_vm7, %v6019_v7, %v6020_v25 }
 0x8f9   : >> { %v6030_v50 = vsel %vm538_vm0, %v6027_v8, %v6029_v54  ;;  %vm6358_vm0 = vcmask (%p4978_p11), 261120  }
 0x910   : >> { %v5705_v48 = vpop.f32.mrf.mxu2 }
 0x912   : >> { %v5665_v21 = vpop.f32.mrf.mxu3 }
 0x917   : >> { %v5685_v55 = vpop.f32.mrf.mxu1 }
 0x918   : >> { %v5745_v13 = vpop.f32.mrf.mxu2  ;;  %v5686_v35 = vadd.f32 %v5685_v55, %v5665_v21 }
 0x91a   : >> { %v5725_v58 = vpop.f32.mrf.mxu0  ;;  %v5706_v5 = vadd.f32 %v5705_v48, %v5686_v35 }
 0x91b   : >> { %v5765_v0 = vpop.f32.mrf.mxu3  ;;  %v5746_v19 = vadd.f32 %v5745_v13, %v5725_v58 }
 0x91c   : >> { %v6021_v46 = vrot.slane %v5706_v5, 4 }
 0x91d   : >> { %v5766_v30 = vadd.f32 %v5765_v0, %v5746_v19 }
 0x91f   : >> { %v6022_v45 = vrot.slane %v5766_v30, 3 }
 0x921   : >> { %v6032_v42 = vsel %vm6031_vm8, %v6021_v46, %v6022_v45 }
 0x93c   : >> { %v5825_v62 = vpop.f32.mrf.mxu0 }
 0x93f   : >> { %v5785_v32 = vpop.f32.mrf.mxu1 }
 0x945   : >> { %v5805_v47 = vpop.f32.mrf.mxu3 }
 0x946   : >> { %v5845_v52 = vpop.f32.mrf.mxu2  ;;  %v5806_v1 = vadd.f32 %v5805_v47, %v5785_v32  ;;  %v5865_v37 = vpop.f32.mrf.mxu0 }
 0x947   : >> { %v5866_v41 = vadd.f32 %v5865_v37, %v5845_v52 }
 0x948   : >> { %v5826_v33 = vadd.f32 %v5825_v62, %v5806_v1  ;;  %v5885_v51 = vpop.f32.mrf.mxu1 }
 0x949   : >> { %v5886_v20 = vadd.f32 %v5885_v51, %v5866_v41 }
 0x94a   : >> { %v6023_v10 = vrot.slane %v5826_v33, 2 }
 0x94b   : >> { %v6024_v3 = vrot.slane %v5886_v20, 1 }
 0x94d   : >> { %v6034_v14 = vsel %vm6033_vm9, %v6023_v10, %v6024_v3 }
 0x94e   : >> { %v6036_v59 = vsel %vm6035_vm10, %v6032_v42, %v6034_v14 }
 0x94f   : >> { %v6038_v11 = vsel %vm6037_vm11, %v6030_v50, %v6036_v59 }
 0x950   : >> { %v14192_v53 = vadd.f32 %v6038_v11, %v4994_v12 }
 0x952   : >> { %6063 = vrot.lane.b32.xlu0 %v14192_v53, %s6770_s29  ;;  %v6044_v58 = vsub.f32 0.0, %v14192_v53  ;;  %v6087_v41 = vrot.slane %v14192_v53, 5 }
 0x954   : >> { %v6045_v62 = vmul.f32 1.442695, %v6044_v58  ;;  %v6150_v58 = vld [vmem:[%s14569_s6 + $0xe8] sm:$0xff] (%p4978_p11) }
 0x961   : >> { %v5945_v39 = vpop.f32.mrf.mxu2 }
 0x963   : >> { %v5905_v23 = vpop.f32.mrf.mxu3  ;;  %v5925_v22 = vpop.f32.mrf.mxu1 }
 0x964   : >> { %v5926_v38 = vadd.f32 %v5925_v22, %v5905_v23 }
 0x966   : >> { %v5946_v56 = vadd.f32 %v5945_v39, %v5926_v38 }
 0x96b   : >> { %v5965_v15 = vpop.f32.mrf.mxu0 }
 0x96d   : >> { %v5985_v57 = vpop.f32.mrf.mxu2 }
 0x96e   : >> { %v5986_v40 = vadd.f32 %v5985_v57, %v5965_v15 }
 0x970   : >> { %v6005_v29 = vpop.f32.mrf.mxu3 }
 0x971   : >> { %v6006_v18 = vadd.f32 %v6005_v29, %v5986_v40 }
 0x973   : >> { %v6025_v34 = vrot.slane %v6006_v18, 7  ;;  %v6199_v18 = vld [vmem:[%s14569_s6 + $0x270] sm:$0xff] (%p4978_p11) }
 0x974   : > { %6263 = vmatpush.msra.mxu2 (%p4978_p11), %v6199_v18  ;;  %v6166_v18 = vld [vmem:[%s14569_s6 + $0x168] sm:$0xff] (%p4978_p11) }
 0x975   : >> { %v6039_v61 = vsel %vm6026_vm6, %v5946_v56, %v6025_v34  ;;  %v6197_v56 = vld [vmem:[%s14569_s6 + $0x260] sm:$0xff] (%p4978_p11)  ;;  %v6151_v34 = vld [vmem:[%s14569_s6 + $0xf0] sm:$0xff] (%p4978_p11) }
 0x976   : >> { %v6043_v4 = vadd.f32 %v6568_v28, %v6039_v61  ;;  %v6195_v28 = vld [vmem:[%s14569_s6 + $0x250] sm:$0xff] (%p4978_p11)  ;;  %6215 = vmatpush.msra.mxu0 (%p4978_p11), %v6151_v34  ;;  %6264 = vmatpush.msra.mxu2 (%p4978_p11), %v6197_v56  ;;  %v6200_v56 = vld [vmem:[%s14569_s6 + $0x278] sm:$0xff] (%p4978_p11) }
 0x977   : > { %v6183_v61 = vld [vmem:[%s14569_s6 + $0x1f0] sm:$0xff] (%p4978_p11) }
 0x978   : >> { %6091 = vrot.lane.b32.xlu0 %v6043_v4, %s6770_s29  ;;  %6235 = vmatpush.msra.mxu1 (%p4978_p11), %v6183_v61  ;;  %v6147_v4 = vld [vmem:[%s14569_s6 + $0xd0] sm:$0xff] (%p4978_p11)  ;;  %v6124_v61 = vld [vmem:[%s14569_s6 + $0x18] sm:$0xff] (%p4978_p11)  ;;  %s6417_s29 = sshll.u32 (%p4978_p11), %s6413_s26, 4  ;;  %s6418_s29 = int_to_ptr.hbm [resolvable:$true] %s6417_s29 }
 0x979   : > { %6265 = vmatpush.msra.mxu2 (%p4978_p11), %v6195_v28  ;;  %v6153_v28 = vld [vmem:[%s14569_s6 + $0x100] sm:$0xff] (%p4978_p11)  ;;  %s6695_s30 = sshra.s32 (%p4978_p11), %s6418_s29, 4  ;;  %s6696_s30 = int_to_ptr.hbm [resolvable:$true] %s6695_s30 }
 0x97a   : > { %s6697_s17 = scalar_lea.hbm (%p4978_p11), %s6696_s30, 1  ;;  %p6702_p1 = scmp.lt.s32.totalorder (%p4978_p11), %s6696_s30, %s14573_s10 }
 0x97b   : > { %p6698_p12 = scmp.ne.s32.totalorder (%p4978_p11), %s6696_s30, %s6697_s17  ;;  %p6703_p2 = scmp.lt.s32.totalorder (%p4978_p11), %s6701_s25, %s6697_s17 }
 0x97d   : > { %p6699_p13 = pnand (%p4978_p11), %p6698_p12, %p6864_p5  ;;  %p6704_p3 = por (%p4978_p11), %p6703_p2, %p6702_p1 }
 0x97f   : > { %p6700_p0 = pneg (%p4978_p11), %p6699_p13 }
 0x981   : > { %p6705_p4 = pnand (%p4978_p11), %p6704_p3, %p6700_p0 }
 0x9c4   : >> { %v6064_v24 = vpop.permute.xlu0 %6063 }
 0x9c5   : >> { %v6065_v60 = vrot.slane %v6064_v24, 2  ;;  %v6066_v36 = vrot.slane %v6064_v24, 3  ;;  %v6093_v35 = vrot.slane %v6064_v24, 7  ;;  %v6181_v24 = vld [vmem:[%s14569_s6 + $0x1e0] sm:$0xff] (%p4978_p11) }
 0x9c6   : > { %6236 = vmatpush.msra.mxu1 (%p4978_p11), %v6181_v24  ;;  %v6198_v24 = vld [vmem:[%s14569_s6 + $0x268] sm:$0xff] (%p4978_p11) }
 0x9c7   : >> { %v6067_v48 = vsel %vm3744_vm5, %v6065_v60, %v6066_v36  ;;  %v6193_v60 = vld [vmem:[%s14569_s6 + $0x240] sm:$0xff] (%p4978_p11)  ;;  %v6152_v36 = vld [vmem:[%s14569_s6 + $0xf8] sm:$0xff] (%p4978_p11) }
 0x9c8   : >> { %v6069_v21 = vsub.f32 0.0, %v6067_v48  ;;  %v6145_v48 = vld [vmem:[%s14569_s6 + $0xc0] sm:$0xff] (%p4978_p11)  ;;  %6275 = vmatpush.msra.mxu3 (%p4978_p11), %v6152_v36  ;;  %6266 = vmatpush.msra.mxu2 (%p4978_p11), %v6193_v60  ;;  %v6162_v60 = vld [vmem:[%s14569_s6 + $0x148] sm:$0xff] (%p4978_p11) }
 0x9c9   : > { %v6122_v36 = vld [vmem:[%s14569_s6 + $0x8] sm:$0xff] (%p4978_p11) }
 0x9ca   : >> { %v6070_v55 = vmul.f32 1.442695, %v6069_v21  ;;  %v6179_v21 = vld [vmem:[%s14569_s6 + $0x1d0] sm:$0xff] (%p4978_p11)  ;;  %6276 = vmatpush.msra.mxu3 (%p4978_p11), %v6150_v58  ;;  %v6352_v58 = vld [vmem:[%s14571_s8 + $0x78] sm:$0xff] (%p4978_p11) }
 0x9cb   : > { %6237 = vmatpush.msra.mxu1 (%p4978_p11), %v6179_v21  ;;  %v6160_v21 = vld [vmem:[%s14569_s6 + $0x138] sm:$0xff] (%p4978_p11) }
 0x9cc   : >> { %6665 = vpow2.f32 %v6070_v55  ;;  %v6191_v55 = vld [vmem:[%s14569_s6 + $0x230] sm:$0xff] (%p4978_p11) }
 0x9cd   : >> { %6667 = vpow2.f32 %v6045_v62  ;;  %v6177_v62 = vld [vmem:[%s14569_s6 + $0x1c0] sm:$0xff] (%p4978_p11)  ;;  %6267 = vmatpush.msra.mxu2 (%p4978_p11), %v6191_v55  ;;  %v6194_v55 = vld [vmem:[%s14569_s6 + $0x248] sm:$0xff] (%p4978_p11) }
 0x9ce   : > { %6238 = vmatpush.msra.mxu1 (%p4978_p11), %v6177_v62  ;;  %v6158_v62 = vld [vmem:[%s14569_s6 + $0x128] sm:$0xff] (%p4978_p11) }
 0x9d2   : >> { %v6666_v13 = vpop.eup %6665 }
 0x9d3   : >> { %v6668_v0 = vpop.eup %6667  ;;  %v6072_v32 = vadd.f32 1.0, %v6666_v13  ;;  %v6143_v13 = vld [vmem:[%s14569_s6 + $0xb0] sm:$0xff] (%p4978_p11) }
 0x9d4   : >> { %v6047_v63 = vadd.f32 1.0, %v6668_v0  ;;  %v6148_v0 = vld [vmem:[%s14569_s6 + $0xd8] sm:$0xff] (%p4978_p11) }
 0x9d5   : >> { %6669 = vrcp.f32 %v6072_v32  ;;  %v6084_v26 = vand.u32 2147483648, %v6072_v32  ;;  %vm6078_vm14 = vweird.f32 %v6072_v32  ;;  %v6082_v33 = vand.u32 2147483647, %v6072_v32  ;;  %6277 = vmatpush.msra.mxu3 (%p4978_p11), %v6148_v0  ;;  %v6192_v0 = vld [vmem:[%s14569_s6 + $0x238] sm:$0xff] (%p4978_p11) }
 0x9d6   : >> { %6671 = vrcp.f32 %v6047_v63  ;;  %v6059_v51 = vand.u32 2147483648, %v6047_v63  ;;  %vm6053_vm1 = vweird.f32 %v6047_v63  ;;  %v6057_v20 = vand.u32 2147483647, %v6047_v63 }
 0x9d7   : >> { %v6085_v6 = vor.u32 1.1754944e-38, %v6084_v26  ;;  %vm6083_vm3 = vcmp.eq.f32.partialorder %v6082_v33, 8.507059e+37  ;;  %v6133_v26 = vld [vmem:[%s14569_s6 + $0x60] sm:$0xff] (%p4978_p11) }
 0x9d8   : >> { %v6060_v46 = vor.u32 1.1754944e-38, %v6059_v51  ;;  %vm6058_vm4 = vcmp.eq.f32.partialorder %v6057_v20, 8.507059e+37  ;;  %v6165_v33 = vld [vmem:[%s14569_s6 + $0x160] sm:$0xff] (%p4978_p11)  ;;  %v6178_v51 = vld [vmem:[%s14569_s6 + $0x1c8] sm:$0xff] (%p4978_p11)  ;;  %v6131_v20 = vld [vmem:[%s14569_s6 + $0x50] sm:$0xff] (%p4978_p11) }
 0x9db   : >> { %v6670_v9 = vpop.eup %6669 }
 0x9dc   : >> { %v6672_v17 = vpop.eup %6671  ;;  %v6074_v19 = vmul.f32 %v6670_v9, %v6072_v32  ;;  %vm6079_vm12 = vweird.f32 %v6670_v9  ;;  %v6189_v32 = vld [vmem:[%s14569_s6 + $0x220] sm:$0xff] (%p4978_p11) }
 0x9dd   : >> { %v6049_v49 = vmul.f32 %v6672_v17, %v6047_v63  ;;  %vm6054_vm13 = vweird.f32 %v6672_v17  ;;  %vm6080_vm15 = vmor %vm6078_vm14, %vm6079_vm12  ;;  %v6175_v63 = vld [vmem:[%s14569_s6 + $0x1b0] sm:$0xff] (%p4978_p11)  ;;  %6268 = vmatpush.msra.mxu2 (%p4978_p11), %v6189_v32  ;;  %v6156_v32 = vld [vmem:[%s14569_s6 + $0x118] sm:$0xff] (%p4978_p11) }
 0x9de   : >> { %v6075_v30 = vsub.f32 1.0, %v6074_v19  ;;  %vm6055_vm2 = vmor %vm6053_vm1, %vm6054_vm13  ;;  %v6187_v19 = vld [vmem:[%s14569_s6 + $0x210] sm:$0xff] (%p4978_p11)  ;;  %6239 = vmatpush.msra.mxu1 (%p4978_p11), %v6175_v63  ;;  %v6350_v63 = vld [vmem:[%s14571_s8 + $0x68] sm:$0xff] (%p4978_p11) }
 0x9df   : >> { %v6050_v52 = vsub.f32 1.0, %v6049_v49  ;;  %v6173_v49 = vld [vmem:[%s14569_s6 + $0x1a0] sm:$0xff] (%p4978_p11)  ;;  %6269 = vmatpush.msra.mxu2 (%p4978_p11), %v6187_v19 }
 0x9e0   : >> { %v6076_v37 = vmul.f32 %v6670_v9, %v6075_v30  ;;  %v6171_v30 = vld [vmem:[%s14569_s6 + $0x190] sm:$0xff] (%p4978_p11)  ;;  %6240 = vmatpush.msra.mxu1 (%p4978_p11), %v6173_v49  ;;  %v6349_v19 = vld [vmem:[%s14571_s8 + $0x60] sm:$0xff] (%p4978_p11)  ;;  %v6188_v49 = vld [vmem:[%s14569_s6 + $0x218] sm:$0xff] (%p4978_p11) }
 0x9e1   : >> { %v6051_v25 = vmul.f32 %v6672_v17, %v6050_v52  ;;  %v6137_v52 = vld [vmem:[%s14569_s6 + $0x80] sm:$0xff] (%p4978_p11) }
 0x9e2   : >> { %v6077_v5 = vadd.f32 %v6670_v9, %v6076_v37  ;;  %v6182_v37 = vld [vmem:[%s14569_s6 + $0x1e8] sm:$0xff] (%p4978_p11)  ;;  %6241 = vmatpush.msra.mxu1 (%p4978_p11), %v6171_v30 }
 0x9e3   : >> { %v6052_v45 = vadd.f32 %v6672_v17, %v6051_v25  ;;  %v6140_v25 = vld [vmem:[%s14569_s6 + $0x98] sm:$0xff] (%p4978_p11)  ;;  %v6346_v30 = vld [vmem:[%s14571_s8 + $0x48] sm:$0xff] (%p4978_p11) }
 0x9e4   : >> { %v6081_v44 = vsel %vm6080_vm15, %v6670_v9, %v6077_v5  ;;  %v6141_v9 = vld [vmem:[%s14569_s6 + $0xa0] sm:$0xff] (%p4978_p11)  ;;  %v6167_v5 = vld [vmem:[%s14569_s6 + $0x170] sm:$0xff] (%p4978_p11) }
 0x9e5   : >> { %v6056_v10 = vsel %vm6055_vm2, %v6672_v17, %v6052_v45  ;;  %v6086_v3 = vsel %vm6083_vm3, %v6085_v6, %v6081_v44  ;;  %v6146_v17 = vld [vmem:[%s14569_s6 + $0xc8] sm:$0xff] (%p4978_p11)  ;;  %v6136_v44 = vld [vmem:[%s14569_s6 + $0x78] sm:$0xff] (%p4978_p11) }
 0x9e6   : >> { %v6061_v12 = vsel %vm6058_vm4, %v6060_v46, %v6056_v10  ;;  %v6116_v8 = vmul.f32 %v6759_v27, %v6086_v3  ;;  %6278 = vmatpush.msra.mxu3 (%p4978_p11), %v6146_v17  ;;  %v6138_v45 = vld [vmem:[%s14569_s6 + $0x88] sm:$0xff] (%p4978_p11)  ;;  %v6176_v6 = vld [vmem:[%s14569_s6 + $0x1b8] sm:$0xff] (%p4978_p11)  ;;  %v6129_v10 = vld [vmem:[%s14569_s6 + $0x40] sm:$0xff] (%p4978_p11) }
 0x9e7   : > { %v6161_v46 = vld [vmem:[%s14569_s6 + $0x140] sm:$0xff] (%p4978_p11)  ;;  %v6174_v3 = vld [vmem:[%s14569_s6 + $0x1a8] sm:$0xff] (%p4978_p11) }
 0x9e8   : > { %v6154_v17 = vld [vmem:[%s14569_s6 + $0x108] sm:$0xff] (%p4978_p11) }
 0x9ea   : >> { %v6092_v2 = vpop.permute.xlu0 %6091 }
 0x9eb   : >> { %v6094_v16 = vrot.slane %v6092_v2, 7 }
 0x9ed   : >> { %v6095_v47 = vsel %vm6026_vm6, %v6093_v35, %v6094_v16  ;;  %v6144_v35 = vld [vmem:[%s14569_s6 + $0xb8] sm:$0xff] (%p4978_p11)  ;;  %v6185_v16 = vld [vmem:[%s14569_s6 + $0x200] sm:$0xff] (%p4978_p11) }
 0x9ee   : >> { %v6096_v31 = vsel %vm3744_vm5, %v6095_v47, %v6092_v2  ;;  %v6139_v2 = vld [vmem:[%s14569_s6 + $0x90] sm:$0xff] (%p4978_p11)  ;;  %v6184_v47 = vld [vmem:[%s14569_s6 + $0x1f8] sm:$0xff] (%p4978_p11)  ;;  %6279 = vmatpush.msra.mxu3 (%p4978_p11), %v6144_v35  ;;  %6270 = vmatpush.msra.mxu2 (%p4978_p11), %v6185_v16  ;;  %v6186_v35 = vld [vmem:[%s14569_s6 + $0x208] sm:$0xff] (%p4978_p11) }
 0x9ef   : >> { %v6098_v1 = vsub.f32 0.0, %v6096_v31  ;;  %v6142_v31 = vld [vmem:[%s14569_s6 + $0xa8] sm:$0xff] (%p4978_p11)  ;;  %v6347_v16 = vld [vmem:[%s14571_s8 + $0x50] sm:$0xff] (%p4978_p11) }
 0x9f0   : > { %6295 = vmatpush.msrb.mxu2 (%p4978_p11), %v6184_v47  ;;  %6280 = vmatpush.msra.mxu3 (%p4978_p11), %v6142_v31  ;;  %v6345_v47 = vld [vmem:[%s14571_s8 + $0x40] sm:$0xff] (%p4978_p11)  ;;  %v6343_v31 = vld [vmem:[%s14571_s8 + $0x30] sm:$0xff] (%p4978_p11) }
 0x9f1   : >> { %v6099_v7 = vmul.f32 1.442695, %v6098_v1  ;;  %v6169_v1 = vld [vmem:[%s14569_s6 + $0x180] sm:$0xff] (%p4978_p11) }
 0x9f2   : > { %6242 = vmatpush.msra.mxu1 (%p4978_p11), %v6169_v1  ;;  %6296 = vmatpush.msrb.mxu2 (%p4978_p11), %v6182_v37  ;;  %v6341_v1 = vld [vmem:[%s14571_s8 + $0x20] sm:$0xff] (%p4978_p11)  ;;  %v6340_v37 = vld [vmem:[%s14571_s8 + $0x18] sm:$0xff] (%p4978_p11) }
 0x9f3   : >> { %6673 = vpow2.f32 %v6099_v7  ;;  %v6135_v7 = vld [vmem:[%s14569_s6 + $0x70] sm:$0xff] (%p4978_p11)  ;;  %6281 = vmatpush.msra.mxu3 (%p4978_p11), %v6140_v25  ;;  %v6338_v25 = vld [vmem:[%s14571_s8 + $0x8] sm:$0xff] (%p4978_p11) }
 0x9f4   : >> { %6675 = vtanh.f32 %v6087_v41  ;;  %v6180_v41 = vld [vmem:[%s14569_s6 + $0x1d8] sm:$0xff] (%p4978_p11)  ;;  %6243 = vmatpush.msra.mxu1 (%p4978_p11), %v6167_v5  ;;  %v6337_v5 = vld [vmem:[%s14571_s8] sm:$0xff] (%p4978_p11) }
 0x9f5   : > { %6297 = vmatpush.msrb.mxu2 (%p4978_p11), %v6180_v41  ;;  %6282 = vmatpush.msra.mxu3 (%p4978_p11), %v6138_v45  ;;  %v6356_v41 = vld [vmem:[%s14571_s8 + $0x98] sm:$0xff] (%p4978_p11)  ;;  %v6354_v45 = vld [vmem:[%s14571_s8 + $0x88] sm:$0xff] (%p4978_p11) }
 0x9f6   : > { %6244 = vmatpush.msra.mxu1 (%p4978_p11), %v6165_v33  ;;  %v6353_v33 = vld [vmem:[%s14571_s8 + $0x80] sm:$0xff] (%p4978_p11) }
 0x9f7   : > { %6298 = vmatpush.msrb.mxu2 (%p4978_p11), %v6178_v51  ;;  %6283 = vmatpush.msra.mxu3 (%p4978_p11), %v6136_v44  ;;  %v6201_v51 = vld [vmem:[%s14570_s7] sm:$0x3] (%p4978_p11) }
 0x9f9   : >> { %v6674_v43 = vpop.eup %6673  ;;  %6299 = vmatpush.msrb.mxu2 (%p4978_p11), %v6176_v6 }
 0x9fa   : >> { %v6101_v54 = vadd.f32 1.0, %v6674_v43  ;;  %v6676_v42 = vpop.eup %6675  ;;  %v6163_v43 = vld [vmem:[%s14569_s6 + $0x150] sm:$0xff] (%p4978_p11) }
 0x9fb   : >> { %v6117_v14 = vmul.f32 %v6676_v42, %v6061_v12  ;;  %6245 = vmatpush.msra.mxu1 (%p4978_p11), %v6163_v43  ;;  %v6159_v42 = vld [vmem:[%s14569_s6 + $0x130] sm:$0xff] (%p4978_p11)  ;;  %6300 = vmatpush.msrb.mxu2 (%p4978_p11), %v6174_v3 }
 0x9fc   : >> { %6677 = vrcp.f32 %v6101_v54  ;;  %v6113_v53 = vand.u32 2147483648, %v6101_v54  ;;  %v6111_v23 = vand.u32 2147483647, %v6101_v54  ;;  %vm6107_vm7 = vweird.f32 %v6101_v54 }
 0x9fd   : >> { %v6118_v27 = vadd.f32 %v6117_v14, %v6116_v8   ;;  %v6132_v8 = vld [vmem:[%s14569_s6 + $0x58] sm:$0xff] (%p4978_p11)  ;;  %6246 = vmatpush.msra.mxu1 (%p4978_p11), %v6161_v46 }
 0x9fe   : >> { %v6114_v15 = vor.u32 1.1754944e-38, %v6113_v53  ;;  %vm6112_vm9 = vcmp.eq.f32.partialorder %v6111_v23, 8.507059e+37  ;;  %v6172_v14 = vld [vmem:[%s14569_s6 + $0x198] sm:$0xff] (%p4978_p11)  ;;  %v6170_v53 = vld [vmem:[%s14569_s6 + $0x188] sm:$0xff] (%p4978_p11) }
 0x9ff   : >> { %6679 = vtanh.f32 %v6118_v27  ;;  %v6149_v27 = vld [vmem:[%s14569_s6 + $0xe0] sm:$0xff] (%p4978_p11)  ;;  %6247 = vmatpush.msra.mxu1 (%p4978_p11), %v6159_v42  ;;  %6301 = vmatpush.msrb.mxu2 (%p4978_p11), %v6172_v14 }
 0xa00   : > { %6216 = vmatpush.msra.mxu0 (%p4978_p11), %v6149_v27  ;;  %v6164_v27 = vld [vmem:[%s14569_s6 + $0x158] sm:$0xff] (%p4978_p11) }
 0xa01   : > { %6302 = vmatpush.msrb.mxu2 (%p4978_p11), %v6170_v53 }
 0xa02   : >> { %v6678_v50 = vpop.eup %6677  ;;  %6217 = vmatpush.msra.mxu0 (%p4978_p11), %v6147_v4 }
 0xa03   : >> { %v6103_v59 = vmul.f32 %v6678_v50, %v6101_v54  ;;  %vm6108_vm6 = vweird.f32 %v6678_v50  ;;  %v6134_v54 = vld [vmem:[%s14569_s6 + $0x68] sm:$0xff] (%p4978_p11) }
 0xa04   : >> { %vm6109_vm8 = vmor %vm6107_vm7, %vm6108_vm6  ;;  %6218 = vmatpush.msra.mxu0 (%p4978_p11), %v6145_v48  ;;  %6284 = vmatpush.msra.mxu3 (%p4978_p11), %v6134_v54  ;;  %v6196_v48 = vld [vmem:[%s14569_s6 + $0x258] sm:$0xff] (%p4978_p11) }
 0xa05   : >> { %v6104_v11 = vsub.f32 1.0, %v6103_v59  ;;  %v6680_v38 = vpop.eup %6679  ;;  %v6130_v59 = vld [vmem:[%s14569_s6 + $0x48] sm:$0xff] (%p4978_p11) }
 0xa06   : > { %6219 = vmatpush.msra.mxu0 (%p4978_p11), %v6143_v13  ;;  %6285 = vmatpush.msra.mxu3 (%p4978_p11), %v6132_v8  ;;  %v6351_v13 = vld [vmem:[%s14571_s8 + $0x70] sm:$0xff] (%p4978_p11) }
 0xa07   : >> { %v6105_v39 = vmul.f32 %v6678_v50, %v6104_v11  ;;  %v6157_v11 = vld [vmem:[%s14569_s6 + $0x120] sm:$0xff] (%p4978_p11) }
 0xa08   : > { %6220 = vmatpush.msra.mxu0 (%p4978_p11), %v6141_v9  ;;  %6286 = vmatpush.msra.mxu3 (%p4978_p11), %v6130_v59  ;;  %v6190_v9 = vld [vmem:[%s14569_s6 + $0x228] sm:$0xff] (%p4978_p11) }
 0xa09   : >> { %v6106_v22 = vadd.f32 %v6678_v50, %v6105_v39  ;;  %v6123_v39 = vld [vmem:[%s14569_s6 + $0x10] sm:$0xff] (%p4978_p11)  ;;  %6248 = vmatpush.msra.mxu1 (%p4978_p11), %v6157_v11 }
 0xa0a   : > { %6221 = vmatpush.msra.mxu0 (%p4978_p11), %v6139_v2  ;;  %v6348_v2 = vld [vmem:[%s14571_s8 + $0x58] sm:$0xff] (%p4978_p11) }
 0xa0b   : >> { %v6110_v57 = vsel %vm6109_vm8, %v6678_v50, %v6106_v22  ;;  %v6125_v50 = vld [vmem:[%s14569_s6 + $0x20] sm:$0xff] (%p4978_p11)  ;;  %v6128_v22 = vld [vmem:[%s14569_s6 + $0x38] sm:$0xff] (%p4978_p11) }
 0xa0c   : >> { %v6115_v40 = vsel %vm6112_vm9, %v6114_v15, %v6110_v57  ;;  %4980 = sbr.rel (!%p4978_p11) target bundleno = 2068 (0x814), region = 104  ;;  %6222 = vmatpush.msra.mxu0 (%p4978_p11), %v6137_v52  ;;  %v6168_v15 = vld [vmem:[%s14569_s6 + $0x178] sm:$0xff] (%p4978_p11)  ;;  %v6121_v57 = vld [vmem:[%s14569_s6] sm:$0xff] (%p4978_p11)  ;;  %6287 = vmatpush.msra.mxu3 (%p4978_p11), %v6128_v22 }
 0xa0d   : >> { %v14203_v12 = vmul.f32 %v6680_v38, %v6115_v40   ;;  %v6155_v38 = vld [vmem:[%s14569_s6 + $0x110] sm:$0xff] (%p4978_p11)  ;;  %v6126_v40 = vld [vmem:[%s14569_s6 + $0x28] sm:$0xff] (%p4978_p11)  ;;  %6303 = vmatpush.msrb.mxu2 (%p4978_p11), %v6168_v15  ;;  %v6344_v52 = vld [vmem:[%s14571_s8 + $0x38] sm:$0xff] (%p4978_p11) }
 0xa0e   : > { %6223 = vmatpush.msra.mxu0 (%p4978_p11), %v6135_v7  ;;  %6249 = vmatpush.msra.mxu1 (%p4978_p11), %v6155_v38  ;;  %v6339_v7 = vld [vmem:[%s14571_s8 + $0x10] sm:$0xff] (%p4978_p11) }
 0xa0f   : >> { %v15207_v29 = vmov %v14203_v12  ;;  %6288 = vmatpush.msra.mxu3 (%p4978_p11), %v6126_v40  ;;  %6304 = vmatpush.msrb.mxu2 (%p4978_p11), %v6166_v18 }
 0xa10   : >> { %v15208_v12 = vmov %v15207_v29  ;;  %6224 = vmatpush.msra.mxu0 (%p4978_p11), %v6133_v26  ;;  %v6205_v23 = vperm.slane (%p4978_p11), %v15207_v29, 2  ;;  %v6203_v34 = vperm.slane (%p4978_p11), %v15207_v29, 0  ;;  %v6204_v4 = vperm.slane (%p4978_p11), %v15207_v29, 1  ;;  %6250 = vmatpush.msra.mxu1 (%p4978_p11), %v6153_v28  ;;  %v6342_v29 = vld [vmem:[%s14571_s8 + $0x28] sm:$0xff] (%p4978_p11)  ;;  %v6355_v26 = vld [vmem:[%s14571_s8 + $0x90] sm:$0xff] (%p4978_p11) }
 0xa11   : > { %v6127_v12 = vld [vmem:[%s14569_s6 + $0x30] sm:$0xff]  ;;  %6305 = vmatpush.msrb.mxu2 %v6164_v27  ;;  %6289 = vmatpush.msra.mxu3 %v6124_v61 }
 0xa12   : > { %6225 = vmatpush.msra.mxu0 %v6131_v20  ;;  %6579 = vmatmul.msk.f32.vlgmr.msra.gmra.mxu2 %vm3744_vm5, %v6205_v23  ;;  %v6209_v20 = vperm.slane %v6201_v51, 0 }
 0xa13   : > { %6251 = vmatmul.f32.vlgmr.msra.gmra.mxu1 %v6204_v4  ;;  %6306 = vmatpush.msrb.mxu2 %v6162_v60 }
 0xa14   : > { %6226 = vmatpush.msra.mxu0 %v6129_v10  ;;  %6290 = vmatpush.msra.mxu3 %v6122_v36 }
 0xa15   : > { %6291 = vmatmul.f32.vlgmr.msra.gmra.mxu3 %v6203_v34  ;;  %6307 = vmatpush.msrb.mxu2 %v6160_v21 }
 0xa16   : > { %6227 = vmatpush.msra.mxu0 %v6127_v12  ;;  %6362 = vmatpush.msrb.mxu1 %v6352_v58  ;;  %v6210_v12 = vperm.slane %v6201_v51, 1 }
 0xa17   : > { %6308 = vmatpush.msrb.mxu2 %v6158_v62  ;;  %6394 = vmatpush.msrb.mxu3 %v6356_v41 }
 0xa18   : > { %6228 = vmatpush.msra.mxu0 %v6125_v50  ;;  %6363 = vmatpush.msrb.mxu1 %v6351_v13 }
 0xa19   : > { %6309 = vmatpush.msrb.mxu2 %v6156_v32  ;;  %6395 = vmatpush.msrb.mxu3 %v6355_v26 }
 0xa1a   : > { %6229 = vmatpush.msra.mxu0 %v6123_v39  ;;  %6364 = vmatpush.msrb.mxu1 %v6350_v63  ;;  %v6357_v39 = vld [vmem:[%s14572_s9] sm:$0x1] }
 0xa1b   : > { %6310 = vmatpush.msrb.mxu2 %v6154_v17  ;;  %6396 = vmatpush.msrb.mxu3 %v6354_v45 }
 0xa1c   : > { %6230 = vmatpush.msra.mxu0 %v6121_v57  ;;  %6365 = vmatpush.msrb.mxu1 %v6349_v19 }
 0xa1d   : > { %6231 = vmatmul.f32.vlgmr.msra.gmra.mxu0 %v6203_v34  ;;  %6311 = vmatmul.f32.vlgmr.msrb.gmra.mxu2 %v6204_v4 }
 0xa1e   : > { %6323 = vmatpush.msrb.mxu0 %v6200_v56  ;;  %6366 = vmatpush.msrb.mxu1 %v6348_v2 }
 0xa1f   : > { %6397 = vmatpush.msrb.mxu3 %v6353_v33 }
 0xa20   : > { %6324 = vmatpush.msrb.mxu0 %v6198_v24  ;;  %6367 = vmatpush.msrb.mxu1 %v6347_v16 }
 0xa22   : > { %6325 = vmatpush.msrb.mxu0 %v6196_v48  ;;  %6368 = vmatpush.msrb.mxu1 %v6346_v30 }
 0xa24   : > { %6326 = vmatpush.msrb.mxu0 %v6194_v55  ;;  %6369 = vmatpush.msrb.mxu1 %v6345_v47 }
 0xa26   : > { %6327 = vmatpush.msrb.mxu0 %v6192_v0  ;;  %6370 = vmatpush.msrb.mxu1 %v6344_v52 }
 0xa28   : > { %6328 = vmatpush.msrb.mxu0 %v6190_v9  ;;  %6371 = vmatpush.msrb.mxu1 %v6343_v31 }
 0xa2a   : > { %6329 = vmatpush.msrb.mxu0 %v6188_v49  ;;  %6372 = vmatpush.msrb.mxu1 %v6342_v29 }
 0xa2c   : > { %6330 = vmatpush.msrb.mxu0 %v6186_v35  ;;  %6373 = vmatpush.msrb.mxu1 %v6341_v1 }
 0xa2d   : > { %6580 = vmatmul.msk.f32.vlgmr.msrb.gmra.mxu0 %vm3744_vm5, %v6205_v23  ;;  %vm6402_vm5 = vcmask 507904  }
 0xa2e   : > { %6374 = vmatpush.msrb.mxu1 %v6340_v37 }
 0xa30   : > { %6375 = vmatpush.msrb.mxu1 %v6339_v7 }
 0xa32   : > { %6376 = vmatpush.msrb.mxu1 %v6338_v25 }
 0xa34   : > { %6377 = vmatpush.msrb.mxu1 %v6337_v5 }
 0xa90   : > { %v6252_v6 = vpop.f32.mrf.mxu1 }
 0xa95   : > { %v6272_v10 = vpop.f32.mrf.mxu2 }
 0xa98   : > { %v6292_v8 = vpop.f32.mrf.mxu3 }
 0xa99   : > { %v6293_v42 = vadd.f32 %v6292_v8, %v6210_v12 }
 0xa9a   : > { %v6232_v44 = vpop.f32.mrf.mxu0 }
 0xa9b   : > { %v6233_v43 = vadd.f32 %v6232_v44, %v6209_v20 }
 0xa9d   : > { %v6253_v54 = vadd.f32 %v6252_v6, %v6233_v43 }
 0xa9f   : > { %v6273_v46 = vadd.f32 %v6272_v10, %v6253_v54 }
 0xaa0   : > { %v6312_v14 = vpop.f32.mrf.mxu2 }
 0xaa1   : > { %v6335_v3 = vmax.f32 %v6273_v46, 0.0  ;;  %v6313_v59 = vadd.f32 %v6312_v14, %v6293_v42 }
 0xaa3   : > { %6378 = vmatmul.f32.vlgmr.msrb.gmra.mxu1 %v6335_v3 }
 0xaaa   : > { %v6332_v50 = vpop.f32.mrf.mxu0 }
 0xaab   : > { %v6333_v11 = vadd.f32 %v6332_v50, %v6313_v59 }
 0xaad   : > { %v6336_v53 = vmax.f32 %v6333_v11, 0.0 }
 0xaaf   : > { %6581 = vmatmul.msk.f32.vlgmr.msrb.gmra.mxu3 %vm6358_vm0, %v6336_v53 }
 0xb20   : > { %v6379_v23 = vpop.f32.mrf.mxu1 }
 0xb21   : > { %v6380_v22 = vadd.f32 %v6379_v23, %v6357_v39 }
 0xb32   : > { %v6399_v15 = vpop.f32.mrf.mxu3 }
 0xb33   : > { %v6400_v57 = vadd.f32 %v6399_v15, %v6380_v22 }
 0xb35   : > { %6403 = vst.msk [vmem:[%s12918_s18] sm:$0x1] %vm6402_vm5, %v6400_v57 }
 0xb36   : > { %6708 = shalt.err (!%p6705_p4)
}
 0xb37   : > { %6593 = dma.vmem_to_hbm [thread:$0]  (%p6864_p5), %s6416_s27, 16, %s6418_s29, %s6405_s11  }
 0xb38 PF: > { %p6599_p7 = scmp.ge.s32.totalorder %s6755_s16, 2  ;;  %s6429_s18 = sand.u32 1, %s6743_s13  }
 0xb39   : > { %s6430_s21 = scalar_lea.sflag [#allocation4], %s6429_s18 }
 0xb3a   : > { %p6596_p8 = pnand %p6599_p7, %p6868_p6 }
 0xb3c   : > { %p6597_p9 = pneg %p6596_p8 }
 0xb3e   : > { %6738 = dma.done.wait (%p6597_p9), %s6430_s21, 16  }
 0xb3f   : > { %6740 = vsyncadd (%p6597_p9), %s6430_s21, 4294967280  ;;  %p20_p10 = scmp.ge.s32.totalorder %s6851_s19, 4   ;;  %s15210_s13 = smov %s6747_s14 }
 0xb40   : > { %s15211_s14 = smov %s6751_s15  ;;  %s15212_s15 = smov %s6862_s22 }
 0xb41   : > { %s15213_s16 = smov %s6851_s19  ;;  %22 = sbr.rel (!%p20_p10) target bundleno = 5 (0x5), region = 115 }
 0xb46   :  { %6435 = vsyncpa [#allocation4], 1 }
 0xb47   :  { %6437 = vsyncpa [#allocation4 + $0x1], 1 }

</bundles_post_ra>
